<compile_context>
chip_gen: v7x
topology: tpu7x:2x2x1
jax: 0.10.0
libtpu: 0.0.40
codegen_flags: <defaults>
</compile_context>

<pallas_src>
import jax
import jax.numpy as jnp
from jax import lax
from jax.experimental import pallas as pl
from jax.experimental.pallas import tpu as pltpu

_NORM_EPS = 1e-12


def stochastic_text_kernel(text_ref, video_ref, w_ref, b_ref, sigma_ref,
                           out_ref, logvar_ref):
    # Compute in f32 regardless of storage dtype.
    t = text_ref[...].astype(jnp.float32)          # [tm, D]
    v = video_ref[...].astype(jnp.float32)         # [tm, F, D]

    # L2-normalize along embed dim: rsqrt (EUP slot) + multiply, no VALU divide.
    tn = t * lax.rsqrt(jnp.sum(t * t, axis=-1, keepdims=True) + _NORM_EPS)
    vn = v * lax.rsqrt(jnp.sum(v * v, axis=-1, keepdims=True) + _NORM_EPS)

    # PyTorch: text repeated over frames -> [T,F,D]; bmm with video^T -> [T,F,F];
    # mean over dim=1. All repeated rows are identical, so this collapses to
    # sims[t, f] = <tn[t], vn[t, f]>. Computed per T-tile so it stays in vregs.
    sims = jnp.sum(tn[:, None, :] * vn, axis=-1)   # [tm, F] f32

    # linear_proj: log_var = sims @ W.T + b, with w_ref = W.T of shape [F, D].
    F = w_ref.shape[0]
    if F >= 128:
        # Large contraction: worth an MXU matmul.
        log_var = jnp.dot(sims, w_ref[...].astype(jnp.float32),
                          preferred_element_type=jnp.float32) + b_ref[...].astype(jnp.float32)
    else:
        # Tiny K (= num_frames): F unrolled VPU FMAs beat an MXU push/drain
        # round-trip for a 128-padded 8-wide contraction.
        log_var = jnp.broadcast_to(b_ref[...].astype(jnp.float32),
                                   (t.shape[0], t.shape[1]))
        for f in range(F):  # static unroll
            log_var = log_var + sims[:, f:f + 1] * w_ref[f:f + 1, :].astype(jnp.float32)

    # Reference uses exp(log_var) directly (T-MASS-style radius), NOT exp(0.5*log_var).
    text_std = jnp.exp(log_var)

    # Reparameterization: text_mean + sigma * std. text_mean is just the input
    # text and is returned directly from the wrapper (no in-kernel copy).
    out_ref[...] = (t + sigma_ref[...].astype(jnp.float32) * text_std).astype(out_ref.dtype)
    logvar_ref[...] = log_var.astype(logvar_ref.dtype)


def _choose_tm(T: int) -> int:
    """Largest sublane-aligned T tile (<=128 rows) that evenly divides T."""
    if T % 8 != 0:
        return T                  # single full block (full-dim blocks are always legal)
    tm = min(T, 128)              # cap keeps video tile small enough for v7x VMEM
    while T % tm != 0:
        tm -= 8
    return tm


def stochastic_text(text, video, w_t, bias, sigma, *, tm=None):
    """text: [T, D]; video: [T, F, D]; w_t: [F, D]; bias: [1, D]; sigma: [T, D].

    Returns (sampled_text [T,D], text_mean [T,D], log_var [T,D] f32).
    """
    T, D = text.shape
    Tv, F, Dv = video.shape
    assert Tv == T and Dv == D and w_t.shape == (F, D) and bias.shape == (1, D)
    assert sigma.shape == (T, D)
    if tm is None:
        tm = _choose_tm(T)
    grid = (T // tm,)

    vmem = pltpu.MemorySpace.VMEM
    in_specs = [
        pl.BlockSpec((tm, D), lambda i: (i, 0), memory_space=vmem),        # text
        pl.BlockSpec((tm, F, D), lambda i: (i, 0, 0), memory_space=vmem),  # video
        pl.BlockSpec((F, D), lambda i: (0, 0), memory_space=vmem),         # w_t (resident)
        pl.BlockSpec((1, D), lambda i: (0, 0), memory_space=vmem),         # bias (resident)
        pl.BlockSpec((tm, D), lambda i: (i, 0), memory_space=vmem),        # sigma
    ]
    out_specs = (
        pl.BlockSpec((tm, D), lambda i: (i, 0), memory_space=vmem),        # sampled text
        pl.BlockSpec((tm, D), lambda i: (i, 0), memory_space=vmem),        # log_var
    )
    out_shape = (
        jax.ShapeDtypeStruct((T, D), text.dtype),   # text_features (sampled)
        jax.ShapeDtypeStruct((T, D), jnp.float32),  # log_var
    )

    sampled, log_var = pl.pallas_call(
        stochastic_text_kernel,
        grid=grid,
        in_specs=in_specs,
        out_specs=out_specs,
        out_shape=out_shape,
        compiler_params=pltpu.CompilerParams(
            dimension_semantics=("parallel",)),
    )(text, video, w_t, bias, sigma)

    # text_mean == input text; returning it directly avoids a whole [T, D]
    # VMEM output buffer and its HBM writeback inside the kernel.
    return sampled, text, log_var


if __name__ == "__main__":
    # Small but lane/sublane-aligned shapes: D multiple of 128 (unmasked vst),
    # T multiple of 8. stochastic_prior = 'uniform01'.
    T, F, D = 8, 8, 128

    key = jax.random.PRNGKey(0)
    k_text, k_video, k_sigma = jax.random.split(key, 3)

    text = jax.random.normal(k_text, (T, D), dtype=jnp.float32)
    video = jax.random.normal(k_video, (T, F, D), dtype=jnp.float32)

    # _init_parameters(): nn.init.eye_(linear_proj.weight) -> W [D, F]; bias = 0.
    # (learnable_scalar is unused in forward; omitted.)
    w = jnp.eye(D, F, dtype=jnp.float32)       # [D, F]  (nn.Linear(F, D).weight)
    w_t = w.T                                  # [F, D]
    bias = jnp.zeros((1, D), dtype=jnp.float32)

    # sigma = torch.rand_like(text_features)  (uniform01 prior), drawn in the
    # wrapper with jax.random for determinism.
    sigma = jax.random.uniform(k_sigma, (T, D), dtype=jnp.float32)

    out, mean, log_var = jax.block_until_ready(
        stochastic_text(text, video, w_t, bias, sigma))

    # Pure-JAX reference mirroring the PyTorch forward exactly.
    tn = text / jnp.linalg.norm(text, axis=-1, keepdims=True)
    vn = video / jnp.linalg.norm(video, axis=-1, keepdims=True)
    t_rep = jnp.repeat(tn[:, None, :], F, axis=1)                        # [T,F,D]
    sims_ref = jnp.mean(jnp.einsum('tfd,tgd->tfg', t_rep, vn), axis=1)   # [T,F]
    log_var_ref = sims_ref @ w.T + bias                                  # [T,D]
    out_ref_ = text + sigma * jnp.exp(log_var_ref)

    assert out.shape == (T, D) and mean.shape == (T, D) and log_var.shape == (T, D)
    assert jnp.allclose(mean, text)
    assert jnp.allclose(log_var, log_var_ref, rtol=1e-5, atol=1e-5)
    assert jnp.allclose(out, out_ref_, rtol=1e-5, atol=1e-5)
    print("KERNEL_OK")
</pallas_src>

<mosaic_0001>
module attributes {stable_mosaic.version = 11 : i64} {
  func.func @stochastic_text_kernel(%arg0: i32, %arg1: memref<8x128xf32, #tpu.memory_space<vmem>>, %arg2: memref<8x8x128xf32, #tpu.memory_space<vmem>>, %arg3: memref<8x128xf32, #tpu.memory_space<vmem>>, %arg4: memref<1x128xf32, #tpu.memory_space<vmem>>, %arg5: memref<8x128xf32, #tpu.memory_space<vmem>>, %arg6: memref<8x128xf32, #tpu.memory_space<vmem>>, %arg7: memref<8x128xf32, #tpu.memory_space<vmem>>) attributes {dimension_semantics = [#tpu.dimension_semantics<parallel>], iteration_bounds = array<i64: 1>, scalar_prefetch = 0 : i64, scratch_operands = 0 : i64, tpu.core_type = #tpu.core_type<tc>, window_params = [{transform_indices = @transform_0, window_bounds = array<i64: 8, 128>}, {transform_indices = @transform_1, window_bounds = array<i64: 8, 8, 128>}, {pipeline_mode = #tpu.pipeline_mode<synchronous>, transform_indices = @transform_2, window_bounds = array<i64: 8, 128>}, {pipeline_mode = #tpu.pipeline_mode<synchronous>, transform_indices = @transform_3, window_bounds = array<i64: 1, 128>}, {transform_indices = @transform_4, window_bounds = array<i64: 8, 128>}, {transform_indices = @transform_5, window_bounds = array<i64: 8, 128>}, {transform_indices = @transform_6, window_bounds = array<i64: 8, 128>}]} {
    %c0 = arith.constant 0 : index
    %c0_0 = arith.constant 0 : index
    %0 = vector.load %arg1[%c0, %c0_0] : memref<8x128xf32, #tpu.memory_space<vmem>>, vector<8x128xf32>
    %c0_1 = arith.constant 0 : index
    %c0_2 = arith.constant 0 : index
    %c0_3 = arith.constant 0 : index
    %1 = vector.load %arg2[%c0_1, %c0_2, %c0_3] : memref<8x8x128xf32, #tpu.memory_space<vmem>>, vector<8x8x128xf32>
    %2 = arith.mulf %0, %0 : vector<8x128xf32>
    %cst = arith.constant dense<0.000000e+00> : vector<8xf32>
    %3 = vector.multi_reduction <add>, %2, %cst [1] : vector<8x128xf32> to vector<8xf32>
    %4 = vector.shape_cast %3 : vector<8xf32> to vector<8x1xf32>
    %cst_4 = arith.constant 9.99999996E-13 : f32
    %5 = vector.broadcast %cst_4 : f32 to vector<8x1xf32>
    %6 = arith.addf %4, %5 : vector<8x1xf32>
    %7 = math.rsqrt %6 : vector<8x1xf32>
    %8 = vector.broadcast %7 : vector<8x1xf32> to vector<8x128xf32>
    %9 = arith.mulf %0, %8 : vector<8x128xf32>
    %10 = arith.mulf %1, %1 : vector<8x8x128xf32>
    %cst_5 = arith.constant dense<0.000000e+00> : vector<8x8xf32>
    %11 = vector.multi_reduction <add>, %10, %cst_5 [2] : vector<8x8x128xf32> to vector<8x8xf32>
    %12 = vector.shape_cast %11 : vector<8x8xf32> to vector<8x8x1xf32>
    %cst_6 = arith.constant 9.99999996E-13 : f32
    %13 = vector.broadcast %cst_6 : f32 to vector<8x8x1xf32>
    %14 = arith.addf %12, %13 : vector<8x8x1xf32>
    %15 = math.rsqrt %14 : vector<8x8x1xf32>
    %16 = vector.broadcast %15 : vector<8x8x1xf32> to vector<8x8x128xf32>
    %17 = arith.mulf %1, %16 : vector<8x8x128xf32>
    %18 = vector.shape_cast %9 : vector<8x128xf32> to vector<8x1x128xf32>
    %19 = vector.broadcast %18 : vector<8x1x128xf32> to vector<8x8x128xf32>
    %20 = arith.mulf %19, %17 : vector<8x8x128xf32>
    %cst_7 = arith.constant dense<0.000000e+00> : vector<8x8xf32>
    %21 = vector.multi_reduction <add>, %20, %cst_7 [2] : vector<8x8x128xf32> to vector<8x8xf32>
    %c0_8 = arith.constant 0 : index
    %c0_9 = arith.constant 0 : index
    %22 = vector.load %arg4[%c0_8, %c0_9] : memref<1x128xf32, #tpu.memory_space<vmem>>, vector<1x128xf32>
    %23 = vector.shape_cast %22 : vector<1x128xf32> to vector<1x128xf32>
    %24 = vector.broadcast %23 : vector<1x128xf32> to vector<8x128xf32>
    %25 = vector.extract_strided_slice %21 {offsets = [0, 0], sizes = [8, 1], strides = [1, 1]} : vector<8x8xf32> to vector<8x1xf32>
    %c0_10 = arith.constant 0 : index
    %c0_11 = arith.constant 0 : index
    %26 = vector.load %arg3[%c0_10, %c0_11] : memref<8x128xf32, #tpu.memory_space<vmem>>, vector<1x128xf32>
    %27 = vector.broadcast %25 : vector<8x1xf32> to vector<8x128xf32>
    %28 = vector.broadcast %26 : vector<1x128xf32> to vector<8x128xf32>
    %29 = arith.mulf %27, %28 : vector<8x128xf32>
    %30 = arith.addf %24, %29 : vector<8x128xf32>
    %31 = vector.extract_strided_slice %21 {offsets = [0, 1], sizes = [8, 1], strides = [1, 1]} : vector<8x8xf32> to vector<8x1xf32>
    %c1 = arith.constant 1 : index
    %c0_12 = arith.constant 0 : index
    %32 = vector.load %arg3[%c1, %c0_12] : memref<8x128xf32, #tpu.memory_space<vmem>>, vector<1x128xf32>
    %33 = vector.broadcast %31 : vector<8x1xf32> to vector<8x128xf32>
    %34 = vector.broadcast %32 : vector<1x128xf32> to vector<8x128xf32>
    %35 = arith.mulf %33, %34 : vector<8x128xf32>
    %36 = arith.addf %30, %35 : vector<8x128xf32>
    %37 = vector.extract_strided_slice %21 {offsets = [0, 2], sizes = [8, 1], strides = [1, 1]} : vector<8x8xf32> to vector<8x1xf32>
    %c2 = arith.constant 2 : index
    %c0_13 = arith.constant 0 : index
    %38 = vector.load %arg3[%c2, %c0_13] : memref<8x128xf32, #tpu.memory_space<vmem>>, vector<1x128xf32>
    %39 = vector.broadcast %37 : vector<8x1xf32> to vector<8x128xf32>
    %40 = vector.broadcast %38 : vector<1x128xf32> to vector<8x128xf32>
    %41 = arith.mulf %39, %40 : vector<8x128xf32>
    %42 = arith.addf %36, %41 : vector<8x128xf32>
    %43 = vector.extract_strided_slice %21 {offsets = [0, 3], sizes = [8, 1], strides = [1, 1]} : vector<8x8xf32> to vector<8x1xf32>
    %c3 = arith.constant 3 : index
    %c0_14 = arith.constant 0 : index
    %44 = vector.load %arg3[%c3, %c0_14] : memref<8x128xf32, #tpu.memory_space<vmem>>, vector<1x128xf32>
    %45 = vector.broadcast %43 : vector<8x1xf32> to vector<8x128xf32>
    %46 = vector.broadcast %44 : vector<1x128xf32> to vector<8x128xf32>
    %47 = arith.mulf %45, %46 : vector<8x128xf32>
    %48 = arith.addf %42, %47 : vector<8x128xf32>
    %49 = vector.extract_strided_slice %21 {offsets = [0, 4], sizes = [8, 1], strides = [1, 1]} : vector<8x8xf32> to vector<8x1xf32>
    %c4 = arith.constant 4 : index
    %c0_15 = arith.constant 0 : index
    %50 = vector.load %arg3[%c4, %c0_15] : memref<8x128xf32, #tpu.memory_space<vmem>>, vector<1x128xf32>
    %51 = vector.broadcast %49 : vector<8x1xf32> to vector<8x128xf32>
    %52 = vector.broadcast %50 : vector<1x128xf32> to vector<8x128xf32>
    %53 = arith.mulf %51, %52 : vector<8x128xf32>
    %54 = arith.addf %48, %53 : vector<8x128xf32>
    %55 = vector.extract_strided_slice %21 {offsets = [0, 5], sizes = [8, 1], strides = [1, 1]} : vector<8x8xf32> to vector<8x1xf32>
    %c5 = arith.constant 5 : index
    %c0_16 = arith.constant 0 : index
    %56 = vector.load %arg3[%c5, %c0_16] : memref<8x128xf32, #tpu.memory_space<vmem>>, vector<1x128xf32>
    %57 = vector.broadcast %55 : vector<8x1xf32> to vector<8x128xf32>
    %58 = vector.broadcast %56 : vector<1x128xf32> to vector<8x128xf32>
    %59 = arith.mulf %57, %58 : vector<8x128xf32>
    %60 = arith.addf %54, %59 : vector<8x128xf32>
    %61 = vector.extract_strided_slice %21 {offsets = [0, 6], sizes = [8, 1], strides = [1, 1]} : vector<8x8xf32> to vector<8x1xf32>
    %c6 = arith.constant 6 : index
    %c0_17 = arith.constant 0 : index
    %62 = vector.load %arg3[%c6, %c0_17] : memref<8x128xf32, #tpu.memory_space<vmem>>, vector<1x128xf32>
    %63 = vector.broadcast %61 : vector<8x1xf32> to vector<8x128xf32>
    %64 = vector.broadcast %62 : vector<1x128xf32> to vector<8x128xf32>
    %65 = arith.mulf %63, %64 : vector<8x128xf32>
    %66 = arith.addf %60, %65 : vector<8x128xf32>
    %67 = vector.extract_strided_slice %21 {offsets = [0, 7], sizes = [8, 1], strides = [1, 1]} : vector<8x8xf32> to vector<8x1xf32>
    %c7 = arith.constant 7 : index
    %c0_18 = arith.constant 0 : index
    %68 = vector.load %arg3[%c7, %c0_18] : memref<8x128xf32, #tpu.memory_space<vmem>>, vector<1x128xf32>
    %69 = vector.broadcast %67 : vector<8x1xf32> to vector<8x128xf32>
    %70 = vector.broadcast %68 : vector<1x128xf32> to vector<8x128xf32>
    %71 = arith.mulf %69, %70 : vector<8x128xf32>
    %72 = arith.addf %66, %71 : vector<8x128xf32>
    %73 = math.exp %72 : vector<8x128xf32>
    %c0_19 = arith.constant 0 : index
    %c0_20 = arith.constant 0 : index
    %74 = vector.load %arg5[%c0_19, %c0_20] : memref<8x128xf32, #tpu.memory_space<vmem>>, vector<8x128xf32>
    %75 = arith.mulf %74, %73 : vector<8x128xf32>
    %76 = arith.addf %0, %75 : vector<8x128xf32>
    %c0_21 = arith.constant 0 : index
    %c0_22 = arith.constant 0 : index
    %77 = vector.load %arg6[%c0_21, %c0_22] : memref<8x128xf32, #tpu.memory_space<vmem>>, vector<8x128xf32>
    tpu.vector_store %arg6[%c0_21, %c0_22], %76 {strides = array<i32>} : memref<8x128xf32, #tpu.memory_space<vmem>>, vector<8x128xf32>,
    %c0_23 = arith.constant 0 : index
    %c0_24 = arith.constant 0 : index
    %78 = vector.load %arg7[%c0_23, %c0_24] : memref<8x128xf32, #tpu.memory_space<vmem>>, vector<8x128xf32>
    tpu.vector_store %arg7[%c0_23, %c0_24], %72 {strides = array<i32>} : memref<8x128xf32, #tpu.memory_space<vmem>>, vector<8x128xf32>,
    return
  }
  func.func @transform_0(%arg0: i32) -> (i32, i32) {
    %c0_i32 = arith.constant 0 : i32
    %c0_i32_0 = arith.constant 0 : i32
    return %arg0, %c0_i32 : i32, i32
  }
  func.func @transform_1(%arg0: i32) -> (i32, i32, i32) {
    %c0_i32 = arith.constant 0 : i32
    %c0_i32_0 = arith.constant 0 : i32
    %c0_i32_1 = arith.constant 0 : i32
    return %arg0, %c0_i32, %c0_i32_0 : i32, i32, i32
  }
  func.func @transform_2(%arg0: i32) -> (i32, i32) {
    %c0_i32 = arith.constant 0 : i32
    %c0_i32_0 = arith.constant 0 : i32
    %c0_i32_1 = arith.constant 0 : i32
    return %c0_i32, %c0_i32_0 : i32, i32
  }
  func.func @transform_3(%arg0: i32) -> (i32, i32) {
    %c0_i32 = arith.constant 0 : i32
    %c0_i32_0 = arith.constant 0 : i32
    %c0_i32_1 = arith.constant 0 : i32
    return %c0_i32, %c0_i32_0 : i32, i32
  }
  func.func @transform_4(%arg0: i32) -> (i32, i32) {
    %c0_i32 = arith.constant 0 : i32
    %c0_i32_0 = arith.constant 0 : i32
    return %arg0, %c0_i32 : i32, i32
  }
  func.func @transform_5(%arg0: i32) -> (i32, i32) {
    %c0_i32 = arith.constant 0 : i32
    %c0_i32_0 = arith.constant 0 : i32
    return %arg0, %c0_i32 : i32, i32
  }
  func.func @transform_6(%arg0: i32) -> (i32, i32) {
    %c0_i32 = arith.constant 0 : i32
    %c0_i32_0 = arith.constant 0 : i32
    return %arg0, %c0_i32 : i32, i32
  }
}

</mosaic_0001>

<bundles_post_ra>
// kernel: tpu_custom_call.1
= control target key start
LH: loop header
LB: loop body
LE: loop exit
PB: predicated region body
PF: predicated region fallthrough
CT: control target
= control target key end

     0   :  { %12 = vsyncpa [#allocation3], 0  ;;  %s16203_s0 = inlined_call_operand.hbm [shape: f32[8,128], index: 0, kind: input, shape index: {}]   ;;  %s16204_s1 = inlined_call_operand.hbm [shape: f32[8,8,128], index: 1, kind: input, shape index: {}]   ;;  %s16205_s2 = inlined_call_operand.hbm [shape: f32[8,128], index: 2, kind: input, shape index: {}]   ;;  %s16206_s3 = inlined_call_operand.vmem [shape: f32[1,128], index: 3, kind: input, shape index: {}]   ;;  %s16207_s4 = inlined_call_operand.vmem [shape: f32[8,128], index: 4, kind: input, shape index: {}]   ;;  %s16208_s5 = inlined_call_operand.hbm [shape: f32[8,128], index: 5, kind: output, shape index: {0}]   ;;  %s16209_s6 = inlined_call_operand.hbm [shape: f32[8,128], index: 6, kind: output, shape index: {1}]  }
   0x1   :  { %13 = vsyncpa [#allocation6], 0 }
   0x2   :  { %14 = vsyncpa [#allocation4], 0 }
   0x3   :  { %15 = vsyncpa [#allocation10], 0  ;;  %s11664_s21 = smov [#allocation5]   ;;  %s11546_s25 = scalar_lea.hbm %s16204_s1, 1024 }
   0x4   :  { %s31_s22 = sshll.u32 %s11664_s21, 4  ;;  %p11547_p0 = scmp.ne.s32.totalorder %s16204_s1, %s11546_s25  ;;  %s32_s22 = int_to_ptr.vmem [resolvable:$true] %s31_s22 }
   0x5   :  { %p11550_p1 = scmp.lt.u32.totalorder %s11546_s25, %s16204_s1 }
   0x7   :  { %p11552_p2 = pnand %p11550_p1, %p11547_p0 }
   0x9   :  { %11555 = shalt.err (!%p11552_p2)
}
   0xa   :  { %s11556_s30 = scalar_lea.vmem %s32_s22, 1024  ;;  %p11561_p4 = scmp.lt.s32.totalorder %s32_s22, %s32_s22 }
   0xb   :  { %p11557_p3 = scmp.ne.s32.totalorder %s32_s22, %s11556_s30  ;;  %p11562_p5 = scmp.lt.s32.totalorder %s11556_s30, %s11556_s30 }
   0xd   :  { %p11563_p6 = por %p11562_p5, %p11561_p4 }
   0xf   :  { %p11564_p7 = pnand %p11563_p6, %p11557_p3 }
  0x11   :  { %11567 = shalt.err (!%p11564_p7)
}
  0x12   :  { %s11665_s7 = smov 128   ;;  %s11666_s8 = smov 8  }
  0x13   :  { %37 = dma.hbm_to_vmem [thread:$0]  %s16204_s1, 1024, %s32_s22, [#allocation6], %s11665_s7, %s11665_s7, %s11666_s8  }
  0x14   :  { %s11667_s11 = smov [#allocation2]   ;;  %s11668_s13 = smov [#allocation7]  }
  0x15   :  { %s22_s12 = sshll.u32 %s11667_s11, 4  ;;  %s44_s14 = sshll.u32 %s11668_s13, 4  ;;  %s23_s12 = int_to_ptr.vmem [resolvable:$true] %s22_s12  ;;  %s45_s14 = int_to_ptr.vmem [resolvable:$true] %s44_s14 }
  0x16   :  { %s11568_s17 = scalar_lea.hbm %s16203_s0, 128 }
  0x17   :  { %p11569_p8 = scmp.ne.s32.totalorder %s16203_s0, %s11568_s17  ;;  %p11572_p9 = scmp.lt.u32.totalorder %s11568_s17, %s16203_s0 }
  0x19   :  { %p11574_p10 = pnand %p11572_p9, %p11569_p8 }
  0x1b   :  { %11577 = shalt.err (!%p11574_p10)
}
  0x1c   :  { %s11578_s1 = scalar_lea.vmem %s23_s12, 128  ;;  %p11583_p12 = scmp.lt.s32.totalorder %s23_s12, %s23_s12 }
  0x1d   :  { %p11579_p11 = scmp.ne.s32.totalorder %s23_s12, %s11578_s1  ;;  %p11584_p13 = scmp.lt.s32.totalorder %s11578_s1, %s11578_s1 }
  0x1f   :  { %p11585_p0 = por %p11584_p13, %p11583_p12 }
  0x21   :  { %p11586_p1 = pnand %p11585_p0, %p11579_p11 }
  0x23   :  { %11589 = shalt.err (!%p11586_p1)
}
  0x24   :  { %25 = dma.hbm_to_vmem [thread:$0]  %s16203_s0, 128, %s23_s12, [#allocation3]  }
  0x25   :  { %s11590_s26 = scalar_lea.hbm %s16205_s2, 128 }
  0x26   :  { %p11591_p2 = scmp.ne.s32.totalorder %s16205_s2, %s11590_s26  ;;  %p11594_p3 = scmp.lt.u32.totalorder %s11590_s26, %s16205_s2 }
  0x28   :  { %p11596_p4 = pnand %p11594_p3, %p11591_p2 }
  0x2a   :  { %11599 = shalt.err (!%p11596_p4)
}
  0x2b   :  { %s11600_s7 = scalar_lea.vmem %s45_s14, 128  ;;  %p11605_p6 = scmp.lt.s32.totalorder %s45_s14, %s45_s14 }
  0x2c   :  { %p11601_p5 = scmp.ne.s32.totalorder %s45_s14, %s11600_s7  ;;  %p11606_p7 = scmp.lt.s32.totalorder %s11600_s7, %s11600_s7 }
  0x2e   :  { %p11607_p8 = por %p11606_p7, %p11605_p6 }
  0x30   :  { %p11608_p9 = pnand %p11607_p8, %p11601_p5 }
  0x32   :  { %11611 = shalt.err (!%p11608_p9)
}
  0x33   :  { %47 = dma.hbm_to_vmem [thread:$0]  %s16205_s2, 128, %s45_s14, [#allocation6]  }
  0x34   :  { %11656 = dma.done.wait [#allocation3], 128  }
  0x35   :  { %11657 = vsyncadd [#allocation3], 4294967168 }
  0x36   :  { %11658 = dma.done.wait [#allocation6], 1152  }
  0x37   :  { %11659 = vsyncadd [#allocation6], 4294966144  ;;  %v11744_v0 = vld [vmem:[#allocation5 + $0x8] sm:$0xff]  ;;  %v11746_v1 = vld [vmem:[#allocation2] sm:$0xff]  ;;  %v129_v19 = vlaneseq  ;;  %v11669_v61 = vmov 1966171168  }
  0x38   :  { %v11748_v2 = vld [vmem:[#allocation5 + $0x10] sm:$0xff]  ;;  %v77_v3 = vmul.f32 %v11744_v0, %v11744_v0  ;;  %v70_v4 = vmul.f32 %v11746_v1, %v11746_v1  ;;  %v11754_v5 = vld [vmem:[#allocation5] sm:$0xff]  ;;  %v11762_v9 = vld [vmem:[#allocation5 + $0x18] sm:$0xff]  ;;  %v127_v62 = vunpack.c.l.s4 %v11669_v61  ;;  %vm1013_vm0 = vcmask 130112  }
  0x39   :  { %v78_v6 = vmul.f32 %v11748_v2, %v11748_v2  ;;  %v76_v7 = vmul.f32 %v11754_v5, %v11754_v5  ;;  %v11760_v8 = vld [vmem:[#allocation5 + $0x20] sm:$0xff]  ;;  %v79_v11 = vmul.f32 %v11762_v9, %v11762_v9  ;;  %v11768_v12 = vld [vmem:[#allocation5 + $0x30] sm:$0xff]  ;;  %v11770_v13 = vld [vmem:[#allocation5 + $0x28] sm:$0xff]  ;;  %v11780_v20 = vshrl.u32 %v129_v19, 7 }
  0x3a   :  { %86 = vadd.xlane.f32.xlu1 %v77_v3  ;;  %71 = vadd.xlane.f32.xlu0 %v70_v4  ;;  %v80_v10 = vmul.f32 %v11760_v8, %v11760_v8  ;;  %v82_v14 = vmul.f32 %v11768_v12, %v11768_v12  ;;  %v81_v15 = vmul.f32 %v11770_v13, %v11770_v13  ;;  %v11776_v16 = vld [vmem:[#allocation5 + $0x38] sm:$0xff]  ;;  %v11506_v18 = vld [vmem:[#allocation7] ss:$0 sm:$0xff]  ;;  %v1003_v21 = vand.u32 127, %v129_v19 }
  0x3b   :  { %v83_v17 = vmul.f32 %v11776_v16, %v11776_v16  ;;  %vm1020_vm1 = vcmask 195712   ;;  %vm1027_vm2 = vcmask 261312   ;;  %vm1034_vm3 = vcmask 326912  }
  0x3c   :  { %v11783_v22 = vsub.s32 %v1003_v21, %v11780_v20  ;;  %v1008_v23 = vadd.s32 4294967288, %v1003_v21  ;;  %v1015_v24 = vadd.s32 4294967280, %v1003_v21  ;;  %v1022_v25 = vadd.s32 4294967272, %v1003_v21 }
  0x3d   :  { %v1029_v26 = vadd.s32 4294967264, %v1003_v21  ;;  %v1036_v27 = vadd.s32 4294967256, %v1003_v21  ;;  %v1043_v28 = vadd.s32 4294967248, %v1003_v21  ;;  %v1050_v29 = vadd.s32 4294967240, %v1003_v21 }
  0x3e   :  { %88 = vadd.xlane.f32.xlu1 %v78_v6  ;;  %84 = vadd.xlane.f32.xlu0 %v76_v7  ;;  %v11786_v30 = vsub.s32 %v1008_v23, %v11780_v20  ;;  %v11789_v31 = vsub.s32 %v1015_v24, %v11780_v20  ;;  %v11792_v32 = vsub.s32 %v1022_v25, %v11780_v20  ;;  %v1057_v33 = vadd.s32 4294967232, %v1003_v21 }
  0x3f   :  { %v11795_v34 = vsub.s32 %v1029_v26, %v11780_v20  ;;  %v11798_v35 = vsub.s32 %v1036_v27, %v11780_v20  ;;  %v11801_v36 = vsub.s32 %v1043_v28, %v11780_v20  ;;  %v11804_v37 = vsub.s32 %v1050_v29, %v11780_v20 }
  0x40   :  { %v11807_v38 = vsub.s32 %v1057_v33, %v11780_v20  ;;  %v1064_v39 = vadd.s32 4294967224, %v1003_v21  ;;  %v1071_v40 = vadd.s32 4294967216, %v1003_v21  ;;  %v1078_v41 = vadd.s32 4294967208, %v1003_v21 }
  0x41   :  { %v1085_v42 = vadd.s32 4294967200, %v1003_v21  ;;  %v1092_v43 = vadd.s32 4294967192, %v1003_v21  ;;  %v1099_v44 = vadd.s32 4294967184, %v1003_v21  ;;  %v1106_v45 = vadd.s32 4294967176, %v1003_v21 }
  0x42   :  { %92 = vadd.xlane.f32.xlu1 %v80_v10  ;;  %90 = vadd.xlane.f32.xlu0 %v79_v11  ;;  %v11810_v46 = vsub.s32 %v1064_v39, %v11780_v20  ;;  %v11813_v47 = vsub.s32 %v1071_v40, %v11780_v20  ;;  %v11816_v48 = vsub.s32 %v1078_v41, %v11780_v20  ;;  %v128_v6 = vunpack.c.0.s8 %v127_v62 }
  0x43   :  { %v11819_v49 = vsub.s32 %v1085_v42, %v11780_v20  ;;  %v11822_v50 = vsub.s32 %v1092_v43, %v11780_v20  ;;  %v11825_v51 = vsub.s32 %v1099_v44, %v11780_v20  ;;  %v11828_v52 = vsub.s32 %v1106_v45, %v11780_v20 }
  0x44   :  { %v11833_v26 = vsub.s32 0, %v11780_v20  ;;  %vm1041_vm4 = vcmask 392512   ;;  %vm1048_vm5 = vcmask 458112   ;;  %vm1055_vm6 = vcmask 523712  }
  0x45   :  { %vm1062_vm7 = vcmask 589312   ;;  %vm1069_vm8 = vcmask 654912   ;;  %vm1076_vm9 = vcmask 720512   ;;  %vm16212_vm10 = vcmask 786112  }
  0x46   :  { %96 = vadd.xlane.f32.xlu1 %v82_v14  ;;  %94 = vadd.xlane.f32.xlu0 %v81_v15  ;;  %v131_v15 = vsub.s32 %v128_v6, %v11780_v20  ;;  %vm1090_vm11 = vcmask 851712   ;;  %vm1097_vm12 = vcmask 917312   ;;  %vm1104_vm13 = vcmask 982912  }
  0x47   :  { %vm1111_vm14 = vcmask 1048512   ;;  %vm16210_vm15 = vcmask 1041409  }
  0x4a   :  { %98 = vadd.xlane.f32.xlu0 %v83_v17 }
  0x57   :  { %284 = vbcast.lane.b32.xlu1 %v11506_v18, 256 }
  0x5b   :  { %292 = vbcast.lane.b32.xlu1 %v11506_v18, 272 }
  0x5f   :  { %296 = vbcast.lane.b32.xlu1 %v11506_v18, 280 }
  0x60   :  { %288 = vbcast.lane.b32.xlu0 %v11506_v18, 264 }
  0x63   :  { %300 = vbcast.lane.b32.xlu1 %v11506_v18, 288 }
  0x64   :  { %304 = vbcast.lane.b32.xlu0 %v11506_v18, 296 }
  0x67   :  { %308 = vbcast.lane.b32.xlu1 %v11506_v18, 304 }
  0x68   :  { %312 = vbcast.lane.b32.xlu0 %v11506_v18, 312 }
  0x6b   :  { %316 = vbcast.lane.b32.xlu1 %v11506_v18, 320 }
  0x6c   :  { %320 = vbcast.lane.b32.xlu0 %v11506_v18, 328 }
  0x6f   :  { %324 = vbcast.lane.b32.xlu1 %v11506_v18, 336 }
  0x70   :  { %328 = vbcast.lane.b32.xlu0 %v11506_v18, 344 }
  0x73   :  { %332 = vbcast.lane.b32.xlu1 %v11506_v18, 352 }
  0x74   :  { %336 = vbcast.lane.b32.xlu0 %v11506_v18, 360 }
  0x77   :  { %340 = vbcast.lane.b32.xlu1 %v11506_v18, 368 }
  0x78   :  { %344 = vbcast.lane.b32.xlu0 %v11506_v18, 376 }
  0xc7   :  { %v87_v53 = vpop.xlane.xlu1 %86  ;;  %v72_v54 = vpop.xlane.xlu0 %71 }
  0xc8   :  { %v73_v55 = vadd.f32 1e-12, %v72_v54  ;;  %v101_v56 = vadd.f32 1e-12, %v87_v53 }
  0xca   :  { %11525 = vrsqrt.f32 %v73_v55 }
  0xcb   :  { %v89_v57 = vpop.xlane.xlu1 %88  ;;  %v85_v58 = vpop.xlane.xlu0 %84  ;;  %11527 = vrsqrt.f32 %v101_v56 }
  0xcc   :  { %v102_v59 = vadd.f32 1e-12, %v89_v57  ;;  %v100_v60 = vadd.f32 1e-12, %v85_v58 }
  0xce   :  { %11529 = vrsqrt.f32 %v100_v60 }
  0xcf   :  { %v93_v63 = vpop.xlane.xlu1 %92  ;;  %v91_v3 = vpop.xlane.xlu0 %90  ;;  %11531 = vrsqrt.f32 %v102_v59 }
  0xd0   :  { %v103_v4 = vadd.f32 1e-12, %v91_v3  ;;  %v104_v7 = vadd.f32 1e-12, %v93_v63 }
  0xd2   :  { %11533 = vrsqrt.f32 %v103_v4 }
  0xd3   :  { %v97_v10 = vpop.xlane.xlu1 %96  ;;  %v95_v11 = vpop.xlane.xlu0 %94  ;;  %11535 = vrsqrt.f32 %v104_v7 }
  0xd4   :  { %v105_v14 = vadd.f32 1e-12, %v95_v11  ;;  %v11526_v17 = vpop.eup %11525  ;;  %v106_v18 = vadd.f32 1e-12, %v97_v10 }
  0xd5   :  { %v75_v19 = vmul.f32 %v11526_v17, %v11746_v1  ;;  %v11528_v23 = vpop.eup %11527 }
  0xd6   :  { %11537 = vrsqrt.f32 %v105_v14  ;;  %v117_v42 = vmul.f32 %v11528_v23, %v11744_v0 }
  0xd7   :  { %v99_v21 = vpop.xlane.xlu0 %98  ;;  %v132_v25 = vrot.slane %v75_v19, %v131_v15  ;;  %v125_v27 = vcombine.high %v75_v19, %v75_v19  ;;  %11539 = vrsqrt.f32 %v106_v18 }
  0xd8   :  { %v107_v24 = vadd.f32 1e-12, %v99_v21  ;;  %v11530_v28 = vpop.eup %11529 }
  0xd9   :  { %v11532_v29 = vpop.eup %11531  ;;  %v116_v33 = vmul.f32 %v11530_v28, %v11754_v5  ;;  %v148_v39 = vrot.slane %v132_v25, %v131_v15  ;;  %v140_v40 = vcombine.high %v132_v25, %v132_v25  ;;  %v139_v41 = vrot.slane %v125_v27, %v131_v15  ;;  %v11851_v27 = vpop.permute.xlu1 %284 }
  0xda   :  { %11541 = vrsqrt.f32 %v107_v24  ;;  %v118_v53 = vmul.f32 %v11532_v29, %v11748_v2  ;;  %v11670_v25 = vmov 0  }
  0xdb   :  { %v177_v1 = vrot.slane %v148_v39, %v11833_v26  ;;  %v162_v43 = vrot.slane %v140_v40, %v131_v15  ;;  %v170_v44 = vcombine.high %v148_v39, %v148_v39  ;;  %v155_v54 = vrot.slane %v139_v41, %v131_v15  ;;  %11524 = vset.pattern.permute.xlu0 %v11670_v25  ;;  %v11865_v40 = vpop.permute.xlu0 %288 }
  0xdc   :  { %v11534_v45 = vpop.eup %11533  ;;  %v141_v5 = vcombine.high %v139_v41, %v139_v41  ;;  %11523 = vset.pattern.permute.xlu1 %v11670_v25 }
  0xdd   :  { %v214_v55 = vmul.f32 %v177_v1, %v116_v33  ;;  %v181_v56 = vrot.slane %v162_v43, %v11833_v26  ;;  %v185_v57 = vrot.slane %v170_v44, %v11833_v26  ;;  %v11536_v58 = vpop.eup %11535  ;;  %v172_v59 = vcombine.high %v162_v43, %v162_v43 }
  0xde   :  { %v119_v61 = vmul.f32 %v11534_v45, %v11762_v9  ;;  %v120_v2 = vmul.f32 %v11536_v58, %v11760_v8  ;;  %v193_v3 = vrot.slane %v155_v54, %v11833_v26  ;;  %v169_v4 = vrot.slane %v141_v5, %v131_v15 }
  0xdf   :  { %222 = vadd.xlane.f32.xlu1 %v214_v55  ;;  %v215_v60 = vmul.f32 %v181_v56, %v117_v42  ;;  %v189_v0 = vrot.slane %v172_v59, %v11833_v26  ;;  %v216_v63 = vmul.f32 %v185_v57, %v118_v53  ;;  %v171_v11 = vcombine.high %v155_v54, %v155_v54  ;;  %v11869_v1 = vpop.permute.xlu0 %304 }
  0xe0   :  { %v11538_v62 = vpop.eup %11537  ;;  %v218_v17 = vmul.f32 %v193_v3, %v120_v2  ;;  %v197_v9 = vrot.slane %v169_v4, %v11833_v26  ;;  %v173_v19 = vcombine.high %v169_v4, %v169_v4 }
  0xe1   :  { %224 = vadd.xlane.f32.xlu0 %v215_v60  ;;  %v11540_v6 = vpop.eup %11539  ;;  %v217_v7 = vmul.f32 %v189_v0, %v119_v61  ;;  %v121_v10 = vmul.f32 %v11538_v62, %v11770_v13  ;;  %v201_v8 = vrot.slane %v171_v11, %v11833_v26 }
  0xe2   :  { %v122_v18 = vmul.f32 %v11540_v6, %v11768_v12  ;;  %v205_v24 = vrot.slane %v173_v19, %v11833_v26  ;;  %v11853_v12 = vpop.permute.xlu1 %292 }
  0xe3   :  { %226 = vadd.xlane.f32.xlu1 %v216_v63  ;;  %v219_v21 = vmul.f32 %v197_v9, %v121_v10  ;;  %v11875_v44 = vpop.permute.xlu0 %312 }
  0xe4   :  { %v11542_v14 = vpop.eup %11541  ;;  %v220_v23 = vmul.f32 %v201_v8, %v122_v18 }
  0xe5   :  { %228 = vadd.xlane.f32.xlu0 %v217_v7  ;;  %v123_v15 = vmul.f32 %v11542_v14, %v11776_v16 }
  0xe6   :  { %v11855_v28 = vpop.permute.xlu1 %296 }
  0xe7   :  { %230 = vadd.xlane.f32.xlu1 %v218_v17  ;;  %v221_v13 = vmul.f32 %v205_v24, %v123_v15  ;;  %v11879_v53 = vpop.permute.xlu0 %320 }
  0xe9   :  { %232 = vadd.xlane.f32.xlu0 %v219_v21 }
  0xea   :  { %v11857_v29 = vpop.permute.xlu1 %300 }
  0xeb   :  { %234 = vadd.xlane.f32.xlu1 %v220_v23  ;;  %v11885_v5 = vpop.permute.xlu0 %328 }
  0xed   :  { %236 = vadd.xlane.f32.xlu0 %v221_v13 }
  0xee   :  { %v11859_v33 = vpop.permute.xlu1 %308 }
  0xef   :  { %v11889_v60 = vpop.permute.xlu0 %336 }
  0xf2   :  { %v11861_v16 = vpop.permute.xlu1 %316 }
  0xf3   :  { %v11895_v2 = vpop.permute.xlu0 %344 }
  0xf6   :  { %v11863_v39 = vpop.permute.xlu1 %324 }
  0xfa   :  { %v11867_v41 = vpop.permute.xlu1 %332 }
  0xfe   :  { %v11871_v42 = vpop.permute.xlu1 %340 }
 0x16c   :  { %v11873_v43 = vpop.xlane.xlu1 %222 }
 0x16d   :  { %v249_v45 = vrot.slane %v11873_v43, %v11833_v26 }
 0x16e   :  { %v11899_v6 = vpop.xlane.xlu0 %224 }
 0x16f   :  { %v362_v54 = vmul.f32 %v11851_v27, %v249_v45  ;;  %v363_v55 = vmul.f32 %v11865_v40, %v249_v45  ;;  %v364_v56 = vmul.f32 %v11853_v12, %v249_v45  ;;  %v366_v57 = vmul.f32 %v11857_v29, %v249_v45 }
 0x170   :  { %v365_v58 = vmul.f32 %v11855_v28, %v249_v45  ;;  %v368_v59 = vmul.f32 %v11859_v33, %v249_v45  ;;  %v370_v61 = vmul.f32 %v11861_v16, %v249_v45  ;;  %v367_v62 = vmul.f32 %v11869_v1, %v249_v45 }
 0x171   :  { %619 = vperm.xlu1 %11523, %v362_v54   ;;  %622 = vperm.xlu0 %11524, %v363_v55   ;;  %v372_v0 = vmul.f32 %v11863_v39, %v249_v45  ;;  %v369_v63 = vmul.f32 %v11875_v44, %v249_v45  ;;  %v374_v3 = vmul.f32 %v11867_v41, %v249_v45  ;;  %v11919_v55 = vpop.xlane.xlu1 %226 }
 0x172   :  { %v371_v4 = vmul.f32 %v11879_v53, %v249_v45  ;;  %v253_v7 = vrot.slane %v11899_v6, %v11833_v26  ;;  %v376_v10 = vmul.f32 %v11871_v42, %v249_v45  ;;  %v373_v11 = vmul.f32 %v11885_v5, %v249_v45 }
 0x173   :  { %v375_v14 = vmul.f32 %v11889_v60, %v249_v45  ;;  %v377_v9 = vmul.f32 %v11895_v2, %v249_v45 }
 0x174   :  { %v378_v17 = vmul.f32 %v11851_v27, %v253_v7  ;;  %v380_v18 = vmul.f32 %v11853_v12, %v253_v7  ;;  %v379_v19 = vmul.f32 %v11865_v40, %v253_v7  ;;  %v382_v21 = vmul.f32 %v11857_v29, %v253_v7 }
 0x175   :  { %625 = vperm.xlu1 %11523, %v364_v56   ;;  %631 = vperm.xlu0 %11524, %v366_v57   ;;  %v381_v8 = vmul.f32 %v11855_v28, %v253_v7  ;;  %v384_v15 = vmul.f32 %v11859_v33, %v253_v7  ;;  %v383_v23 = vmul.f32 %v11869_v1, %v253_v7 }
 0x176   :  { %v386_v24 = vmul.f32 %v11861_v16, %v253_v7  ;;  %v385_v13 = vmul.f32 %v11875_v44, %v253_v7  ;;  %v388_v25 = vmul.f32 %v11863_v39, %v253_v7  ;;  %v387_v45 = vmul.f32 %v11879_v53, %v253_v7 }
 0x177   :  { %v390_v54 = vmul.f32 %v11867_v41, %v253_v7  ;;  %v257_v56 = vrot.slane %v11919_v55, %v11833_v26  ;;  %v389_v57 = vmul.f32 %v11885_v5, %v253_v7 }
 0x179   :  { %628 = vperm.xlu1 %11523, %v365_v58   ;;  %637 = vperm.xlu0 %11524, %v368_v59   ;;  %v392_v58 = vmul.f32 %v11871_v42, %v253_v7  ;;  %v391_v59 = vmul.f32 %v11889_v60, %v253_v7 }
 0x17d   :  { %643 = vperm.xlu0 %11524, %v370_v61   ;;  %634 = vperm.xlu1 %11523, %v367_v62   ;;  %v394_v61 = vmul.f32 %v11851_v27, %v257_v56  ;;  %v393_v62 = vmul.f32 %v11895_v2, %v253_v7  ;;  %v402_v7 = vmul.f32 %v11861_v16, %v257_v56 }
 0x181   :  { %649 = vperm.xlu0 %11524, %v372_v0   ;;  %640 = vperm.xlu1 %11523, %v369_v63   ;;  %v396_v0 = vmul.f32 %v11853_v12, %v257_v56  ;;  %v395_v63 = vmul.f32 %v11865_v40, %v257_v56 }
 0x185   :  { %655 = vperm.xlu0 %11524, %v374_v3   ;;  %646 = vperm.xlu1 %11523, %v371_v4   ;;  %v398_v3 = vmul.f32 %v11857_v29, %v257_v56  ;;  %v397_v4 = vmul.f32 %v11855_v28, %v257_v56 }
 0x189   :  { %661 = vperm.xlu0 %11524, %v376_v10   ;;  %652 = vperm.xlu1 %11523, %v373_v11   ;;  %v400_v10 = vmul.f32 %v11859_v33, %v257_v56  ;;  %v399_v11 = vmul.f32 %v11869_v1, %v257_v56 }
 0x18d   :  { %658 = vperm.xlu1 %11523, %v375_v14   ;;  %667 = vperm.xlu0 %11524, %v378_v17   ;;  %v401_v14 = vmul.f32 %v11875_v44, %v257_v56  ;;  %v404_v17 = vmul.f32 %v11863_v39, %v257_v56 }
 0x191   :  { %664 = vperm.xlu1 %11523, %v377_v9   ;;  %673 = vperm.xlu0 %11524, %v380_v18   ;;  %v403_v9 = vmul.f32 %v11879_v53, %v257_v56  ;;  %v406_v18 = vmul.f32 %v11867_v41, %v257_v56 }
 0x195   :  { %670 = vperm.xlu1 %11523, %v379_v19   ;;  %679 = vperm.xlu0 %11524, %v382_v21   ;;  %v11939_v19 = vpop.xlane.xlu1 %230 }
 0x196   :  { %v265_v21 = vrot.slane %v11939_v19, %v11833_v26 }
 0x199   :  { %676 = vperm.xlu1 %11523, %v381_v8   ;;  %685 = vperm.xlu0 %11524, %v384_v15   ;;  %v405_v8 = vmul.f32 %v11885_v5, %v257_v56  ;;  %v408_v15 = vmul.f32 %v11871_v42, %v257_v56 }
 0x19d   :  { %682 = vperm.xlu1 %11523, %v383_v23   ;;  %691 = vperm.xlu0 %11524, %v386_v24   ;;  %v407_v23 = vmul.f32 %v11889_v60, %v257_v56  ;;  %v426_v24 = vmul.f32 %v11851_v27, %v265_v21 }
 0x1a1   :  { %688 = vperm.xlu1 %11523, %v385_v13   ;;  %697 = vperm.xlu0 %11524, %v388_v25   ;;  %v409_v13 = vmul.f32 %v11895_v2, %v257_v56  ;;  %v428_v25 = vmul.f32 %v11853_v12, %v265_v21  ;;  %v434_v56 = vmul.f32 %v11861_v16, %v265_v21 }
 0x1a5   :  { %694 = vperm.xlu1 %11523, %v387_v45   ;;  %703 = vperm.xlu0 %11524, %v390_v54   ;;  %v427_v45 = vmul.f32 %v11865_v40, %v265_v21  ;;  %v430_v54 = vmul.f32 %v11857_v29, %v265_v21 }
 0x1a9   :  { %700 = vperm.xlu1 %11523, %v389_v57   ;;  %709 = vperm.xlu0 %11524, %v392_v58   ;;  %v429_v57 = vmul.f32 %v11855_v28, %v265_v21  ;;  %v432_v58 = vmul.f32 %v11859_v33, %v265_v21 }
 0x1ad   :  { %706 = vperm.xlu1 %11523, %v391_v59   ;;  %715 = vperm.xlu0 %11524, %v394_v61   ;;  %v431_v59 = vmul.f32 %v11869_v1, %v265_v21  ;;  %v11955_v61 = vpop.xlane.xlu0 %228 }
 0x1b1   :  { %712 = vperm.xlu1 %11523, %v393_v62   ;;  %721 = vperm.xlu0 %11524, %v396_v0   ;;  %v433_v62 = vmul.f32 %v11875_v44, %v265_v21  ;;  %v436_v0 = vmul.f32 %v11863_v39, %v265_v21 }
 0x1b5   :  { %718 = vperm.xlu1 %11523, %v395_v63   ;;  %727 = vperm.xlu0 %11524, %v398_v3   ;;  %v435_v63 = vmul.f32 %v11879_v53, %v265_v21  ;;  %v438_v3 = vmul.f32 %v11867_v41, %v265_v21 }
 0x1b9   :  { %724 = vperm.xlu1 %11523, %v397_v4   ;;  %733 = vperm.xlu0 %11524, %v400_v10   ;;  %v11961_v4 = vpop.xlane.xlu0 %232  ;;  %v11965_v10 = vrot.slane %v11955_v61, %v11833_v26 }
 0x1bd   :  { %730 = vperm.xlu1 %11523, %v399_v11   ;;  %739 = vperm.xlu0 %11524, %v402_v7   ;;  %v437_v11 = vmul.f32 %v11885_v5, %v265_v21  ;;  %v440_v7 = vmul.f32 %v11871_v42, %v265_v21 }
 0x1c1   :  { %736 = vperm.xlu1 %11523, %v401_v14   ;;  %745 = vperm.xlu0 %11524, %v404_v17   ;;  %v11969_v14 = vpop.xlane.xlu1 %234  ;;  %v11971_v17 = vpop.xlane.xlu0 %236 }
 0x1c5   :  { %742 = vperm.xlu1 %11523, %v403_v9   ;;  %751 = vperm.xlu0 %11524, %v406_v18   ;;  %v439_v9 = vmul.f32 %v11889_v60, %v265_v21  ;;  %v410_v18 = vmul.f32 %v11851_v27, %v11965_v10 }
 0x1c9   :  { %748 = vperm.xlu1 %11523, %v405_v8   ;;  %757 = vperm.xlu0 %11524, %v408_v15  }
 0x1cd   :  { %754 = vperm.xlu1 %11523, %v407_v23   ;;  %811 = vperm.xlu0 %11524, %v426_v24   ;;  %v441_v23 = vmul.f32 %v11895_v2, %v265_v21  ;;  %v412_v24 = vmul.f32 %v11853_v12, %v11965_v10 }
 0x1d1   :  { %760 = vperm.xlu1 %11523, %v409_v13   ;;  %817 = vperm.xlu0 %11524, %v428_v25  }
 0x1d5   :  { %814 = vperm.xlu1 %11523, %v427_v45   ;;  %823 = vperm.xlu0 %11524, %v430_v54  }
 0x1d9   :  { %820 = vperm.xlu1 %11523, %v429_v57   ;;  %829 = vperm.xlu0 %11524, %v432_v58   ;;  %v411_v57 = vmul.f32 %v11865_v40, %v11965_v10  ;;  %v414_v58 = vmul.f32 %v11857_v29, %v11965_v10 }
 0x1dd   :  { %826 = vperm.xlu1 %11523, %v431_v59   ;;  %835 = vperm.xlu0 %11524, %v434_v56  }
 0x1e1   :  { %832 = vperm.xlu1 %11523, %v433_v62   ;;  %841 = vperm.xlu0 %11524, %v436_v0   ;;  %v413_v62 = vmul.f32 %v11855_v28, %v11965_v10  ;;  %v416_v0 = vmul.f32 %v11859_v33, %v11965_v10 }
 0x1e5   :  { %838 = vperm.xlu1 %11523, %v435_v63   ;;  %847 = vperm.xlu0 %11524, %v438_v3  }
 0x1e9   :  { %844 = vperm.xlu1 %11523, %v437_v11   ;;  %853 = vperm.xlu0 %11524, %v440_v7  }
 0x1ed   :  { %850 = vperm.xlu1 %11523, %v439_v9   ;;  %763 = vperm.xlu0 %11524, %v410_v18   ;;  %v415_v18 = vmul.f32 %v11869_v1, %v11965_v10 }
 0x1f0   :  { %v620_v8 = vpop.permute.xlu1 %619  ;;  %v623_v15 = vpop.permute.xlu0 %622 }
 0x1f1   :  { %v1007_v13 = vrot.slane %v620_v8, %v11783_v22  ;;  %v1012_v25 = vrot.slane %v623_v15, %v11786_v30  ;;  %856 = vperm.xlu1 %11523, %v441_v23   ;;  %769 = vperm.xlu0 %11524, %v412_v24   ;;  %v418_v8 = vmul.f32 %v11861_v16, %v11965_v10 }
 0x1f3   :  { %v1014_v45 = vsel %vm1013_vm0, %v1012_v25, %v1007_v13 }
 0x1f4   :  { %v626_v54 = vpop.permute.xlu1 %625  ;;  %v632_v59 = vpop.permute.xlu0 %631 }
 0x1f5   :  { %v1019_v21 = vrot.slane %v626_v54, %v11789_v31  ;;  %766 = vperm.xlu1 %11523, %v411_v57   ;;  %775 = vperm.xlu0 %11524, %v414_v58   ;;  %v1033_v7 = vrot.slane %v632_v59, %v11795_v34  ;;  %v417_v54 = vmul.f32 %v11875_v44, %v11965_v10 }
 0x1f6   :  { %v420_v57 = vmul.f32 %v11863_v39, %v11965_v10 }
 0x1f7   :  { %v1021_v56 = vsel %vm1020_vm1, %v1019_v21, %v1014_v45 }
 0x1f8   :  { %v629_v63 = vpop.permute.xlu1 %628  ;;  %v638_v3 = vpop.permute.xlu0 %637 }
 0x1f9   :  { %v1026_v11 = vrot.slane %v629_v63, %v11792_v32  ;;  %772 = vperm.xlu1 %11523, %v413_v62   ;;  %781 = vperm.xlu0 %11524, %v416_v0   ;;  %v1047_v25 = vrot.slane %v638_v3, %v11801_v36  ;;  %v419_v63 = vmul.f32 %v11879_v53, %v11965_v10 }
 0x1fa   :  { %v422_v3 = vmul.f32 %v11867_v41, %v11965_v10 }
 0x1fb   :  { %v1028_v9 = vsel %vm1027_vm2, %v1026_v11, %v1021_v56 }
 0x1fc   :  { %v635_v15 = vpop.permute.xlu1 %634  ;;  %v1035_v23 = vsel %vm1034_vm3, %v1033_v7, %v1028_v9  ;;  %v644_v24 = vpop.permute.xlu0 %643 }
 0x1fd   :  { %v1040_v13 = vrot.slane %v635_v15, %v11798_v35  ;;  %778 = vperm.xlu1 %11523, %v415_v18   ;;  %787 = vperm.xlu0 %11524, %v418_v8   ;;  %v1061_v62 = vrot.slane %v644_v24, %v11807_v38  ;;  %v12020_v15 = vrot.slane %v11961_v4, %v11833_v26 }
 0x1fe   :  { %v421_v24 = vmul.f32 %v11885_v5, %v11965_v10 }
 0x1ff   :  { %v1042_v45 = vsel %vm1041_vm4, %v1040_v13, %v1035_v23  ;;  %v424_v13 = vmul.f32 %v11871_v42, %v11965_v10 }
 0x200   :  { %v641_v58 = vpop.permute.xlu1 %640  ;;  %v1049_v21 = vsel %vm1048_vm5, %v1047_v25, %v1042_v45  ;;  %v650_v59 = vpop.permute.xlu0 %649 }
 0x201   :  { %v1054_v56 = vrot.slane %v641_v58, %v11804_v37  ;;  %784 = vperm.xlu1 %11523, %v417_v54   ;;  %793 = vperm.xlu0 %11524, %v420_v57   ;;  %v1075_v8 = vrot.slane %v650_v59, %v11813_v47  ;;  %v423_v59 = vmul.f32 %v11889_v60, %v11965_v10 }
 0x203   :  { %v1056_v0 = vsel %vm1055_vm6, %v1054_v56, %v1049_v21  ;;  %v442_v56 = vmul.f32 %v11851_v27, %v12020_v15 }
 0x204   :  { %v647_v11 = vpop.permute.xlu1 %646  ;;  %v1063_v7 = vsel %vm1062_vm7, %v1061_v62, %v1056_v0  ;;  %v656_v9 = vpop.permute.xlu0 %655 }
 0x205   :  { %v1068_v18 = vrot.slane %v647_v11, %v11810_v46  ;;  %790 = vperm.xlu1 %11523, %v419_v63   ;;  %799 = vperm.xlu0 %11524, %v422_v3   ;;  %v1089_v58 = vrot.slane %v656_v9, %v11819_v49  ;;  %v425_v9 = vmul.f32 %v11895_v2, %v11965_v10 }
 0x206   :  { %v446_v10 = vmul.f32 %v11857_v29, %v12020_v15 }
 0x207   :  { %v1070_v23 = vsel %vm1069_vm8, %v1068_v18, %v1063_v7  ;;  %v444_v18 = vmul.f32 %v11853_v12, %v12020_v15 }
 0x208   :  { %v653_v25 = vpop.permute.xlu1 %652  ;;  %v1077_v45 = vsel %vm1076_vm9, %v1075_v8, %v1070_v23  ;;  %v662_v54 = vpop.permute.xlu0 %661 }
 0x209   :  { %v1082_v57 = vrot.slane %v653_v25, %v11816_v48  ;;  %796 = vperm.xlu1 %11523, %v421_v24   ;;  %805 = vperm.xlu0 %11524, %v424_v13   ;;  %v1103_v11 = vrot.slane %v662_v54, %v11825_v51 }
 0x20b   :  { %v1084_v21 = vsel %vm16212_vm10, %v1082_v57, %v1077_v45  ;;  %v443_v45 = vmul.f32 %v11865_v40, %v12020_v15 }
 0x20c   :  { %v659_v62 = vpop.permute.xlu1 %658  ;;  %v1091_v0 = vsel %vm1090_vm11, %v1089_v58, %v1084_v21  ;;  %v668_v63 = vpop.permute.xlu0 %667 }
 0x20d   :  { %v1096_v3 = vrot.slane %v659_v62, %v11822_v50  ;;  %802 = vperm.xlu1 %11523, %v423_v59   ;;  %859 = vperm.xlu0 %11524, %v442_v56   ;;  %v1116_v58 = vrot.slane %v668_v63, %v11783_v22  ;;  %v445_v62 = vmul.f32 %v11855_v28, %v12020_v15 }
 0x20f   :  { %v1098_v7 = vsel %vm1097_vm12, %v1096_v3, %v1091_v0  ;;  %v448_v0 = vmul.f32 %v11859_v33, %v12020_v15 }
 0x210   :  { %v665_v8 = vpop.permute.xlu1 %664  ;;  %v1105_v23 = vsel %vm1104_vm13, %v1103_v11, %v1098_v7  ;;  %v674_v24 = vpop.permute.xlu0 %673 }
 0x211   :  { %v1110_v13 = vrot.slane %v665_v8, %v11828_v52  ;;  %808 = vperm.xlu1 %11523, %v425_v9   ;;  %865 = vperm.xlu0 %11524, %v444_v18   ;;  %v1125_v59 = vrot.slane %v674_v24, %v11789_v31  ;;  %v447_v8 = vmul.f32 %v11869_v1, %v12020_v15 }
 0x213   :  { %v12046_v25 = vsel %vm1111_vm14, %v1110_v13, %v1105_v23  ;;  %v450_v23 = vmul.f32 %v11861_v16, %v12020_v15 }
 0x214   :  { %v671_v54 = vpop.permute.xlu1 %670  ;;  %v680_v57 = vpop.permute.xlu0 %679 }
 0x215   :  { %v1120_v21 = vrot.slane %v671_v54, %v11786_v30  ;;  %862 = vperm.xlu1 %11523, %v443_v45   ;;  %871 = vperm.xlu0 %11524, %v446_v10   ;;  %v1135_v9 = vrot.slane %v680_v57, %v11795_v34 }
 0x217   :  { %v1121_v56 = vsel %vm1013_vm0, %v1120_v21, %v1116_v58  ;;  %v449_v58 = vmul.f32 %v11875_v44, %v12020_v15  ;;  %v452_v21 = vmul.f32 %v11863_v39, %v12020_v15 }
 0x218   :  { %v677_v3 = vpop.permute.xlu1 %676  ;;  %v1126_v11 = vsel %vm1020_vm1, %v1125_v59, %v1121_v56  ;;  %v686_v7 = vpop.permute.xlu0 %685 }
 0x219   :  { %v1130_v63 = vrot.slane %v677_v3, %v11792_v32  ;;  %868 = vperm.xlu1 %11523, %v445_v62   ;;  %877 = vperm.xlu0 %11524, %v448_v0   ;;  %v1145_v54 = vrot.slane %v686_v7, %v11801_v36  ;;  %v451_v7 = vmul.f32 %v11879_v53, %v12020_v15 }
 0x21b   :  { %v1131_v18 = vsel %vm1027_vm2, %v1130_v63, %v1126_v11  ;;  %v454_v63 = vmul.f32 %v11867_v41, %v12020_v15 }
 0x21c   :  { %v683_v24 = vpop.permute.xlu1 %682  ;;  %v1136_v13 = vsel %vm1034_vm3, %v1135_v9, %v1131_v18  ;;  %v692_v45 = vpop.permute.xlu0 %691 }
 0x21d   :  { %v1140_v10 = vrot.slane %v683_v24, %v11798_v35  ;;  %874 = vperm.xlu1 %11523, %v447_v8   ;;  %883 = vperm.xlu0 %11524, %v450_v23   ;;  %v1155_v3 = vrot.slane %v692_v45, %v11807_v38 }
 0x21f   :  { %v1141_v57 = vsel %vm1041_vm4, %v1140_v10, %v1136_v13  ;;  %v12089_v13 = vrot.slane %v11969_v14, %v11833_v26  ;;  %v453_v10 = vmul.f32 %v11885_v5, %v12020_v15 }
 0x220   :  { %v689_v59 = vpop.permute.xlu1 %688  ;;  %v1146_v56 = vsel %vm1048_vm5, %v1145_v54, %v1141_v57  ;;  %v698_v62 = vpop.permute.xlu0 %697  ;;  %v456_v54 = vmul.f32 %v11871_v42, %v12020_v15 }
 0x221   :  { %v1150_v0 = vrot.slane %v689_v59, %v11804_v37  ;;  %880 = vperm.xlu1 %11523, %v449_v58   ;;  %889 = vperm.xlu0 %11524, %v452_v21   ;;  %v1165_v24 = vrot.slane %v698_v62, %v11813_v47 }
 0x223   :  { %v1151_v11 = vsel %vm1055_vm6, %v1150_v0, %v1146_v56  ;;  %v455_v0 = vmul.f32 %v11889_v60, %v12020_v15 }
 0x224   :  { %v695_v9 = vpop.permute.xlu1 %694  ;;  %v1156_v18 = vsel %vm1062_vm7, %v1155_v3, %v1151_v11  ;;  %v704_v8 = vpop.permute.xlu0 %703  ;;  %v458_v3 = vmul.f32 %v11851_v27, %v12089_v13 }
 0x225   :  { %v1160_v23 = vrot.slane %v695_v9, %v11810_v46  ;;  %886 = vperm.xlu1 %11523, %v451_v7   ;;  %895 = vperm.xlu0 %11524, %v454_v63   ;;  %v1175_v56 = vrot.slane %v704_v8, %v11819_v49 }
 0x227   :  { %v1161_v45 = vsel %vm1069_vm8, %v1160_v23, %v1156_v18  ;;  %v457_v23 = vmul.f32 %v11895_v2, %v12020_v15  ;;  %v462_v15 = vmul.f32 %v11857_v29, %v12089_v13 }
 0x228   :  { %v701_v57 = vpop.permute.xlu1 %700  ;;  %v1166_v58 = vsel %vm1076_vm9, %v1165_v24, %v1161_v45  ;;  %v710_v21 = vpop.permute.xlu0 %709  ;;  %v460_v24 = vmul.f32 %v11853_v12, %v12089_v13 }
 0x229   :  { %v1170_v59 = vrot.slane %v701_v57, %v11816_v48  ;;  %892 = vperm.xlu1 %11523, %v453_v10   ;;  %901 = vperm.xlu0 %11524, %v456_v54   ;;  %v1185_v18 = vrot.slane %v710_v21, %v11825_v51  ;;  %v459_v21 = vmul.f32 %v11865_v40, %v12089_v13 }
 0x22b   :  { %v1171_v62 = vsel %vm16212_vm10, %v1170_v59, %v1166_v58 }
 0x22c   :  { %v707_v11 = vpop.permute.xlu1 %706  ;;  %v1176_v7 = vsel %vm1090_vm11, %v1175_v56, %v1171_v62  ;;  %v716_v63 = vpop.permute.xlu0 %715 }
 0x22d   :  { %v1180_v9 = vrot.slane %v707_v11, %v11822_v50  ;;  %898 = vperm.xlu1 %11523, %v455_v0   ;;  %907 = vperm.xlu0 %11524, %v458_v3   ;;  %v1195_v0 = vrot.slane %v716_v63, %v11783_v22 }
 0x22f   :  { %v1181_v8 = vsel %vm1097_vm12, %v1180_v9, %v1176_v7  ;;  %v461_v9 = vmul.f32 %v11855_v28, %v12089_v13 }
 0x230   :  { %v713_v45 = vpop.permute.xlu1 %712  ;;  %v1186_v10 = vsel %vm1104_vm13, %v1185_v18, %v1181_v8  ;;  %v722_v54 = vpop.permute.xlu0 %721  ;;  %v464_v18 = vmul.f32 %v11859_v33, %v12089_v13 }
 0x231   :  { %v1190_v57 = vrot.slane %v713_v45, %v11828_v52  ;;  %904 = vperm.xlu1 %11523, %v457_v23   ;;  %913 = vperm.xlu0 %11524, %v460_v24   ;;  %v1204_v11 = vrot.slane %v722_v54, %v11789_v31  ;;  %v466_v54 = vmul.f32 %v11861_v16, %v12089_v13 }
 0x233   :  { %v1191_v58 = vsel %vm1111_vm14, %v1190_v57, %v1186_v10  ;;  %v463_v10 = vmul.f32 %v11869_v1, %v12089_v13 }
 0x234   :  { %v12121_v59 = vsel %vm16210_vm15, %v1191_v58, %v12046_v25  ;;  %v719_v56 = vpop.permute.xlu1 %718  ;;  %v728_v62 = vpop.permute.xlu0 %727  ;;  %vm16211_vm15 = vcmask 1042434  }
 0x235   :  { %v1199_v3 = vrot.slane %v719_v56, %v11786_v30  ;;  %910 = vperm.xlu1 %11523, %v459_v21   ;;  %919 = vperm.xlu0 %11524, %v462_v15   ;;  %v1214_v24 = vrot.slane %v728_v62, %v11795_v34 }
 0x237   :  { %v1200_v7 = vsel %vm1013_vm0, %v1199_v3, %v1195_v0  ;;  %v465_v0 = vmul.f32 %v11875_v44, %v12089_v13  ;;  %v468_v3 = vmul.f32 %v11863_v39, %v12089_v13 }
 0x238   :  { %v725_v25 = vpop.permute.xlu1 %724  ;;  %v1205_v8 = vsel %vm1020_vm1, %v1204_v11, %v1200_v7  ;;  %v734_v23 = vpop.permute.xlu0 %733 }
 0x239   :  { %v1209_v63 = vrot.slane %v725_v25, %v11792_v32  ;;  %916 = vperm.xlu1 %11523, %v461_v9   ;;  %925 = vperm.xlu0 %11524, %v464_v18   ;;  %v1224_v56 = vrot.slane %v734_v23, %v11801_v36  ;;  %v467_v23 = vmul.f32 %v11879_v53, %v12089_v13 }
 0x23b   :  { %v1210_v45 = vsel %vm1027_vm2, %v1209_v63, %v1205_v8  ;;  %v470_v63 = vmul.f32 %v11867_v41, %v12089_v13 }
 0x23c   :  { %v731_v57 = vpop.permute.xlu1 %730  ;;  %v1215_v58 = vsel %vm1034_vm3, %v1214_v24, %v1210_v45  ;;  %v740_v21 = vpop.permute.xlu0 %739 }
 0x23d   :  { %v1219_v15 = vrot.slane %v731_v57, %v11798_v35  ;;  %922 = vperm.xlu1 %11523, %v463_v10   ;;  %931 = vperm.xlu0 %11524, %v466_v54   ;;  %v1234_v25 = vrot.slane %v740_v21, %v11807_v38 }
 0x23f   :  { %v1220_v62 = vsel %vm1041_vm4, %v1219_v15, %v1215_v58  ;;  %v12160_v58 = vrot.slane %v11971_v17, %v11833_v26  ;;  %v469_v15 = vmul.f32 %v11885_v5, %v12089_v13 }
 0x240   :  { %v737_v11 = vpop.permute.xlu1 %736  ;;  %v1225_v7 = vsel %vm1048_vm5, %v1224_v56, %v1220_v62  ;;  %v746_v9 = vpop.permute.xlu0 %745  ;;  %v472_v56 = vmul.f32 %v11871_v42, %v12089_v13 }
 0x241   :  { %v1229_v18 = vrot.slane %v737_v11, %v11804_v37  ;;  %928 = vperm.xlu1 %11523, %v465_v0   ;;  %937 = vperm.xlu0 %11524, %v468_v3   ;;  %v1244_v57 = vrot.slane %v746_v9, %v11813_v47  ;;  %v471_v9 = vmul.f32 %v11889_v60, %v12089_v13 }
 0x243   :  { %v1230_v8 = vsel %vm1055_vm6, %v1229_v18, %v1225_v7  ;;  %v474_v18 = vmul.f32 %v11851_v27, %v12160_v58 }
 0x244   :  { %v743_v24 = vpop.permute.xlu1 %742  ;;  %v1235_v45 = vsel %vm1062_vm7, %v1234_v25, %v1230_v8  ;;  %v752_v10 = vpop.permute.xlu0 %751 }
 0x245   :  { %v1239_v54 = vrot.slane %v743_v24, %v11810_v46  ;;  %934 = vperm.xlu1 %11523, %v467_v23   ;;  %943 = vperm.xlu0 %11524, %v470_v63   ;;  %v1254_v7 = vrot.slane %v752_v10, %v11819_v49  ;;  %v473_v10 = vmul.f32 %v11895_v2, %v12089_v13 }
 0x246   :  { %v478_v13 = vmul.f32 %v11857_v29, %v12160_v58  ;;  %v480_v29 = vmul.f32 %v11859_v33, %v12160_v58 }
 0x247   :  { %v1240_v21 = vsel %vm1069_vm8, %v1239_v54, %v1235_v45  ;;  %v476_v54 = vmul.f32 %v11853_v12, %v12160_v58 }
 0x248   :  { %v749_v62 = vpop.permute.xlu1 %748  ;;  %v1245_v0 = vsel %vm1076_vm9, %v1244_v57, %v1240_v21  ;;  %v758_v3 = vpop.permute.xlu0 %757 }
 0x249   :  { %v1249_v11 = vrot.slane %v749_v62, %v11816_v48  ;;  %940 = vperm.xlu1 %11523, %v469_v15   ;;  %949 = vperm.xlu0 %11524, %v472_v56   ;;  %v1264_v24 = vrot.slane %v758_v3, %v11825_v51  ;;  %v475_v62 = vmul.f32 %v11865_v40, %v12160_v58 }
 0x24a   :  { %v477_v40 = vmul.f32 %v11855_v28, %v12160_v58  ;;  %v482_v28 = vmul.f32 %v11861_v16, %v12160_v58 }
 0x24b   :  { %v1250_v26 = vsel %vm16212_vm10, %v1249_v11, %v1245_v0 }
 0x24c   :  { %v755_v25 = vpop.permute.xlu1 %754  ;;  %v1255_v8 = vsel %vm1090_vm11, %v1254_v7, %v1250_v26  ;;  %v812_v23 = vpop.permute.xlu0 %811 }
 0x24d   :  { %v1259_v63 = vrot.slane %v755_v25, %v11822_v50  ;;  %946 = vperm.xlu1 %11523, %v471_v9   ;;  %955 = vperm.xlu0 %11524, %v474_v18   ;;  %v1353_v11 = vrot.slane %v812_v23, %v11783_v22 }
 0x24f   :  { %v1260_v45 = vsel %vm1097_vm12, %v1259_v63, %v1255_v8 }
 0x250   :  { %v761_v57 = vpop.permute.xlu1 %760  ;;  %v1265_v27 = vsel %vm1104_vm13, %v1264_v24, %v1260_v45  ;;  %v818_v21 = vpop.permute.xlu0 %817  ;;  %v479_v24 = vmul.f32 %v11869_v1, %v12160_v58  ;;  %v484_v1 = vmul.f32 %v11863_v39, %v12160_v58 }
 0x251   :  { %v1269_v15 = vrot.slane %v761_v57, %v11828_v52  ;;  %952 = vperm.xlu1 %11523, %v473_v10   ;;  %961 = vperm.xlu0 %11524, %v476_v54   ;;  %v1362_v26 = vrot.slane %v818_v21, %v11789_v31  ;;  %v481_v21 = vmul.f32 %v11875_v44, %v12160_v58 }
 0x252   :  { %v486_v44 = vmul.f32 %v11867_v41, %v12160_v58 }
 0x253   :  { %v1270_v56 = vsel %vm1111_vm14, %v1269_v15, %v1265_v27 }
 0x254   :  { %v12192_v12 = vsel %vm16211_vm15, %v1270_v56, %v12121_v59  ;;  %v815_v0 = vpop.permute.xlu1 %814  ;;  %v824_v3 = vpop.permute.xlu0 %823  ;;  %vm16214_vm15 = vcmask 1043459  }
 0x255   :  { %v1357_v7 = vrot.slane %v815_v0, %v11786_v30  ;;  %958 = vperm.xlu1 %11523, %v475_v62   ;;  %967 = vperm.xlu0 %11524, %v478_v13   ;;  %v1372_v23 = vrot.slane %v824_v3, %v11795_v34  ;;  %v483_v3 = vmul.f32 %v11879_v53, %v12160_v58 }
 0x256   :  { %v488_v53 = vmul.f32 %v11871_v42, %v12160_v58 }
 0x257   :  { %v1358_v9 = vsel %vm1013_vm0, %v1357_v7, %v1353_v11 }
 0x258   :  { %v821_v59 = vpop.permute.xlu1 %820  ;;  %v1363_v18 = vsel %vm1020_vm1, %v1362_v26, %v1358_v9  ;;  %v830_v25 = vpop.permute.xlu0 %829 }
 0x259   :  { %v1367_v8 = vrot.slane %v821_v59, %v11792_v32  ;;  %964 = vperm.xlu1 %11523, %v477_v40   ;;  %973 = vperm.xlu0 %11524, %v480_v29   ;;  %v1382_v57 = vrot.slane %v830_v25, %v11801_v36  ;;  %v485_v29 = vmul.f32 %v11885_v5, %v12160_v58 }
 0x25a   :  { %v487_v5 = vmul.f32 %v11889_v60, %v12160_v58 }
 0x25b   :  { %v1368_v63 = vsel %vm1027_vm2, %v1367_v8, %v1363_v18 }
 0x25c   :  { %v827_v45 = vpop.permute.xlu1 %826  ;;  %v1373_v33 = vsel %vm1034_vm3, %v1372_v23, %v1368_v63  ;;  %v836_v10 = vpop.permute.xlu0 %835  ;;  %v12237_v23 = vld [vmem:[#allocation7 + $0x1] ss:$0 sm:$0xff] }
 0x25d   :  { %v1377_v54 = vrot.slane %v827_v45, %v11798_v35  ;;  %970 = vperm.xlu1 %11523, %v479_v24   ;;  %979 = vperm.xlu0 %11524, %v482_v28   ;;  %v1392_v13 = vrot.slane %v836_v10, %v11807_v38 }
 0x25f   :  { %v1378_v27 = vsel %vm1041_vm4, %v1377_v54, %v1373_v33  ;;  %v489_v54 = vmul.f32 %v11895_v2, %v12160_v58 }
 0x260   :  { %v833_v15 = vpop.permute.xlu1 %832  ;;  %v1383_v16 = vsel %vm1048_vm5, %v1382_v57, %v1378_v27  ;;  %v842_v56 = vpop.permute.xlu0 %841 }
 0x261   :  { %v1387_v62 = vrot.slane %v833_v15, %v11804_v37  ;;  %976 = vperm.xlu1 %11523, %v481_v21   ;;  %985 = vperm.xlu0 %11524, %v484_v1   ;;  %v1402_v9 = vrot.slane %v842_v56, %v11813_v47 }
 0x263   :  { %v1388_v0 = vsel %vm1055_vm6, %v1387_v62, %v1383_v16 }
 0x264   :  { %v839_v11 = vpop.permute.xlu1 %838  ;;  %v1393_v39 = vsel %vm1062_vm7, %v1392_v13, %v1388_v0  ;;  %v848_v7 = vpop.permute.xlu0 %847 }
 0x265   :  { %v1397_v26 = vrot.slane %v839_v11, %v11810_v46  ;;  %982 = vperm.xlu1 %11523, %v483_v3   ;;  %991 = vperm.xlu0 %11524, %v486_v44   ;;  %v1412_v8 = vrot.slane %v848_v7, %v11819_v49 }
 0x267   :  { %v1398_v40 = vsel %vm1069_vm8, %v1397_v26, %v1393_v39 }
 0x268   :  { %v845_v59 = vpop.permute.xlu1 %844  ;;  %v1403_v41 = vsel %vm1076_vm9, %v1402_v9, %v1398_v40  ;;  %v854_v18 = vpop.permute.xlu0 %853 }
 0x269   :  { %v1407_v25 = vrot.slane %v845_v59, %v11816_v48  ;;  %988 = vperm.xlu1 %11523, %v485_v29   ;;  %997 = vperm.xlu0 %11524, %v488_v53   ;;  %v1422_v33 = vrot.slane %v854_v18, %v11825_v51 }
 0x26b   :  { %v1408_v63 = vsel %vm16212_vm10, %v1407_v25, %v1403_v41 }
 0x26c   :  { %v851_v24 = vpop.permute.xlu1 %850  ;;  %v1413_v42 = vsel %vm1090_vm11, %v1412_v8, %v1408_v63  ;;  %v764_v28 = vpop.permute.xlu0 %763 }
 0x26d   :  { %v1417_v45 = vrot.slane %v851_v24, %v11822_v50  ;;  %994 = vperm.xlu1 %11523, %v487_v5   ;;  %1721 = vbcast.lane.b32.xlu0 %v12237_v23, 256  ;;  %v1274_v56 = vrot.slane %v764_v28, %v11783_v22 }
 0x26f   :  { %v1418_v10 = vsel %vm1097_vm12, %v1417_v45, %v1413_v42 }
 0x270   :  { %v857_v57 = vpop.permute.xlu1 %856  ;;  %v1423_v27 = vsel %vm1104_vm13, %v1422_v33, %v1418_v10  ;;  %v770_v60 = vpop.permute.xlu0 %769 }
 0x271   :  { %v1427_v21 = vrot.slane %v857_v57, %v11828_v52  ;;  %1000 = vperm.xlu1 %11523, %v489_v54   ;;  %1729 = vbcast.lane.b32.xlu0 %v12237_v23, 272  ;;  %v1283_v2 = vrot.slane %v770_v60, %v11789_v31 }
 0x273   :  { %v12253_v1 = vsel %vm1111_vm14, %v1427_v21, %v1423_v27 }
 0x274   :  { %v767_v15 = vpop.permute.xlu1 %766  ;;  %v776_v16 = vpop.permute.xlu0 %775 }
 0x275   :  { %v1278_v62 = vrot.slane %v767_v15, %v11786_v30  ;;  %1725 = vbcast.lane.b32.xlu1 %v12237_v23, 264  ;;  %1737 = vbcast.lane.b32.xlu0 %v12237_v23, 288  ;;  %v1293_v11 = vrot.slane %v776_v16, %v11795_v34 }
 0x277   :  { %v1279_v58 = vsel %vm1013_vm0, %v1278_v62, %v1274_v56 }
 0x278   :  { %v773_v13 = vpop.permute.xlu1 %772  ;;  %v1284_v0 = vsel %vm1020_vm1, %v1283_v2, %v1279_v58  ;;  %v782_v3 = vpop.permute.xlu0 %781 }
 0x279   :  { %v1288_v44 = vrot.slane %v773_v13, %v11792_v32  ;;  %1733 = vbcast.lane.b32.xlu1 %v12237_v23, 280  ;;  %1745 = vbcast.lane.b32.xlu0 %v12237_v23, 304  ;;  %v1303_v29 = vrot.slane %v782_v3, %v11801_v36 }
 0x27b   :  { %v1289_v39 = vsel %vm1027_vm2, %v1288_v44, %v1284_v0 }
 0x27c   :  { %v779_v7 = vpop.permute.xlu1 %778  ;;  %v1294_v26 = vsel %vm1034_vm3, %v1293_v11, %v1289_v39  ;;  %v788_v9 = vpop.permute.xlu0 %787 }
 0x27d   :  { %v1298_v40 = vrot.slane %v779_v7, %v11798_v35  ;;  %1741 = vbcast.lane.b32.xlu1 %v12237_v23, 296  ;;  %1753 = vbcast.lane.b32.xlu0 %v12237_v23, 320  ;;  %v1313_v8 = vrot.slane %v788_v9, %v11807_v38 }
 0x27f   :  { %v1299_v53 = vsel %vm1041_vm4, %v1298_v40, %v1294_v26 }
 0x280   :  { %v785_v59 = vpop.permute.xlu1 %784  ;;  %v1304_v41 = vsel %vm1048_vm5, %v1303_v29, %v1299_v53  ;;  %v794_v18 = vpop.permute.xlu0 %793 }
 0x281   :  { %v1308_v25 = vrot.slane %v785_v59, %v11804_v37  ;;  %1749 = vbcast.lane.b32.xlu1 %v12237_v23, 312  ;;  %1761 = vbcast.lane.b32.xlu0 %v12237_v23, 336  ;;  %v1323_v45 = vrot.slane %v794_v18, %v11813_v47 }
 0x283   :  { %v1309_v63 = vsel %vm1055_vm6, %v1308_v25, %v1304_v41 }
 0x284   :  { %v791_v5 = vpop.permute.xlu1 %790  ;;  %v1314_v24 = vsel %vm1062_vm7, %v1313_v8, %v1309_v63  ;;  %v800_v42 = vpop.permute.xlu0 %799 }
 0x285   :  { %v1318_v28 = vrot.slane %v791_v5, %v11810_v46  ;;  %1757 = vbcast.lane.b32.xlu1 %v12237_v23, 328  ;;  %1769 = vbcast.lane.b32.xlu0 %v12237_v23, 352  ;;  %v1333_v60 = vrot.slane %v800_v42, %v11819_v49 }
 0x287   :  { %v1319_v33 = vsel %vm1069_vm8, %v1318_v28, %v1314_v24 }
 0x288   :  { %v797_v10 = vpop.permute.xlu1 %796  ;;  %v1324_v54 = vsel %vm1076_vm9, %v1323_v45, %v1319_v33  ;;  %v806_v57 = vpop.permute.xlu0 %805 }
 0x289   :  { %v1328_v27 = vrot.slane %v797_v10, %v11816_v48  ;;  %1765 = vbcast.lane.b32.xlu1 %v12237_v23, 344  ;;  %1777 = vbcast.lane.b32.xlu0 %v12237_v23, 368  ;;  %v1343_v2 = vrot.slane %v806_v57, %v11825_v51 }
 0x28b   :  { %v1329_v21 = vsel %vm16212_vm10, %v1328_v27, %v1324_v54  ;;  %vm16213_vm10 = vcmask 1044484  }
 0x28c   :  { %v803_v15 = vpop.permute.xlu1 %802  ;;  %v1334_v16 = vsel %vm1090_vm11, %v1333_v60, %v1329_v21  ;;  %v860_v56 = vpop.permute.xlu0 %859 }
 0x28d   :  { %v1338_v62 = vrot.slane %v803_v15, %v11822_v50  ;;  %1773 = vbcast.lane.b32.xlu1 %v12237_v23, 360  ;;  %v1432_v9 = vrot.slane %v860_v56, %v11783_v22 }
 0x28f   :  { %v1339_v58 = vsel %vm1097_vm12, %v1338_v62, %v1334_v16 }
 0x290   :  { %v809_v13 = vpop.permute.xlu1 %808  ;;  %v1344_v0 = vsel %vm1104_vm13, %v1343_v2, %v1339_v58  ;;  %v866_v3 = vpop.permute.xlu0 %865 }
 0x291   :  { %v1348_v44 = vrot.slane %v809_v13, %v11828_v52  ;;  %1781 = vbcast.lane.b32.xlu1 %v12237_v23, 376  ;;  %v1441_v53 = vrot.slane %v866_v3, %v11789_v31 }
 0x293   :  { %v1349_v11 = vsel %vm1111_vm14, %v1348_v44, %v1344_v0 }
 0x294   :  { %v1671_v39 = vsel %vm16214_vm15, %v1349_v11, %v12192_v12  ;;  %v863_v7 = vpop.permute.xlu1 %862  ;;  %v872_v26 = vpop.permute.xlu0 %871  ;;  %vm16215_vm15 = vcmask 1045509  }
 0x295   :  { %v1436_v40 = vrot.slane %v863_v7, %v11786_v30  ;;  %v1673_v29 = vsel %vm16213_vm10, %v12253_v1, %v1671_v39  ;;  %v1451_v12 = vrot.slane %v872_v26, %v11795_v34  ;;  %vm16218_vm10 = vcmask 786112  }
 0x297   :  { %v1437_v59 = vsel %vm1013_vm0, %v1436_v40, %v1432_v9 }
 0x298   :  { %v869_v23 = vpop.permute.xlu1 %868  ;;  %v1442_v41 = vsel %vm1020_vm1, %v1441_v53, %v1437_v59  ;;  %v878_v18 = vpop.permute.xlu0 %877 }
 0x299   :  { %v1446_v25 = vrot.slane %v869_v23, %v11792_v32  ;;  %v1461_v42 = vrot.slane %v878_v18, %v11801_v36 }
 0x29b   :  { %v1447_v8 = vsel %vm1027_vm2, %v1446_v25, %v1442_v41 }
 0x29c   :  { %v875_v63 = vpop.permute.xlu1 %874  ;;  %v1452_v5 = vsel %vm1034_vm3, %v1451_v12, %v1447_v8  ;;  %v884_v24 = vpop.permute.xlu0 %883 }
 0x29d   :  { %v1456_v1 = vrot.slane %v875_v63, %v11798_v35  ;;  %v1471_v57 = vrot.slane %v884_v24, %v11807_v38 }
 0x29f   :  { %v1457_v28 = vsel %vm1041_vm4, %v1456_v1, %v1452_v5 }
 0x2a0   :  { %v881_v45 = vpop.permute.xlu1 %880  ;;  %v1462_v33 = vsel %vm1048_vm5, %v1461_v42, %v1457_v28  ;;  %v890_v10 = vpop.permute.xlu0 %889 }
 0x2a1   :  { %v1466_v54 = vrot.slane %v881_v45, %v11804_v37  ;;  %v1481_v56 = vrot.slane %v890_v10, %v11813_v47 }
 0x2a3   :  { %v1467_v27 = vsel %vm1055_vm6, %v1466_v54, %v1462_v33 }
 0x2a4   :  { %v887_v60 = vpop.permute.xlu1 %886  ;;  %v1472_v21 = vsel %vm1062_vm7, %v1471_v57, %v1467_v27  ;;  %v896_v15 = vpop.permute.xlu0 %895 }
 0x2a5   :  { %v1476_v16 = vrot.slane %v887_v60, %v11810_v46  ;;  %v1491_v3 = vrot.slane %v896_v15, %v11819_v49 }
 0x2a7   :  { %v1477_v62 = vsel %vm1069_vm8, %v1476_v16, %v1472_v21 }
 0x2a8   :  { %v893_v2 = vpop.permute.xlu1 %892  ;;  %v1482_v58 = vsel %vm1076_vm9, %v1481_v56, %v1477_v62  ;;  %v902_v13 = vpop.permute.xlu0 %901 }
 0x2a9   :  { %v1486_v0 = vrot.slane %v893_v2, %v11816_v48  ;;  %v1501_v9 = vrot.slane %v902_v13, %v11825_v51 }
 0x2ab   :  { %v1487_v44 = vsel %vm16218_vm10, %v1486_v0, %v1482_v58 }
 0x2ac   :  { %v899_v11 = vpop.permute.xlu1 %898  ;;  %v1492_v39 = vsel %vm1090_vm11, %v1491_v3, %v1487_v44  ;;  %v908_v7 = vpop.permute.xlu0 %907 }
 0x2ad   :  { %v1496_v26 = vrot.slane %v899_v11, %v11822_v50  ;;  %v1511_v63 = vrot.slane %v908_v7, %v11783_v22 }
 0x2af   :  { %v1497_v40 = vsel %vm1097_vm12, %v1496_v26, %v1492_v39 }
 0x2b0   :  { %v905_v53 = vpop.permute.xlu1 %904  ;;  %v1502_v59 = vsel %vm1104_vm13, %v1501_v9, %v1497_v40  ;;  %v914_v23 = vpop.permute.xlu0 %913 }
 0x2b1   :  { %v1506_v41 = vrot.slane %v905_v53, %v11828_v52  ;;  %v1520_v24 = vrot.slane %v914_v23, %v11789_v31 }
 0x2b3   :  { %v1507_v18 = vsel %vm1111_vm14, %v1506_v41, %v1502_v59 }
 0x2b4   :  { %v1675_v25 = vsel %vm16215_vm15, %v1507_v18, %v1673_v29  ;;  %v911_v12 = vpop.permute.xlu1 %910  ;;  %v920_v8 = vpop.permute.xlu0 %919  ;;  %vm16217_vm15 = vcmask 1046534  }
 0x2b5   :  { %v1515_v5 = vrot.slane %v911_v12, %v11786_v30  ;;  %v1530_v10 = vrot.slane %v920_v8, %v11795_v34 }
 0x2b7   :  { %v1516_v1 = vsel %vm1013_vm0, %v1515_v5, %v1511_v63 }
 0x2b8   :  { %v917_v42 = vpop.permute.xlu1 %916  ;;  %v1521_v28 = vsel %vm1020_vm1, %v1520_v24, %v1516_v1  ;;  %v926_v45 = vpop.permute.xlu0 %925 }
 0x2b9   :  { %v1525_v33 = vrot.slane %v917_v42, %v11792_v32  ;;  %v1540_v21 = vrot.slane %v926_v45, %v11801_v36 }
 0x2bb   :  { %v1526_v29 = vsel %vm1027_vm2, %v1525_v33, %v1521_v28 }
 0x2bc   :  { %v923_v54 = vpop.permute.xlu1 %922  ;;  %v1531_v57 = vsel %vm1034_vm3, %v1530_v10, %v1526_v29  ;;  %v932_v27 = vpop.permute.xlu0 %931 }
 0x2bd   :  { %v1535_v60 = vrot.slane %v923_v54, %v11798_v35  ;;  %v1550_v58 = vrot.slane %v932_v27, %v11807_v38 }
 0x2bf   :  { %v1536_v15 = vsel %vm1041_vm4, %v1535_v60, %v1531_v57 }
 0x2c0   :  { %v929_v16 = vpop.permute.xlu1 %928  ;;  %v1541_v56 = vsel %vm1048_vm5, %v1540_v21, %v1536_v15  ;;  %v938_v62 = vpop.permute.xlu0 %937 }
 0x2c1   :  { %v1545_v2 = vrot.slane %v929_v16, %v11804_v37  ;;  %v1560_v39 = vrot.slane %v938_v62, %v11813_v47 }
 0x2c3   :  { %v1546_v13 = vsel %vm1055_vm6, %v1545_v2, %v1541_v56 }
 0x2c4   :  { %v935_v0 = vpop.permute.xlu1 %934  ;;  %v1551_v3 = vsel %vm1062_vm7, %v1550_v58, %v1546_v13  ;;  %v944_v44 = vpop.permute.xlu0 %943 }
 0x2c5   :  { %v1555_v11 = vrot.slane %v935_v0, %v11810_v46  ;;  %v1570_v59 = vrot.slane %v944_v44, %v11819_v49 }
 0x2c7   :  { %v1556_v7 = vsel %vm1069_vm8, %v1555_v11, %v1551_v3 }
 0x2c8   :  { %v941_v26 = vpop.permute.xlu1 %940  ;;  %v1561_v9 = vsel %vm1076_vm9, %v1560_v39, %v1556_v7  ;;  %v950_v40 = vpop.permute.xlu0 %949 }
 0x2c9   :  { %v1565_v53 = vrot.slane %v941_v26, %v11816_v48  ;;  %v1580_v63 = vrot.slane %v950_v40, %v11825_v51 }
 0x2cb   :  { %v1566_v23 = vsel %vm16218_vm10, %v1565_v53, %v1561_v9 }
 0x2cc   :  { %v947_v41 = vpop.permute.xlu1 %946  ;;  %v1571_v18 = vsel %vm1090_vm11, %v1570_v59, %v1566_v23  ;;  %v956_v12 = vpop.permute.xlu0 %955 }
 0x2cd   :  { %v1575_v8 = vrot.slane %v947_v41, %v11822_v50  ;;  %v1590_v54 = vrot.slane %v956_v12, %v11783_v22  ;;  %v12388_v12 = vsub.s32 1, %v11780_v20 }
 0x2cf   :  { %v1576_v5 = vsel %vm1097_vm12, %v1575_v8, %v1571_v18 }
 0x2d0   :  { %v953_v24 = vpop.permute.xlu1 %952  ;;  %v1581_v1 = vsel %vm1104_vm13, %v1580_v63, %v1576_v5  ;;  %v962_v42 = vpop.permute.xlu0 %961 }
 0x2d1   :  { %v1585_v28 = vrot.slane %v953_v24, %v11828_v52  ;;  %v1599_v27 = vrot.slane %v962_v42, %v11789_v31 }
 0x2d3   :  { %v1586_v45 = vsel %vm1111_vm14, %v1585_v28, %v1581_v1  ;;  %v1686_v28 = vrot.slane %v11873_v43, %v12388_v12 }
 0x2d4   :  { %v1677_v33 = vsel %vm16217_vm15, %v1586_v45, %v1675_v25  ;;  %v959_v10 = vpop.permute.xlu1 %958  ;;  %v968_v29 = vpop.permute.xlu0 %967  ;;  %vm16228_vm15 = vcmask 1045509  }
 0x2d5   :  { %v1594_v57 = vrot.slane %v959_v10, %v11786_v30  ;;  %v1609_v62 = vrot.slane %v968_v29, %v11795_v34 }
 0x2d7   :  { %v1595_v60 = vsel %vm1013_vm0, %v1594_v57, %v1590_v54 }
 0x2d8   :  { %v965_v21 = vpop.permute.xlu1 %964  ;;  %v1600_v15 = vsel %vm1020_vm1, %v1599_v27, %v1595_v60  ;;  %v974_v16 = vpop.permute.xlu0 %973 }
 0x2d9   :  { %v1604_v56 = vrot.slane %v965_v21, %v11792_v32  ;;  %v1619_v3 = vrot.slane %v974_v16, %v11801_v36 }
 0x2db   :  { %v1605_v25 = vsel %vm1027_vm2, %v1604_v56, %v1600_v15 }
 0x2dc   :  { %v971_v2 = vpop.permute.xlu1 %970  ;;  %v1610_v58 = vsel %vm1034_vm3, %v1609_v62, %v1605_v25  ;;  %v980_v13 = vpop.permute.xlu0 %979 }
 0x2dd   :  { %v1614_v0 = vrot.slane %v971_v2, %v11798_v35  ;;  %v1629_v9 = vrot.slane %v980_v13, %v11807_v38 }
 0x2df   :  { %v1615_v44 = vsel %vm1041_vm4, %v1614_v0, %v1610_v58 }
 0x2e0   :  { %v977_v11 = vpop.permute.xlu1 %976  ;;  %v1620_v39 = vsel %vm1048_vm5, %v1619_v3, %v1615_v44  ;;  %v986_v7 = vpop.permute.xlu0 %985 }
 0x2e1   :  { %v1624_v26 = vrot.slane %v977_v11, %v11804_v37  ;;  %v1639_v18 = vrot.slane %v986_v7, %v11813_v47 }
 0x2e3   :  { %v1625_v40 = vsel %vm1055_vm6, %v1624_v26, %v1620_v39 }
 0x2e4   :  { %v983_v53 = vpop.permute.xlu1 %982  ;;  %v1630_v59 = vsel %vm1062_vm7, %v1629_v9, %v1625_v40  ;;  %v992_v23 = vpop.permute.xlu0 %991 }
 0x2e5   :  { %v1634_v41 = vrot.slane %v983_v53, %v11810_v46  ;;  %v1649_v42 = vrot.slane %v992_v23, %v11819_v49 }
 0x2e7   :  { %v1635_v8 = vsel %vm1069_vm8, %v1634_v41, %v1630_v59 }
 0x2e8   :  { %v989_v63 = vpop.permute.xlu1 %988  ;;  %v1640_v5 = vsel %vm1076_vm9, %v1639_v18, %v1635_v8  ;;  %v998_v24 = vpop.permute.xlu0 %997 }
 0x2e9   :  { %v1644_v1 = vrot.slane %v989_v63, %v11816_v48  ;;  %v1659_v60 = vrot.slane %v998_v24, %v11825_v51 }
 0x2eb   :  { %v1645_v45 = vsel %vm16218_vm10, %v1644_v1, %v1640_v5  ;;  %vm16216_vm10 = vcmask 1047559  }
 0x2ec   :  { %v995_v10 = vpop.permute.xlu1 %994  ;;  %v1650_v29 = vsel %vm1090_vm11, %v1649_v42, %v1645_v45  ;;  %v12398_v54 = vpop.permute.xlu0 %1721 }
 0x2ed   :  { %v1654_v57 = vrot.slane %v995_v10, %v11822_v50  ;;  %v1799_v27 = vmul.f32 %v12398_v54, %v1686_v28 }
 0x2ef   :  { %v1655_v21 = vsel %vm1097_vm12, %v1654_v57, %v1650_v29  ;;  %2056 = vperm.xlu0 %11524, %v1799_v27   ;;  %v1690_v29 = vrot.slane %v11899_v6, %v12388_v12 }
 0x2f0   :  { %v1001_v15 = vpop.permute.xlu1 %1000  ;;  %v1660_v16 = vsel %vm1104_vm13, %v1659_v60, %v1655_v21  ;;  %v12405_v56 = vpop.permute.xlu0 %1729 }
 0x2f1   :  { %v1664_v62 = vrot.slane %v1001_v15, %v11828_v52  ;;  %v1801_v25 = vmul.f32 %v12405_v56, %v1686_v28  ;;  %v1815_v60 = vmul.f32 %v12398_v54, %v1690_v29 }
 0x2f3   :  { %v1665_v2 = vsel %vm1111_vm14, %v1664_v62, %v1660_v16  ;;  %2062 = vperm.xlu0 %11524, %v1801_v25   ;;  %v1817_v16 = vmul.f32 %v12405_v56, %v1690_v29 }
 0x2f4   :  { %v12411_v58 = vsel %vm16216_vm10, %v1665_v2, %v1677_v33  ;;  %v12413_v13 = vpop.permute.xlu1 %1725  ;;  %v12415_v0 = vpop.permute.xlu0 %1737  ;;  %vm16219_vm10 = vcmask 786112  }
 0x2f5   :  { %v1800_v3 = vmul.f32 %v12413_v13, %v1686_v28  ;;  %v1803_v44 = vmul.f32 %v12415_v0, %v1686_v28  ;;  %v1816_v62 = vmul.f32 %v12413_v13, %v1690_v29  ;;  %v1819_v25 = vmul.f32 %v12415_v0, %v1690_v29 }
 0x2f7   :  { %2059 = vperm.xlu1 %11523, %v1800_v3   ;;  %2068 = vperm.xlu0 %11524, %v1803_v44  }
 0x2f8   :  { %v12419_v11 = vpop.permute.xlu1 %1733  ;;  %v12421_v39 = vpop.permute.xlu0 %1745 }
 0x2f9   :  { %v1802_v7 = vmul.f32 %v12419_v11, %v1686_v28  ;;  %v1805_v26 = vmul.f32 %v12421_v39, %v1686_v28  ;;  %v1818_v2 = vmul.f32 %v12419_v11, %v1690_v29  ;;  %v1821_v3 = vmul.f32 %v12421_v39, %v1690_v29 }
 0x2fb   :  { %2065 = vperm.xlu1 %11523, %v1802_v7   ;;  %2074 = vperm.xlu0 %11524, %v1805_v26  }
 0x2fc   :  { %v12425_v33 = vpop.permute.xlu1 %1741  ;;  %v12427_v9 = vpop.permute.xlu0 %1753 }
 0x2fd   :  { %v1804_v40 = vmul.f32 %v12425_v33, %v1686_v28  ;;  %v1807_v53 = vmul.f32 %v12427_v9, %v1686_v28  ;;  %v1820_v44 = vmul.f32 %v12425_v33, %v1690_v29 }
 0x2ff   :  { %2071 = vperm.xlu1 %11523, %v1804_v40   ;;  %2080 = vperm.xlu0 %11524, %v1807_v53  }
 0x300   :  { %v12431_v59 = vpop.permute.xlu1 %1749  ;;  %v12433_v23 = vpop.permute.xlu0 %1761 }
 0x301   :  { %v1806_v41 = vmul.f32 %v12431_v59, %v1686_v28  ;;  %v1809_v18 = vmul.f32 %v12433_v23, %v1686_v28  ;;  %v1822_v7 = vmul.f32 %v12431_v59, %v1690_v29  ;;  %v1825_v26 = vmul.f32 %v12433_v23, %v1690_v29 }
 0x303   :  { %2077 = vperm.xlu1 %11523, %v1806_v41   ;;  %2086 = vperm.xlu0 %11524, %v1809_v18  }
 0x304   :  { %v12437_v8 = vpop.permute.xlu1 %1757  ;;  %v12439_v63 = vpop.permute.xlu0 %1769 }
 0x305   :  { %v1808_v5 = vmul.f32 %v12437_v8, %v1686_v28  ;;  %v1811_v24 = vmul.f32 %v12439_v63, %v1686_v28  ;;  %v1824_v40 = vmul.f32 %v12437_v8, %v1690_v29  ;;  %v1827_v53 = vmul.f32 %v12439_v63, %v1690_v29 }
 0x307   :  { %2083 = vperm.xlu1 %11523, %v1808_v5   ;;  %2092 = vperm.xlu0 %11524, %v1811_v24   ;;  %v1694_v5 = vrot.slane %v11919_v55, %v12388_v12 }
 0x308   :  { %v12443_v1 = vpop.permute.xlu1 %1765  ;;  %v12445_v42 = vpop.permute.xlu0 %1777 }
 0x309   :  { %v1810_v45 = vmul.f32 %v12443_v1, %v1686_v28  ;;  %v1813_v10 = vmul.f32 %v12445_v42, %v1686_v28  ;;  %v1826_v41 = vmul.f32 %v12443_v1, %v1690_v29  ;;  %v1829_v18 = vmul.f32 %v12445_v42, %v1690_v29 }
 0x30b   :  { %2089 = vperm.xlu1 %11523, %v1810_v45   ;;  %2098 = vperm.xlu0 %11524, %v1813_v10   ;;  %v1831_v45 = vmul.f32 %v12398_v54, %v1694_v5 }
 0x30c   :  { %v12451_v57 = vpop.permute.xlu1 %1773 }
 0x30d   :  { %v1812_v27 = vmul.f32 %v12451_v57, %v1686_v28  ;;  %v1828_v24 = vmul.f32 %v12451_v57, %v1690_v29 }
 0x30f   :  { %2095 = vperm.xlu1 %11523, %v1812_v27   ;;  %2104 = vperm.xlu0 %11524, %v1815_v60   ;;  %v1833_v27 = vmul.f32 %v12405_v56, %v1694_v5  ;;  %v1832_v60 = vmul.f32 %v12413_v13, %v1694_v5 }
 0x310   :  { %v12455_v21 = vpop.permute.xlu1 %1781 }
 0x311   :  { %v1814_v15 = vmul.f32 %v12455_v21, %v1686_v28  ;;  %v1823_v28 = vmul.f32 %v12427_v9, %v1690_v29  ;;  %v1830_v10 = vmul.f32 %v12455_v21, %v1690_v29  ;;  %v1839_v29 = vmul.f32 %v12427_v9, %v1694_v5 }
 0x313   :  { %2101 = vperm.xlu1 %11523, %v1814_v15   ;;  %2110 = vperm.xlu0 %11524, %v1817_v16   ;;  %v1835_v15 = vmul.f32 %v12415_v0, %v1694_v5  ;;  %v1834_v16 = vmul.f32 %v12419_v11, %v1694_v5 }
 0x317   :  { %2107 = vperm.xlu1 %11523, %v1816_v62   ;;  %2116 = vperm.xlu0 %11524, %v1819_v25   ;;  %v1837_v62 = vmul.f32 %v12421_v39, %v1694_v5  ;;  %v1836_v25 = vmul.f32 %v12425_v33, %v1694_v5 }
 0x31b   :  { %2113 = vperm.xlu1 %11523, %v1818_v2   ;;  %2122 = vperm.xlu0 %11524, %v1821_v3   ;;  %v1838_v2 = vmul.f32 %v12431_v59, %v1694_v5  ;;  %v1841_v3 = vmul.f32 %v12433_v23, %v1694_v5 }
 0x31f   :  { %2119 = vperm.xlu1 %11523, %v1820_v44   ;;  %2128 = vperm.xlu0 %11524, %v1823_v28   ;;  %v1840_v44 = vmul.f32 %v12437_v8, %v1694_v5  ;;  %v1843_v28 = vmul.f32 %v12439_v63, %v1694_v5 }
 0x323   :  { %2125 = vperm.xlu1 %11523, %v1822_v7   ;;  %2134 = vperm.xlu0 %11524, %v1825_v26   ;;  %v1842_v7 = vmul.f32 %v12443_v1, %v1694_v5  ;;  %v1845_v26 = vmul.f32 %v12445_v42, %v1694_v5 }
 0x327   :  { %2131 = vperm.xlu1 %11523, %v1824_v40   ;;  %2140 = vperm.xlu0 %11524, %v1827_v53   ;;  %v1698_v40 = vrot.slane %v11955_v61, %v12388_v12  ;;  %v1844_v53 = vmul.f32 %v12451_v57, %v1694_v5 }
 0x32b   :  { %2137 = vperm.xlu1 %11523, %v1826_v41   ;;  %2146 = vperm.xlu0 %11524, %v1829_v18   ;;  %v1847_v41 = vmul.f32 %v12398_v54, %v1698_v40  ;;  %v1846_v18 = vmul.f32 %v12455_v21, %v1694_v5  ;;  %v1855_v5 = vmul.f32 %v12427_v9, %v1698_v40 }
 0x32f   :  { %2143 = vperm.xlu1 %11523, %v1828_v24   ;;  %2152 = vperm.xlu0 %11524, %v1831_v45   ;;  %v1849_v24 = vmul.f32 %v12405_v56, %v1698_v40  ;;  %v1848_v45 = vmul.f32 %v12413_v13, %v1698_v40 }
 0x333   :  { %2149 = vperm.xlu1 %11523, %v1830_v10   ;;  %2158 = vperm.xlu0 %11524, %v1833_v27   ;;  %v1851_v10 = vmul.f32 %v12415_v0, %v1698_v40  ;;  %v1850_v27 = vmul.f32 %v12419_v11, %v1698_v40 }
 0x337   :  { %2155 = vperm.xlu1 %11523, %v1832_v60   ;;  %2164 = vperm.xlu0 %11524, %v1835_v15   ;;  %v1853_v60 = vmul.f32 %v12421_v39, %v1698_v40  ;;  %v1852_v15 = vmul.f32 %v12425_v33, %v1698_v40 }
 0x33b   :  { %2161 = vperm.xlu1 %11523, %v1834_v16   ;;  %2170 = vperm.xlu0 %11524, %v1837_v62   ;;  %v1854_v16 = vmul.f32 %v12431_v59, %v1698_v40  ;;  %v1857_v62 = vmul.f32 %v12433_v23, %v1698_v40 }
 0x33f   :  { %2167 = vperm.xlu1 %11523, %v1836_v25   ;;  %2176 = vperm.xlu0 %11524, %v1839_v29   ;;  %v1856_v25 = vmul.f32 %v12437_v8, %v1698_v40  ;;  %v1859_v29 = vmul.f32 %v12439_v63, %v1698_v40 }
 0x343   :  { %2173 = vperm.xlu1 %11523, %v1838_v2   ;;  %2182 = vperm.xlu0 %11524, %v1841_v3   ;;  %v1858_v2 = vmul.f32 %v12443_v1, %v1698_v40  ;;  %v1861_v3 = vmul.f32 %v12445_v42, %v1698_v40 }
 0x347   :  { %2179 = vperm.xlu1 %11523, %v1840_v44   ;;  %2188 = vperm.xlu0 %11524, %v1843_v28   ;;  %v12509_v44 = vrot.slane %v11939_v19, %v12388_v12  ;;  %v1860_v28 = vmul.f32 %v12451_v57, %v1698_v40 }
 0x34b   :  { %2185 = vperm.xlu1 %11523, %v1842_v7   ;;  %2194 = vperm.xlu0 %11524, %v1845_v26   ;;  %v1863_v7 = vmul.f32 %v12398_v54, %v12509_v44 }
 0x34f   :  { %2191 = vperm.xlu1 %11523, %v1844_v53   ;;  %2200 = vperm.xlu0 %11524, %v1847_v41   ;;  %v1862_v53 = vmul.f32 %v12455_v21, %v1698_v40  ;;  %v1865_v41 = vmul.f32 %v12405_v56, %v12509_v44 }
 0x353   :  { %2197 = vperm.xlu1 %11523, %v1846_v18   ;;  %2206 = vperm.xlu0 %11524, %v1849_v24   ;;  %v1864_v24 = vmul.f32 %v12413_v13, %v12509_v44 }
 0x357   :  { %2203 = vperm.xlu1 %11523, %v1848_v45   ;;  %2212 = vperm.xlu0 %11524, %v1851_v10   ;;  %v1867_v45 = vmul.f32 %v12415_v0, %v12509_v44 }
 0x35b   :  { %2209 = vperm.xlu1 %11523, %v1850_v27   ;;  %2218 = vperm.xlu0 %11524, %v1853_v60  }
 0x35f   :  { %2215 = vperm.xlu1 %11523, %v1852_v15   ;;  %2224 = vperm.xlu0 %11524, %v1855_v5  }
 0x363   :  { %2221 = vperm.xlu1 %11523, %v1854_v16   ;;  %2230 = vperm.xlu0 %11524, %v1857_v62   ;;  %v1866_v16 = vmul.f32 %v12419_v11, %v12509_v44  ;;  %v1869_v62 = vmul.f32 %v12421_v39, %v12509_v44 }
 0x367   :  { %2227 = vperm.xlu1 %11523, %v1856_v25   ;;  %2236 = vperm.xlu0 %11524, %v1859_v29  }
 0x36b   :  { %2233 = vperm.xlu1 %11523, %v1858_v2   ;;  %2242 = vperm.xlu0 %11524, %v1861_v3  }
 0x36e   :  { %v2057_v26 = vpop.permute.xlu0 %2056 }
 0x36f   :  { %2239 = vperm.xlu1 %11523, %v1860_v28   ;;  %2248 = vperm.xlu0 %11524, %v1863_v7   ;;  %v2442_v60 = vrot.slane %v2057_v26, %v11783_v22  ;;  %v1868_v26 = vmul.f32 %v12425_v33, %v12509_v44 }
 0x372   :  { %v2063_v18 = vpop.permute.xlu0 %2062 }
 0x373   :  { %2245 = vperm.xlu1 %11523, %v1862_v53   ;;  %2254 = vperm.xlu0 %11524, %v1865_v41   ;;  %v2451_v40 = vrot.slane %v2063_v18, %v11789_v31  ;;  %v1871_v53 = vmul.f32 %v12427_v9, %v12509_v44 }
 0x376   :  { %v2060_v10 = vpop.permute.xlu1 %2059  ;;  %v2069_v27 = vpop.permute.xlu0 %2068 }
 0x377   :  { %v2446_v15 = vrot.slane %v2060_v10, %v11786_v30  ;;  %2251 = vperm.xlu1 %11523, %v1864_v24   ;;  %2260 = vperm.xlu0 %11524, %v1867_v45   ;;  %v2461_v28 = vrot.slane %v2069_v27, %v11795_v34 }
 0x379   :  { %v2447_v5 = vsel %vm1013_vm0, %v2446_v15, %v2442_v60  ;;  %v1870_v60 = vmul.f32 %v12431_v59, %v12509_v44  ;;  %v1873_v15 = vmul.f32 %v12433_v23, %v12509_v44 }
 0x37a   :  { %v2066_v25 = vpop.permute.xlu1 %2065  ;;  %v2452_v29 = vsel %vm1020_vm1, %v2451_v40, %v2447_v5  ;;  %v2075_v2 = vpop.permute.xlu0 %2074 }
 0x37b   :  { %v2456_v3 = vrot.slane %v2066_v25, %v11792_v32  ;;  %2257 = vperm.xlu1 %11523, %v1866_v16   ;;  %2266 = vperm.xlu0 %11524, %v1869_v62   ;;  %v2471_v10 = vrot.slane %v2075_v2, %v11801_v36  ;;  %v1872_v2 = vmul.f32 %v12437_v8, %v12509_v44 }
 0x37d   :  { %v2457_v7 = vsel %vm1027_vm2, %v2456_v3, %v2452_v29  ;;  %v1875_v3 = vmul.f32 %v12439_v63, %v12509_v44 }
 0x37e   :  { %v2072_v41 = vpop.permute.xlu1 %2071  ;;  %v2462_v18 = vsel %vm1034_vm3, %v2461_v28, %v2457_v7  ;;  %v2081_v24 = vpop.permute.xlu0 %2080 }
 0x37f   :  { %v2466_v45 = vrot.slane %v2072_v41, %v11798_v35  ;;  %2263 = vperm.xlu1 %11523, %v1868_v26   ;;  %2272 = vperm.xlu0 %11524, %v1871_v53   ;;  %v2481_v25 = vrot.slane %v2081_v24, %v11807_v38  ;;  %v1874_v24 = vmul.f32 %v12443_v1, %v12509_v44 }
 0x381   :  { %v2467_v27 = vsel %vm1041_vm4, %v2466_v45, %v2462_v18  ;;  %v1877_v45 = vmul.f32 %v12445_v42, %v12509_v44 }
 0x382   :  { %v2078_v40 = vpop.permute.xlu1 %2077  ;;  %v2472_v5 = vsel %vm1048_vm5, %v2471_v10, %v2467_v27  ;;  %v2087_v16 = vpop.permute.xlu0 %2086 }
 0x383   :  { %v2476_v62 = vrot.slane %v2078_v40, %v11804_v37  ;;  %2269 = vperm.xlu1 %11523, %v1870_v60   ;;  %2278 = vperm.xlu0 %11524, %v1873_v15   ;;  %v2491_v41 = vrot.slane %v2087_v16, %v11813_v47  ;;  %v12564_v15 = vrot.slane %v11961_v4, %v12388_v12 }
 0x385   :  { %v2477_v29 = vsel %vm1055_vm6, %v2476_v62, %v2472_v5  ;;  %v1876_v62 = vmul.f32 %v12451_v57, %v12509_v44 }
 0x386   :  { %v2084_v28 = vpop.permute.xlu1 %2083  ;;  %v2482_v7 = vsel %vm1062_vm7, %v2481_v25, %v2477_v29  ;;  %v2093_v26 = vpop.permute.xlu0 %2092  ;;  %v1879_v25 = vmul.f32 %v12398_v54, %v12564_v15 }
 0x387   :  { %v2486_v53 = vrot.slane %v2084_v28, %v11810_v46  ;;  %2275 = vperm.xlu1 %11523, %v1872_v2   ;;  %2284 = vperm.xlu0 %11524, %v1875_v3   ;;  %v2501_v5 = vrot.slane %v2093_v26, %v11819_v49 }
 0x389   :  { %v2487_v18 = vsel %vm1069_vm8, %v2486_v53, %v2482_v7  ;;  %v1878_v53 = vmul.f32 %v12455_v21, %v12509_v44  ;;  %v1883_v44 = vmul.f32 %v12415_v0, %v12564_v15 }
 0x38a   :  { %v2090_v10 = vpop.permute.xlu1 %2089  ;;  %v2492_v27 = vsel %vm1076_vm9, %v2491_v41, %v2487_v18  ;;  %v2099_v60 = vpop.permute.xlu0 %2098  ;;  %v1881_v41 = vmul.f32 %v12405_v56, %v12564_v15 }
 0x38b   :  { %v2496_v40 = vrot.slane %v2090_v10, %v11816_v48  ;;  %2281 = vperm.xlu1 %11523, %v1874_v24   ;;  %2290 = vperm.xlu0 %11524, %v1877_v45   ;;  %v2511_v7 = vrot.slane %v2099_v60, %v11825_v51  ;;  %v1880_v60 = vmul.f32 %v12413_v13, %v12564_v15 }
 0x38d   :  { %v2497_v16 = vsel %vm16219_vm10, %v2496_v40, %v2492_v27 }
 0x38e   :  { %v2096_v29 = vpop.permute.xlu1 %2095  ;;  %v2502_v2 = vsel %vm1090_vm11, %v2501_v5, %v2497_v16  ;;  %v2105_v3 = vpop.permute.xlu0 %2104 }
 0x38f   :  { %v2506_v28 = vrot.slane %v2096_v29, %v11822_v50  ;;  %2287 = vperm.xlu1 %11523, %v1876_v62   ;;  %2296 = vperm.xlu0 %11524, %v1879_v25   ;;  %v2521_v16 = vrot.slane %v2105_v3, %v11783_v22 }
 0x391   :  { %v2507_v26 = vsel %vm1097_vm12, %v2506_v28, %v2502_v2  ;;  %v1882_v2 = vmul.f32 %v12419_v11, %v12564_v15  ;;  %v1885_v28 = vmul.f32 %v12421_v39, %v12564_v15 }
 0x392   :  { %v2102_v18 = vpop.permute.xlu1 %2101  ;;  %v2512_v24 = vsel %vm1104_vm13, %v2511_v7, %v2507_v26  ;;  %v2111_v45 = vpop.permute.xlu0 %2110 }
 0x393   :  { %v2516_v10 = vrot.slane %v2102_v18, %v11828_v52  ;;  %2293 = vperm.xlu1 %11523, %v1878_v53   ;;  %2302 = vperm.xlu0 %11524, %v1881_v41   ;;  %v2530_v25 = vrot.slane %v2111_v45, %v11789_v31  ;;  %v1887_v45 = vmul.f32 %v12427_v9, %v12564_v15 }
 0x395   :  { %v12584_v27 = vsel %vm1111_vm14, %v2516_v10, %v2512_v24  ;;  %v1884_v24 = vmul.f32 %v12425_v33, %v12564_v15 }
 0x396   :  { %v2108_v40 = vpop.permute.xlu1 %2107  ;;  %v2117_v5 = vpop.permute.xlu0 %2116 }
 0x397   :  { %v2525_v62 = vrot.slane %v2108_v40, %v11786_v30  ;;  %2299 = vperm.xlu1 %11523, %v1880_v60   ;;  %2308 = vperm.xlu0 %11524, %v1883_v44   ;;  %v2540_v41 = vrot.slane %v2117_v5, %v11795_v34 }
 0x399   :  { %v2526_v29 = vsel %vm1013_vm0, %v2525_v62, %v2521_v16  ;;  %v1886_v62 = vmul.f32 %v12431_v59, %v12564_v15 }
 0x39a   :  { %v2114_v7 = vpop.permute.xlu1 %2113  ;;  %v2531_v26 = vsel %vm1020_vm1, %v2530_v25, %v2526_v29  ;;  %v2123_v53 = vpop.permute.xlu0 %2122  ;;  %v1889_v25 = vmul.f32 %v12433_v23, %v12564_v15 }
 0x39b   :  { %v2535_v3 = vrot.slane %v2114_v7, %v11792_v32  ;;  %2305 = vperm.xlu1 %11523, %v1882_v2   ;;  %2314 = vperm.xlu0 %11524, %v1885_v28   ;;  %v2550_v16 = vrot.slane %v2123_v53, %v11801_v36 }
 0x39d   :  { %v2536_v18 = vsel %vm1027_vm2, %v2535_v3, %v2531_v26  ;;  %v1888_v3 = vmul.f32 %v12437_v8, %v12564_v15 }
 0x39e   :  { %v2120_v10 = vpop.permute.xlu1 %2119  ;;  %v2541_v60 = vsel %vm1034_vm3, %v2540_v41, %v2536_v18  ;;  %v2129_v44 = vpop.permute.xlu0 %2128  ;;  %v1891_v41 = vmul.f32 %v12439_v63, %v12564_v15 }
 0x39f   :  { %v2545_v40 = vrot.slane %v2120_v10, %v11798_v35  ;;  %2311 = vperm.xlu1 %11523, %v1884_v24   ;;  %2320 = vperm.xlu0 %11524, %v1887_v45   ;;  %v2560_v26 = vrot.slane %v2129_v44, %v11807_v38 }
 0x3a1   :  { %v2546_v5 = vsel %vm1041_vm4, %v2545_v40, %v2541_v60  ;;  %v1890_v40 = vmul.f32 %v12443_v1, %v12564_v15 }
 0x3a2   :  { %v2126_v29 = vpop.permute.xlu1 %2125  ;;  %v2551_v2 = vsel %vm1048_vm5, %v2550_v16, %v2546_v5  ;;  %v2135_v28 = vpop.permute.xlu0 %2134  ;;  %v1893_v16 = vmul.f32 %v12445_v42, %v12564_v15 }
 0x3a3   :  { %v2555_v7 = vrot.slane %v2126_v29, %v11804_v37  ;;  %2317 = vperm.xlu1 %11523, %v1886_v62   ;;  %2326 = vperm.xlu0 %11524, %v1889_v25   ;;  %v2570_v60 = vrot.slane %v2135_v28, %v11813_v47  ;;  %v12633_v29 = vrot.slane %v11969_v14, %v12388_v12 }
 0x3a5   :  { %v2556_v53 = vsel %vm1055_vm6, %v2555_v7, %v2551_v2 }
 0x3a6   :  { %v2132_v18 = vpop.permute.xlu1 %2131  ;;  %v2561_v24 = vsel %vm1062_vm7, %v2560_v26, %v2556_v53  ;;  %v2141_v45 = vpop.permute.xlu0 %2140  ;;  %v1892_v26 = vmul.f32 %v12451_v57, %v12564_v15  ;;  %v1895_v53 = vmul.f32 %v12398_v54, %v12633_v29 }
 0x3a7   :  { %v2565_v10 = vrot.slane %v2132_v18, %v11810_v46  ;;  %2323 = vperm.xlu1 %11523, %v1888_v3   ;;  %2332 = vperm.xlu0 %11524, %v1891_v41   ;;  %v2580_v28 = vrot.slane %v2141_v45, %v11819_v49 }
 0x3a9   :  { %v2566_v44 = vsel %vm1069_vm8, %v2565_v10, %v2561_v24 }
 0x3aa   :  { %v2138_v5 = vpop.permute.xlu1 %2137  ;;  %v2571_v62 = vsel %vm1076_vm9, %v2570_v60, %v2566_v44  ;;  %v2147_v25 = vpop.permute.xlu0 %2146  ;;  %v1894_v60 = vmul.f32 %v12455_v21, %v12564_v15  ;;  %v1897_v44 = vmul.f32 %v12405_v56, %v12633_v29 }
 0x3ab   :  { %v2575_v2 = vrot.slane %v2138_v5, %v11816_v48  ;;  %2329 = vperm.xlu1 %11523, %v1890_v40   ;;  %2338 = vperm.xlu0 %11524, %v1893_v16   ;;  %v2590_v10 = vrot.slane %v2147_v25, %v11825_v51  ;;  %v1896_v25 = vmul.f32 %v12413_v13, %v12633_v29 }
 0x3ad   :  { %v2576_v7 = vsel %vm16219_vm10, %v2575_v2, %v2571_v62  ;;  %vm16220_vm10 = vcmask 1041409  }
 0x3ae   :  { %v2144_v3 = vpop.permute.xlu1 %2143  ;;  %v2581_v41 = vsel %vm1090_vm11, %v2580_v28, %v2576_v7  ;;  %v2153_v18 = vpop.permute.xlu0 %2152  ;;  %v1899_v28 = vmul.f32 %v12415_v0, %v12633_v29 }
 0x3af   :  { %v2585_v24 = vrot.slane %v2144_v3, %v11822_v50  ;;  %2335 = vperm.xlu1 %11523, %v1892_v26   ;;  %2344 = vperm.xlu0 %11524, %v1895_v53   ;;  %v2600_v53 = vrot.slane %v2153_v18, %v11783_v22 }
 0x3b1   :  { %v2586_v45 = vsel %vm1097_vm12, %v2585_v24, %v2581_v41 }
 0x3b2   :  { %v2150_v40 = vpop.permute.xlu1 %2149  ;;  %v2591_v16 = vsel %vm1104_vm13, %v2590_v10, %v2586_v45  ;;  %v2159_v5 = vpop.permute.xlu0 %2158  ;;  %v1898_v10 = vmul.f32 %v12419_v11, %v12633_v29  ;;  %v1901_v45 = vmul.f32 %v12421_v39, %v12633_v29 }
 0x3b3   :  { %v2595_v62 = vrot.slane %v2150_v40, %v11828_v52  ;;  %2341 = vperm.xlu1 %11523, %v1894_v60   ;;  %2350 = vperm.xlu0 %11524, %v1897_v44   ;;  %v2609_v41 = vrot.slane %v2159_v5, %v11789_v31  ;;  %v1900_v5 = vmul.f32 %v12425_v33, %v12633_v29 }
 0x3b5   :  { %v2596_v2 = vsel %vm1111_vm14, %v2595_v62, %v2591_v16  ;;  %v1903_v62 = vmul.f32 %v12427_v9, %v12633_v29 }
 0x3b6   :  { %v12659_v15 = vsel %vm16220_vm10, %v2596_v2, %v12584_v27  ;;  %v2156_v7 = vpop.permute.xlu1 %2155  ;;  %v2165_v26 = vpop.permute.xlu0 %2164  ;;  %vm16221_vm10 = vcmask 786112  }
 0x3b7   :  { %v2604_v3 = vrot.slane %v2156_v7, %v11786_v30  ;;  %2347 = vperm.xlu1 %11523, %v1896_v25   ;;  %2356 = vperm.xlu0 %11524, %v1899_v28   ;;  %v2619_v40 = vrot.slane %v2165_v26, %v11795_v34 }
 0x3b9   :  { %v2605_v24 = vsel %vm1013_vm0, %v2604_v3, %v2600_v53  ;;  %v1902_v3 = vmul.f32 %v12431_v59, %v12633_v29 }
 0x3ba   :  { %v2162_v27 = vpop.permute.xlu1 %2161  ;;  %v2610_v60 = vsel %vm1020_vm1, %v2609_v41, %v2605_v24  ;;  %v2171_v44 = vpop.permute.xlu0 %2170  ;;  %v1905_v41 = vmul.f32 %v12433_v23, %v12633_v29 }
 0x3bb   :  { %v2614_v18 = vrot.slane %v2162_v27, %v11792_v32  ;;  %2353 = vperm.xlu1 %11523, %v1898_v10   ;;  %2362 = vperm.xlu0 %11524, %v1901_v45   ;;  %v2629_v53 = vrot.slane %v2171_v44, %v11801_v36 }
 0x3bd   :  { %v2615_v16 = vsel %vm1027_vm2, %v2614_v18, %v2610_v60  ;;  %v1904_v18 = vmul.f32 %v12437_v8, %v12633_v29 }
 0x3be   :  { %v2168_v2 = vpop.permute.xlu1 %2167  ;;  %v2620_v25 = vsel %vm1034_vm3, %v2619_v40, %v2615_v16  ;;  %v2177_v28 = vpop.permute.xlu0 %2176  ;;  %v1907_v40 = vmul.f32 %v12439_v63, %v12633_v29 }
 0x3bf   :  { %v2624_v7 = vrot.slane %v2168_v2, %v11798_v35  ;;  %2359 = vperm.xlu1 %11523, %v1900_v5   ;;  %2368 = vperm.xlu0 %11524, %v1903_v62   ;;  %v2639_v60 = vrot.slane %v2177_v28, %v11807_v38 }
 0x3c1   :  { %v2625_v26 = vsel %vm1041_vm4, %v2624_v7, %v2620_v25  ;;  %v1906_v7 = vmul.f32 %v12443_v1, %v12633_v29 }
 0x3c2   :  { %v2174_v24 = vpop.permute.xlu1 %2173  ;;  %v2630_v10 = vsel %vm1048_vm5, %v2629_v53, %v2625_v26  ;;  %v2183_v45 = vpop.permute.xlu0 %2182  ;;  %v1909_v53 = vmul.f32 %v12445_v42, %v12633_v29 }
 0x3c3   :  { %v2634_v27 = vrot.slane %v2174_v24, %v11804_v37  ;;  %2365 = vperm.xlu1 %11523, %v1902_v3   ;;  %2374 = vperm.xlu0 %11524, %v1905_v41   ;;  %v2649_v25 = vrot.slane %v2183_v45, %v11813_v47  ;;  %v12704_v24 = vrot.slane %v11971_v17, %v12388_v12 }
 0x3c5   :  { %v2635_v44 = vsel %vm1055_vm6, %v2634_v27, %v2630_v10 }
 0x3c6   :  { %v2180_v16 = vpop.permute.xlu1 %2179  ;;  %v2640_v5 = vsel %vm1062_vm7, %v2639_v60, %v2635_v44  ;;  %v2189_v62 = vpop.permute.xlu0 %2188  ;;  %v1908_v60 = vmul.f32 %v12451_v57, %v12633_v29  ;;  %v1911_v44 = vmul.f32 %v12398_v54, %v12704_v24 }
 0x3c7   :  { %v2644_v2 = vrot.slane %v2180_v16, %v11810_v46  ;;  %2371 = vperm.xlu1 %11523, %v1904_v18   ;;  %2380 = vperm.xlu0 %11524, %v1907_v40   ;;  %v2659_v45 = vrot.slane %v2189_v62, %v11819_v49 }
 0x3c9   :  { %v2645_v28 = vsel %vm1069_vm8, %v2644_v2, %v2640_v5  ;;  %v1910_v2 = vmul.f32 %v12455_v21, %v12633_v29 }
 0x3ca   :  { %v2186_v26 = vpop.permute.xlu1 %2185  ;;  %v2650_v3 = vsel %vm1076_vm9, %v2649_v25, %v2645_v28  ;;  %v2195_v41 = vpop.permute.xlu0 %2194  ;;  %v1913_v25 = vmul.f32 %v12405_v56, %v12704_v24 }
 0x3cb   :  { %v2654_v10 = vrot.slane %v2186_v26, %v11816_v48  ;;  %2377 = vperm.xlu1 %11523, %v1906_v7   ;;  %2386 = vperm.xlu0 %11524, %v1909_v53   ;;  %v2669_v5 = vrot.slane %v2195_v41, %v11825_v51  ;;  %v1915_v41 = vmul.f32 %v12415_v0, %v12704_v24 }
 0x3cc   :  { %v1917_v0 = vmul.f32 %v12421_v39, %v12704_v24 }
 0x3cd   :  { %v2655_v27 = vsel %vm16221_vm10, %v2654_v10, %v2650_v3  ;;  %v1912_v3 = vmul.f32 %v12413_v13, %v12704_v24  ;;  %vm16222_vm10 = vcmask 1042434   ;;  %v1914_v13 = vmul.f32 %v12419_v11, %v12704_v24 }
 0x3ce   :  { %v2192_v18 = vpop.permute.xlu1 %2191  ;;  %v2660_v40 = vsel %vm1090_vm11, %v2659_v45, %v2655_v27  ;;  %v2201_v16 = vpop.permute.xlu0 %2200  ;;  %v1919_v11 = vmul.f32 %v12427_v9, %v12704_v24 }
 0x3cf   :  { %v2664_v12 = vrot.slane %v2192_v18, %v11822_v50  ;;  %2383 = vperm.xlu1 %11523, %v1908_v60   ;;  %2392 = vperm.xlu0 %11524, %v1911_v44   ;;  %v2679_v45 = vrot.slane %v2201_v16, %v11783_v22 }
 0x3d1   :  { %v2665_v62 = vsel %vm1097_vm12, %v2664_v12, %v2660_v40 }
 0x3d2   :  { %v2198_v28 = vpop.permute.xlu1 %2197  ;;  %v2670_v54 = vsel %vm1104_vm13, %v2669_v5, %v2665_v62  ;;  %v2207_v7 = vpop.permute.xlu0 %2206  ;;  %v1916_v62 = vmul.f32 %v12425_v33, %v12704_v24  ;;  %v1921_v33 = vmul.f32 %v12433_v23, %v12704_v24 }
 0x3d3   :  { %v2674_v53 = vrot.slane %v2198_v28, %v11828_v52  ;;  %2389 = vperm.xlu1 %11523, %v1910_v2   ;;  %2398 = vperm.xlu0 %11524, %v1913_v25   ;;  %v2688_v60 = vrot.slane %v2207_v7, %v11789_v31 }
 0x3d5   :  { %v2675_v26 = vsel %vm1111_vm14, %v2674_v53, %v2670_v54  ;;  %v1918_v53 = vmul.f32 %v12431_v59, %v12704_v24  ;;  %v1923_v59 = vmul.f32 %v12439_v63, %v12704_v24 }
 0x3d6   :  { %v12730_v29 = vsel %vm16222_vm10, %v2675_v26, %v12659_v15  ;;  %v2204_v56 = vpop.permute.xlu1 %2203  ;;  %v2213_v10 = vpop.permute.xlu0 %2212  ;;  %vm16223_vm10 = vcmask 786112  }
 0x3d7   :  { %v2683_v27 = vrot.slane %v2204_v56, %v11786_v30  ;;  %2395 = vperm.xlu1 %11523, %v1912_v3   ;;  %2404 = vperm.xlu0 %11524, %v1915_v41   ;;  %v2698_v12 = vrot.slane %v2213_v10, %v11795_v34 }
 0x3d9   :  { %v2684_v44 = vsel %vm1013_vm0, %v2683_v27, %v2679_v45  ;;  %v1920_v45 = vmul.f32 %v12437_v8, %v12704_v24  ;;  %v1925_v8 = vmul.f32 %v12445_v42, %v12704_v24 }
 0x3da   :  { %v2210_v15 = vpop.permute.xlu1 %2209  ;;  %v2689_v18 = vsel %vm1020_vm1, %v2688_v60, %v2684_v44  ;;  %v2219_v40 = vpop.permute.xlu0 %2218 }
 0x3db   :  { %v2693_v16 = vrot.slane %v2210_v15, %v11792_v32  ;;  %2401 = vperm.xlu1 %11523, %v1914_v13   ;;  %2410 = vperm.xlu0 %11524, %v1917_v0   ;;  %v2708_v54 = vrot.slane %v2219_v40, %v11801_v36  ;;  %v1922_v15 = vmul.f32 %v12443_v1, %v12704_v24 }
 0x3dc   :  { %v1924_v1 = vmul.f32 %v12451_v57, %v12704_v24 }
 0x3dd   :  { %v2694_v5 = vsel %vm1027_vm2, %v2693_v16, %v2689_v18 }
 0x3de   :  { %v2216_v2 = vpop.permute.xlu1 %2215  ;;  %v2699_v39 = vsel %vm1034_vm3, %v2698_v12, %v2694_v5  ;;  %v2225_v25 = vpop.permute.xlu0 %2224  ;;  %v12775_v5 = vld [vmem:[#allocation7 + $0x2] ss:$0 sm:$0xff] }
 0x3df   :  { %v2703_v28 = vrot.slane %v2216_v2, %v11798_v35  ;;  %2407 = vperm.xlu1 %11523, %v1916_v62   ;;  %2416 = vperm.xlu0 %11524, %v1919_v11   ;;  %v2718_v56 = vrot.slane %v2225_v25, %v11807_v38 }
 0x3e1   :  { %v2704_v7 = vsel %vm1041_vm4, %v2703_v28, %v2699_v39 }
 0x3e2   :  { %v2222_v26 = vpop.permute.xlu1 %2221  ;;  %v2709_v9 = vsel %vm1048_vm5, %v2708_v54, %v2704_v7  ;;  %v2231_v3 = vpop.permute.xlu0 %2230  ;;  %v1926_v54 = vmul.f32 %v12455_v21, %v12704_v24 }
 0x3e3   :  { %v2713_v41 = vrot.slane %v2222_v26, %v11804_v37  ;;  %2413 = vperm.xlu1 %11523, %v1918_v53   ;;  %2422 = vperm.xlu0 %11524, %v1921_v33   ;;  %v2728_v13 = vrot.slane %v2231_v3, %v11813_v47 }
 0x3e5   :  { %v2714_v10 = vsel %vm1055_vm6, %v2713_v41, %v2709_v9 }
 0x3e6   :  { %v2228_v27 = vpop.permute.xlu1 %2227  ;;  %v2719_v23 = vsel %vm1062_vm7, %v2718_v56, %v2714_v10  ;;  %v2237_v60 = vpop.permute.xlu0 %2236 }
 0x3e7   :  { %v2723_v44 = vrot.slane %v2228_v27, %v11810_v46  ;;  %2419 = vperm.xlu1 %11523, %v1920_v45   ;;  %2428 = vperm.xlu0 %11524, %v1923_v59   ;;  %v2738_v12 = vrot.slane %v2237_v60, %v11819_v49 }
 0x3e9   :  { %v2724_v0 = vsel %vm1069_vm8, %v2723_v44, %v2719_v23 }
 0x3ea   :  { %v2234_v18 = vpop.permute.xlu1 %2233  ;;  %v2729_v63 = vsel %vm1076_vm9, %v2728_v13, %v2724_v0  ;;  %v2243_v40 = vpop.permute.xlu0 %2242 }
 0x3eb   :  { %v2733_v16 = vrot.slane %v2234_v18, %v11816_v48  ;;  %2425 = vperm.xlu1 %11523, %v1922_v15   ;;  %2434 = vperm.xlu0 %11524, %v1925_v8   ;;  %v2748_v25 = vrot.slane %v2243_v40, %v11825_v51 }
 0x3ed   :  { %v2734_v62 = vsel %vm16223_vm10, %v2733_v16, %v2729_v63  ;;  %vm16224_vm10 = vcmask 1043459  }
 0x3ee   :  { %v2240_v11 = vpop.permute.xlu1 %2239  ;;  %v2739_v42 = vsel %vm1090_vm11, %v2738_v12, %v2734_v62  ;;  %v2249_v2 = vpop.permute.xlu0 %2248 }
 0x3ef   :  { %v2743_v39 = vrot.slane %v2240_v11, %v11822_v50  ;;  %2431 = vperm.xlu1 %11523, %v1924_v1   ;;  %3119 = vbcast.lane.b32.xlu0 %v12775_v5, 256  ;;  %v2758_v56 = vrot.slane %v2249_v2, %v11783_v22 }
 0x3f1   :  { %v2744_v28 = vsel %vm1097_vm12, %v2743_v39, %v2739_v42 }
 0x3f2   :  { %v2246_v7 = vpop.permute.xlu1 %2245  ;;  %v2749_v53 = vsel %vm1104_vm13, %v2748_v25, %v2744_v28  ;;  %v2255_v57 = vpop.permute.xlu0 %2254 }
 0x3f3   :  { %v2753_v33 = vrot.slane %v2246_v7, %v11828_v52  ;;  %2437 = vperm.xlu1 %11523, %v1926_v54   ;;  %3127 = vbcast.lane.b32.xlu0 %v12775_v5, 272  ;;  %v2767_v24 = vrot.slane %v2255_v57, %v11789_v31 }
 0x3f5   :  { %v2754_v26 = vsel %vm1111_vm14, %v2753_v33, %v2749_v53 }
 0x3f6   :  { %v12793_v9 = vsel %vm16224_vm10, %v2754_v26, %v12730_v29  ;;  %v2252_v3 = vpop.permute.xlu1 %2251  ;;  %v2261_v41 = vpop.permute.xlu0 %2260  ;;  %vm16225_vm10 = vcmask 786112  }
 0x3f7   :  { %v2762_v21 = vrot.slane %v2252_v3, %v11786_v30  ;;  %3123 = vbcast.lane.b32.xlu1 %v12775_v5, 264  ;;  %3135 = vbcast.lane.b32.xlu0 %v12775_v5, 288  ;;  %v2777_v23 = vrot.slane %v2261_v41, %v11795_v34 }
 0x3f9   :  { %v2763_v10 = vsel %vm1013_vm0, %v2762_v21, %v2758_v56 }
 0x3fa   :  { %v2258_v45 = vpop.permute.xlu1 %2257  ;;  %v2768_v59 = vsel %vm1020_vm1, %v2767_v24, %v2763_v10  ;;  %v2267_v27 = vpop.permute.xlu0 %2266 }
 0x3fb   :  { %v2772_v29 = vrot.slane %v2258_v45, %v11792_v32  ;;  %3131 = vbcast.lane.b32.xlu1 %v12775_v5, 280  ;;  %3143 = vbcast.lane.b32.xlu0 %v12775_v5, 304  ;;  %v2787_v8 = vrot.slane %v2267_v27, %v11801_v36 }
 0x3fd   :  { %v2773_v60 = vsel %vm1027_vm2, %v2772_v29, %v2768_v59 }
 0x3fe   :  { %v2264_v44 = vpop.permute.xlu1 %2263  ;;  %v2778_v13 = vsel %vm1034_vm3, %v2777_v23, %v2773_v60  ;;  %v2273_v0 = vpop.permute.xlu0 %2272 }
 0x3ff   :  { %v2782_v15 = vrot.slane %v2264_v44, %v11798_v35  ;;  %3139 = vbcast.lane.b32.xlu1 %v12775_v5, 296  ;;  %3151 = vbcast.lane.b32.xlu0 %v12775_v5, 320  ;;  %v2797_v62 = vrot.slane %v2273_v0, %v11807_v38 }
 0x401   :  { %v2783_v18 = vsel %vm1041_vm4, %v2782_v15, %v2778_v13 }
 0x402   :  { %v2270_v63 = vpop.permute.xlu1 %2269  ;;  %v2788_v40 = vsel %vm1048_vm5, %v2787_v8, %v2783_v18  ;;  %v2279_v16 = vpop.permute.xlu0 %2278 }
 0x403   :  { %v2792_v12 = vrot.slane %v2270_v63, %v11804_v37  ;;  %3147 = vbcast.lane.b32.xlu1 %v12775_v5, 312  ;;  %3159 = vbcast.lane.b32.xlu0 %v12775_v5, 336  ;;  %v2807_v25 = vrot.slane %v2279_v16, %v11813_v47 }
 0x405   :  { %v2793_v1 = vsel %vm1055_vm6, %v2792_v12, %v2788_v40 }
 0x406   :  { %v2276_v11 = vpop.permute.xlu1 %2275  ;;  %v2798_v42 = vsel %vm1062_vm7, %v2797_v62, %v2793_v1  ;;  %v2285_v2 = vpop.permute.xlu0 %2284 }
 0x407   :  { %v2802_v39 = vrot.slane %v2276_v11, %v11810_v46  ;;  %3155 = vbcast.lane.b32.xlu1 %v12775_v5, 328  ;;  %3167 = vbcast.lane.b32.xlu0 %v12775_v5, 352  ;;  %v2817_v33 = vrot.slane %v2285_v2, %v11819_v49 }
 0x409   :  { %v2803_v28 = vsel %vm1069_vm8, %v2802_v39, %v2798_v42 }
 0x40a   :  { %v2282_v54 = vpop.permute.xlu1 %2281  ;;  %v2808_v7 = vsel %vm1076_vm9, %v2807_v25, %v2803_v28  ;;  %v2291_v53 = vpop.permute.xlu0 %2290 }
 0x40b   :  { %v2812_v57 = vrot.slane %v2282_v54, %v11816_v48  ;;  %3163 = vbcast.lane.b32.xlu1 %v12775_v5, 344  ;;  %3175 = vbcast.lane.b32.xlu0 %v12775_v5, 368  ;;  %v2827_v24 = vrot.slane %v2291_v53, %v11825_v51 }
 0x40d   :  { %v2813_v26 = vsel %vm16225_vm10, %v2812_v57, %v2808_v7  ;;  %vm16226_vm10 = vcmask 1044484  }
 0x40e   :  { %v2288_v3 = vpop.permute.xlu1 %2287  ;;  %v2818_v41 = vsel %vm1090_vm11, %v2817_v33, %v2813_v26  ;;  %v2297_v56 = vpop.permute.xlu0 %2296 }
 0x40f   :  { %v2822_v21 = vrot.slane %v2288_v3, %v11822_v50  ;;  %3171 = vbcast.lane.b32.xlu1 %v12775_v5, 360  ;;  %v2837_v0 = vrot.slane %v2297_v56, %v11783_v22 }
 0x411   :  { %v2823_v10 = vsel %vm1097_vm12, %v2822_v21, %v2818_v41 }
 0x412   :  { %v2294_v45 = vpop.permute.xlu1 %2293  ;;  %v2828_v59 = vsel %vm1104_vm13, %v2827_v24, %v2823_v10  ;;  %v2303_v27 = vpop.permute.xlu0 %2302 }
 0x413   :  { %v2832_v29 = vrot.slane %v2294_v45, %v11828_v52  ;;  %3179 = vbcast.lane.b32.xlu1 %v12775_v5, 376  ;;  %v2846_v8 = vrot.slane %v2303_v27, %v11789_v31 }
 0x415   :  { %v2833_v23 = vsel %vm1111_vm14, %v2832_v29, %v2828_v59 }
 0x416   :  { %v3074_v60 = vsel %vm16226_vm10, %v2833_v23, %v12793_v9  ;;  %v2300_v44 = vpop.permute.xlu1 %2299  ;;  %v2309_v13 = vpop.permute.xlu0 %2308  ;;  %vm16227_vm10 = vcmask 786112  }
 0x417   :  { %v2841_v15 = vrot.slane %v2300_v44, %v11786_v30  ;;  %v2856_v12 = vrot.slane %v2309_v13, %v11795_v34 }
 0x419   :  { %v2842_v18 = vsel %vm1013_vm0, %v2841_v15, %v2837_v0 }
 0x41a   :  { %v2306_v63 = vpop.permute.xlu1 %2305  ;;  %v2847_v40 = vsel %vm1020_vm1, %v2846_v8, %v2842_v18  ;;  %v2315_v16 = vpop.permute.xlu0 %2314 }
 0x41b   :  { %v2851_v5 = vrot.slane %v2306_v63, %v11792_v32  ;;  %v2866_v2 = vrot.slane %v2315_v16, %v11801_v36 }
 0x41d   :  { %v2852_v9 = vsel %vm1027_vm2, %v2851_v5, %v2847_v40 }
 0x41e   :  { %v2312_v62 = vpop.permute.xlu1 %2311  ;;  %v2857_v1 = vsel %vm1034_vm3, %v2856_v12, %v2852_v9  ;;  %v2321_v11 = vpop.permute.xlu0 %2320 }
 0x41f   :  { %v2861_v42 = vrot.slane %v2312_v62, %v11798_v35  ;;  %v2876_v53 = vrot.slane %v2321_v11, %v11807_v38 }
 0x421   :  { %v2862_v39 = vsel %vm1041_vm4, %v2861_v42, %v2857_v1 }
 0x422   :  { %v2318_v25 = vpop.permute.xlu1 %2317  ;;  %v2867_v28 = vsel %vm1048_vm5, %v2866_v2, %v2862_v39  ;;  %v2327_v54 = vpop.permute.xlu0 %2326 }
 0x423   :  { %v2871_v7 = vrot.slane %v2318_v25, %v11804_v37  ;;  %v2886_v56 = vrot.slane %v2327_v54, %v11813_v47 }
 0x425   :  { %v2872_v57 = vsel %vm1055_vm6, %v2871_v7, %v2867_v28 }
 0x426   :  { %v2324_v33 = vpop.permute.xlu1 %2323  ;;  %v2877_v26 = vsel %vm1062_vm7, %v2876_v53, %v2872_v57  ;;  %v2333_v3 = vpop.permute.xlu0 %2332 }
 0x427   :  { %v2881_v41 = vrot.slane %v2324_v33, %v11810_v46  ;;  %v2896_v27 = vrot.slane %v2333_v3, %v11819_v49 }
 0x429   :  { %v2882_v21 = vsel %vm1069_vm8, %v2881_v41, %v2877_v26 }
 0x42a   :  { %v2330_v24 = vpop.permute.xlu1 %2329  ;;  %v2887_v10 = vsel %vm1076_vm9, %v2886_v56, %v2882_v21  ;;  %v2339_v45 = vpop.permute.xlu0 %2338 }
 0x42b   :  { %v2891_v59 = vrot.slane %v2330_v24, %v11816_v48  ;;  %v2906_v15 = vrot.slane %v2339_v45, %v11825_v51 }
 0x42d   :  { %v2892_v29 = vsel %vm16227_vm10, %v2891_v59, %v2887_v10 }
 0x42e   :  { %v2336_v23 = vpop.permute.xlu1 %2335  ;;  %v2897_v44 = vsel %vm1090_vm11, %v2896_v27, %v2892_v29  ;;  %v2345_v13 = vpop.permute.xlu0 %2344 }
 0x42f   :  { %v2901_v0 = vrot.slane %v2336_v23, %v11822_v50  ;;  %v2916_v1 = vrot.slane %v2345_v13, %v11783_v22 }
 0x431   :  { %v2902_v8 = vsel %vm1097_vm12, %v2901_v0, %v2897_v44 }
 0x432   :  { %v2342_v18 = vpop.permute.xlu1 %2341  ;;  %v2907_v63 = vsel %vm1104_vm13, %v2906_v15, %v2902_v8  ;;  %v2351_v40 = vpop.permute.xlu0 %2350 }
 0x433   :  { %v2911_v16 = vrot.slane %v2342_v18, %v11828_v52  ;;  %v2925_v42 = vrot.slane %v2351_v40, %v11789_v31 }
 0x435   :  { %v2912_v5 = vsel %vm1111_vm14, %v2911_v16, %v2907_v63 }
 0x436   :  { %v3075_v12 = vsel %vm16228_vm15, %v2912_v5, %v3074_v60  ;;  %v2348_v9 = vpop.permute.xlu1 %2347  ;;  %v2357_v62 = vpop.permute.xlu0 %2356  ;;  %vm16229_vm15 = vmmov %vm16227_vm10  ;;  %vm16230_vm10 = vcmask 1046534  }
 0x437   :  { %v2920_v11 = vrot.slane %v2348_v9, %v11786_v30  ;;  %v2935_v7 = vrot.slane %v2357_v62, %v11795_v34 }
 0x439   :  { %v2921_v2 = vsel %vm1013_vm0, %v2920_v11, %v2916_v1 }
 0x43a   :  { %v2354_v39 = vpop.permute.xlu1 %2353  ;;  %v2926_v25 = vsel %vm1020_vm1, %v2925_v42, %v2921_v2  ;;  %v2363_v28 = vpop.permute.xlu0 %2362 }
 0x43b   :  { %v2930_v54 = vrot.slane %v2354_v39, %v11792_v32  ;;  %v2945_v3 = vrot.slane %v2363_v28, %v11801_v36 }
 0x43d   :  { %v2931_v60 = vsel %vm1027_vm2, %v2930_v54, %v2926_v25 }
 0x43e   :  { %v2360_v53 = vpop.permute.xlu1 %2359  ;;  %v2936_v57 = vsel %vm1034_vm3, %v2935_v7, %v2931_v60  ;;  %v2369_v33 = vpop.permute.xlu0 %2368 }
 0x43f   :  { %v2940_v26 = vrot.slane %v2360_v53, %v11798_v35  ;;  %v2955_v45 = vrot.slane %v2369_v33, %v11807_v38 }
 0x441   :  { %v2941_v41 = vsel %vm1041_vm4, %v2940_v26, %v2936_v57 }
 0x442   :  { %v2366_v56 = vpop.permute.xlu1 %2365  ;;  %v2946_v21 = vsel %vm1048_vm5, %v2945_v3, %v2941_v41  ;;  %v2375_v24 = vpop.permute.xlu0 %2374 }
 0x443   :  { %v2950_v10 = vrot.slane %v2366_v56, %v11804_v37  ;;  %v2965_v13 = vrot.slane %v2375_v24, %v11813_v47 }
 0x445   :  { %v2951_v59 = vsel %vm1055_vm6, %v2950_v10, %v2946_v21 }
 0x446   :  { %v2372_v27 = vpop.permute.xlu1 %2371  ;;  %v2956_v29 = vsel %vm1062_vm7, %v2955_v45, %v2951_v59  ;;  %v2381_v23 = vpop.permute.xlu0 %2380 }
 0x447   :  { %v2960_v44 = vrot.slane %v2372_v27, %v11810_v46  ;;  %v2975_v40 = vrot.slane %v2381_v23, %v11819_v49 }
 0x449   :  { %v2961_v0 = vsel %vm1069_vm8, %v2960_v44, %v2956_v29 }
 0x44a   :  { %v2378_v15 = vpop.permute.xlu1 %2377  ;;  %v2966_v8 = vsel %vm1076_vm9, %v2965_v13, %v2961_v0  ;;  %v2387_v18 = vpop.permute.xlu0 %2386 }
 0x44b   :  { %v2970_v63 = vrot.slane %v2378_v15, %v11816_v48  ;;  %v2985_v11 = vrot.slane %v2387_v18, %v11825_v51 }
 0x44d   :  { %v2971_v16 = vsel %vm16229_vm15, %v2970_v63, %v2966_v8 }
 0x44e   :  { %v2384_v5 = vpop.permute.xlu1 %2383  ;;  %v2976_v9 = vsel %vm1090_vm11, %v2975_v40, %v2971_v16  ;;  %v2393_v62 = vpop.permute.xlu0 %2392 }
 0x44f   :  { %v2980_v1 = vrot.slane %v2384_v5, %v11822_v50  ;;  %v2995_v57 = vrot.slane %v2393_v62, %v11783_v22 }
 0x451   :  { %v2981_v42 = vsel %vm1097_vm12, %v2980_v1, %v2976_v9  ;;  %v12926_v1 = vsub.s32 2, %v11780_v20 }
 0x452   :  { %v2390_v2 = vpop.permute.xlu1 %2389  ;;  %v2986_v39 = vsel %vm1104_vm13, %v2985_v11, %v2981_v42  ;;  %v2399_v25 = vpop.permute.xlu0 %2398 }
 0x453   :  { %v2990_v28 = vrot.slane %v2390_v2, %v11828_v52  ;;  %v3004_v26 = vrot.slane %v2399_v25, %v11789_v31 }
 0x455   :  { %v2991_v54 = vsel %vm1111_vm14, %v2990_v28, %v2986_v39 }
 0x456   :  { %v3076_v7 = vsel %vm16230_vm10, %v2991_v54, %v3075_v12  ;;  %v2396_v60 = vpop.permute.xlu1 %2395  ;;  %v2405_v53 = vpop.permute.xlu0 %2404  ;;  %v12934_v54 = vrot.slane %v11873_v43, %v12926_v1  ;;  %vm16231_vm10 = vcmask 1047559  }
 0x457   :  { %v2999_v33 = vrot.slane %v2396_v60, %v11786_v30  ;;  %v3014_v10 = vrot.slane %v2405_v53, %v11795_v34 }
 0x459   :  { %v3000_v3 = vsel %vm1013_vm0, %v2999_v33, %v2995_v57 }
 0x45a   :  { %v2402_v41 = vpop.permute.xlu1 %2401  ;;  %v3005_v56 = vsel %vm1020_vm1, %v3004_v26, %v3000_v3  ;;  %v2411_v21 = vpop.permute.xlu0 %2410 }
 0x45b   :  { %v3009_v24 = vrot.slane %v2402_v41, %v11792_v32  ;;  %v3024_v23 = vrot.slane %v2411_v21, %v11801_v36  ;;  %v11505_v21 = vld [vmem:[%s16206_s3] ss:$0 sm:$0xff]  ;;  %s11671_s3 = smov [#allocation9]  }
 0x45c   :  { %s11491_s10 = sshll.u32 %s11671_s3, 4  ;;  %s11492_s10 = int_to_ptr.vmem [resolvable:$true] %s11491_s10 }
 0x45d   :  { %v3010_v12 = vsel %vm1027_vm2, %v3009_v24, %v3005_v56  ;;  %s11612_s11 = scalar_lea.vmem %s11492_s10, 128  ;;  %p11617_p11 = scmp.lt.s32.totalorder %s11492_s10, %s11492_s10 }
 0x45e   :  { %v2408_v45 = vpop.permute.xlu1 %2407  ;;  %v3015_v59 = vsel %vm1034_vm3, %v3014_v10, %v3010_v12  ;;  %v2417_v27 = vpop.permute.xlu0 %2416  ;;  %p11613_p10 = scmp.ne.s32.totalorder %s11492_s10, %s11612_s11  ;;  %p11618_p12 = scmp.lt.s32.totalorder %s11612_s11, %s11612_s11 }
 0x45f   :  { %v3019_v29 = vrot.slane %v2408_v45, %v11798_v35  ;;  %v3034_v18 = vrot.slane %v2417_v27, %v11807_v38  ;;  %v1681_v27 = vadd.f32 %v11505_v21, %v12411_v58 }
 0x460   :  { %p11619_p13 = por %p11618_p12, %p11617_p11 }
 0x461   :  { %v3020_v44 = vsel %vm1041_vm4, %v3019_v29, %v3015_v59 }
 0x462   :  { %v2414_v13 = vpop.permute.xlu1 %2413  ;;  %v3025_v0 = vsel %vm1048_vm5, %v3024_v23, %v3020_v44  ;;  %v2423_v15 = vpop.permute.xlu0 %2422  ;;  %p11620_p0 = pnand %p11619_p13, %p11613_p10 }
 0x463   :  { %v3029_v8 = vrot.slane %v2414_v13, %v11804_v37  ;;  %v3044_v62 = vrot.slane %v2423_v15, %v11813_v47 }
 0x465   :  { %v3030_v63 = vsel %vm1055_vm6, %v3029_v8, %v3025_v0 }
 0x466   :  { %v2420_v40 = vpop.permute.xlu1 %2419  ;;  %v3035_v16 = vsel %vm1062_vm7, %v3034_v18, %v3030_v63  ;;  %v2429_v5 = vpop.permute.xlu0 %2428 }
 0x467   :  { %v3039_v9 = vrot.slane %v2420_v40, %v11810_v46  ;;  %v3054_v28 = vrot.slane %v2429_v5, %v11819_v49 }
 0x469   :  { %v3040_v11 = vsel %vm1069_vm8, %v3039_v9, %v3035_v16 }
 0x46a   :  { %v2426_v42 = vpop.permute.xlu1 %2425  ;;  %v3045_v2 = vsel %vm1076_vm9, %v3044_v62, %v3040_v11  ;;  %v2435_v39 = vpop.permute.xlu0 %2434 }
 0x46b   :  { %v3049_v25 = vrot.slane %v2426_v42, %v11816_v48  ;;  %v3064_v41 = vrot.slane %v2435_v39, %v11825_v51 }
 0x46d   :  { %v3050_v60 = vsel %vm16229_vm15, %v3049_v25, %v3045_v2 }
 0x46e   :  { %v2432_v53 = vpop.permute.xlu1 %2431  ;;  %v3055_v57 = vsel %vm1090_vm11, %v3054_v28, %v3050_v60  ;;  %v12938_v33 = vpop.permute.xlu0 %3119 }
 0x46f   :  { %v3059_v26 = vrot.slane %v2432_v53, %v11822_v50  ;;  %v3197_v3 = vmul.f32 %v12938_v33, %v12934_v54 }
 0x471   :  { %v3060_v56 = vsel %vm1097_vm12, %v3059_v26, %v3055_v57  ;;  %3454 = vperm.xlu0 %11524, %v3197_v3  }
 0x472   :  { %v2438_v24 = vpop.permute.xlu1 %2437  ;;  %v3065_v10 = vsel %vm1104_vm13, %v3064_v41, %v3060_v56  ;;  %v12949_v12 = vpop.permute.xlu0 %3127  ;;  %v3088_v41 = vrot.slane %v11899_v6, %v12926_v1 }
 0x473   :  { %v3069_v45 = vrot.slane %v2438_v24, %v11828_v52  ;;  %v3199_v59 = vmul.f32 %v12949_v12, %v12934_v54 }
 0x474   :  { %v3213_v24 = vmul.f32 %v12938_v33, %v3088_v41 }
 0x475   :  { %v3070_v29 = vsel %vm1111_vm14, %v3069_v45, %v3065_v10  ;;  %3460 = vperm.xlu0 %11524, %v3199_v59   ;;  %v3215_v59 = vmul.f32 %v12949_v12, %v3088_v41 }
 0x476   :  { %v3077_v23 = vsel %vm16231_vm10, %v3070_v29, %v3076_v7  ;;  %v12957_v44 = vpop.permute.xlu1 %3123  ;;  %v12959_v13 = vpop.permute.xlu0 %3135  ;;  %vm16232_vm10 = vmmov %vm16229_vm15 }
 0x477   :  { %v12961_v0 = vadd.f32 %v3077_v23, %v1681_v27  ;;  %v3198_v15 = vmul.f32 %v12957_v44, %v12934_v54  ;;  %v3201_v8 = vmul.f32 %v12959_v13, %v12934_v54  ;;  %v3214_v27 = vmul.f32 %v12957_v44, %v3088_v41 }
 0x478   :  { %v3217_v29 = vmul.f32 %v12959_v13, %v3088_v41 }
 0x479   :  { %3457 = vperm.xlu1 %11523, %v3198_v15   ;;  %3466 = vperm.xlu0 %11524, %v3201_v8  }
 0x47a   :  { %v12967_v58 = vpop.permute.xlu1 %3131  ;;  %v12969_v18 = vpop.permute.xlu0 %3143 }
 0x47b   :  { %v3200_v7 = vmul.f32 %v12967_v58, %v12934_v54  ;;  %v3203_v63 = vmul.f32 %v12969_v18, %v12934_v54  ;;  %v3216_v23 = vmul.f32 %v12967_v58, %v3088_v41  ;;  %v3219_v15 = vmul.f32 %v12969_v18, %v3088_v41 }
 0x47d   :  { %3463 = vperm.xlu1 %11523, %v3200_v7   ;;  %3472 = vperm.xlu0 %11524, %v3203_v63  }
 0x47e   :  { %v12975_v40 = vpop.permute.xlu1 %3139  ;;  %v12977_v16 = vpop.permute.xlu0 %3151 }
 0x47f   :  { %v3202_v5 = vmul.f32 %v12975_v40, %v12934_v54  ;;  %v3205_v9 = vmul.f32 %v12977_v16, %v12934_v54  ;;  %v3218_v8 = vmul.f32 %v12975_v40, %v3088_v41 }
 0x481   :  { %3469 = vperm.xlu1 %11523, %v3202_v5   ;;  %3478 = vperm.xlu0 %11524, %v3205_v9  }
 0x482   :  { %v12983_v62 = vpop.permute.xlu1 %3147  ;;  %v12985_v11 = vpop.permute.xlu0 %3159 }
 0x483   :  { %v3204_v42 = vmul.f32 %v12983_v62, %v12934_v54  ;;  %v3207_v2 = vmul.f32 %v12985_v11, %v12934_v54  ;;  %v3220_v7 = vmul.f32 %v12983_v62, %v3088_v41  ;;  %v3223_v63 = vmul.f32 %v12985_v11, %v3088_v41 }
 0x485   :  { %3475 = vperm.xlu1 %11523, %v3204_v42   ;;  %3484 = vperm.xlu0 %11524, %v3207_v2  }
 0x486   :  { %v12991_v39 = vpop.permute.xlu1 %3155  ;;  %v12993_v25 = vpop.permute.xlu0 %3167 }
 0x487   :  { %v3206_v28 = vmul.f32 %v12991_v39, %v12934_v54  ;;  %v3209_v60 = vmul.f32 %v12993_v25, %v12934_v54  ;;  %v3222_v5 = vmul.f32 %v12991_v39, %v3088_v41  ;;  %v3225_v9 = vmul.f32 %v12993_v25, %v3088_v41 }
 0x489   :  { %3481 = vperm.xlu1 %11523, %v3206_v28   ;;  %3490 = vperm.xlu0 %11524, %v3209_v60   ;;  %v3092_v28 = vrot.slane %v11919_v55, %v12926_v1 }
 0x48a   :  { %v12999_v53 = vpop.permute.xlu1 %3163  ;;  %v13001_v57 = vpop.permute.xlu0 %3175 }
 0x48b   :  { %v3208_v26 = vmul.f32 %v12999_v53, %v12934_v54  ;;  %v3211_v3 = vmul.f32 %v13001_v57, %v12934_v54  ;;  %v3224_v42 = vmul.f32 %v12999_v53, %v3088_v41  ;;  %v3227_v2 = vmul.f32 %v13001_v57, %v3088_v41 }
 0x48d   :  { %3487 = vperm.xlu1 %11523, %v3208_v26   ;;  %3496 = vperm.xlu0 %11524, %v3211_v3   ;;  %v3229_v26 = vmul.f32 %v12938_v33, %v3092_v28 }
 0x48e   :  { %v13009_v56 = vpop.permute.xlu1 %3171 }
 0x48f   :  { %v3210_v21 = vmul.f32 %v13009_v56, %v12934_v54  ;;  %v3226_v60 = vmul.f32 %v13009_v56, %v3088_v41 }
 0x491   :  { %3493 = vperm.xlu1 %11523, %v3210_v21   ;;  %3502 = vperm.xlu0 %11524, %v3213_v24   ;;  %v3231_v21 = vmul.f32 %v12949_v12, %v3092_v28  ;;  %v3230_v24 = vmul.f32 %v12957_v44, %v3092_v28 }
 0x492   :  { %v13014_v10 = vpop.permute.xlu1 %3179 }
 0x493   :  { %v3212_v45 = vmul.f32 %v13014_v10, %v12934_v54  ;;  %v3221_v54 = vmul.f32 %v12977_v16, %v3088_v41  ;;  %v3228_v3 = vmul.f32 %v13014_v10, %v3088_v41  ;;  %v3237_v41 = vmul.f32 %v12977_v16, %v3092_v28 }
 0x495   :  { %3499 = vperm.xlu1 %11523, %v3212_v45   ;;  %3508 = vperm.xlu0 %11524, %v3215_v59   ;;  %v3233_v45 = vmul.f32 %v12959_v13, %v3092_v28  ;;  %v3232_v59 = vmul.f32 %v12967_v58, %v3092_v28 }
 0x499   :  { %3505 = vperm.xlu1 %11523, %v3214_v27   ;;  %3514 = vperm.xlu0 %11524, %v3217_v29   ;;  %v3235_v27 = vmul.f32 %v12969_v18, %v3092_v28  ;;  %v3234_v29 = vmul.f32 %v12975_v40, %v3092_v28 }
 0x49d   :  { %3511 = vperm.xlu1 %11523, %v3216_v23   ;;  %3520 = vperm.xlu0 %11524, %v3219_v15   ;;  %v3236_v23 = vmul.f32 %v12983_v62, %v3092_v28  ;;  %v3239_v15 = vmul.f32 %v12985_v11, %v3092_v28 }
 0x4a1   :  { %3517 = vperm.xlu1 %11523, %v3218_v8   ;;  %3526 = vperm.xlu0 %11524, %v3221_v54   ;;  %v3238_v8 = vmul.f32 %v12991_v39, %v3092_v28  ;;  %v3241_v54 = vmul.f32 %v12993_v25, %v3092_v28 }
 0x4a5   :  { %3523 = vperm.xlu1 %11523, %v3220_v7   ;;  %3532 = vperm.xlu0 %11524, %v3223_v63   ;;  %v3240_v7 = vmul.f32 %v12999_v53, %v3092_v28  ;;  %v3243_v63 = vmul.f32 %v13001_v57, %v3092_v28 }
 0x4a9   :  { %3529 = vperm.xlu1 %11523, %v3222_v5   ;;  %3538 = vperm.xlu0 %11524, %v3225_v9   ;;  %v3096_v5 = vrot.slane %v11955_v61, %v12926_v1  ;;  %v3242_v9 = vmul.f32 %v13009_v56, %v3092_v28 }
 0x4ad   :  { %3535 = vperm.xlu1 %11523, %v3224_v42   ;;  %3544 = vperm.xlu0 %11524, %v3227_v2   ;;  %v3245_v42 = vmul.f32 %v12938_v33, %v3096_v5  ;;  %v3244_v2 = vmul.f32 %v13014_v10, %v3092_v28  ;;  %v3253_v28 = vmul.f32 %v12977_v16, %v3096_v5 }
 0x4b1   :  { %3541 = vperm.xlu1 %11523, %v3226_v60   ;;  %3550 = vperm.xlu0 %11524, %v3229_v26   ;;  %v3247_v60 = vmul.f32 %v12949_v12, %v3096_v5  ;;  %v3246_v26 = vmul.f32 %v12957_v44, %v3096_v5 }
 0x4b5   :  { %3547 = vperm.xlu1 %11523, %v3228_v3   ;;  %3556 = vperm.xlu0 %11524, %v3231_v21   ;;  %v3249_v3 = vmul.f32 %v12959_v13, %v3096_v5  ;;  %v3248_v21 = vmul.f32 %v12967_v58, %v3096_v5 }
 0x4b9   :  { %3553 = vperm.xlu1 %11523, %v3230_v24   ;;  %3562 = vperm.xlu0 %11524, %v3233_v45   ;;  %v3251_v24 = vmul.f32 %v12969_v18, %v3096_v5  ;;  %v3250_v45 = vmul.f32 %v12975_v40, %v3096_v5 }
 0x4bd   :  { %3559 = vperm.xlu1 %11523, %v3232_v59   ;;  %3568 = vperm.xlu0 %11524, %v3235_v27   ;;  %v3252_v59 = vmul.f32 %v12983_v62, %v3096_v5  ;;  %v3255_v27 = vmul.f32 %v12985_v11, %v3096_v5 }
 0x4c1   :  { %3565 = vperm.xlu1 %11523, %v3234_v29   ;;  %3574 = vperm.xlu0 %11524, %v3237_v41   ;;  %v3254_v29 = vmul.f32 %v12991_v39, %v3096_v5  ;;  %v3257_v41 = vmul.f32 %v12993_v25, %v3096_v5 }
 0x4c5   :  { %3571 = vperm.xlu1 %11523, %v3236_v23   ;;  %3580 = vperm.xlu0 %11524, %v3239_v15   ;;  %v3256_v23 = vmul.f32 %v12999_v53, %v3096_v5  ;;  %v3259_v15 = vmul.f32 %v13001_v57, %v3096_v5 }
 0x4c9   :  { %3577 = vperm.xlu1 %11523, %v3238_v8   ;;  %3586 = vperm.xlu0 %11524, %v3241_v54   ;;  %v13069_v8 = vrot.slane %v11939_v19, %v12926_v1  ;;  %v3258_v54 = vmul.f32 %v13009_v56, %v3096_v5 }
 0x4cd   :  { %3583 = vperm.xlu1 %11523, %v3240_v7   ;;  %3592 = vperm.xlu0 %11524, %v3243_v63   ;;  %v3261_v7 = vmul.f32 %v12938_v33, %v13069_v8 }
 0x4d1   :  { %3589 = vperm.xlu1 %11523, %v3242_v9   ;;  %3598 = vperm.xlu0 %11524, %v3245_v42   ;;  %v3260_v9 = vmul.f32 %v13014_v10, %v3096_v5  ;;  %v3263_v42 = vmul.f32 %v12949_v12, %v13069_v8 }
 0x4d5   :  { %3595 = vperm.xlu1 %11523, %v3244_v2   ;;  %3604 = vperm.xlu0 %11524, %v3247_v60   ;;  %v3262_v60 = vmul.f32 %v12957_v44, %v13069_v8 }
 0x4d9   :  { %3601 = vperm.xlu1 %11523, %v3246_v26   ;;  %3610 = vperm.xlu0 %11524, %v3249_v3   ;;  %v3265_v26 = vmul.f32 %v12959_v13, %v13069_v8 }
 0x4dd   :  { %3607 = vperm.xlu1 %11523, %v3248_v21   ;;  %3616 = vperm.xlu0 %11524, %v3251_v24  }
 0x4e1   :  { %3613 = vperm.xlu1 %11523, %v3250_v45   ;;  %3622 = vperm.xlu0 %11524, %v3253_v28  }
 0x4e5   :  { %3619 = vperm.xlu1 %11523, %v3252_v59   ;;  %3628 = vperm.xlu0 %11524, %v3255_v27   ;;  %v3264_v59 = vmul.f32 %v12967_v58, %v13069_v8  ;;  %v3267_v27 = vmul.f32 %v12969_v18, %v13069_v8 }
 0x4e9   :  { %3625 = vperm.xlu1 %11523, %v3254_v29   ;;  %3634 = vperm.xlu0 %11524, %v3257_v41  }
 0x4ed   :  { %3631 = vperm.xlu1 %11523, %v3256_v23   ;;  %3640 = vperm.xlu0 %11524, %v3259_v15  }
 0x4f0   :  { %v3455_v63 = vpop.permute.xlu0 %3454 }
 0x4f1   :  { %3637 = vperm.xlu1 %11523, %v3258_v54   ;;  %3646 = vperm.xlu0 %11524, %v3261_v7   ;;  %v3840_v24 = vrot.slane %v3455_v63, %v11783_v22  ;;  %v3266_v63 = vmul.f32 %v12975_v40, %v13069_v8 }
 0x4f4   :  { %v3461_v2 = vpop.permute.xlu0 %3460 }
 0x4f5   :  { %3643 = vperm.xlu1 %11523, %v3260_v9   ;;  %3652 = vperm.xlu0 %11524, %v3263_v42   ;;  %v3849_v5 = vrot.slane %v3461_v2, %v11789_v31  ;;  %v3269_v9 = vmul.f32 %v12977_v16, %v13069_v8 }
 0x4f8   :  { %v3458_v3 = vpop.permute.xlu1 %3457  ;;  %v3467_v21 = vpop.permute.xlu0 %3466 }
 0x4f9   :  { %v3844_v45 = vrot.slane %v3458_v3, %v11786_v30  ;;  %3649 = vperm.xlu1 %11523, %v3262_v60   ;;  %3658 = vperm.xlu0 %11524, %v3265_v26   ;;  %v3859_v54 = vrot.slane %v3467_v21, %v11795_v34 }
 0x4fb   :  { %v3845_v28 = vsel %vm1013_vm0, %v3844_v45, %v3840_v24  ;;  %v3268_v24 = vmul.f32 %v12983_v62, %v13069_v8  ;;  %v3271_v45 = vmul.f32 %v12985_v11, %v13069_v8 }
 0x4fc   :  { %v3464_v29 = vpop.permute.xlu1 %3463  ;;  %v3850_v41 = vsel %vm1020_vm1, %v3849_v5, %v3845_v28  ;;  %v3473_v23 = vpop.permute.xlu0 %3472 }
 0x4fd   :  { %v3854_v15 = vrot.slane %v3464_v29, %v11792_v32  ;;  %3655 = vperm.xlu1 %11523, %v3264_v59   ;;  %3664 = vperm.xlu0 %11524, %v3267_v27   ;;  %v3869_v3 = vrot.slane %v3473_v23, %v11801_v36  ;;  %v3270_v23 = vmul.f32 %v12991_v39, %v13069_v8 }
 0x4ff   :  { %v3855_v7 = vsel %vm1027_vm2, %v3854_v15, %v3850_v41  ;;  %v3273_v15 = vmul.f32 %v12993_v25, %v13069_v8 }
 0x500   :  { %v3470_v42 = vpop.permute.xlu1 %3469  ;;  %v3860_v2 = vsel %vm1034_vm3, %v3859_v54, %v3855_v7  ;;  %v3479_v60 = vpop.permute.xlu0 %3478 }
 0x501   :  { %v3864_v26 = vrot.slane %v3470_v42, %v11798_v35  ;;  %3661 = vperm.xlu1 %11523, %v3266_v63   ;;  %3670 = vperm.xlu0 %11524, %v3269_v9   ;;  %v3879_v29 = vrot.slane %v3479_v60, %v11807_v38  ;;  %v3272_v60 = vmul.f32 %v12999_v53, %v13069_v8 }
 0x503   :  { %v3865_v21 = vsel %vm1041_vm4, %v3864_v26, %v3860_v2  ;;  %v3275_v26 = vmul.f32 %v13001_v57, %v13069_v8 }
 0x504   :  { %v3476_v5 = vpop.permute.xlu1 %3475  ;;  %v3870_v28 = vsel %vm1048_vm5, %v3869_v3, %v3865_v21  ;;  %v3485_v59 = vpop.permute.xlu0 %3484 }
 0x505   :  { %v3874_v27 = vrot.slane %v3476_v5, %v11804_v37  ;;  %3667 = vperm.xlu1 %11523, %v3268_v24   ;;  %3676 = vperm.xlu0 %11524, %v3271_v45   ;;  %v3889_v42 = vrot.slane %v3485_v59, %v11813_v47  ;;  %v13124_v45 = vrot.slane %v11961_v4, %v12926_v1 }
 0x507   :  { %v3875_v41 = vsel %vm1055_vm6, %v3874_v27, %v3870_v28  ;;  %v3274_v27 = vmul.f32 %v13009_v56, %v13069_v8 }
 0x508   :  { %v3482_v54 = vpop.permute.xlu1 %3481  ;;  %v3880_v7 = vsel %vm1062_vm7, %v3879_v29, %v3875_v41  ;;  %v3491_v63 = vpop.permute.xlu0 %3490  ;;  %v3277_v29 = vmul.f32 %v12938_v33, %v13124_v45 }
 0x509   :  { %v3884_v9 = vrot.slane %v3482_v54, %v11810_v46  ;;  %3673 = vperm.xlu1 %11523, %v3270_v23   ;;  %3682 = vperm.xlu0 %11524, %v3273_v15   ;;  %v3899_v28 = vrot.slane %v3491_v63, %v11819_v49 }
 0x50b   :  { %v3885_v2 = vsel %vm1069_vm8, %v3884_v9, %v3880_v7  ;;  %v3276_v9 = vmul.f32 %v13014_v10, %v13069_v8  ;;  %v3281_v8 = vmul.f32 %v12959_v13, %v13124_v45 }
 0x50c   :  { %v3488_v3 = vpop.permute.xlu1 %3487  ;;  %v3890_v21 = vsel %vm1076_vm9, %v3889_v42, %v3885_v2  ;;  %v3497_v24 = vpop.permute.xlu0 %3496  ;;  %v3279_v42 = vmul.f32 %v12949_v12, %v13124_v45 }
 0x50d   :  { %v3894_v5 = vrot.slane %v3488_v3, %v11816_v48  ;;  %3679 = vperm.xlu1 %11523, %v3272_v60   ;;  %3688 = vperm.xlu0 %11524, %v3275_v26   ;;  %v3909_v7 = vrot.slane %v3497_v24, %v11825_v51  ;;  %v3278_v24 = vmul.f32 %v12957_v44, %v13124_v45 }
 0x50f   :  { %v3895_v59 = vsel %vm16229_vm15, %v3894_v5, %v3890_v21  ;;  %vm16233_vm15 = vcmask 1041409  }
 0x510   :  { %v3494_v41 = vpop.permute.xlu1 %3493  ;;  %v3900_v23 = vsel %vm1090_vm11, %v3899_v28, %v3895_v59  ;;  %v3503_v15 = vpop.permute.xlu0 %3502 }
 0x511   :  { %v3904_v54 = vrot.slane %v3494_v41, %v11822_v50  ;;  %3685 = vperm.xlu1 %11523, %v3274_v27   ;;  %3694 = vperm.xlu0 %11524, %v3277_v29   ;;  %v3919_v59 = vrot.slane %v3503_v15, %v11783_v22 }
 0x513   :  { %v3905_v63 = vsel %vm1097_vm12, %v3904_v54, %v3900_v23  ;;  %v3280_v23 = vmul.f32 %v12967_v58, %v13124_v45  ;;  %v3283_v54 = vmul.f32 %v12969_v18, %v13124_v45 }
 0x514   :  { %v3500_v2 = vpop.permute.xlu1 %3499  ;;  %v3910_v60 = vsel %vm1104_vm13, %v3909_v7, %v3905_v63  ;;  %v3509_v26 = vpop.permute.xlu0 %3508 }
 0x515   :  { %v3914_v3 = vrot.slane %v3500_v2, %v11828_v52  ;;  %3691 = vperm.xlu1 %11523, %v3276_v9   ;;  %3700 = vperm.xlu0 %11524, %v3279_v42   ;;  %v3928_v29 = vrot.slane %v3509_v26, %v11789_v31  ;;  %v3285_v26 = vmul.f32 %v12977_v16, %v13124_v45 }
 0x517   :  { %v13144_v21 = vsel %vm1111_vm14, %v3914_v3, %v3910_v60  ;;  %v3282_v60 = vmul.f32 %v12975_v40, %v13124_v45 }
 0x518   :  { %v3506_v5 = vpop.permute.xlu1 %3505  ;;  %v3515_v28 = vpop.permute.xlu0 %3514 }
 0x519   :  { %v3923_v27 = vrot.slane %v3506_v5, %v11786_v30  ;;  %3697 = vperm.xlu1 %11523, %v3278_v24   ;;  %3706 = vperm.xlu0 %11524, %v3281_v8   ;;  %v3938_v42 = vrot.slane %v3515_v28, %v11795_v34 }
 0x51b   :  { %v3924_v41 = vsel %vm1013_vm0, %v3923_v27, %v3919_v59  ;;  %v3284_v27 = vmul.f32 %v12983_v62, %v13124_v45 }
 0x51c   :  { %v3512_v7 = vpop.permute.xlu1 %3511  ;;  %v3929_v63 = vsel %vm1020_vm1, %v3928_v29, %v3924_v41  ;;  %v3521_v9 = vpop.permute.xlu0 %3520  ;;  %v3287_v29 = vmul.f32 %v12985_v11, %v13124_v45 }
 0x51d   :  { %v3933_v15 = vrot.slane %v3512_v7, %v11792_v32  ;;  %3703 = vperm.xlu1 %11523, %v3280_v23   ;;  %3712 = vperm.xlu0 %11524, %v3283_v54   ;;  %v3948_v59 = vrot.slane %v3521_v9, %v11801_v36 }
 0x51f   :  { %v3934_v2 = vsel %vm1027_vm2, %v3933_v15, %v3929_v63  ;;  %v3286_v15 = vmul.f32 %v12991_v39, %v13124_v45 }
 0x520   :  { %v3518_v3 = vpop.permute.xlu1 %3517  ;;  %v3939_v24 = vsel %vm1034_vm3, %v3938_v42, %v3934_v2  ;;  %v3527_v8 = vpop.permute.xlu0 %3526  ;;  %v3289_v42 = vmul.f32 %v12993_v25, %v13124_v45 }
 0x521   :  { %v3943_v5 = vrot.slane %v3518_v3, %v11798_v35  ;;  %3709 = vperm.xlu1 %11523, %v3282_v60   ;;  %3718 = vperm.xlu0 %11524, %v3285_v26   ;;  %v3958_v63 = vrot.slane %v3527_v8, %v11807_v38 }
 0x523   :  { %v3944_v28 = vsel %vm1041_vm4, %v3943_v5, %v3939_v24  ;;  %v3288_v5 = vmul.f32 %v12999_v53, %v13124_v45 }
 0x524   :  { %v3524_v41 = vpop.permute.xlu1 %3523  ;;  %v3949_v23 = vsel %vm1048_vm5, %v3948_v59, %v3944_v28  ;;  %v3533_v54 = vpop.permute.xlu0 %3532  ;;  %v3291_v59 = vmul.f32 %v13001_v57, %v13124_v45 }
 0x525   :  { %v3953_v7 = vrot.slane %v3524_v41, %v11804_v37  ;;  %3715 = vperm.xlu1 %11523, %v3284_v27   ;;  %3724 = vperm.xlu0 %11524, %v3287_v29   ;;  %v3968_v24 = vrot.slane %v3533_v54, %v11813_v47  ;;  %v13193_v41 = vrot.slane %v11969_v14, %v12926_v1 }
 0x527   :  { %v3954_v9 = vsel %vm1055_vm6, %v3953_v7, %v3949_v23 }
 0x528   :  { %v3530_v2 = vpop.permute.xlu1 %3529  ;;  %v3959_v60 = vsel %vm1062_vm7, %v3958_v63, %v3954_v9  ;;  %v3539_v26 = vpop.permute.xlu0 %3538  ;;  %v3290_v63 = vmul.f32 %v13009_v56, %v13124_v45  ;;  %v3293_v9 = vmul.f32 %v12938_v33, %v13193_v41 }
 0x529   :  { %v3963_v3 = vrot.slane %v3530_v2, %v11810_v46  ;;  %3721 = vperm.xlu1 %11523, %v3286_v15   ;;  %3730 = vperm.xlu0 %11524, %v3289_v42   ;;  %v3978_v54 = vrot.slane %v3539_v26, %v11819_v49 }
 0x52b   :  { %v3964_v8 = vsel %vm1069_vm8, %v3963_v3, %v3959_v60 }
 0x52c   :  { %v3536_v28 = vpop.permute.xlu1 %3535  ;;  %v3969_v27 = vsel %vm1076_vm9, %v3968_v24, %v3964_v8  ;;  %v3545_v29 = vpop.permute.xlu0 %3544  ;;  %v3292_v24 = vmul.f32 %v13014_v10, %v13124_v45  ;;  %v3295_v8 = vmul.f32 %v12949_v12, %v13193_v41 }
 0x52d   :  { %v3973_v23 = vrot.slane %v3536_v28, %v11816_v48  ;;  %3727 = vperm.xlu1 %11523, %v3288_v5   ;;  %3736 = vperm.xlu0 %11524, %v3291_v59   ;;  %v3988_v3 = vrot.slane %v3545_v29, %v11825_v51  ;;  %v3294_v29 = vmul.f32 %v12957_v44, %v13193_v41 }
 0x52f   :  { %v3974_v7 = vsel %vm16232_vm10, %v3973_v23, %v3969_v27 }
 0x530   :  { %v3542_v15 = vpop.permute.xlu1 %3541  ;;  %v3979_v42 = vsel %vm1090_vm11, %v3978_v54, %v3974_v7  ;;  %v3551_v2 = vpop.permute.xlu0 %3550  ;;  %v3297_v54 = vmul.f32 %v12959_v13, %v13193_v41 }
 0x531   :  { %v3983_v60 = vrot.slane %v3542_v15, %v11822_v50  ;;  %3733 = vperm.xlu1 %11523, %v3290_v63   ;;  %3742 = vperm.xlu0 %11524, %v3293_v9   ;;  %v3998_v9 = vrot.slane %v3551_v2, %v11783_v22 }
 0x533   :  { %v3984_v26 = vsel %vm1097_vm12, %v3983_v60, %v3979_v42 }
 0x534   :  { %v3548_v5 = vpop.permute.xlu1 %3547  ;;  %v3989_v59 = vsel %vm1104_vm13, %v3988_v3, %v3984_v26  ;;  %v3557_v28 = vpop.permute.xlu0 %3556  ;;  %v3296_v3 = vmul.f32 %v12967_v58, %v13193_v41  ;;  %v3299_v26 = vmul.f32 %v12969_v18, %v13193_v41 }
 0x535   :  { %v3993_v27 = vrot.slane %v3548_v5, %v11828_v52  ;;  %3739 = vperm.xlu1 %11523, %v3292_v24   ;;  %3748 = vperm.xlu0 %11524, %v3295_v8   ;;  %v4007_v42 = vrot.slane %v3557_v28, %v11789_v31  ;;  %v3298_v28 = vmul.f32 %v12975_v40, %v13193_v41 }
 0x537   :  { %v3994_v23 = vsel %vm1111_vm14, %v3993_v27, %v3989_v59  ;;  %v3301_v27 = vmul.f32 %v12977_v16, %v13193_v41 }
 0x538   :  { %v13219_v45 = vsel %vm16233_vm15, %v3994_v23, %v13144_v21  ;;  %v3554_v7 = vpop.permute.xlu1 %3553  ;;  %v3563_v63 = vpop.permute.xlu0 %3562  ;;  %vm16234_vm15 = vcmask 1042434  }
 0x539   :  { %v4002_v15 = vrot.slane %v3554_v7, %v11786_v30  ;;  %3745 = vperm.xlu1 %11523, %v3294_v29   ;;  %3754 = vperm.xlu0 %11524, %v3297_v54   ;;  %v4017_v5 = vrot.slane %v3563_v63, %v11795_v34 }
 0x53b   :  { %v4003_v60 = vsel %vm1013_vm0, %v4002_v15, %v3998_v9  ;;  %v3300_v15 = vmul.f32 %v12983_v62, %v13193_v41 }
 0x53c   :  { %v3560_v21 = vpop.permute.xlu1 %3559  ;;  %v4008_v24 = vsel %vm1020_vm1, %v4007_v42, %v4003_v60  ;;  %v3569_v8 = vpop.permute.xlu0 %3568  ;;  %v3303_v42 = vmul.f32 %v12985_v11, %v13193_v41 }
 0x53d   :  { %v4012_v2 = vrot.slane %v3560_v21, %v11792_v32  ;;  %3751 = vperm.xlu1 %11523, %v3296_v3   ;;  %3760 = vperm.xlu0 %11524, %v3299_v26   ;;  %v4027_v9 = vrot.slane %v3569_v8, %v11801_v36 }
 0x53f   :  { %v4013_v59 = vsel %vm1027_vm2, %v4012_v2, %v4008_v24  ;;  %v3302_v2 = vmul.f32 %v12991_v39, %v13193_v41 }
 0x540   :  { %v3566_v23 = vpop.permute.xlu1 %3565  ;;  %v4018_v29 = vsel %vm1034_vm3, %v4017_v5, %v4013_v59  ;;  %v3575_v54 = vpop.permute.xlu0 %3574  ;;  %v3305_v5 = vmul.f32 %v12993_v25, %v13193_v41 }
 0x541   :  { %v4022_v7 = vrot.slane %v3566_v23, %v11798_v35  ;;  %3757 = vperm.xlu1 %11523, %v3298_v28   ;;  %3766 = vperm.xlu0 %11524, %v3301_v27   ;;  %v4037_v24 = vrot.slane %v3575_v54, %v11807_v38 }
 0x543   :  { %v4023_v63 = vsel %vm1041_vm4, %v4022_v7, %v4018_v29  ;;  %v3304_v7 = vmul.f32 %v12999_v53, %v13193_v41 }
 0x544   :  { %v3572_v60 = vpop.permute.xlu1 %3571  ;;  %v4028_v3 = vsel %vm1048_vm5, %v4027_v9, %v4023_v63  ;;  %v3581_v26 = vpop.permute.xlu0 %3580  ;;  %v3307_v9 = vmul.f32 %v13001_v57, %v13193_v41 }
 0x545   :  { %v4032_v21 = vrot.slane %v3572_v60, %v11804_v37  ;;  %3763 = vperm.xlu1 %11523, %v3300_v15   ;;  %3772 = vperm.xlu0 %11524, %v3303_v42   ;;  %v4047_v29 = vrot.slane %v3581_v26, %v11813_v47  ;;  %v13264_v60 = vrot.slane %v11971_v17, %v12926_v1 }
 0x547   :  { %v4033_v8 = vsel %vm1055_vm6, %v4032_v21, %v4028_v3 }
 0x548   :  { %v3578_v59 = vpop.permute.xlu1 %3577  ;;  %v4038_v28 = vsel %vm1062_vm7, %v4037_v24, %v4033_v8  ;;  %v3587_v27 = vpop.permute.xlu0 %3586  ;;  %v3306_v24 = vmul.f32 %v13009_v56, %v13193_v41  ;;  %v3309_v8 = vmul.f32 %v12938_v33, %v13264_v60 }
 0x549   :  { %v4042_v23 = vrot.slane %v3578_v59, %v11810_v46  ;;  %3769 = vperm.xlu1 %11523, %v3302_v2   ;;  %3778 = vperm.xlu0 %11524, %v3305_v5   ;;  %v4057_v26 = vrot.slane %v3587_v27, %v11819_v49 }
 0x54b   :  { %v4043_v54 = vsel %vm1069_vm8, %v4042_v23, %v4038_v28  ;;  %v3308_v23 = vmul.f32 %v13014_v10, %v13193_v41 }
 0x54c   :  { %v3584_v63 = vpop.permute.xlu1 %3583  ;;  %v4048_v15 = vsel %vm1076_vm9, %v4047_v29, %v4043_v54  ;;  %v3593_v42 = vpop.permute.xlu0 %3592  ;;  %v3311_v29 = vmul.f32 %v12949_v12, %v13264_v60 }
 0x54d   :  { %v4052_v3 = vrot.slane %v3584_v63, %v11816_v48  ;;  %3775 = vperm.xlu1 %11523, %v3304_v7   ;;  %3784 = vperm.xlu0 %11524, %v3307_v9   ;;  %v4067_v28 = vrot.slane %v3593_v42, %v11825_v51  ;;  %v3313_v42 = vmul.f32 %v12959_v13, %v13264_v60 }
 0x54e   :  { %v3315_v13 = vmul.f32 %v12969_v18, %v13264_v60 }
 0x54f   :  { %v4053_v21 = vsel %vm16232_vm10, %v4052_v3, %v4048_v15  ;;  %v3310_v15 = vmul.f32 %v12957_v44, %v13264_v60  ;;  %v3312_v44 = vmul.f32 %v12967_v58, %v13264_v60  ;;  %v3317_v58 = vmul.f32 %v12977_v16, %v13264_v60 }
 0x550   :  { %v3590_v2 = vpop.permute.xlu1 %3589  ;;  %v4058_v5 = vsel %vm1090_vm11, %v4057_v26, %v4053_v21  ;;  %v3599_v59 = vpop.permute.xlu0 %3598 }
 0x551   :  { %v4062_v1 = vrot.slane %v3590_v2, %v11822_v50  ;;  %3781 = vperm.xlu1 %11523, %v3306_v24   ;;  %3790 = vperm.xlu0 %11524, %v3309_v8   ;;  %v4077_v26 = vrot.slane %v3599_v59, %v11783_v22 }
 0x553   :  { %v4063_v27 = vsel %vm1097_vm12, %v4062_v1, %v4058_v5 }
 0x554   :  { %v3596_v54 = vpop.permute.xlu1 %3595  ;;  %v4068_v33 = vsel %vm1104_vm13, %v4067_v28, %v4063_v27  ;;  %v3605_v7 = vpop.permute.xlu0 %3604  ;;  %v3314_v27 = vmul.f32 %v12975_v40, %v13264_v60  ;;  %v3319_v40 = vmul.f32 %v12985_v11, %v13264_v60 }
 0x555   :  { %v4072_v9 = vrot.slane %v3596_v54, %v11828_v52  ;;  %3787 = vperm.xlu1 %11523, %v3308_v23   ;;  %3796 = vperm.xlu0 %11524, %v3311_v29   ;;  %v4086_v24 = vrot.slane %v3605_v7, %v11789_v31 }
 0x557   :  { %v4073_v63 = vsel %vm1111_vm14, %v4072_v9, %v4068_v33  ;;  %v3316_v9 = vmul.f32 %v12983_v62, %v13264_v60  ;;  %v3321_v62 = vmul.f32 %v12993_v25, %v13264_v60 }
 0x558   :  { %v13290_v41 = vsel %vm16234_vm15, %v4073_v63, %v13219_v45  ;;  %v3602_v12 = vpop.permute.xlu1 %3601  ;;  %v3611_v3 = vpop.permute.xlu0 %3610  ;;  %vm16235_vm15 = vcmask 1043459  }
 0x559   :  { %v4081_v21 = vrot.slane %v3602_v12, %v11786_v30  ;;  %3793 = vperm.xlu1 %11523, %v3310_v15   ;;  %3802 = vperm.xlu0 %11524, %v3313_v42   ;;  %v4096_v1 = vrot.slane %v3611_v3, %v11795_v34 }
 0x55b   :  { %v4082_v8 = vsel %vm1013_vm0, %v4081_v21, %v4077_v26  ;;  %v3318_v26 = vmul.f32 %v12991_v39, %v13264_v60  ;;  %v3323_v39 = vmul.f32 %v13001_v57, %v13264_v60 }
 0x55c   :  { %v3608_v45 = vpop.permute.xlu1 %3607  ;;  %v4087_v2 = vsel %vm1020_vm1, %v4086_v24, %v4082_v8  ;;  %v3617_v5 = vpop.permute.xlu0 %3616 }
 0x55d   :  { %v4091_v59 = vrot.slane %v3608_v45, %v11792_v32  ;;  %3799 = vperm.xlu1 %11523, %v3312_v44   ;;  %3808 = vperm.xlu0 %11524, %v3315_v13   ;;  %v4106_v33 = vrot.slane %v3617_v5, %v11801_v36  ;;  %v3320_v45 = vmul.f32 %v12999_v53, %v13264_v60 }
 0x55e   :  { %v3322_v53 = vmul.f32 %v13009_v56, %v13264_v60 }
 0x55f   :  { %v4092_v28 = vsel %vm1027_vm2, %v4091_v59, %v4087_v2 }
 0x560   :  { %v3614_v23 = vpop.permute.xlu1 %3613  ;;  %v4097_v18 = vsel %vm1034_vm3, %v4096_v1, %v4092_v28  ;;  %v3623_v29 = vpop.permute.xlu0 %3622  ;;  %v13335_v28 = vld [vmem:[#allocation7 + $0x3] ss:$0 sm:$0xff] }
 0x561   :  { %v4101_v54 = vrot.slane %v3614_v23, %v11798_v35  ;;  %3805 = vperm.xlu1 %11523, %v3314_v27   ;;  %3814 = vperm.xlu0 %11524, %v3317_v58   ;;  %v4116_v12 = vrot.slane %v3623_v29, %v11807_v38 }
 0x563   :  { %v4102_v7 = vsel %vm1041_vm4, %v4101_v54, %v4097_v18 }
 0x564   :  { %v3620_v63 = vpop.permute.xlu1 %3619  ;;  %v4107_v16 = vsel %vm1048_vm5, %v4106_v33, %v4102_v7  ;;  %v3629_v15 = vpop.permute.xlu0 %3628  ;;  %v3324_v33 = vmul.f32 %v13014_v10, %v13264_v60 }
 0x565   :  { %v4111_v42 = vrot.slane %v3620_v63, %v11804_v37  ;;  %3811 = vperm.xlu1 %11523, %v3316_v9   ;;  %3820 = vperm.xlu0 %11524, %v3319_v40   ;;  %v4126_v44 = vrot.slane %v3629_v15, %v11813_v47 }
 0x567   :  { %v4112_v3 = vsel %vm1055_vm6, %v4111_v42, %v4107_v16 }
 0x568   :  { %v3626_v21 = vpop.permute.xlu1 %3625  ;;  %v4117_v11 = vsel %vm1062_vm7, %v4116_v12, %v4112_v3  ;;  %v3635_v24 = vpop.permute.xlu0 %3634 }
 0x569   :  { %v4121_v8 = vrot.slane %v3626_v21, %v11810_v46  ;;  %3817 = vperm.xlu1 %11523, %v3318_v26   ;;  %3826 = vperm.xlu0 %11524, %v3321_v62   ;;  %v4136_v1 = vrot.slane %v3635_v24, %v11819_v49 }
 0x56b   :  { %v4122_v13 = vsel %vm1069_vm8, %v4121_v8, %v4117_v11 }
 0x56c   :  { %v3632_v2 = vpop.permute.xlu1 %3631  ;;  %v4127_v25 = vsel %vm1076_vm9, %v4126_v44, %v4122_v13  ;;  %v3641_v5 = vpop.permute.xlu0 %3640 }
 0x56d   :  { %v4131_v59 = vrot.slane %v3632_v2, %v11816_v48  ;;  %3823 = vperm.xlu1 %11523, %v3320_v45   ;;  %3832 = vperm.xlu0 %11524, %v3323_v39   ;;  %v4146_v29 = vrot.slane %v3641_v5, %v11825_v51 }
 0x56f   :  { %v4132_v27 = vsel %vm16232_vm10, %v4131_v59, %v4127_v25 }
 0x570   :  { %v3638_v58 = vpop.permute.xlu1 %3637  ;;  %v4137_v57 = vsel %vm1090_vm11, %v4136_v1, %v4132_v27  ;;  %v3647_v23 = vpop.permute.xlu0 %3646 }
 0x571   :  { %v4141_v18 = vrot.slane %v3638_v58, %v11822_v50  ;;  %3829 = vperm.xlu1 %11523, %v3322_v53   ;;  %4517 = vbcast.lane.b32.xlu0 %v13335_v28, 256  ;;  %v4156_v12 = vrot.slane %v3647_v23, %v11783_v22 }
 0x573   :  { %v4142_v54 = vsel %vm1097_vm12, %v4141_v18, %v4137_v57 }
 0x574   :  { %v3644_v7 = vpop.permute.xlu1 %3643  ;;  %v4147_v9 = vsel %vm1104_vm13, %v4146_v29, %v4142_v54  ;;  %v3653_v56 = vpop.permute.xlu0 %3652 }
 0x575   :  { %v4151_v40 = vrot.slane %v3644_v7, %v11828_v52  ;;  %3835 = vperm.xlu1 %11523, %v3324_v33   ;;  %4525 = vbcast.lane.b32.xlu0 %v13335_v28, 272  ;;  %v4165_v60 = vrot.slane %v3653_v56, %v11789_v31 }
 0x577   :  { %v4152_v63 = vsel %vm1111_vm14, %v4151_v40, %v4147_v9 }
 0x578   :  { %v13353_v16 = vsel %vm16235_vm15, %v4152_v63, %v13290_v41  ;;  %v3650_v15 = vpop.permute.xlu1 %3649  ;;  %v3659_v42 = vpop.permute.xlu0 %3658  ;;  %vm16236_vm15 = vcmask 1044484  }
 0x579   :  { %v4160_v10 = vrot.slane %v3650_v15, %v11786_v30  ;;  %4521 = vbcast.lane.b32.xlu1 %v13335_v28, 264  ;;  %4533 = vbcast.lane.b32.xlu0 %v13335_v28, 288  ;;  %v4175_v11 = vrot.slane %v3659_v42, %v11795_v34 }
 0x57b   :  { %v4161_v3 = vsel %vm1013_vm0, %v4160_v10, %v4156_v12 }
 0x57c   :  { %v3656_v26 = vpop.permute.xlu1 %3655  ;;  %v4166_v62 = vsel %vm1020_vm1, %v4165_v60, %v4161_v3  ;;  %v3665_v21 = vpop.permute.xlu0 %3664 }
 0x57d   :  { %v4170_v41 = vrot.slane %v3656_v26, %v11792_v32  ;;  %4529 = vbcast.lane.b32.xlu1 %v13335_v28, 280  ;;  %4541 = vbcast.lane.b32.xlu0 %v13335_v28, 304  ;;  %v4185_v39 = vrot.slane %v3665_v21, %v11801_v36 }
 0x57f   :  { %v4171_v24 = vsel %vm1027_vm2, %v4170_v41, %v4166_v62 }
 0x580   :  { %v3662_v8 = vpop.permute.xlu1 %3661  ;;  %v4176_v44 = vsel %vm1034_vm3, %v4175_v11, %v4171_v24  ;;  %v3671_v13 = vpop.permute.xlu0 %3670 }
 0x581   :  { %v4180_v45 = vrot.slane %v3662_v8, %v11798_v35  ;;  %4537 = vbcast.lane.b32.xlu1 %v13335_v28, 296  ;;  %4549 = vbcast.lane.b32.xlu0 %v13335_v28, 320  ;;  %v4195_v27 = vrot.slane %v3671_v13, %v11807_v38 }
 0x583   :  { %v4181_v2 = vsel %vm1041_vm4, %v4180_v45, %v4176_v44 }
 0x584   :  { %v3668_v25 = vpop.permute.xlu1 %3667  ;;  %v4186_v5 = vsel %vm1048_vm5, %v4185_v39, %v4181_v2  ;;  %v3677_v59 = vpop.permute.xlu0 %3676 }
 0x585   :  { %v4190_v1 = vrot.slane %v3668_v25, %v11804_v37  ;;  %4545 = vbcast.lane.b32.xlu1 %v13335_v28, 312  ;;  %4557 = vbcast.lane.b32.xlu0 %v13335_v28, 336  ;;  %v4205_v29 = vrot.slane %v3677_v59, %v11813_v47 }
 0x587   :  { %v4191_v53 = vsel %vm1055_vm6, %v4190_v1, %v4186_v5 }
 0x588   :  { %v3674_v58 = vpop.permute.xlu1 %3673  ;;  %v4196_v57 = vsel %vm1062_vm7, %v4195_v27, %v4191_v53  ;;  %v3683_v23 = vpop.permute.xlu0 %3682 }
 0x589   :  { %v4200_v18 = vrot.slane %v3674_v58, %v11810_v46  ;;  %4553 = vbcast.lane.b32.xlu1 %v13335_v28, 328  ;;  %4565 = vbcast.lane.b32.xlu0 %v13335_v28, 352  ;;  %v4215_v40 = vrot.slane %v3683_v23, %v11819_v49 }
 0x58b   :  { %v4201_v54 = vsel %vm1069_vm8, %v4200_v18, %v4196_v57 }
 0x58c   :  { %v3680_v33 = vpop.permute.xlu1 %3679  ;;  %v4206_v7 = vsel %vm1076_vm9, %v4205_v29, %v4201_v54  ;;  %v3689_v9 = vpop.permute.xlu0 %3688 }
 0x58d   :  { %v4210_v56 = vrot.slane %v3680_v33, %v11816_v48  ;;  %4561 = vbcast.lane.b32.xlu1 %v13335_v28, 344  ;;  %4573 = vbcast.lane.b32.xlu0 %v13335_v28, 368  ;;  %v4225_v60 = vrot.slane %v3689_v9, %v11825_v51 }
 0x58f   :  { %v4211_v63 = vsel %vm16232_vm10, %v4210_v56, %v4206_v7 }
 0x590   :  { %v3686_v15 = vpop.permute.xlu1 %3685  ;;  %v4216_v42 = vsel %vm1090_vm11, %v4215_v40, %v4211_v63  ;;  %v3695_v12 = vpop.permute.xlu0 %3694 }
 0x591   :  { %v4220_v10 = vrot.slane %v3686_v15, %v11822_v50  ;;  %4569 = vbcast.lane.b32.xlu1 %v13335_v28, 360  ;;  %v4235_v13 = vrot.slane %v3695_v12, %v11783_v22 }
 0x593   :  { %v4221_v3 = vsel %vm1097_vm12, %v4220_v10, %v4216_v42 }
 0x594   :  { %v3692_v26 = vpop.permute.xlu1 %3691  ;;  %v4226_v62 = vsel %vm1104_vm13, %v4225_v60, %v4221_v3  ;;  %v3701_v21 = vpop.permute.xlu0 %3700 }
 0x595   :  { %v4230_v41 = vrot.slane %v3692_v26, %v11828_v52  ;;  %4577 = vbcast.lane.b32.xlu1 %v13335_v28, 376  ;;  %v4244_v39 = vrot.slane %v3701_v21, %v11789_v31 }
 0x597   :  { %v4231_v11 = vsel %vm1111_vm14, %v4230_v41, %v4226_v62 }
 0x598   :  { %v4472_v24 = vsel %vm16236_vm15, %v4231_v11, %v13353_v16  ;;  %v3698_v8 = vpop.permute.xlu1 %3697  ;;  %v3707_v44 = vpop.permute.xlu0 %3706  ;;  %vm16237_vm15 = vcmask 1045509  }
 0x599   :  { %v4239_v45 = vrot.slane %v3698_v8, %v11786_v30  ;;  %v4254_v1 = vrot.slane %v3707_v44, %v11795_v34 }
 0x59b   :  { %v4240_v2 = vsel %vm1013_vm0, %v4239_v45, %v4235_v13 }
 0x59c   :  { %v3704_v25 = vpop.permute.xlu1 %3703  ;;  %v4245_v5 = vsel %vm1020_vm1, %v4244_v39, %v4240_v2  ;;  %v3713_v59 = vpop.permute.xlu0 %3712 }
 0x59d   :  { %v4249_v28 = vrot.slane %v3704_v25, %v11792_v32  ;;  %v4264_v23 = vrot.slane %v3713_v59, %v11801_v36 }
 0x59f   :  { %v4250_v16 = vsel %vm1027_vm2, %v4249_v28, %v4245_v5 }
 0x5a0   :  { %v3710_v27 = vpop.permute.xlu1 %3709  ;;  %v4255_v53 = vsel %vm1034_vm3, %v4254_v1, %v4250_v16  ;;  %v3719_v58 = vpop.permute.xlu0 %3718 }
 0x5a1   :  { %v4259_v57 = vrot.slane %v3710_v27, %v11798_v35  ;;  %v4274_v9 = vrot.slane %v3719_v58, %v11807_v38 }
 0x5a3   :  { %v4260_v18 = vsel %vm1041_vm4, %v4259_v57, %v4255_v53 }
 0x5a4   :  { %v3716_v29 = vpop.permute.xlu1 %3715  ;;  %v4265_v54 = vsel %vm1048_vm5, %v4264_v23, %v4260_v18  ;;  %v3725_v33 = vpop.permute.xlu0 %3724 }
 0x5a5   :  { %v4269_v7 = vrot.slane %v3716_v29, %v11804_v37  ;;  %v4284_v12 = vrot.slane %v3725_v33, %v11813_v47 }
 0x5a7   :  { %v4270_v56 = vsel %vm1055_vm6, %v4269_v7, %v4265_v54 }
 0x5a8   :  { %v3722_v40 = vpop.permute.xlu1 %3721  ;;  %v4275_v63 = vsel %vm1062_vm7, %v4274_v9, %v4270_v56  ;;  %v3731_v15 = vpop.permute.xlu0 %3730 }
 0x5a9   :  { %v4279_v42 = vrot.slane %v3722_v40, %v11810_v46  ;;  %v4294_v21 = vrot.slane %v3731_v15, %v11819_v49 }
 0x5ab   :  { %v4280_v10 = vsel %vm1069_vm8, %v4279_v42, %v4275_v63 }
 0x5ac   :  { %v3728_v60 = vpop.permute.xlu1 %3727  ;;  %v4285_v3 = vsel %vm1076_vm9, %v4284_v12, %v4280_v10  ;;  %v3737_v26 = vpop.permute.xlu0 %3736 }
 0x5ad   :  { %v4289_v62 = vrot.slane %v3728_v60, %v11816_v48  ;;  %v4304_v45 = vrot.slane %v3737_v26, %v11825_v51 }
 0x5af   :  { %v4290_v41 = vsel %vm16232_vm10, %v4289_v62, %v4285_v3 }
 0x5b0   :  { %v3734_v11 = vpop.permute.xlu1 %3733  ;;  %v4295_v8 = vsel %vm1090_vm11, %v4294_v21, %v4290_v41  ;;  %v3743_v44 = vpop.permute.xlu0 %3742 }
 0x5b1   :  { %v4299_v13 = vrot.slane %v3734_v11, %v11822_v50  ;;  %v4314_v53 = vrot.slane %v3743_v44, %v11783_v22 }
 0x5b3   :  { %v4300_v39 = vsel %vm1097_vm12, %v4299_v13, %v4295_v8 }
 0x5b4   :  { %v3740_v2 = vpop.permute.xlu1 %3739  ;;  %v4305_v25 = vsel %vm1104_vm13, %v4304_v45, %v4300_v39  ;;  %v3749_v5 = vpop.permute.xlu0 %3748 }
 0x5b5   :  { %v4309_v59 = vrot.slane %v3740_v2, %v11828_v52  ;;  %v4323_v57 = vrot.slane %v3749_v5, %v11789_v31 }
 0x5b7   :  { %v4310_v28 = vsel %vm1111_vm14, %v4309_v59, %v4305_v25 }
 0x5b8   :  { %v4473_v1 = vsel %vm16237_vm15, %v4310_v28, %v4472_v24  ;;  %v3746_v16 = vpop.permute.xlu1 %3745  ;;  %v3755_v27 = vpop.permute.xlu0 %3754  ;;  %vm16238_vm15 = vcmask 1046534  }
 0x5b9   :  { %v4318_v58 = vrot.slane %v3746_v16, %v11786_v30  ;;  %v4333_v7 = vrot.slane %v3755_v27, %v11795_v34 }
 0x5bb   :  { %v4319_v23 = vsel %vm1013_vm0, %v4318_v58, %v4314_v53 }
 0x5bc   :  { %v3752_v18 = vpop.permute.xlu1 %3751  ;;  %v4324_v29 = vsel %vm1020_vm1, %v4323_v57, %v4319_v23  ;;  %v3761_v54 = vpop.permute.xlu0 %3760 }
 0x5bd   :  { %v4328_v33 = vrot.slane %v3752_v18, %v11792_v32  ;;  %v4343_v15 = vrot.slane %v3761_v54, %v11801_v36 }
 0x5bf   :  { %v4329_v24 = vsel %vm1027_vm2, %v4328_v33, %v4324_v29 }
 0x5c0   :  { %v3758_v9 = vpop.permute.xlu1 %3757  ;;  %v4334_v56 = vsel %vm1034_vm3, %v4333_v7, %v4329_v24  ;;  %v3767_v40 = vpop.permute.xlu0 %3766 }
 0x5c1   :  { %v4338_v63 = vrot.slane %v3758_v9, %v11798_v35  ;;  %v4353_v26 = vrot.slane %v3767_v40, %v11807_v38 }
 0x5c3   :  { %v4339_v42 = vsel %vm1041_vm4, %v4338_v63, %v4334_v56 }
 0x5c4   :  { %v3764_v12 = vpop.permute.xlu1 %3763  ;;  %v4344_v10 = vsel %vm1048_vm5, %v4343_v15, %v4339_v42  ;;  %v3773_v60 = vpop.permute.xlu0 %3772 }
 0x5c5   :  { %v4348_v3 = vrot.slane %v3764_v12, %v11804_v37  ;;  %v4363_v44 = vrot.slane %v3773_v60, %v11813_v47 }
 0x5c7   :  { %v4349_v62 = vsel %vm1055_vm6, %v4348_v3, %v4344_v10 }
 0x5c8   :  { %v3770_v21 = vpop.permute.xlu1 %3769  ;;  %v4354_v41 = vsel %vm1062_vm7, %v4353_v26, %v4349_v62  ;;  %v3779_v11 = vpop.permute.xlu0 %3778 }
 0x5c9   :  { %v4358_v8 = vrot.slane %v3770_v21, %v11810_v46  ;;  %v4373_v5 = vrot.slane %v3779_v11, %v11819_v49 }
 0x5cb   :  { %v4359_v13 = vsel %vm1069_vm8, %v4358_v8, %v4354_v41 }
 0x5cc   :  { %v3776_v45 = vpop.permute.xlu1 %3775  ;;  %v4364_v39 = vsel %vm1076_vm9, %v4363_v44, %v4359_v13  ;;  %v3785_v2 = vpop.permute.xlu0 %3784 }
 0x5cd   :  { %v4368_v25 = vrot.slane %v3776_v45, %v11816_v48  ;;  %v4383_v58 = vrot.slane %v3785_v2, %v11825_v51 }
 0x5cf   :  { %v4369_v59 = vsel %vm16232_vm10, %v4368_v25, %v4364_v39 }
 0x5d0   :  { %v3782_v28 = vpop.permute.xlu1 %3781  ;;  %v4374_v16 = vsel %vm1090_vm11, %v4373_v5, %v4369_v59  ;;  %v3791_v27 = vpop.permute.xlu0 %3790 }
 0x5d1   :  { %v4378_v53 = vrot.slane %v3782_v28, %v11822_v50  ;;  %v4393_v56 = vrot.slane %v3791_v27, %v11783_v22 }
 0x5d3   :  { %v4379_v57 = vsel %vm1097_vm12, %v4378_v53, %v4374_v16  ;;  %v13486_v53 = vsub.s32 3, %v11780_v20 }
 0x5d4   :  { %v3788_v23 = vpop.permute.xlu1 %3787  ;;  %v4384_v18 = vsel %vm1104_vm13, %v4383_v58, %v4379_v57  ;;  %v3797_v29 = vpop.permute.xlu0 %3796 }
 0x5d5   :  { %v4388_v54 = vrot.slane %v3788_v23, %v11828_v52  ;;  %v4402_v63 = vrot.slane %v3797_v29, %v11789_v31 }
 0x5d7   :  { %v4389_v33 = vsel %vm1111_vm14, %v4388_v54, %v4384_v18 }
 0x5d8   :  { %v4474_v7 = vsel %vm16238_vm15, %v4389_v33, %v4473_v1  ;;  %v3794_v24 = vpop.permute.xlu1 %3793  ;;  %v3803_v9 = vpop.permute.xlu0 %3802  ;;  %v4482_v33 = vrot.slane %v11873_v43, %v13486_v53  ;;  %vm16239_vm15 = vcmask 1047559  }
 0x5d9   :  { %v4397_v40 = vrot.slane %v3794_v24, %v11786_v30  ;;  %v4412_v3 = vrot.slane %v3803_v9, %v11795_v34 }
 0x5db   :  { %v4398_v15 = vsel %vm1013_vm0, %v4397_v40, %v4393_v56 }
 0x5dc   :  { %v3800_v42 = vpop.permute.xlu1 %3799  ;;  %v4403_v12 = vsel %vm1020_vm1, %v4402_v63, %v4398_v15  ;;  %v3809_v10 = vpop.permute.xlu0 %3808 }
 0x5dd   :  { %v4407_v60 = vrot.slane %v3800_v42, %v11792_v32  ;;  %v4422_v11 = vrot.slane %v3809_v10, %v11801_v36 }
 0x5df   :  { %v4408_v1 = vsel %vm1027_vm2, %v4407_v60, %v4403_v12 }
 0x5e0   :  { %v3806_v26 = vpop.permute.xlu1 %3805  ;;  %v4413_v62 = vsel %vm1034_vm3, %v4412_v3, %v4408_v1  ;;  %v3815_v21 = vpop.permute.xlu0 %3814 }
 0x5e1   :  { %v4417_v41 = vrot.slane %v3806_v26, %v11798_v35  ;;  %v4432_v2 = vrot.slane %v3815_v21, %v11807_v38 }
 0x5e3   :  { %v4418_v8 = vsel %vm1041_vm4, %v4417_v41, %v4413_v62 }
 0x5e4   :  { %v3812_v44 = vpop.permute.xlu1 %3811  ;;  %v4423_v13 = vsel %vm1048_vm5, %v4422_v11, %v4418_v8  ;;  %v3821_v45 = vpop.permute.xlu0 %3820 }
 0x5e5   :  { %v4427_v39 = vrot.slane %v3812_v44, %v11804_v37  ;;  %v4442_v27 = vrot.slane %v3821_v45, %v11813_v47 }
 0x5e7   :  { %v4428_v25 = vsel %vm1055_vm6, %v4427_v39, %v4423_v13 }
 0x5e8   :  { %v3818_v5 = vpop.permute.xlu1 %3817  ;;  %v4433_v59 = vsel %vm1062_vm7, %v4432_v2, %v4428_v25  ;;  %v3827_v28 = vpop.permute.xlu0 %3826 }
 0x5e9   :  { %v4437_v16 = vrot.slane %v3818_v5, %v11810_v46  ;;  %v4452_v54 = vrot.slane %v3827_v28, %v11819_v49 }
 0x5eb   :  { %v4438_v58 = vsel %vm1069_vm8, %v4437_v16, %v4433_v59 }
 0x5ec   :  { %v3824_v57 = vpop.permute.xlu1 %3823  ;;  %v4443_v23 = vsel %vm1076_vm9, %v4442_v27, %v4438_v58  ;;  %v3833_v18 = vpop.permute.xlu0 %3832 }
 0x5ed   :  { %v4447_v29 = vrot.slane %v3824_v57, %v11816_v48  ;;  %v4462_v42 = vrot.slane %v3833_v18, %v11825_v51 }
 0x5ef   :  { %v4448_v24 = vsel %vm16232_vm10, %v4447_v29, %v4443_v23 }
 0x5f0   :  { %v3830_v9 = vpop.permute.xlu1 %3829  ;;  %v4453_v56 = vsel %vm1090_vm11, %v4452_v54, %v4448_v24  ;;  %v13496_v40 = vpop.permute.xlu0 %4517 }
 0x5f1   :  { %v4457_v63 = vrot.slane %v3830_v9, %v11822_v50  ;;  %v4595_v15 = vmul.f32 %v13496_v40, %v4482_v33 }
 0x5f3   :  { %v4458_v12 = vsel %vm1097_vm12, %v4457_v63, %v4453_v56  ;;  %4852 = vperm.xlu0 %11524, %v4595_v15   ;;  %v4486_v63 = vrot.slane %v11899_v6, %v13486_v53 }
 0x5f4   :  { %v3836_v10 = vpop.permute.xlu1 %3835  ;;  %v4463_v60 = vsel %vm1104_vm13, %v4462_v42, %v4458_v12  ;;  %v13503_v3 = vpop.permute.xlu0 %4525 }
 0x5f5   :  { %v4467_v1 = vrot.slane %v3836_v10, %v11828_v52  ;;  %v4597_v26 = vmul.f32 %v13503_v3, %v4482_v33  ;;  %v4611_v12 = vmul.f32 %v13496_v40, %v4486_v63 }
 0x5f7   :  { %v4468_v62 = vsel %vm1111_vm14, %v4467_v1, %v4463_v60  ;;  %4858 = vperm.xlu0 %11524, %v4597_v26   ;;  %v4613_v1 = vmul.f32 %v13503_v3, %v4486_v63 }
 0x5f8   :  { %v4475_v21 = vsel %vm16239_vm15, %v4468_v62, %v4474_v7  ;;  %v13509_v41 = vpop.permute.xlu1 %4521  ;;  %v13511_v11 = vpop.permute.xlu0 %4533  ;;  %vm16240_vm15 = vmmov %vm16232_vm10 }
 0x5f9   :  { %v13514_v8 = vadd.f32 %v4475_v21, %v12961_v0  ;;  %v4596_v44 = vmul.f32 %v13509_v41, %v4482_v33  ;;  %v4599_v13 = vmul.f32 %v13511_v11, %v4482_v33  ;;  %v4612_v26 = vmul.f32 %v13509_v41, %v4486_v63 }
 0x5fa   :  { %v4615_v62 = vmul.f32 %v13511_v11, %v4486_v63 }
 0x5fb   :  { %4855 = vperm.xlu1 %11523, %v4596_v44   ;;  %4864 = vperm.xlu0 %11524, %v4599_v13  }
 0x5fc   :  { %v13518_v45 = vpop.permute.xlu1 %4529  ;;  %v13520_v39 = vpop.permute.xlu0 %4541 }
 0x5fd   :  { %v4598_v2 = vmul.f32 %v13518_v45, %v4482_v33  ;;  %v4601_v7 = vmul.f32 %v13520_v39, %v4482_v33  ;;  %v4614_v21 = vmul.f32 %v13518_v45, %v4486_v63  ;;  %v4617_v44 = vmul.f32 %v13520_v39, %v4486_v63 }
 0x5ff   :  { %4861 = vperm.xlu1 %11523, %v4598_v2   ;;  %4870 = vperm.xlu0 %11524, %v4601_v7  }
 0x600   :  { %v13524_v25 = vpop.permute.xlu1 %4537  ;;  %v13526_v0 = vpop.permute.xlu0 %4549 }
 0x601   :  { %v4600_v5 = vmul.f32 %v13524_v25, %v4482_v33  ;;  %v4603_v59 = vmul.f32 %v13526_v0, %v4482_v33  ;;  %v4616_v13 = vmul.f32 %v13524_v25, %v4486_v63 }
 0x603   :  { %4867 = vperm.xlu1 %11523, %v4600_v5   ;;  %4876 = vperm.xlu0 %11524, %v4603_v59  }
 0x604   :  { %v13530_v28 = vpop.permute.xlu1 %4545  ;;  %v13532_v16 = vpop.permute.xlu0 %4557 }
 0x605   :  { %v4602_v27 = vmul.f32 %v13530_v28, %v4482_v33  ;;  %v4605_v58 = vmul.f32 %v13532_v16, %v4482_v33  ;;  %v4618_v2 = vmul.f32 %v13530_v28, %v4486_v63  ;;  %v4621_v7 = vmul.f32 %v13532_v16, %v4486_v63 }
 0x607   :  { %4873 = vperm.xlu1 %11523, %v4602_v27   ;;  %4882 = vperm.xlu0 %11524, %v4605_v58  }
 0x608   :  { %v13536_v57 = vpop.permute.xlu1 %4553  ;;  %v13538_v23 = vpop.permute.xlu0 %4565 }
 0x609   :  { %v4604_v18 = vmul.f32 %v13536_v57, %v4482_v33  ;;  %v4607_v29 = vmul.f32 %v13538_v23, %v4482_v33  ;;  %v4620_v5 = vmul.f32 %v13536_v57, %v4486_v63  ;;  %v4623_v59 = vmul.f32 %v13538_v23, %v4486_v63 }
 0x60b   :  { %4879 = vperm.xlu1 %11523, %v4604_v18   ;;  %4888 = vperm.xlu0 %11524, %v4607_v29   ;;  %v4490_v18 = vrot.slane %v11919_v55, %v13486_v53 }
 0x60c   :  { %v13542_v54 = vpop.permute.xlu1 %4561  ;;  %v13544_v24 = vpop.permute.xlu0 %4573 }
 0x60d   :  { %v4606_v9 = vmul.f32 %v13542_v54, %v4482_v33  ;;  %v4609_v56 = vmul.f32 %v13544_v24, %v4482_v33  ;;  %v4622_v27 = vmul.f32 %v13542_v54, %v4486_v63  ;;  %v4625_v58 = vmul.f32 %v13544_v24, %v4486_v63 }
 0x60f   :  { %4885 = vperm.xlu1 %11523, %v4606_v9   ;;  %4894 = vperm.xlu0 %11524, %v4609_v56   ;;  %v4627_v9 = vmul.f32 %v13496_v40, %v4490_v18 }
 0x610   :  { %v13550_v15 = vpop.permute.xlu1 %4569 }
 0x611   :  { %v4608_v42 = vmul.f32 %v13550_v15, %v4482_v33  ;;  %v4624_v29 = vmul.f32 %v13550_v15, %v4486_v63 }
 0x613   :  { %4891 = vperm.xlu1 %11523, %v4608_v42   ;;  %4900 = vperm.xlu0 %11524, %v4611_v12   ;;  %v4629_v42 = vmul.f32 %v13503_v3, %v4490_v18  ;;  %v4628_v12 = vmul.f32 %v13509_v41, %v4490_v18 }
 0x614   :  { %v13554_v10 = vpop.permute.xlu1 %4577 }
 0x615   :  { %v4610_v60 = vmul.f32 %v13554_v10, %v4482_v33  ;;  %v4619_v33 = vmul.f32 %v13526_v0, %v4486_v63  ;;  %v4626_v56 = vmul.f32 %v13554_v10, %v4486_v63  ;;  %v4635_v63 = vmul.f32 %v13526_v0, %v4490_v18 }
 0x617   :  { %4897 = vperm.xlu1 %11523, %v4610_v60   ;;  %4906 = vperm.xlu0 %11524, %v4613_v1   ;;  %v4631_v60 = vmul.f32 %v13511_v11, %v4490_v18  ;;  %v4630_v1 = vmul.f32 %v13518_v45, %v4490_v18 }
 0x61b   :  { %4903 = vperm.xlu1 %11523, %v4612_v26   ;;  %4912 = vperm.xlu0 %11524, %v4615_v62   ;;  %v4633_v26 = vmul.f32 %v13520_v39, %v4490_v18  ;;  %v4632_v62 = vmul.f32 %v13524_v25, %v4490_v18 }
 0x61f   :  { %4909 = vperm.xlu1 %11523, %v4614_v21   ;;  %4918 = vperm.xlu0 %11524, %v4617_v44   ;;  %v4634_v21 = vmul.f32 %v13530_v28, %v4490_v18  ;;  %v4637_v44 = vmul.f32 %v13532_v16, %v4490_v18 }
 0x623   :  { %4915 = vperm.xlu1 %11523, %v4616_v13   ;;  %4924 = vperm.xlu0 %11524, %v4619_v33   ;;  %v4636_v13 = vmul.f32 %v13536_v57, %v4490_v18  ;;  %v4639_v33 = vmul.f32 %v13538_v23, %v4490_v18 }
 0x627   :  { %4921 = vperm.xlu1 %11523, %v4618_v2   ;;  %4930 = vperm.xlu0 %11524, %v4621_v7   ;;  %v4638_v2 = vmul.f32 %v13542_v54, %v4490_v18  ;;  %v4641_v7 = vmul.f32 %v13544_v24, %v4490_v18 }
 0x62b   :  { %4927 = vperm.xlu1 %11523, %v4620_v5   ;;  %4936 = vperm.xlu0 %11524, %v4623_v59   ;;  %v4494_v5 = vrot.slane %v11955_v61, %v13486_v53  ;;  %v4640_v59 = vmul.f32 %v13550_v15, %v4490_v18 }
 0x62f   :  { %4933 = vperm.xlu1 %11523, %v4622_v27   ;;  %4942 = vperm.xlu0 %11524, %v4625_v58   ;;  %v4643_v27 = vmul.f32 %v13496_v40, %v4494_v5  ;;  %v4642_v58 = vmul.f32 %v13554_v10, %v4490_v18  ;;  %v4651_v18 = vmul.f32 %v13526_v0, %v4494_v5 }
 0x633   :  { %4939 = vperm.xlu1 %11523, %v4624_v29   ;;  %4948 = vperm.xlu0 %11524, %v4627_v9   ;;  %v4645_v29 = vmul.f32 %v13503_v3, %v4494_v5  ;;  %v4644_v9 = vmul.f32 %v13509_v41, %v4494_v5 }
 0x637   :  { %4945 = vperm.xlu1 %11523, %v4626_v56   ;;  %4954 = vperm.xlu0 %11524, %v4629_v42   ;;  %v4647_v56 = vmul.f32 %v13511_v11, %v4494_v5  ;;  %v4646_v42 = vmul.f32 %v13518_v45, %v4494_v5 }
 0x63b   :  { %4951 = vperm.xlu1 %11523, %v4628_v12   ;;  %4960 = vperm.xlu0 %11524, %v4631_v60   ;;  %v4649_v12 = vmul.f32 %v13520_v39, %v4494_v5  ;;  %v4648_v60 = vmul.f32 %v13524_v25, %v4494_v5 }
 0x63f   :  { %4957 = vperm.xlu1 %11523, %v4630_v1   ;;  %4966 = vperm.xlu0 %11524, %v4633_v26   ;;  %v4650_v1 = vmul.f32 %v13530_v28, %v4494_v5  ;;  %v4653_v26 = vmul.f32 %v13532_v16, %v4494_v5 }
 0x643   :  { %4963 = vperm.xlu1 %11523, %v4632_v62   ;;  %4972 = vperm.xlu0 %11524, %v4635_v63   ;;  %v4652_v62 = vmul.f32 %v13536_v57, %v4494_v5  ;;  %v4655_v63 = vmul.f32 %v13538_v23, %v4494_v5 }
 0x647   :  { %4969 = vperm.xlu1 %11523, %v4634_v21   ;;  %4978 = vperm.xlu0 %11524, %v4637_v44   ;;  %v4654_v21 = vmul.f32 %v13542_v54, %v4494_v5  ;;  %v4657_v44 = vmul.f32 %v13544_v24, %v4494_v5 }
 0x64b   :  { %4975 = vperm.xlu1 %11523, %v4636_v13   ;;  %4984 = vperm.xlu0 %11524, %v4639_v33   ;;  %v13608_v13 = vrot.slane %v11939_v19, %v13486_v53  ;;  %v4656_v33 = vmul.f32 %v13550_v15, %v4494_v5 }
 0x64f   :  { %4981 = vperm.xlu1 %11523, %v4638_v2   ;;  %4990 = vperm.xlu0 %11524, %v4641_v7   ;;  %v4659_v2 = vmul.f32 %v13496_v40, %v13608_v13 }
 0x653   :  { %4987 = vperm.xlu1 %11523, %v4640_v59   ;;  %4996 = vperm.xlu0 %11524, %v4643_v27   ;;  %v4658_v59 = vmul.f32 %v13554_v10, %v4494_v5  ;;  %v4661_v27 = vmul.f32 %v13503_v3, %v13608_v13 }
 0x657   :  { %4993 = vperm.xlu1 %11523, %v4642_v58   ;;  %5002 = vperm.xlu0 %11524, %v4645_v29   ;;  %v4660_v29 = vmul.f32 %v13509_v41, %v13608_v13 }
 0x65b   :  { %4999 = vperm.xlu1 %11523, %v4644_v9   ;;  %5008 = vperm.xlu0 %11524, %v4647_v56   ;;  %v4663_v9 = vmul.f32 %v13511_v11, %v13608_v13 }
 0x65f   :  { %5005 = vperm.xlu1 %11523, %v4646_v42   ;;  %5014 = vperm.xlu0 %11524, %v4649_v12  }
 0x663   :  { %5011 = vperm.xlu1 %11523, %v4648_v60   ;;  %5020 = vperm.xlu0 %11524, %v4651_v18  }
 0x667   :  { %5017 = vperm.xlu1 %11523, %v4650_v1   ;;  %5026 = vperm.xlu0 %11524, %v4653_v26   ;;  %v4662_v1 = vmul.f32 %v13518_v45, %v13608_v13  ;;  %v4665_v26 = vmul.f32 %v13520_v39, %v13608_v13 }
 0x66b   :  { %5023 = vperm.xlu1 %11523, %v4652_v62   ;;  %5032 = vperm.xlu0 %11524, %v4655_v63  }
 0x66f   :  { %5029 = vperm.xlu1 %11523, %v4654_v21   ;;  %5038 = vperm.xlu0 %11524, %v4657_v44  }
 0x672   :  { %v4853_v7 = vpop.permute.xlu0 %4852 }
 0x673   :  { %5035 = vperm.xlu1 %11523, %v4656_v33   ;;  %5044 = vperm.xlu0 %11524, %v4659_v2   ;;  %v5238_v12 = vrot.slane %v4853_v7, %v11783_v22  ;;  %v4664_v7 = vmul.f32 %v13524_v25, %v13608_v13 }
 0x676   :  { %v4859_v58 = vpop.permute.xlu0 %4858 }
 0x677   :  { %5041 = vperm.xlu1 %11523, %v4658_v59   ;;  %5050 = vperm.xlu0 %11524, %v4661_v27   ;;  %v5247_v5 = vrot.slane %v4859_v58, %v11789_v31  ;;  %v4667_v59 = vmul.f32 %v13526_v0, %v13608_v13 }
 0x67a   :  { %v4856_v56 = vpop.permute.xlu1 %4855  ;;  %v4865_v42 = vpop.permute.xlu0 %4864 }
 0x67b   :  { %v5242_v60 = vrot.slane %v4856_v56, %v11786_v30  ;;  %5047 = vperm.xlu1 %11523, %v4660_v29   ;;  %5056 = vperm.xlu0 %11524, %v4663_v9   ;;  %v5257_v33 = vrot.slane %v4865_v42, %v11795_v34 }
 0x67d   :  { %v5243_v18 = vsel %vm1013_vm0, %v5242_v60, %v5238_v12  ;;  %v4666_v12 = vmul.f32 %v13530_v28, %v13608_v13  ;;  %v4669_v60 = vmul.f32 %v13532_v16, %v13608_v13 }
 0x67e   :  { %v4862_v62 = vpop.permute.xlu1 %4861  ;;  %v5248_v63 = vsel %vm1020_vm1, %v5247_v5, %v5243_v18  ;;  %v4871_v21 = vpop.permute.xlu0 %4870 }
 0x67f   :  { %v5252_v44 = vrot.slane %v4862_v62, %v11792_v32  ;;  %5053 = vperm.xlu1 %11523, %v4662_v1   ;;  %5062 = vperm.xlu0 %11524, %v4665_v26   ;;  %v5267_v56 = vrot.slane %v4871_v21, %v11801_v36  ;;  %v4668_v21 = vmul.f32 %v13536_v57, %v13608_v13 }
 0x681   :  { %v5253_v2 = vsel %vm1027_vm2, %v5252_v44, %v5248_v63  ;;  %v4671_v44 = vmul.f32 %v13538_v23, %v13608_v13 }
 0x682   :  { %v4868_v27 = vpop.permute.xlu1 %4867  ;;  %v5258_v58 = vsel %vm1034_vm3, %v5257_v33, %v5253_v2  ;;  %v4877_v29 = vpop.permute.xlu0 %4876 }
 0x683   :  { %v5262_v9 = vrot.slane %v4868_v27, %v11798_v35  ;;  %5059 = vperm.xlu1 %11523, %v4664_v7   ;;  %5068 = vperm.xlu0 %11524, %v4667_v59   ;;  %v5277_v62 = vrot.slane %v4877_v29, %v11807_v38  ;;  %v4670_v29 = vmul.f32 %v13542_v54, %v13608_v13 }
 0x685   :  { %v5263_v42 = vsel %vm1041_vm4, %v5262_v9, %v5258_v58  ;;  %v4673_v9 = vmul.f32 %v13544_v24, %v13608_v13 }
 0x686   :  { %v4874_v5 = vpop.permute.xlu1 %4873  ;;  %v5268_v18 = vsel %vm1048_vm5, %v5267_v56, %v5263_v42  ;;  %v4883_v1 = vpop.permute.xlu0 %4882 }
 0x687   :  { %v5272_v26 = vrot.slane %v4874_v5, %v11804_v37  ;;  %5065 = vperm.xlu1 %11523, %v4666_v12   ;;  %5074 = vperm.xlu0 %11524, %v4669_v60   ;;  %v5287_v27 = vrot.slane %v4883_v1, %v11813_v47  ;;  %v13663_v60 = vrot.slane %v11961_v4, %v13486_v53 }
 0x689   :  { %v5273_v63 = vsel %vm1055_vm6, %v5272_v26, %v5268_v18  ;;  %v4672_v26 = vmul.f32 %v13550_v15, %v13608_v13 }
 0x68a   :  { %v4880_v33 = vpop.permute.xlu1 %4879  ;;  %v5278_v2 = vsel %vm1062_vm7, %v5277_v62, %v5273_v63  ;;  %v4889_v7 = vpop.permute.xlu0 %4888  ;;  %v4675_v62 = vmul.f32 %v13496_v40, %v13663_v60 }
 0x68b   :  { %v5282_v59 = vrot.slane %v4880_v33, %v11810_v46  ;;  %5071 = vperm.xlu1 %11523, %v4668_v21   ;;  %5080 = vperm.xlu0 %11524, %v4671_v44   ;;  %v5297_v18 = vrot.slane %v4889_v7, %v11819_v49 }
 0x68d   :  { %v5283_v58 = vsel %vm1069_vm8, %v5282_v59, %v5278_v2  ;;  %v4674_v59 = vmul.f32 %v13554_v10, %v13608_v13  ;;  %v4679_v13 = vmul.f32 %v13511_v11, %v13663_v60 }
 0x68e   :  { %v4886_v56 = vpop.permute.xlu1 %4885  ;;  %v5288_v42 = vsel %vm1076_vm9, %v5287_v27, %v5283_v58  ;;  %v4895_v12 = vpop.permute.xlu0 %4894  ;;  %v4677_v27 = vmul.f32 %v13503_v3, %v13663_v60 }
 0x68f   :  { %v5292_v5 = vrot.slane %v4886_v56, %v11816_v48  ;;  %5077 = vperm.xlu1 %11523, %v4670_v29   ;;  %5086 = vperm.xlu0 %11524, %v4673_v9   ;;  %v5307_v2 = vrot.slane %v4895_v12, %v11825_v51  ;;  %v4676_v12 = vmul.f32 %v13509_v41, %v13663_v60 }
 0x691   :  { %v5293_v1 = vsel %vm16232_vm10, %v5292_v5, %v5288_v42  ;;  %vm16241_vm10 = vcmask 1041409  }
 0x692   :  { %v4892_v63 = vpop.permute.xlu1 %4891  ;;  %v5298_v21 = vsel %vm1090_vm11, %v5297_v18, %v5293_v1  ;;  %v4901_v44 = vpop.permute.xlu0 %4900 }
 0x693   :  { %v5302_v33 = vrot.slane %v4892_v63, %v11822_v50  ;;  %5083 = vperm.xlu1 %11523, %v4672_v26   ;;  %5092 = vperm.xlu0 %11524, %v4675_v62   ;;  %v5317_v1 = vrot.slane %v4901_v44, %v11783_v22 }
 0x695   :  { %v5303_v7 = vsel %vm1097_vm12, %v5302_v33, %v5298_v21  ;;  %v4678_v21 = vmul.f32 %v13518_v45, %v13663_v60  ;;  %v4681_v33 = vmul.f32 %v13520_v39, %v13663_v60 }
 0x696   :  { %v4898_v58 = vpop.permute.xlu1 %4897  ;;  %v5308_v29 = vsel %vm1104_vm13, %v5307_v2, %v5303_v7  ;;  %v4907_v9 = vpop.permute.xlu0 %4906 }
 0x697   :  { %v5312_v56 = vrot.slane %v4898_v58, %v11828_v52  ;;  %5089 = vperm.xlu1 %11523, %v4674_v59   ;;  %5098 = vperm.xlu0 %11524, %v4677_v27   ;;  %v5326_v62 = vrot.slane %v4907_v9, %v11789_v31  ;;  %v4683_v9 = vmul.f32 %v13526_v0, %v13663_v60 }
 0x699   :  { %v13683_v42 = vsel %vm1111_vm14, %v5312_v56, %v5308_v29  ;;  %v4680_v29 = vmul.f32 %v13524_v25, %v13663_v60 }
 0x69a   :  { %v4904_v5 = vpop.permute.xlu1 %4903  ;;  %v4913_v18 = vpop.permute.xlu0 %4912 }
 0x69b   :  { %v5321_v26 = vrot.slane %v4904_v5, %v11786_v30  ;;  %5095 = vperm.xlu1 %11523, %v4676_v12   ;;  %5104 = vperm.xlu0 %11524, %v4679_v13   ;;  %v5336_v27 = vrot.slane %v4913_v18, %v11795_v34 }
 0x69d   :  { %v5322_v63 = vsel %vm1013_vm0, %v5321_v26, %v5317_v1  ;;  %v4682_v26 = vmul.f32 %v13530_v28, %v13663_v60 }
 0x69e   :  { %v4910_v2 = vpop.permute.xlu1 %4909  ;;  %v5327_v7 = vsel %vm1020_vm1, %v5326_v62, %v5322_v63  ;;  %v4919_v59 = vpop.permute.xlu0 %4918  ;;  %v4685_v62 = vmul.f32 %v13532_v16, %v13663_v60 }
 0x69f   :  { %v5331_v44 = vrot.slane %v4910_v2, %v11792_v32  ;;  %5101 = vperm.xlu1 %11523, %v4678_v21   ;;  %5110 = vperm.xlu0 %11524, %v4681_v33   ;;  %v5346_v1 = vrot.slane %v4919_v59, %v11801_v36 }
 0x6a1   :  { %v5332_v58 = vsel %vm1027_vm2, %v5331_v44, %v5327_v7  ;;  %v4684_v44 = vmul.f32 %v13536_v57, %v13663_v60 }
 0x6a2   :  { %v4916_v56 = vpop.permute.xlu1 %4915  ;;  %v5337_v12 = vsel %vm1034_vm3, %v5336_v27, %v5332_v58  ;;  %v4925_v13 = vpop.permute.xlu0 %4924  ;;  %v4687_v27 = vmul.f32 %v13538_v23, %v13663_v60 }
 0x6a3   :  { %v5341_v5 = vrot.slane %v4916_v56, %v11798_v35  ;;  %5107 = vperm.xlu1 %11523, %v4680_v29   ;;  %5116 = vperm.xlu0 %11524, %v4683_v9   ;;  %v5356_v7 = vrot.slane %v4925_v13, %v11807_v38 }
 0x6a5   :  { %v5342_v18 = vsel %vm1041_vm4, %v5341_v5, %v5337_v12  ;;  %v4686_v5 = vmul.f32 %v13542_v54, %v13663_v60 }
 0x6a6   :  { %v4922_v63 = vpop.permute.xlu1 %4921  ;;  %v5347_v21 = vsel %vm1048_vm5, %v5346_v1, %v5342_v18  ;;  %v4931_v33 = vpop.permute.xlu0 %4930  ;;  %v4689_v1 = vmul.f32 %v13544_v24, %v13663_v60 }
 0x6a7   :  { %v5351_v2 = vrot.slane %v4922_v63, %v11804_v37  ;;  %5113 = vperm.xlu1 %11523, %v4682_v26   ;;  %5122 = vperm.xlu0 %11524, %v4685_v62   ;;  %v5366_v12 = vrot.slane %v4931_v33, %v11813_v47  ;;  %v13732_v63 = vrot.slane %v11969_v14, %v13486_v53 }
 0x6a9   :  { %v5352_v59 = vsel %vm1055_vm6, %v5351_v2, %v5347_v21 }
 0x6aa   :  { %v4928_v58 = vpop.permute.xlu1 %4927  ;;  %v5357_v29 = vsel %vm1062_vm7, %v5356_v7, %v5352_v59  ;;  %v4937_v9 = vpop.permute.xlu0 %4936  ;;  %v4688_v7 = vmul.f32 %v13550_v15, %v13663_v60  ;;  %v4691_v59 = vmul.f32 %v13496_v40, %v13732_v63 }
 0x6ab   :  { %v5361_v56 = vrot.slane %v4928_v58, %v11810_v46  ;;  %5119 = vperm.xlu1 %11523, %v4684_v44   ;;  %5128 = vperm.xlu0 %11524, %v4687_v27   ;;  %v5376_v33 = vrot.slane %v4937_v9, %v11819_v49 }
 0x6ad   :  { %v5362_v13 = vsel %vm1069_vm8, %v5361_v56, %v5357_v29 }
 0x6ae   :  { %v4934_v18 = vpop.permute.xlu1 %4933  ;;  %v5367_v26 = vsel %vm1076_vm9, %v5366_v12, %v5362_v13  ;;  %v4943_v62 = vpop.permute.xlu0 %4942  ;;  %v4690_v12 = vmul.f32 %v13554_v10, %v13663_v60  ;;  %v4693_v13 = vmul.f32 %v13503_v3, %v13732_v63 }
 0x6af   :  { %v5371_v21 = vrot.slane %v4934_v18, %v11816_v48  ;;  %5125 = vperm.xlu1 %11523, %v4686_v5   ;;  %5134 = vperm.xlu0 %11524, %v4689_v1   ;;  %v5386_v56 = vrot.slane %v4943_v62, %v11825_v51  ;;  %v4692_v62 = vmul.f32 %v13509_v41, %v13732_v63 }
 0x6b1   :  { %v5372_v2 = vsel %vm16240_vm15, %v5371_v21, %v5367_v26 }
 0x6b2   :  { %v4940_v44 = vpop.permute.xlu1 %4939  ;;  %v5377_v27 = vsel %vm1090_vm11, %v5376_v33, %v5372_v2  ;;  %v4949_v58 = vpop.permute.xlu0 %4948  ;;  %v4695_v33 = vmul.f32 %v13511_v11, %v13732_v63 }
 0x6b3   :  { %v5381_v29 = vrot.slane %v4940_v44, %v11822_v50  ;;  %5131 = vperm.xlu1 %11523, %v4688_v7   ;;  %5140 = vperm.xlu0 %11524, %v4691_v59   ;;  %v5396_v59 = vrot.slane %v4949_v58, %v11783_v22 }
 0x6b5   :  { %v5382_v9 = vsel %vm1097_vm12, %v5381_v29, %v5377_v27 }
 0x6b6   :  { %v4946_v5 = vpop.permute.xlu1 %4945  ;;  %v5387_v1 = vsel %vm1104_vm13, %v5386_v56, %v5382_v9  ;;  %v4955_v18 = vpop.permute.xlu0 %4954  ;;  %v4694_v56 = vmul.f32 %v13518_v45, %v13732_v63  ;;  %v4697_v9 = vmul.f32 %v13520_v39, %v13732_v63 }
 0x6b7   :  { %v5391_v26 = vrot.slane %v4946_v5, %v11828_v52  ;;  %5137 = vperm.xlu1 %11523, %v4690_v12   ;;  %5146 = vperm.xlu0 %11524, %v4693_v13   ;;  %v5405_v27 = vrot.slane %v4955_v18, %v11789_v31  ;;  %v4696_v18 = vmul.f32 %v13524_v25, %v13732_v63 }
 0x6b9   :  { %v5392_v21 = vsel %vm1111_vm14, %v5391_v26, %v5387_v1  ;;  %v4699_v26 = vmul.f32 %v13526_v0, %v13732_v63 }
 0x6ba   :  { %v13758_v60 = vsel %vm16241_vm10, %v5392_v21, %v13683_v42  ;;  %v4952_v2 = vpop.permute.xlu1 %4951  ;;  %v4961_v7 = vpop.permute.xlu0 %4960  ;;  %vm16242_vm10 = vcmask 1042434  }
 0x6bb   :  { %v5400_v44 = vrot.slane %v4952_v2, %v11786_v30  ;;  %5143 = vperm.xlu1 %11523, %v4692_v62   ;;  %5152 = vperm.xlu0 %11524, %v4695_v33   ;;  %v5415_v5 = vrot.slane %v4961_v7, %v11795_v34 }
 0x6bd   :  { %v5401_v29 = vsel %vm1013_vm0, %v5400_v44, %v5396_v59  ;;  %v4698_v44 = vmul.f32 %v13530_v28, %v13732_v63 }
 0x6be   :  { %v4958_v42 = vpop.permute.xlu1 %4957  ;;  %v5406_v12 = vsel %vm1020_vm1, %v5405_v27, %v5401_v29  ;;  %v4967_v13 = vpop.permute.xlu0 %4966  ;;  %v4701_v27 = vmul.f32 %v13532_v16, %v13732_v63 }
 0x6bf   :  { %v5410_v58 = vrot.slane %v4958_v42, %v11792_v32  ;;  %5149 = vperm.xlu1 %11523, %v4694_v56   ;;  %5158 = vperm.xlu0 %11524, %v4697_v9   ;;  %v5425_v59 = vrot.slane %v4967_v13, %v11801_v36 }
 0x6c1   :  { %v5411_v1 = vsel %vm1027_vm2, %v5410_v58, %v5406_v12  ;;  %v4700_v58 = vmul.f32 %v13536_v57, %v13732_v63 }
 0x6c2   :  { %v4964_v21 = vpop.permute.xlu1 %4963  ;;  %v5416_v62 = vsel %vm1034_vm3, %v5415_v5, %v5411_v1  ;;  %v4973_v33 = vpop.permute.xlu0 %4972  ;;  %v4703_v5 = vmul.f32 %v13538_v23, %v13732_v63 }
 0x6c3   :  { %v5420_v2 = vrot.slane %v4964_v21, %v11798_v35  ;;  %5155 = vperm.xlu1 %11523, %v4696_v18   ;;  %5164 = vperm.xlu0 %11524, %v4699_v26   ;;  %v5435_v12 = vrot.slane %v4973_v33, %v11807_v38 }
 0x6c5   :  { %v5421_v7 = vsel %vm1041_vm4, %v5420_v2, %v5416_v62  ;;  %v4702_v2 = vmul.f32 %v13542_v54, %v13732_v63 }
 0x6c6   :  { %v4970_v29 = vpop.permute.xlu1 %4969  ;;  %v5426_v56 = vsel %vm1048_vm5, %v5425_v59, %v5421_v7  ;;  %v4979_v9 = vpop.permute.xlu0 %4978  ;;  %v4705_v59 = vmul.f32 %v13544_v24, %v13732_v63 }
 0x6c7   :  { %v5430_v42 = vrot.slane %v4970_v29, %v11804_v37  ;;  %5161 = vperm.xlu1 %11523, %v4698_v44   ;;  %5170 = vperm.xlu0 %11524, %v4701_v27   ;;  %v5445_v62 = vrot.slane %v4979_v9, %v11813_v47  ;;  %v13803_v29 = vrot.slane %v11971_v17, %v13486_v53 }
 0x6c9   :  { %v5431_v13 = vsel %vm1055_vm6, %v5430_v42, %v5426_v56 }
 0x6ca   :  { %v4976_v1 = vpop.permute.xlu1 %4975  ;;  %v5436_v18 = vsel %vm1062_vm7, %v5435_v12, %v5431_v13  ;;  %v4985_v26 = vpop.permute.xlu0 %4984  ;;  %v4704_v12 = vmul.f32 %v13550_v15, %v13732_v63  ;;  %v4707_v13 = vmul.f32 %v13496_v40, %v13803_v29 }
 0x6cb   :  { %v5440_v21 = vrot.slane %v4976_v1, %v11810_v46  ;;  %5167 = vperm.xlu1 %11523, %v4700_v58   ;;  %5176 = vperm.xlu0 %11524, %v4703_v5   ;;  %v5455_v9 = vrot.slane %v4985_v26, %v11819_v49 }
 0x6cd   :  { %v5441_v33 = vsel %vm1069_vm8, %v5440_v21, %v5436_v18  ;;  %v4706_v21 = vmul.f32 %v13554_v10, %v13732_v63 }
 0x6ce   :  { %v4982_v7 = vpop.permute.xlu1 %4981  ;;  %v5446_v44 = vsel %vm1076_vm9, %v5445_v62, %v5441_v33  ;;  %v4991_v27 = vpop.permute.xlu0 %4990  ;;  %v4709_v62 = vmul.f32 %v13503_v3, %v13803_v29 }
 0x6cf   :  { %v5450_v56 = vrot.slane %v4982_v7, %v11816_v48  ;;  %5173 = vperm.xlu1 %11523, %v4702_v2   ;;  %5182 = vperm.xlu0 %11524, %v4705_v59   ;;  %v5465_v18 = vrot.slane %v4991_v27, %v11825_v51  ;;  %v4711_v27 = vmul.f32 %v13511_v11, %v13803_v29 }
 0x6d0   :  { %v4713_v11 = vmul.f32 %v13520_v39, %v13803_v29 }
 0x6d1   :  { %v5451_v42 = vsel %vm16240_vm15, %v5450_v56, %v5446_v44  ;;  %v4708_v44 = vmul.f32 %v13509_v41, %v13803_v29  ;;  %v4710_v41 = vmul.f32 %v13518_v45, %v13803_v29  ;;  %v4715_v45 = vmul.f32 %v13526_v0, %v13803_v29 }
 0x6d2   :  { %v4988_v58 = vpop.permute.xlu1 %4987  ;;  %v5456_v5 = vsel %vm1090_vm11, %v5455_v9, %v5451_v42  ;;  %v4997_v1 = vpop.permute.xlu0 %4996 }
 0x6d3   :  { %v5460_v53 = vrot.slane %v4988_v58, %v11822_v50  ;;  %5179 = vperm.xlu1 %11523, %v4704_v12   ;;  %5188 = vperm.xlu0 %11524, %v4707_v13   ;;  %v5475_v9 = vrot.slane %v4997_v1, %v11783_v22 }
 0x6d5   :  { %v5461_v26 = vsel %vm1097_vm12, %v5460_v53, %v5456_v5 }
 0x6d6   :  { %v4994_v33 = vpop.permute.xlu1 %4993  ;;  %v5466_v40 = vsel %vm1104_vm13, %v5465_v18, %v5461_v26  ;;  %v5003_v2 = vpop.permute.xlu0 %5002  ;;  %v4712_v26 = vmul.f32 %v13524_v25, %v13803_v29  ;;  %v4717_v25 = vmul.f32 %v13532_v16, %v13803_v29 }
 0x6d7   :  { %v5470_v59 = vrot.slane %v4994_v33, %v11828_v52  ;;  %5185 = vperm.xlu1 %11523, %v4706_v21   ;;  %5194 = vperm.xlu0 %11524, %v4709_v62   ;;  %v5484_v12 = vrot.slane %v5003_v2, %v11789_v31 }
 0x6d9   :  { %v5471_v7 = vsel %vm1111_vm14, %v5470_v59, %v5466_v40  ;;  %v4714_v59 = vmul.f32 %v13530_v28, %v13803_v29  ;;  %v4719_v28 = vmul.f32 %v13538_v23, %v13803_v29 }
 0x6da   :  { %v13829_v63 = vsel %vm16242_vm10, %v5471_v7, %v13758_v60  ;;  %v5000_v3 = vpop.permute.xlu1 %4999  ;;  %v5009_v56 = vpop.permute.xlu0 %5008  ;;  %vm16243_vm10 = vcmask 1043459  }
 0x6db   :  { %v5479_v42 = vrot.slane %v5000_v3, %v11786_v30  ;;  %5191 = vperm.xlu1 %11523, %v4708_v44   ;;  %5200 = vperm.xlu0 %11524, %v4711_v27   ;;  %v5494_v53 = vrot.slane %v5009_v56, %v11795_v34 }
 0x6dd   :  { %v5480_v13 = vsel %vm1013_vm0, %v5479_v42, %v5475_v9  ;;  %v4716_v9 = vmul.f32 %v13536_v57, %v13803_v29  ;;  %v4721_v57 = vmul.f32 %v13544_v24, %v13803_v29 }
 0x6de   :  { %v5006_v60 = vpop.permute.xlu1 %5005  ;;  %v5485_v58 = vsel %vm1020_vm1, %v5484_v12, %v5480_v13  ;;  %v5015_v5 = vpop.permute.xlu0 %5014 }
 0x6df   :  { %v5489_v1 = vrot.slane %v5006_v60, %v11792_v32  ;;  %5197 = vperm.xlu1 %11523, %v4710_v41   ;;  %5206 = vperm.xlu0 %11524, %v4713_v11   ;;  %v5504_v40 = vrot.slane %v5015_v5, %v11801_v36  ;;  %v4718_v60 = vmul.f32 %v13542_v54, %v13803_v29 }
 0x6e0   :  { %v4720_v54 = vmul.f32 %v13550_v15, %v13803_v29 }
 0x6e1   :  { %v5490_v18 = vsel %vm1027_vm2, %v5489_v1, %v5485_v58 }
 0x6e2   :  { %v5012_v21 = vpop.permute.xlu1 %5011  ;;  %v5495_v39 = vsel %vm1034_vm3, %v5494_v53, %v5490_v18  ;;  %v5021_v62 = vpop.permute.xlu0 %5020  ;;  %v13874_v18 = vld [vmem:[#allocation7 + $0x4] ss:$0 sm:$0xff] }
 0x6e3   :  { %v5499_v33 = vrot.slane %v5012_v21, %v11798_v35  ;;  %5203 = vperm.xlu1 %11523, %v4712_v26   ;;  %5212 = vperm.xlu0 %11524, %v4715_v45   ;;  %v5514_v3 = vrot.slane %v5021_v62, %v11807_v38 }
 0x6e5   :  { %v5500_v2 = vsel %vm1041_vm4, %v5499_v33, %v5495_v39 }
 0x6e6   :  { %v5018_v7 = vpop.permute.xlu1 %5017  ;;  %v5505_v0 = vsel %vm1048_vm5, %v5504_v40, %v5500_v2  ;;  %v5027_v44 = vpop.permute.xlu0 %5026  ;;  %v4722_v40 = vmul.f32 %v13554_v10, %v13803_v29 }
 0x6e7   :  { %v5509_v27 = vrot.slane %v5018_v7, %v11804_v37  ;;  %5209 = vperm.xlu1 %11523, %v4714_v59   ;;  %5218 = vperm.xlu0 %11524, %v4717_v25   ;;  %v5524_v41 = vrot.slane %v5027_v44, %v11813_v47 }
 0x6e9   :  { %v5510_v56 = vsel %vm1055_vm6, %v5509_v27, %v5505_v0 }
 0x6ea   :  { %v5024_v42 = vpop.permute.xlu1 %5023  ;;  %v5515_v16 = vsel %vm1062_vm7, %v5514_v3, %v5510_v56  ;;  %v5033_v12 = vpop.permute.xlu0 %5032 }
 0x6eb   :  { %v5519_v13 = vrot.slane %v5024_v42, %v11810_v46  ;;  %5215 = vperm.xlu1 %11523, %v4716_v9   ;;  %5224 = vperm.xlu0 %11524, %v4719_v28   ;;  %v5534_v53 = vrot.slane %v5033_v12, %v11819_v49 }
 0x6ed   :  { %v5520_v11 = vsel %vm1069_vm8, %v5519_v13, %v5515_v16 }
 0x6ee   :  { %v5030_v58 = vpop.permute.xlu1 %5029  ;;  %v5525_v23 = vsel %vm1076_vm9, %v5524_v41, %v5520_v11  ;;  %v5039_v5 = vpop.permute.xlu0 %5038 }
 0x6ef   :  { %v5529_v1 = vrot.slane %v5030_v58, %v11816_v48  ;;  %5221 = vperm.xlu1 %11523, %v4718_v60   ;;  %5230 = vperm.xlu0 %11524, %v4721_v57   ;;  %v5544_v62 = vrot.slane %v5039_v5, %v11825_v51 }
 0x6f1   :  { %v5530_v26 = vsel %vm16240_vm15, %v5529_v1, %v5525_v23 }
 0x6f2   :  { %v5036_v45 = vpop.permute.xlu1 %5035  ;;  %v5535_v24 = vsel %vm1090_vm11, %v5534_v53, %v5530_v26  ;;  %v5045_v21 = vpop.permute.xlu0 %5044 }
 0x6f3   :  { %v5539_v39 = vrot.slane %v5036_v45, %v11822_v50  ;;  %5227 = vperm.xlu1 %11523, %v4720_v54   ;;  %5915 = vbcast.lane.b32.xlu0 %v13874_v18, 256  ;;  %v5554_v3 = vrot.slane %v5045_v21, %v11783_v22 }
 0x6f5   :  { %v5540_v33 = vsel %vm1097_vm12, %v5539_v39, %v5535_v24 }
 0x6f6   :  { %v5042_v2 = vpop.permute.xlu1 %5041  ;;  %v5545_v59 = vsel %vm1104_vm13, %v5544_v62, %v5540_v33  ;;  %v5051_v15 = vpop.permute.xlu0 %5050 }
 0x6f7   :  { %v5549_v25 = vrot.slane %v5042_v2, %v11828_v52  ;;  %5233 = vperm.xlu1 %11523, %v4722_v40   ;;  %5923 = vbcast.lane.b32.xlu0 %v13874_v18, 272  ;;  %v5563_v29 = vrot.slane %v5051_v15, %v11789_v31 }
 0x6f9   :  { %v5550_v7 = vsel %vm1111_vm14, %v5549_v25, %v5545_v59 }
 0x6fa   :  { %v13892_v0 = vsel %vm16243_vm10, %v5550_v7, %v13829_v63  ;;  %v5048_v44 = vpop.permute.xlu1 %5047  ;;  %v5057_v27 = vpop.permute.xlu0 %5056  ;;  %vm16244_vm10 = vcmask 1044484  }
 0x6fb   :  { %v5558_v10 = vrot.slane %v5048_v44, %v11786_v30  ;;  %5919 = vbcast.lane.b32.xlu1 %v13874_v18, 264  ;;  %5931 = vbcast.lane.b32.xlu0 %v13874_v18, 288  ;;  %v5573_v16 = vrot.slane %v5057_v27, %v11795_v34 }
 0x6fd   :  { %v5559_v56 = vsel %vm1013_vm0, %v5558_v10, %v5554_v3 }
 0x6fe   :  { %v5054_v9 = vpop.permute.xlu1 %5053  ;;  %v5564_v28 = vsel %vm1020_vm1, %v5563_v29, %v5559_v56  ;;  %v5063_v42 = vpop.permute.xlu0 %5062 }
 0x6ff   :  { %v5568_v63 = vrot.slane %v5054_v9, %v11792_v32  ;;  %5927 = vbcast.lane.b32.xlu1 %v13874_v18, 280  ;;  %5939 = vbcast.lane.b32.xlu0 %v13874_v18, 304  ;;  %v5583_v57 = vrot.slane %v5063_v42, %v11801_v36 }
 0x701   :  { %v5569_v12 = vsel %vm1027_vm2, %v5568_v63, %v5564_v28 }
 0x702   :  { %v5060_v13 = vpop.permute.xlu1 %5059  ;;  %v5574_v41 = vsel %vm1034_vm3, %v5573_v16, %v5569_v12  ;;  %v5069_v11 = vpop.permute.xlu0 %5068 }
 0x703   :  { %v5578_v60 = vrot.slane %v5060_v13, %v11798_v35  ;;  %5935 = vbcast.lane.b32.xlu1 %v13874_v18, 296  ;;  %5947 = vbcast.lane.b32.xlu0 %v13874_v18, 320  ;;  %v5593_v26 = vrot.slane %v5069_v11, %v11807_v38 }
 0x705   :  { %v5579_v58 = vsel %vm1041_vm4, %v5578_v60, %v5574_v41 }
 0x706   :  { %v5066_v23 = vpop.permute.xlu1 %5065  ;;  %v5584_v5 = vsel %vm1048_vm5, %v5583_v57, %v5579_v58  ;;  %v5075_v1 = vpop.permute.xlu0 %5074 }
 0x707   :  { %v5588_v53 = vrot.slane %v5066_v23, %v11804_v37  ;;  %5943 = vbcast.lane.b32.xlu1 %v13874_v18, 312  ;;  %5955 = vbcast.lane.b32.xlu0 %v13874_v18, 336  ;;  %v5603_v62 = vrot.slane %v5075_v1, %v11813_v47 }
 0x709   :  { %v5589_v54 = vsel %vm1055_vm6, %v5588_v53, %v5584_v5 }
 0x70a   :  { %v5072_v45 = vpop.permute.xlu1 %5071  ;;  %v5594_v24 = vsel %vm1062_vm7, %v5593_v26, %v5589_v54  ;;  %v5081_v21 = vpop.permute.xlu0 %5080 }
 0x70b   :  { %v5598_v39 = vrot.slane %v5072_v45, %v11810_v46  ;;  %5951 = vbcast.lane.b32.xlu1 %v13874_v18, 328  ;;  %5963 = vbcast.lane.b32.xlu0 %v13874_v18, 352  ;;  %v5613_v25 = vrot.slane %v5081_v21, %v11819_v49 }
 0x70d   :  { %v5599_v33 = vsel %vm1069_vm8, %v5598_v39, %v5594_v24 }
 0x70e   :  { %v5078_v40 = vpop.permute.xlu1 %5077  ;;  %v5604_v2 = vsel %vm1076_vm9, %v5603_v62, %v5599_v33  ;;  %v5087_v59 = vpop.permute.xlu0 %5086 }
 0x70f   :  { %v5608_v15 = vrot.slane %v5078_v40, %v11816_v48  ;;  %5959 = vbcast.lane.b32.xlu1 %v13874_v18, 344  ;;  %5971 = vbcast.lane.b32.xlu0 %v13874_v18, 368  ;;  %v5623_v29 = vrot.slane %v5087_v59, %v11825_v51 }
 0x711   :  { %v5609_v7 = vsel %vm16240_vm15, %v5608_v15, %v5604_v2 }
 0x712   :  { %v5084_v44 = vpop.permute.xlu1 %5083  ;;  %v5614_v27 = vsel %vm1090_vm11, %v5613_v25, %v5609_v7  ;;  %v5093_v3 = vpop.permute.xlu0 %5092 }
 0x713   :  { %v5618_v10 = vrot.slane %v5084_v44, %v11822_v50  ;;  %5967 = vbcast.lane.b32.xlu1 %v13874_v18, 360  ;;  %v5633_v11 = vrot.slane %v5093_v3, %v11783_v22 }
 0x715   :  { %v5619_v56 = vsel %vm1097_vm12, %v5618_v10, %v5614_v27 }
 0x716   :  { %v5090_v9 = vpop.permute.xlu1 %5089  ;;  %v5624_v28 = vsel %vm1104_vm13, %v5623_v29, %v5619_v56  ;;  %v5099_v42 = vpop.permute.xlu0 %5098 }
 0x717   :  { %v5628_v63 = vrot.slane %v5090_v9, %v11828_v52  ;;  %5975 = vbcast.lane.b32.xlu1 %v13874_v18, 376  ;;  %v5642_v57 = vrot.slane %v5099_v42, %v11789_v31 }
 0x719   :  { %v5629_v16 = vsel %vm1111_vm14, %v5628_v63, %v5624_v28 }
 0x71a   :  { %v5870_v12 = vsel %vm16244_vm10, %v5629_v16, %v13892_v0  ;;  %v5096_v13 = vpop.permute.xlu1 %5095  ;;  %v5105_v41 = vpop.permute.xlu0 %5104  ;;  %vm16245_vm10 = vcmask 1045509  }
 0x71b   :  { %v5637_v60 = vrot.slane %v5096_v13, %v11786_v30  ;;  %v5652_v53 = vrot.slane %v5105_v41, %v11795_v34 }
 0x71d   :  { %v5638_v58 = vsel %vm1013_vm0, %v5637_v60, %v5633_v11 }
 0x71e   :  { %v5102_v23 = vpop.permute.xlu1 %5101  ;;  %v5643_v5 = vsel %vm1020_vm1, %v5642_v57, %v5638_v58  ;;  %v5111_v1 = vpop.permute.xlu0 %5110 }
 0x71f   :  { %v5647_v18 = vrot.slane %v5102_v23, %v11792_v32  ;;  %v5662_v21 = vrot.slane %v5111_v1, %v11801_v36 }
 0x721   :  { %v5648_v0 = vsel %vm1027_vm2, %v5647_v18, %v5643_v5 }
 0x722   :  { %v5108_v26 = vpop.permute.xlu1 %5107  ;;  %v5653_v54 = vsel %vm1034_vm3, %v5652_v53, %v5648_v0  ;;  %v5117_v45 = vpop.permute.xlu0 %5116 }
 0x723   :  { %v5657_v24 = vrot.slane %v5108_v26, %v11798_v35  ;;  %v5672_v59 = vrot.slane %v5117_v45, %v11807_v38 }
 0x725   :  { %v5658_v39 = vsel %vm1041_vm4, %v5657_v24, %v5653_v54 }
 0x726   :  { %v5114_v62 = vpop.permute.xlu1 %5113  ;;  %v5663_v33 = vsel %vm1048_vm5, %v5662_v21, %v5658_v39  ;;  %v5123_v40 = vpop.permute.xlu0 %5122 }
 0x727   :  { %v5667_v2 = vrot.slane %v5114_v62, %v11804_v37  ;;  %v5682_v3 = vrot.slane %v5123_v40, %v11813_v47 }
 0x729   :  { %v5668_v15 = vsel %vm1055_vm6, %v5667_v2, %v5663_v33 }
 0x72a   :  { %v5120_v25 = vpop.permute.xlu1 %5119  ;;  %v5673_v7 = vsel %vm1062_vm7, %v5672_v59, %v5668_v15  ;;  %v5129_v44 = vpop.permute.xlu0 %5128 }
 0x72b   :  { %v5677_v27 = vrot.slane %v5120_v25, %v11810_v46  ;;  %v5692_v42 = vrot.slane %v5129_v44, %v11819_v49 }
 0x72d   :  { %v5678_v10 = vsel %vm1069_vm8, %v5677_v27, %v5673_v7 }
 0x72e   :  { %v5126_v29 = vpop.permute.xlu1 %5125  ;;  %v5683_v56 = vsel %vm1076_vm9, %v5682_v3, %v5678_v10  ;;  %v5135_v9 = vpop.permute.xlu0 %5134 }
 0x72f   :  { %v5687_v28 = vrot.slane %v5126_v29, %v11816_v48  ;;  %v5702_v60 = vrot.slane %v5135_v9, %v11825_v51 }
 0x731   :  { %v5688_v63 = vsel %vm16240_vm15, %v5687_v28, %v5683_v56 }
 0x732   :  { %v5132_v16 = vpop.permute.xlu1 %5131  ;;  %v5693_v13 = vsel %vm1090_vm11, %v5692_v42, %v5688_v63  ;;  %v5141_v41 = vpop.permute.xlu0 %5140 }
 0x733   :  { %v5697_v11 = vrot.slane %v5132_v16, %v11822_v50  ;;  %v5712_v54 = vrot.slane %v5141_v41, %v11783_v22 }
 0x735   :  { %v5698_v57 = vsel %vm1097_vm12, %v5697_v11, %v5693_v13 }
 0x736   :  { %v5138_v58 = vpop.permute.xlu1 %5137  ;;  %v5703_v23 = vsel %vm1104_vm13, %v5702_v60, %v5698_v57  ;;  %v5147_v5 = vpop.permute.xlu0 %5146 }
 0x737   :  { %v5707_v1 = vrot.slane %v5138_v58, %v11828_v52  ;;  %v5721_v24 = vrot.slane %v5147_v5, %v11789_v31 }
 0x739   :  { %v5708_v18 = vsel %vm1111_vm14, %v5707_v1, %v5703_v23 }
 0x73a   :  { %v5871_v53 = vsel %vm16245_vm10, %v5708_v18, %v5870_v12  ;;  %v5144_v0 = vpop.permute.xlu1 %5143  ;;  %v5153_v26 = vpop.permute.xlu0 %5152  ;;  %vm16246_vm10 = vcmask 1046534  }
 0x73b   :  { %v5716_v45 = vrot.slane %v5144_v0, %v11786_v30  ;;  %v5731_v2 = vrot.slane %v5153_v26, %v11795_v34 }
 0x73d   :  { %v5717_v21 = vsel %vm1013_vm0, %v5716_v45, %v5712_v54 }
 0x73e   :  { %v5150_v39 = vpop.permute.xlu1 %5149  ;;  %v5722_v62 = vsel %vm1020_vm1, %v5721_v24, %v5717_v21  ;;  %v5159_v33 = vpop.permute.xlu0 %5158 }
 0x73f   :  { %v5726_v40 = vrot.slane %v5150_v39, %v11792_v32  ;;  %v5741_v44 = vrot.slane %v5159_v33, %v11801_v36 }
 0x741   :  { %v5727_v12 = vsel %vm1027_vm2, %v5726_v40, %v5722_v62 }
 0x742   :  { %v5156_v59 = vpop.permute.xlu1 %5155  ;;  %v5732_v15 = vsel %vm1034_vm3, %v5731_v2, %v5727_v12  ;;  %v5165_v25 = vpop.permute.xlu0 %5164 }
 0x743   :  { %v5736_v7 = vrot.slane %v5156_v59, %v11798_v35  ;;  %v5751_v9 = vrot.slane %v5165_v25, %v11807_v38 }
 0x745   :  { %v5737_v27 = vsel %vm1041_vm4, %v5736_v7, %v5732_v15 }
 0x746   :  { %v5162_v3 = vpop.permute.xlu1 %5161  ;;  %v5742_v10 = vsel %vm1048_vm5, %v5741_v44, %v5737_v27  ;;  %v5171_v29 = vpop.permute.xlu0 %5170 }
 0x747   :  { %v5746_v56 = vrot.slane %v5162_v3, %v11804_v37  ;;  %v5761_v41 = vrot.slane %v5171_v29, %v11813_v47 }
 0x749   :  { %v5747_v28 = vsel %vm1055_vm6, %v5746_v56, %v5742_v10 }
 0x74a   :  { %v5168_v42 = vpop.permute.xlu1 %5167  ;;  %v5752_v63 = vsel %vm1062_vm7, %v5751_v9, %v5747_v28  ;;  %v5177_v16 = vpop.permute.xlu0 %5176 }
 0x74b   :  { %v5756_v13 = vrot.slane %v5168_v42, %v11810_v46  ;;  %v5771_v5 = vrot.slane %v5177_v16, %v11819_v49 }
 0x74d   :  { %v5757_v11 = vsel %vm1069_vm8, %v5756_v13, %v5752_v63 }
 0x74e   :  { %v5174_v60 = vpop.permute.xlu1 %5173  ;;  %v5762_v57 = vsel %vm1076_vm9, %v5761_v41, %v5757_v11  ;;  %v5183_v58 = vpop.permute.xlu0 %5182 }
 0x74f   :  { %v5766_v23 = vrot.slane %v5174_v60, %v11816_v48  ;;  %v5781_v45 = vrot.slane %v5183_v58, %v11825_v51 }
 0x751   :  { %v5767_v1 = vsel %vm16240_vm15, %v5766_v23, %v5762_v57 }
 0x752   :  { %v5180_v18 = vpop.permute.xlu1 %5179  ;;  %v5772_v0 = vsel %vm1090_vm11, %v5771_v5, %v5767_v1  ;;  %v5189_v26 = vpop.permute.xlu0 %5188 }
 0x753   :  { %v5776_v54 = vrot.slane %v5180_v18, %v11822_v50  ;;  %v5791_v15 = vrot.slane %v5189_v26, %v11783_v22 }
 0x755   :  { %v5777_v24 = vsel %vm1097_vm12, %v5776_v54, %v5772_v0  ;;  %v14025_v54 = vsub.s32 4, %v11780_v20 }
 0x756   :  { %v5186_v21 = vpop.permute.xlu1 %5185  ;;  %v5782_v39 = vsel %vm1104_vm13, %v5781_v45, %v5777_v24  ;;  %v5195_v62 = vpop.permute.xlu0 %5194 }
 0x757   :  { %v5786_v33 = vrot.slane %v5186_v21, %v11828_v52  ;;  %v5800_v7 = vrot.slane %v5195_v62, %v11789_v31 }
 0x759   :  { %v5787_v40 = vsel %vm1111_vm14, %v5786_v33, %v5782_v39 }
 0x75a   :  { %v5872_v2 = vsel %vm16246_vm10, %v5787_v40, %v5871_v53  ;;  %v5192_v12 = vpop.permute.xlu1 %5191  ;;  %v5201_v59 = vpop.permute.xlu0 %5200  ;;  %v5880_v40 = vrot.slane %v11873_v43, %v14025_v54  ;;  %vm16247_vm10 = vcmask 1047559  }
 0x75b   :  { %v5795_v25 = vrot.slane %v5192_v12, %v11786_v30  ;;  %v5810_v56 = vrot.slane %v5201_v59, %v11795_v34 }
 0x75d   :  { %v5796_v44 = vsel %vm1013_vm0, %v5795_v25, %v5791_v15 }
 0x75e   :  { %v5198_v27 = vpop.permute.xlu1 %5197  ;;  %v5801_v3 = vsel %vm1020_vm1, %v5800_v7, %v5796_v44  ;;  %v5207_v10 = vpop.permute.xlu0 %5206 }
 0x75f   :  { %v5805_v29 = vrot.slane %v5198_v27, %v11792_v32  ;;  %v5820_v16 = vrot.slane %v5207_v10, %v11801_v36 }
 0x761   :  { %v5806_v53 = vsel %vm1027_vm2, %v5805_v29, %v5801_v3 }
 0x762   :  { %v5204_v9 = vpop.permute.xlu1 %5203  ;;  %v5811_v28 = vsel %vm1034_vm3, %v5810_v56, %v5806_v53  ;;  %v5213_v42 = vpop.permute.xlu0 %5212 }
 0x763   :  { %v5815_v63 = vrot.slane %v5204_v9, %v11798_v35  ;;  %v5830_v58 = vrot.slane %v5213_v42, %v11807_v38 }
 0x765   :  { %v5816_v13 = vsel %vm1041_vm4, %v5815_v63, %v5811_v28 }
 0x766   :  { %v5210_v41 = vpop.permute.xlu1 %5209  ;;  %v5821_v11 = vsel %vm1048_vm5, %v5820_v16, %v5816_v13  ;;  %v5219_v60 = vpop.permute.xlu0 %5218 }
 0x767   :  { %v5825_v57 = vrot.slane %v5210_v41, %v11804_v37  ;;  %v5840_v26 = vrot.slane %v5219_v60, %v11813_v47 }
 0x769   :  { %v5826_v23 = vsel %vm1055_vm6, %v5825_v57, %v5821_v11 }
 0x76a   :  { %v5216_v5 = vpop.permute.xlu1 %5215  ;;  %v5831_v1 = vsel %vm1062_vm7, %v5830_v58, %v5826_v23  ;;  %v5225_v18 = vpop.permute.xlu0 %5224 }
 0x76b   :  { %v5835_v0 = vrot.slane %v5216_v5, %v11810_v46  ;;  %v5850_v33 = vrot.slane %v5225_v18, %v11819_v49 }
 0x76d   :  { %v5836_v45 = vsel %vm1069_vm8, %v5835_v0, %v5831_v1 }
 0x76e   :  { %v5222_v24 = vpop.permute.xlu1 %5221  ;;  %v5841_v21 = vsel %vm1076_vm9, %v5840_v26, %v5836_v45  ;;  %v5231_v39 = vpop.permute.xlu0 %5230 }
 0x76f   :  { %v5845_v62 = vrot.slane %v5222_v24, %v11816_v48  ;;  %v5860_v27 = vrot.slane %v5231_v39, %v11825_v51 }
 0x771   :  { %v5846_v12 = vsel %vm16240_vm15, %v5845_v62, %v5841_v21 }
 0x772   :  { %v5228_v59 = vpop.permute.xlu1 %5227  ;;  %v5851_v15 = vsel %vm1090_vm11, %v5850_v33, %v5846_v12  ;;  %v14035_v25 = vpop.permute.xlu0 %5915 }
 0x773   :  { %v5855_v7 = vrot.slane %v5228_v59, %v11822_v50  ;;  %v5993_v44 = vmul.f32 %v14035_v25, %v5880_v40 }
 0x775   :  { %v5856_v3 = vsel %vm1097_vm12, %v5855_v7, %v5851_v15  ;;  %6250 = vperm.xlu0 %11524, %v5993_v44   ;;  %v5884_v7 = vrot.slane %v11899_v6, %v14025_v54 }
 0x776   :  { %v5234_v10 = vpop.permute.xlu1 %5233  ;;  %v5861_v29 = vsel %vm1104_vm13, %v5860_v27, %v5856_v3  ;;  %v14042_v56 = vpop.permute.xlu0 %5923 }
 0x777   :  { %v5865_v53 = vrot.slane %v5234_v10, %v11828_v52  ;;  %v5995_v9 = vmul.f32 %v14042_v56, %v5880_v40  ;;  %v6009_v3 = vmul.f32 %v14035_v25, %v5884_v7 }
 0x779   :  { %v5866_v28 = vsel %vm1111_vm14, %v5865_v53, %v5861_v29  ;;  %6256 = vperm.xlu0 %11524, %v5995_v9   ;;  %v6011_v53 = vmul.f32 %v14042_v56, %v5884_v7 }
 0x77a   :  { %v5873_v42 = vsel %vm16247_vm10, %v5866_v28, %v5872_v2  ;;  %v14048_v63 = vpop.permute.xlu1 %5919  ;;  %v14050_v16 = vpop.permute.xlu0 %5931  ;;  %vm16248_vm10 = vmmov %vm16240_vm15 }
 0x77b   :  { %v14053_v13 = vadd.f32 %v5873_v42, %v13514_v8  ;;  %v5994_v41 = vmul.f32 %v14048_v63, %v5880_v40  ;;  %v5997_v11 = vmul.f32 %v14050_v16, %v5880_v40  ;;  %v6010_v9 = vmul.f32 %v14048_v63, %v5884_v7 }
 0x77c   :  { %v6013_v28 = vmul.f32 %v14050_v16, %v5884_v7 }
 0x77d   :  { %6253 = vperm.xlu1 %11523, %v5994_v41   ;;  %6262 = vperm.xlu0 %11524, %v5997_v11  }
 0x77e   :  { %v14057_v60 = vpop.permute.xlu1 %5927  ;;  %v14059_v57 = vpop.permute.xlu0 %5939 }
 0x77f   :  { %v5996_v58 = vmul.f32 %v14057_v60, %v5880_v40  ;;  %v5999_v2 = vmul.f32 %v14059_v57, %v5880_v40  ;;  %v6012_v42 = vmul.f32 %v14057_v60, %v5884_v7  ;;  %v6015_v41 = vmul.f32 %v14059_v57, %v5884_v7 }
 0x781   :  { %6259 = vperm.xlu1 %11523, %v5996_v58   ;;  %6268 = vperm.xlu0 %11524, %v5999_v2  }
 0x782   :  { %v14063_v23 = vpop.permute.xlu1 %5935  ;;  %v14065_v8 = vpop.permute.xlu0 %5947 }
 0x783   :  { %v5998_v5 = vmul.f32 %v14063_v23, %v5880_v40  ;;  %v6001_v1 = vmul.f32 %v14065_v8, %v5880_v40  ;;  %v6014_v11 = vmul.f32 %v14063_v23, %v5884_v7 }
 0x785   :  { %6265 = vperm.xlu1 %11523, %v5998_v5   ;;  %6274 = vperm.xlu0 %11524, %v6001_v1  }
 0x786   :  { %v14069_v18 = vpop.permute.xlu1 %5943  ;;  %v14071_v0 = vpop.permute.xlu0 %5955 }
 0x787   :  { %v6000_v26 = vmul.f32 %v14069_v18, %v5880_v40  ;;  %v6003_v45 = vmul.f32 %v14071_v0, %v5880_v40  ;;  %v6016_v58 = vmul.f32 %v14069_v18, %v5884_v7  ;;  %v6019_v2 = vmul.f32 %v14071_v0, %v5884_v7 }
 0x789   :  { %6271 = vperm.xlu1 %11523, %v6000_v26   ;;  %6280 = vperm.xlu0 %11524, %v6003_v45  }
 0x78a   :  { %v14075_v24 = vpop.permute.xlu1 %5951  ;;  %v14077_v21 = vpop.permute.xlu0 %5963 }
 0x78b   :  { %v6002_v39 = vmul.f32 %v14075_v24, %v5880_v40  ;;  %v6005_v62 = vmul.f32 %v14077_v21, %v5880_v40  ;;  %v6018_v5 = vmul.f32 %v14075_v24, %v5884_v7  ;;  %v6021_v1 = vmul.f32 %v14077_v21, %v5884_v7 }
 0x78d   :  { %6277 = vperm.xlu1 %11523, %v6002_v39   ;;  %6286 = vperm.xlu0 %11524, %v6005_v62   ;;  %v5888_v39 = vrot.slane %v11919_v55, %v14025_v54 }
 0x78e   :  { %v14081_v33 = vpop.permute.xlu1 %5959  ;;  %v14083_v12 = vpop.permute.xlu0 %5971 }
 0x78f   :  { %v6004_v59 = vmul.f32 %v14081_v33, %v5880_v40  ;;  %v6007_v15 = vmul.f32 %v14083_v12, %v5880_v40  ;;  %v6020_v26 = vmul.f32 %v14081_v33, %v5884_v7  ;;  %v6023_v45 = vmul.f32 %v14083_v12, %v5884_v7 }
 0x791   :  { %6283 = vperm.xlu1 %11523, %v6004_v59   ;;  %6292 = vperm.xlu0 %11524, %v6007_v15   ;;  %v6025_v59 = vmul.f32 %v14035_v25, %v5888_v39 }
 0x792   :  { %v14089_v44 = vpop.permute.xlu1 %5967 }
 0x793   :  { %v6006_v27 = vmul.f32 %v14089_v44, %v5880_v40  ;;  %v6022_v62 = vmul.f32 %v14089_v44, %v5884_v7 }
 0x795   :  { %6289 = vperm.xlu1 %11523, %v6006_v27   ;;  %6298 = vperm.xlu0 %11524, %v6009_v3   ;;  %v6027_v27 = vmul.f32 %v14042_v56, %v5888_v39  ;;  %v6026_v3 = vmul.f32 %v14048_v63, %v5888_v39 }
 0x796   :  { %v14093_v10 = vpop.permute.xlu1 %5975 }
 0x797   :  { %v6008_v29 = vmul.f32 %v14093_v10, %v5880_v40  ;;  %v6017_v40 = vmul.f32 %v14065_v8, %v5884_v7  ;;  %v6024_v15 = vmul.f32 %v14093_v10, %v5884_v7  ;;  %v6033_v7 = vmul.f32 %v14065_v8, %v5888_v39 }
 0x799   :  { %6295 = vperm.xlu1 %11523, %v6008_v29   ;;  %6304 = vperm.xlu0 %11524, %v6011_v53   ;;  %v6029_v29 = vmul.f32 %v14050_v16, %v5888_v39  ;;  %v6028_v53 = vmul.f32 %v14057_v60, %v5888_v39 }
 0x79d   :  { %6301 = vperm.xlu1 %11523, %v6010_v9   ;;  %6310 = vperm.xlu0 %11524, %v6013_v28   ;;  %v6031_v9 = vmul.f32 %v14059_v57, %v5888_v39  ;;  %v6030_v28 = vmul.f32 %v14063_v23, %v5888_v39 }
 0x7a1   :  { %6307 = vperm.xlu1 %11523, %v6012_v42   ;;  %6316 = vperm.xlu0 %11524, %v6015_v41   ;;  %v6032_v42 = vmul.f32 %v14069_v18, %v5888_v39  ;;  %v6035_v41 = vmul.f32 %v14071_v0, %v5888_v39 }
 0x7a5   :  { %6313 = vperm.xlu1 %11523, %v6014_v11   ;;  %6322 = vperm.xlu0 %11524, %v6017_v40   ;;  %v6034_v11 = vmul.f32 %v14075_v24, %v5888_v39  ;;  %v6037_v40 = vmul.f32 %v14077_v21, %v5888_v39 }
 0x7a9   :  { %6319 = vperm.xlu1 %11523, %v6016_v58   ;;  %6328 = vperm.xlu0 %11524, %v6019_v2   ;;  %v6036_v58 = vmul.f32 %v14081_v33, %v5888_v39  ;;  %v6039_v2 = vmul.f32 %v14083_v12, %v5888_v39 }
 0x7ad   :  { %6325 = vperm.xlu1 %11523, %v6018_v5   ;;  %6334 = vperm.xlu0 %11524, %v6021_v1   ;;  %v5892_v5 = vrot.slane %v11955_v61, %v14025_v54  ;;  %v6038_v1 = vmul.f32 %v14089_v44, %v5888_v39 }
 0x7b1   :  { %6331 = vperm.xlu1 %11523, %v6020_v26   ;;  %6340 = vperm.xlu0 %11524, %v6023_v45   ;;  %v6041_v26 = vmul.f32 %v14035_v25, %v5892_v5  ;;  %v6040_v45 = vmul.f32 %v14093_v10, %v5888_v39  ;;  %v6049_v39 = vmul.f32 %v14065_v8, %v5892_v5 }
 0x7b5   :  { %6337 = vperm.xlu1 %11523, %v6022_v62   ;;  %6346 = vperm.xlu0 %11524, %v6025_v59   ;;  %v6043_v62 = vmul.f32 %v14042_v56, %v5892_v5  ;;  %v6042_v59 = vmul.f32 %v14048_v63, %v5892_v5 }
 0x7b9   :  { %6343 = vperm.xlu1 %11523, %v6024_v15   ;;  %6352 = vperm.xlu0 %11524, %v6027_v27   ;;  %v6045_v15 = vmul.f32 %v14050_v16, %v5892_v5  ;;  %v6044_v27 = vmul.f32 %v14057_v60, %v5892_v5 }
 0x7bd   :  { %6349 = vperm.xlu1 %11523, %v6026_v3   ;;  %6358 = vperm.xlu0 %11524, %v6029_v29   ;;  %v6047_v3 = vmul.f32 %v14059_v57, %v5892_v5  ;;  %v6046_v29 = vmul.f32 %v14063_v23, %v5892_v5 }
 0x7c1   :  { %6355 = vperm.xlu1 %11523, %v6028_v53   ;;  %6364 = vperm.xlu0 %11524, %v6031_v9   ;;  %v6048_v53 = vmul.f32 %v14069_v18, %v5892_v5  ;;  %v6051_v9 = vmul.f32 %v14071_v0, %v5892_v5 }
 0x7c5   :  { %6361 = vperm.xlu1 %11523, %v6030_v28   ;;  %6370 = vperm.xlu0 %11524, %v6033_v7   ;;  %v6050_v28 = vmul.f32 %v14075_v24, %v5892_v5  ;;  %v6053_v7 = vmul.f32 %v14077_v21, %v5892_v5 }
 0x7c9   :  { %6367 = vperm.xlu1 %11523, %v6032_v42   ;;  %6376 = vperm.xlu0 %11524, %v6035_v41   ;;  %v6052_v42 = vmul.f32 %v14081_v33, %v5892_v5  ;;  %v6055_v41 = vmul.f32 %v14083_v12, %v5892_v5 }
 0x7cd   :  { %6373 = vperm.xlu1 %11523, %v6034_v11   ;;  %6382 = vperm.xlu0 %11524, %v6037_v40   ;;  %v14147_v11 = vrot.slane %v11939_v19, %v14025_v54  ;;  %v6054_v40 = vmul.f32 %v14089_v44, %v5892_v5 }
 0x7d1   :  { %6379 = vperm.xlu1 %11523, %v6036_v58   ;;  %6388 = vperm.xlu0 %11524, %v6039_v2   ;;  %v6057_v58 = vmul.f32 %v14035_v25, %v14147_v11 }
 0x7d5   :  { %6385 = vperm.xlu1 %11523, %v6038_v1   ;;  %6394 = vperm.xlu0 %11524, %v6041_v26   ;;  %v6056_v1 = vmul.f32 %v14093_v10, %v5892_v5  ;;  %v6059_v26 = vmul.f32 %v14042_v56, %v14147_v11 }
 0x7d9   :  { %6391 = vperm.xlu1 %11523, %v6040_v45   ;;  %6400 = vperm.xlu0 %11524, %v6043_v62   ;;  %v6058_v62 = vmul.f32 %v14048_v63, %v14147_v11 }
 0x7dd   :  { %6397 = vperm.xlu1 %11523, %v6042_v59   ;;  %6406 = vperm.xlu0 %11524, %v6045_v15   ;;  %v6061_v59 = vmul.f32 %v14050_v16, %v14147_v11 }
 0x7e1   :  { %6403 = vperm.xlu1 %11523, %v6044_v27   ;;  %6412 = vperm.xlu0 %11524, %v6047_v3  }
 0x7e5   :  { %6409 = vperm.xlu1 %11523, %v6046_v29   ;;  %6418 = vperm.xlu0 %11524, %v6049_v39  }
 0x7e9   :  { %6415 = vperm.xlu1 %11523, %v6048_v53   ;;  %6424 = vperm.xlu0 %11524, %v6051_v9   ;;  %v6060_v53 = vmul.f32 %v14057_v60, %v14147_v11  ;;  %v6063_v9 = vmul.f32 %v14059_v57, %v14147_v11 }
 0x7ed   :  { %6421 = vperm.xlu1 %11523, %v6050_v28   ;;  %6430 = vperm.xlu0 %11524, %v6053_v7  }
 0x7f1   :  { %6427 = vperm.xlu1 %11523, %v6052_v42   ;;  %6436 = vperm.xlu0 %11524, %v6055_v41  }
 0x7f4   :  { %v6251_v2 = vpop.permute.xlu0 %6250 }
 0x7f5   :  { %6433 = vperm.xlu1 %11523, %v6054_v40   ;;  %6442 = vperm.xlu0 %11524, %v6057_v58   ;;  %v6636_v3 = vrot.slane %v6251_v2, %v11783_v22  ;;  %v6062_v2 = vmul.f32 %v14063_v23, %v14147_v11 }
 0x7f8   :  { %v6257_v45 = vpop.permute.xlu0 %6256 }
 0x7f9   :  { %6439 = vperm.xlu1 %11523, %v6056_v1   ;;  %6448 = vperm.xlu0 %11524, %v6059_v26   ;;  %v6645_v5 = vrot.slane %v6257_v45, %v11789_v31  ;;  %v6065_v1 = vmul.f32 %v14065_v8, %v14147_v11 }
 0x7fc   :  { %v6254_v15 = vpop.permute.xlu1 %6253  ;;  %v6263_v27 = vpop.permute.xlu0 %6262 }
 0x7fd   :  { %v6640_v29 = vrot.slane %v6254_v15, %v11786_v30  ;;  %6445 = vperm.xlu1 %11523, %v6058_v62   ;;  %6454 = vperm.xlu0 %11524, %v6061_v59   ;;  %v6655_v40 = vrot.slane %v6263_v27, %v11795_v34 }
 0x7ff   :  { %v6641_v39 = vsel %vm1013_vm0, %v6640_v29, %v6636_v3  ;;  %v6064_v3 = vmul.f32 %v14069_v18, %v14147_v11  ;;  %v6067_v29 = vmul.f32 %v14071_v0, %v14147_v11 }
 0x800   :  { %v6260_v28 = vpop.permute.xlu1 %6259  ;;  %v6646_v7 = vsel %vm1020_vm1, %v6645_v5, %v6641_v39  ;;  %v6269_v42 = vpop.permute.xlu0 %6268 }
 0x801   :  { %v6650_v41 = vrot.slane %v6260_v28, %v11792_v32  ;;  %6451 = vperm.xlu1 %11523, %v6060_v53   ;;  %6460 = vperm.xlu0 %11524, %v6063_v9   ;;  %v6665_v15 = vrot.slane %v6269_v42, %v11801_v36  ;;  %v6066_v42 = vmul.f32 %v14075_v24, %v14147_v11 }
 0x803   :  { %v6651_v58 = vsel %vm1027_vm2, %v6650_v41, %v6646_v7  ;;  %v6069_v41 = vmul.f32 %v14077_v21, %v14147_v11 }
 0x804   :  { %v6266_v26 = vpop.permute.xlu1 %6265  ;;  %v6656_v45 = vsel %vm1034_vm3, %v6655_v40, %v6651_v58  ;;  %v6275_v62 = vpop.permute.xlu0 %6274 }
 0x805   :  { %v6660_v59 = vrot.slane %v6266_v26, %v11798_v35  ;;  %6457 = vperm.xlu1 %11523, %v6062_v2   ;;  %6466 = vperm.xlu0 %11524, %v6065_v1   ;;  %v6675_v28 = vrot.slane %v6275_v62, %v11807_v38  ;;  %v6068_v62 = vmul.f32 %v14081_v33, %v14147_v11 }
 0x807   :  { %v6661_v27 = vsel %vm1041_vm4, %v6660_v59, %v6656_v45  ;;  %v6071_v59 = vmul.f32 %v14083_v12, %v14147_v11 }
 0x808   :  { %v6272_v5 = vpop.permute.xlu1 %6271  ;;  %v6666_v39 = vsel %vm1048_vm5, %v6665_v15, %v6661_v27  ;;  %v6281_v53 = vpop.permute.xlu0 %6280 }
 0x809   :  { %v6670_v9 = vrot.slane %v6272_v5, %v11804_v37  ;;  %6463 = vperm.xlu1 %11523, %v6064_v3   ;;  %6472 = vperm.xlu0 %11524, %v6067_v29   ;;  %v6685_v26 = vrot.slane %v6281_v53, %v11813_v47  ;;  %v14202_v29 = vrot.slane %v11961_v4, %v14025_v54 }
 0x80b   :  { %v6671_v7 = vsel %vm1055_vm6, %v6670_v9, %v6666_v39  ;;  %v6070_v9 = vmul.f32 %v14089_v44, %v14147_v11 }
 0x80c   :  { %v6278_v40 = vpop.permute.xlu1 %6277  ;;  %v6676_v58 = vsel %vm1062_vm7, %v6675_v28, %v6671_v7  ;;  %v6287_v2 = vpop.permute.xlu0 %6286  ;;  %v6073_v28 = vmul.f32 %v14035_v25, %v14202_v29 }
 0x80d   :  { %v6680_v1 = vrot.slane %v6278_v40, %v11810_v46  ;;  %6469 = vperm.xlu1 %11523, %v6066_v42   ;;  %6478 = vperm.xlu0 %11524, %v6069_v41   ;;  %v6695_v39 = vrot.slane %v6287_v2, %v11819_v49 }
 0x80f   :  { %v6681_v45 = vsel %vm1069_vm8, %v6680_v1, %v6676_v58  ;;  %v6072_v1 = vmul.f32 %v14093_v10, %v14147_v11  ;;  %v6077_v11 = vmul.f32 %v14050_v16, %v14202_v29 }
 0x810   :  { %v6284_v15 = vpop.permute.xlu1 %6283  ;;  %v6686_v27 = vsel %vm1076_vm9, %v6685_v26, %v6681_v45  ;;  %v6293_v3 = vpop.permute.xlu0 %6292  ;;  %v6075_v26 = vmul.f32 %v14042_v56, %v14202_v29 }
 0x811   :  { %v6690_v5 = vrot.slane %v6284_v15, %v11816_v48  ;;  %6475 = vperm.xlu1 %11523, %v6068_v62   ;;  %6484 = vperm.xlu0 %11524, %v6071_v59   ;;  %v6705_v58 = vrot.slane %v6293_v3, %v11825_v51  ;;  %v6074_v3 = vmul.f32 %v14048_v63, %v14202_v29 }
 0x813   :  { %v6691_v53 = vsel %vm16240_vm15, %v6690_v5, %v6686_v27  ;;  %vm16249_vm15 = vcmask 1041409  }
 0x814   :  { %v6290_v7 = vpop.permute.xlu1 %6289  ;;  %v6696_v42 = vsel %vm1090_vm11, %v6695_v39, %v6691_v53  ;;  %v6299_v41 = vpop.permute.xlu0 %6298 }
 0x815   :  { %v6700_v40 = vrot.slane %v6290_v7, %v11822_v50  ;;  %6481 = vperm.xlu1 %11523, %v6070_v9   ;;  %6490 = vperm.xlu0 %11524, %v6073_v28   ;;  %v6715_v53 = vrot.slane %v6299_v41, %v11783_v22 }
 0x817   :  { %v6701_v2 = vsel %vm1097_vm12, %v6700_v40, %v6696_v42  ;;  %v6076_v42 = vmul.f32 %v14057_v60, %v14202_v29  ;;  %v6079_v40 = vmul.f32 %v14059_v57, %v14202_v29 }
 0x818   :  { %v6296_v45 = vpop.permute.xlu1 %6295  ;;  %v6706_v62 = vsel %vm1104_vm13, %v6705_v58, %v6701_v2  ;;  %v6305_v59 = vpop.permute.xlu0 %6304 }
 0x819   :  { %v6710_v15 = vrot.slane %v6296_v45, %v11828_v52  ;;  %6487 = vperm.xlu1 %11523, %v6072_v1   ;;  %6496 = vperm.xlu0 %11524, %v6075_v26   ;;  %v6724_v28 = vrot.slane %v6305_v59, %v11789_v31  ;;  %v6081_v59 = vmul.f32 %v14065_v8, %v14202_v29 }
 0x81b   :  { %v14222_v27 = vsel %vm1111_vm14, %v6710_v15, %v6706_v62  ;;  %v6078_v62 = vmul.f32 %v14063_v23, %v14202_v29 }
 0x81c   :  { %v6302_v5 = vpop.permute.xlu1 %6301  ;;  %v6311_v39 = vpop.permute.xlu0 %6310 }
 0x81d   :  { %v6719_v9 = vrot.slane %v6302_v5, %v11786_v30  ;;  %6493 = vperm.xlu1 %11523, %v6074_v3   ;;  %6502 = vperm.xlu0 %11524, %v6077_v11   ;;  %v6734_v26 = vrot.slane %v6311_v39, %v11795_v34 }
 0x81f   :  { %v6720_v7 = vsel %vm1013_vm0, %v6719_v9, %v6715_v53  ;;  %v6080_v9 = vmul.f32 %v14069_v18, %v14202_v29 }
 0x820   :  { %v6308_v58 = vpop.permute.xlu1 %6307  ;;  %v6725_v2 = vsel %vm1020_vm1, %v6724_v28, %v6720_v7  ;;  %v6317_v1 = vpop.permute.xlu0 %6316  ;;  %v6083_v28 = vmul.f32 %v14071_v0, %v14202_v29 }
 0x821   :  { %v6729_v41 = vrot.slane %v6308_v58, %v11792_v32  ;;  %6499 = vperm.xlu1 %11523, %v6076_v42   ;;  %6508 = vperm.xlu0 %11524, %v6079_v40   ;;  %v6744_v53 = vrot.slane %v6317_v1, %v11801_v36 }
 0x823   :  { %v6730_v45 = vsel %vm1027_vm2, %v6729_v41, %v6725_v2  ;;  %v6082_v41 = vmul.f32 %v14075_v24, %v14202_v29 }
 0x824   :  { %v6314_v15 = vpop.permute.xlu1 %6313  ;;  %v6735_v3 = vsel %vm1034_vm3, %v6734_v26, %v6730_v45  ;;  %v6323_v11 = vpop.permute.xlu0 %6322  ;;  %v6085_v26 = vmul.f32 %v14077_v21, %v14202_v29 }
 0x825   :  { %v6739_v5 = vrot.slane %v6314_v15, %v11798_v35  ;;  %6505 = vperm.xlu1 %11523, %v6078_v62   ;;  %6514 = vperm.xlu0 %11524, %v6081_v59   ;;  %v6754_v2 = vrot.slane %v6323_v11, %v11807_v38 }
 0x827   :  { %v6740_v39 = vsel %vm1041_vm4, %v6739_v5, %v6735_v3  ;;  %v6084_v5 = vmul.f32 %v14081_v33, %v14202_v29 }
 0x828   :  { %v6320_v7 = vpop.permute.xlu1 %6319  ;;  %v6745_v42 = vsel %vm1048_vm5, %v6744_v53, %v6740_v39  ;;  %v6329_v40 = vpop.permute.xlu0 %6328  ;;  %v6087_v53 = vmul.f32 %v14083_v12, %v14202_v29 }
 0x829   :  { %v6749_v58 = vrot.slane %v6320_v7, %v11804_v37  ;;  %6511 = vperm.xlu1 %11523, %v6080_v9   ;;  %6520 = vperm.xlu0 %11524, %v6083_v28   ;;  %v6764_v3 = vrot.slane %v6329_v40, %v11813_v47  ;;  %v14271_v7 = vrot.slane %v11969_v14, %v14025_v54 }
 0x82b   :  { %v6750_v1 = vsel %vm1055_vm6, %v6749_v58, %v6745_v42 }
 0x82c   :  { %v6326_v45 = vpop.permute.xlu1 %6325  ;;  %v6755_v62 = vsel %vm1062_vm7, %v6754_v2, %v6750_v1  ;;  %v6335_v59 = vpop.permute.xlu0 %6334  ;;  %v6086_v2 = vmul.f32 %v14089_v44, %v14202_v29  ;;  %v6089_v1 = vmul.f32 %v14035_v25, %v14271_v7 }
 0x82d   :  { %v6759_v15 = vrot.slane %v6326_v45, %v11810_v46  ;;  %6517 = vperm.xlu1 %11523, %v6082_v41   ;;  %6526 = vperm.xlu0 %11524, %v6085_v26   ;;  %v6774_v40 = vrot.slane %v6335_v59, %v11819_v49 }
 0x82f   :  { %v6760_v11 = vsel %vm1069_vm8, %v6759_v15, %v6755_v62 }
 0x830   :  { %v6332_v39 = vpop.permute.xlu1 %6331  ;;  %v6765_v9 = vsel %vm1076_vm9, %v6764_v3, %v6760_v11  ;;  %v6341_v28 = vpop.permute.xlu0 %6340  ;;  %v6088_v3 = vmul.f32 %v14093_v10, %v14202_v29  ;;  %v6091_v11 = vmul.f32 %v14042_v56, %v14271_v7 }
 0x831   :  { %v6769_v42 = vrot.slane %v6332_v39, %v11816_v48  ;;  %6523 = vperm.xlu1 %11523, %v6084_v5   ;;  %6532 = vperm.xlu0 %11524, %v6087_v53   ;;  %v6784_v15 = vrot.slane %v6341_v28, %v11825_v51  ;;  %v6090_v28 = vmul.f32 %v14048_v63, %v14271_v7 }
 0x833   :  { %v6770_v58 = vsel %vm16248_vm10, %v6769_v42, %v6765_v9 }
 0x834   :  { %v6338_v41 = vpop.permute.xlu1 %6337  ;;  %v6775_v26 = vsel %vm1090_vm11, %v6774_v40, %v6770_v58  ;;  %v6347_v45 = vpop.permute.xlu0 %6346  ;;  %v6093_v40 = vmul.f32 %v14050_v16, %v14271_v7 }
 0x835   :  { %v6779_v62 = vrot.slane %v6338_v41, %v11822_v50  ;;  %6529 = vperm.xlu1 %11523, %v6086_v2   ;;  %6538 = vperm.xlu0 %11524, %v6089_v1   ;;  %v6794_v1 = vrot.slane %v6347_v45, %v11783_v22 }
 0x837   :  { %v6780_v59 = vsel %vm1097_vm12, %v6779_v62, %v6775_v26 }
 0x838   :  { %v6344_v5 = vpop.permute.xlu1 %6343  ;;  %v6785_v53 = vsel %vm1104_vm13, %v6784_v15, %v6780_v59  ;;  %v6353_v39 = vpop.permute.xlu0 %6352  ;;  %v6092_v15 = vmul.f32 %v14057_v60, %v14271_v7  ;;  %v6095_v59 = vmul.f32 %v14059_v57, %v14271_v7 }
 0x839   :  { %v6789_v9 = vrot.slane %v6344_v5, %v11828_v52  ;;  %6535 = vperm.xlu1 %11523, %v6088_v3   ;;  %6544 = vperm.xlu0 %11524, %v6091_v11   ;;  %v6803_v26 = vrot.slane %v6353_v39, %v11789_v31  ;;  %v6094_v39 = vmul.f32 %v14063_v23, %v14271_v7 }
 0x83b   :  { %v6790_v42 = vsel %vm1111_vm14, %v6789_v9, %v6785_v53  ;;  %v6097_v9 = vmul.f32 %v14065_v8, %v14271_v7 }
 0x83c   :  { %v14297_v29 = vsel %vm16249_vm15, %v6790_v42, %v14222_v27  ;;  %v6350_v58 = vpop.permute.xlu1 %6349  ;;  %v6359_v2 = vpop.permute.xlu0 %6358  ;;  %vm16250_vm15 = vcmask 1042434  }
 0x83d   :  { %v6798_v41 = vrot.slane %v6350_v58, %v11786_v30  ;;  %6541 = vperm.xlu1 %11523, %v6090_v28   ;;  %6550 = vperm.xlu0 %11524, %v6093_v40   ;;  %v6813_v5 = vrot.slane %v6359_v2, %v11795_v34 }
 0x83f   :  { %v6799_v62 = vsel %vm1013_vm0, %v6798_v41, %v6794_v1  ;;  %v6096_v41 = vmul.f32 %v14069_v18, %v14271_v7 }
 0x840   :  { %v6356_v27 = vpop.permute.xlu1 %6355  ;;  %v6804_v3 = vsel %vm1020_vm1, %v6803_v26, %v6799_v62  ;;  %v6365_v11 = vpop.permute.xlu0 %6364  ;;  %v6099_v26 = vmul.f32 %v14071_v0, %v14271_v7 }
 0x841   :  { %v6808_v45 = vrot.slane %v6356_v27, %v11792_v32  ;;  %6547 = vperm.xlu1 %11523, %v6092_v15   ;;  %6556 = vperm.xlu0 %11524, %v6095_v59   ;;  %v6823_v1 = vrot.slane %v6365_v11, %v11801_v36 }
 0x843   :  { %v6809_v53 = vsel %vm1027_vm2, %v6808_v45, %v6804_v3  ;;  %v6098_v45 = vmul.f32 %v14075_v24, %v14271_v7 }
 0x844   :  { %v6362_v42 = vpop.permute.xlu1 %6361  ;;  %v6814_v28 = vsel %vm1034_vm3, %v6813_v5, %v6809_v53  ;;  %v6371_v40 = vpop.permute.xlu0 %6370  ;;  %v6101_v5 = vmul.f32 %v14077_v21, %v14271_v7 }
 0x845   :  { %v6818_v58 = vrot.slane %v6362_v42, %v11798_v35  ;;  %6553 = vperm.xlu1 %11523, %v6094_v39   ;;  %6562 = vperm.xlu0 %11524, %v6097_v9   ;;  %v6833_v3 = vrot.slane %v6371_v40, %v11807_v38 }
 0x847   :  { %v6819_v2 = vsel %vm1041_vm4, %v6818_v58, %v6814_v28  ;;  %v6100_v58 = vmul.f32 %v14081_v33, %v14271_v7 }
 0x848   :  { %v6368_v62 = vpop.permute.xlu1 %6367  ;;  %v6824_v15 = vsel %vm1048_vm5, %v6823_v1, %v6819_v2  ;;  %v6377_v59 = vpop.permute.xlu0 %6376  ;;  %v6103_v1 = vmul.f32 %v14083_v12, %v14271_v7 }
 0x849   :  { %v6828_v27 = vrot.slane %v6368_v62, %v11804_v37  ;;  %6559 = vperm.xlu1 %11523, %v6096_v41   ;;  %6568 = vperm.xlu0 %11524, %v6099_v26   ;;  %v6843_v28 = vrot.slane %v6377_v59, %v11813_v47  ;;  %v14342_v62 = vrot.slane %v11971_v17, %v14025_v54 }
 0x84b   :  { %v6829_v11 = vsel %vm1055_vm6, %v6828_v27, %v6824_v15 }
 0x84c   :  { %v6374_v53 = vpop.permute.xlu1 %6373  ;;  %v6834_v39 = vsel %vm1062_vm7, %v6833_v3, %v6829_v11  ;;  %v6383_v9 = vpop.permute.xlu0 %6382  ;;  %v6102_v3 = vmul.f32 %v14089_v44, %v14271_v7  ;;  %v6105_v11 = vmul.f32 %v14035_v25, %v14342_v62 }
 0x84d   :  { %v6838_v42 = vrot.slane %v6374_v53, %v11810_v46  ;;  %6565 = vperm.xlu1 %11523, %v6098_v45   ;;  %6574 = vperm.xlu0 %11524, %v6101_v5   ;;  %v6853_v59 = vrot.slane %v6383_v9, %v11819_v49 }
 0x84f   :  { %v6839_v40 = vsel %vm1069_vm8, %v6838_v42, %v6834_v39  ;;  %v6104_v42 = vmul.f32 %v14093_v10, %v14271_v7 }
 0x850   :  { %v6380_v2 = vpop.permute.xlu1 %6379  ;;  %v6844_v41 = vsel %vm1076_vm9, %v6843_v28, %v6839_v40  ;;  %v6389_v26 = vpop.permute.xlu0 %6388  ;;  %v6107_v28 = vmul.f32 %v14042_v56, %v14342_v62 }
 0x851   :  { %v6848_v15 = vrot.slane %v6380_v2, %v11816_v48  ;;  %6571 = vperm.xlu1 %11523, %v6100_v58   ;;  %6580 = vperm.xlu0 %11524, %v6103_v1   ;;  %v6863_v39 = vrot.slane %v6389_v26, %v11825_v51  ;;  %v6109_v26 = vmul.f32 %v14050_v16, %v14342_v62 }
 0x852   :  { %v6111_v16 = vmul.f32 %v14059_v57, %v14342_v62 }
 0x853   :  { %v6849_v27 = vsel %vm16248_vm10, %v6848_v15, %v6844_v41  ;;  %v6106_v41 = vmul.f32 %v14048_v63, %v14342_v62  ;;  %v6108_v63 = vmul.f32 %v14057_v60, %v14342_v62  ;;  %v6113_v60 = vmul.f32 %v14065_v8, %v14342_v62 }
 0x854   :  { %v6386_v45 = vpop.permute.xlu1 %6385  ;;  %v6854_v5 = vsel %vm1090_vm11, %v6853_v59, %v6849_v27  ;;  %v6395_v53 = vpop.permute.xlu0 %6394 }
 0x855   :  { %v6858_v54 = vrot.slane %v6386_v45, %v11822_v50  ;;  %6577 = vperm.xlu1 %11523, %v6102_v3   ;;  %6586 = vperm.xlu0 %11524, %v6105_v11   ;;  %v6873_v59 = vrot.slane %v6395_v53, %v11783_v22 }
 0x857   :  { %v6859_v9 = vsel %vm1097_vm12, %v6858_v54, %v6854_v5 }
 0x858   :  { %v6392_v40 = vpop.permute.xlu1 %6391  ;;  %v6864_v25 = vsel %vm1104_vm13, %v6863_v39, %v6859_v9  ;;  %v6401_v58 = vpop.permute.xlu0 %6400  ;;  %v6110_v9 = vmul.f32 %v14063_v23, %v14342_v62  ;;  %v6115_v23 = vmul.f32 %v14071_v0, %v14342_v62 }
 0x859   :  { %v6868_v1 = vrot.slane %v6392_v40, %v11828_v52  ;;  %6583 = vperm.xlu1 %11523, %v6104_v42   ;;  %6592 = vperm.xlu0 %11524, %v6107_v28   ;;  %v6882_v3 = vrot.slane %v6401_v58, %v11789_v31 }
 0x85b   :  { %v6869_v2 = vsel %vm1111_vm14, %v6868_v1, %v6864_v25  ;;  %v6112_v1 = vmul.f32 %v14069_v18, %v14342_v62  ;;  %v6117_v18 = vmul.f32 %v14077_v21, %v14342_v62 }
 0x85c   :  { %v14368_v7 = vsel %vm16250_vm15, %v6869_v2, %v14297_v29  ;;  %v6398_v56 = vpop.permute.xlu1 %6397  ;;  %v6407_v15 = vpop.permute.xlu0 %6406  ;;  %vm16251_vm15 = vcmask 1043459  }
 0x85d   :  { %v6877_v27 = vrot.slane %v6398_v56, %v11786_v30  ;;  %6589 = vperm.xlu1 %11523, %v6106_v41   ;;  %6598 = vperm.xlu0 %11524, %v6109_v26   ;;  %v6892_v54 = vrot.slane %v6407_v15, %v11795_v34 }
 0x85f   :  { %v6878_v11 = vsel %vm1013_vm0, %v6877_v27, %v6873_v59  ;;  %v6114_v59 = vmul.f32 %v14075_v24, %v14342_v62  ;;  %v6119_v24 = vmul.f32 %v14083_v12, %v14342_v62 }
 0x860   :  { %v6404_v29 = vpop.permute.xlu1 %6403  ;;  %v6883_v45 = vsel %vm1020_vm1, %v6882_v3, %v6878_v11  ;;  %v6413_v5 = vpop.permute.xlu0 %6412 }
 0x861   :  { %v6887_v53 = vrot.slane %v6404_v29, %v11792_v32  ;;  %6595 = vperm.xlu1 %11523, %v6108_v63   ;;  %6604 = vperm.xlu0 %11524, %v6111_v16   ;;  %v6902_v25 = vrot.slane %v6413_v5, %v11801_v36  ;;  %v6116_v29 = vmul.f32 %v14081_v33, %v14342_v62 }
 0x862   :  { %v6118_v33 = vmul.f32 %v14089_v44, %v14342_v62 }
 0x863   :  { %v6888_v39 = vsel %vm1027_vm2, %v6887_v53, %v6883_v45 }
 0x864   :  { %v6410_v42 = vpop.permute.xlu1 %6409  ;;  %v6893_v57 = vsel %vm1034_vm3, %v6892_v54, %v6888_v39  ;;  %v6419_v28 = vpop.permute.xlu0 %6418  ;;  %v14413_v39 = vld [vmem:[#allocation7 + $0x5] ss:$0 sm:$0xff] }
 0x865   :  { %v6897_v40 = vrot.slane %v6410_v42, %v11798_v35  ;;  %6601 = vperm.xlu1 %11523, %v6110_v9   ;;  %6610 = vperm.xlu0 %11524, %v6113_v60   ;;  %v6912_v56 = vrot.slane %v6419_v28, %v11807_v38 }
 0x867   :  { %v6898_v58 = vsel %vm1041_vm4, %v6897_v40, %v6893_v57 }
 0x868   :  { %v6416_v2 = vpop.permute.xlu1 %6415  ;;  %v6903_v8 = vsel %vm1048_vm5, %v6902_v25, %v6898_v58  ;;  %v6425_v41 = vpop.permute.xlu0 %6424  ;;  %v6120_v25 = vmul.f32 %v14093_v10, %v14342_v62 }
 0x869   :  { %v6907_v26 = vrot.slane %v6416_v2, %v11804_v37  ;;  %6607 = vperm.xlu1 %11523, %v6112_v1   ;;  %6616 = vperm.xlu0 %11524, %v6115_v23   ;;  %v6922_v63 = vrot.slane %v6425_v41, %v11813_v47 }
 0x86b   :  { %v6908_v15 = vsel %vm1055_vm6, %v6907_v26, %v6903_v8 }
 0x86c   :  { %v6422_v27 = vpop.permute.xlu1 %6421  ;;  %v6913_v0 = vsel %vm1062_vm7, %v6912_v56, %v6908_v15  ;;  %v6431_v3 = vpop.permute.xlu0 %6430 }
 0x86d   :  { %v6917_v11 = vrot.slane %v6422_v27, %v11810_v46  ;;  %6613 = vperm.xlu1 %11523, %v6114_v59   ;;  %6622 = vperm.xlu0 %11524, %v6117_v18   ;;  %v6932_v54 = vrot.slane %v6431_v3, %v11819_v49 }
 0x86f   :  { %v6918_v16 = vsel %vm1069_vm8, %v6917_v11, %v6913_v0 }
 0x870   :  { %v6428_v45 = vpop.permute.xlu1 %6427  ;;  %v6923_v21 = vsel %vm1076_vm9, %v6922_v63, %v6918_v16  ;;  %v6437_v5 = vpop.permute.xlu0 %6436 }
 0x871   :  { %v6927_v53 = vrot.slane %v6428_v45, %v11816_v48  ;;  %6619 = vperm.xlu1 %11523, %v6116_v29   ;;  %6628 = vperm.xlu0 %11524, %v6119_v24   ;;  %v6942_v28 = vrot.slane %v6437_v5, %v11825_v51 }
 0x873   :  { %v6928_v9 = vsel %vm16248_vm10, %v6927_v53, %v6923_v21 }
 0x874   :  { %v6434_v60 = vpop.permute.xlu1 %6433  ;;  %v6933_v12 = vsel %vm1090_vm11, %v6932_v54, %v6928_v9  ;;  %v6443_v42 = vpop.permute.xlu0 %6442 }
 0x875   :  { %v6937_v57 = vrot.slane %v6434_v60, %v11822_v50  ;;  %6625 = vperm.xlu1 %11523, %v6118_v33   ;;  %7313 = vbcast.lane.b32.xlu0 %v14413_v39, 256  ;;  %v6952_v56 = vrot.slane %v6443_v42, %v11783_v22 }
 0x877   :  { %v6938_v40 = vsel %vm1097_vm12, %v6937_v57, %v6933_v12 }
 0x878   :  { %v6440_v58 = vpop.permute.xlu1 %6439  ;;  %v6943_v1 = vsel %vm1104_vm13, %v6942_v28, %v6938_v40  ;;  %v6449_v44 = vpop.permute.xlu0 %6448 }
 0x879   :  { %v6947_v23 = vrot.slane %v6440_v58, %v11828_v52  ;;  %6631 = vperm.xlu1 %11523, %v6120_v25   ;;  %7321 = vbcast.lane.b32.xlu0 %v14413_v39, 272  ;;  %v6961_v62 = vrot.slane %v6449_v44, %v11789_v31 }
 0x87b   :  { %v6948_v2 = vsel %vm1111_vm14, %v6947_v23, %v6943_v1 }
 0x87c   :  { %v14431_v8 = vsel %vm16251_vm15, %v6948_v2, %v14368_v7  ;;  %v6446_v41 = vpop.permute.xlu1 %6445  ;;  %v6455_v26 = vpop.permute.xlu0 %6454  ;;  %vm16252_vm15 = vcmask 1044484  }
 0x87d   :  { %v6956_v10 = vrot.slane %v6446_v41, %v11786_v30  ;;  %7317 = vbcast.lane.b32.xlu1 %v14413_v39, 264  ;;  %7329 = vbcast.lane.b32.xlu0 %v14413_v39, 288  ;;  %v6971_v0 = vrot.slane %v6455_v26, %v11795_v34 }
 0x87f   :  { %v6957_v15 = vsel %vm1013_vm0, %v6956_v10, %v6952_v56 }
 0x880   :  { %v6452_v59 = vpop.permute.xlu1 %6451  ;;  %v6962_v18 = vsel %vm1020_vm1, %v6961_v62, %v6957_v15  ;;  %v6461_v27 = vpop.permute.xlu0 %6460 }
 0x881   :  { %v6966_v7 = vrot.slane %v6452_v59, %v11792_v32  ;;  %7325 = vbcast.lane.b32.xlu1 %v14413_v39, 280  ;;  %7337 = vbcast.lane.b32.xlu0 %v14413_v39, 304  ;;  %v6981_v24 = vrot.slane %v6461_v27, %v11801_v36 }
 0x883   :  { %v6967_v3 = vsel %vm1027_vm2, %v6966_v7, %v6962_v18 }
 0x884   :  { %v6458_v11 = vpop.permute.xlu1 %6457  ;;  %v6972_v63 = vsel %vm1034_vm3, %v6971_v0, %v6967_v3  ;;  %v6467_v16 = vpop.permute.xlu0 %6466 }
 0x885   :  { %v6976_v29 = vrot.slane %v6458_v11, %v11798_v35  ;;  %7333 = vbcast.lane.b32.xlu1 %v14413_v39, 296  ;;  %7345 = vbcast.lane.b32.xlu0 %v14413_v39, 320  ;;  %v6991_v9 = vrot.slane %v6467_v16, %v11807_v38 }
 0x887   :  { %v6977_v45 = vsel %vm1041_vm4, %v6976_v29, %v6972_v63 }
 0x888   :  { %v6464_v21 = vpop.permute.xlu1 %6463  ;;  %v6982_v5 = vsel %vm1048_vm5, %v6981_v24, %v6977_v45  ;;  %v6473_v53 = vpop.permute.xlu0 %6472 }
 0x889   :  { %v6986_v54 = vrot.slane %v6464_v21, %v11804_v37  ;;  %7341 = vbcast.lane.b32.xlu1 %v14413_v39, 312  ;;  %7353 = vbcast.lane.b32.xlu0 %v14413_v39, 336  ;;  %v7001_v28 = vrot.slane %v6473_v53, %v11813_v47 }
 0x88b   :  { %v6987_v33 = vsel %vm1055_vm6, %v6986_v54, %v6982_v5 }
 0x88c   :  { %v6470_v60 = vpop.permute.xlu1 %6469  ;;  %v6992_v12 = vsel %vm1062_vm7, %v6991_v9, %v6987_v33  ;;  %v6479_v42 = vpop.permute.xlu0 %6478 }
 0x88d   :  { %v6996_v57 = vrot.slane %v6470_v60, %v11810_v46  ;;  %7349 = vbcast.lane.b32.xlu1 %v14413_v39, 328  ;;  %7361 = vbcast.lane.b32.xlu0 %v14413_v39, 352  ;;  %v7011_v23 = vrot.slane %v6479_v42, %v11819_v49 }
 0x88f   :  { %v6997_v40 = vsel %vm1069_vm8, %v6996_v57, %v6992_v12 }
 0x890   :  { %v6476_v25 = vpop.permute.xlu1 %6475  ;;  %v7002_v58 = vsel %vm1076_vm9, %v7001_v28, %v6997_v40  ;;  %v6485_v1 = vpop.permute.xlu0 %6484 }
 0x891   :  { %v7006_v44 = vrot.slane %v6476_v25, %v11816_v48  ;;  %7357 = vbcast.lane.b32.xlu1 %v14413_v39, 344  ;;  %7369 = vbcast.lane.b32.xlu0 %v14413_v39, 368  ;;  %v7021_v62 = vrot.slane %v6485_v1, %v11825_v51 }
 0x893   :  { %v7007_v2 = vsel %vm16248_vm10, %v7006_v44, %v7002_v58 }
 0x894   :  { %v6482_v41 = vpop.permute.xlu1 %6481  ;;  %v7012_v26 = vsel %vm1090_vm11, %v7011_v23, %v7007_v2  ;;  %v6491_v56 = vpop.permute.xlu0 %6490 }
 0x895   :  { %v7016_v10 = vrot.slane %v6482_v41, %v11822_v50  ;;  %7365 = vbcast.lane.b32.xlu1 %v14413_v39, 360  ;;  %v7031_v16 = vrot.slane %v6491_v56, %v11783_v22 }
 0x897   :  { %v7017_v15 = vsel %vm1097_vm12, %v7016_v10, %v7012_v26 }
 0x898   :  { %v6488_v59 = vpop.permute.xlu1 %6487  ;;  %v7022_v18 = vsel %vm1104_vm13, %v7021_v62, %v7017_v15  ;;  %v6497_v27 = vpop.permute.xlu0 %6496 }
 0x899   :  { %v7026_v7 = vrot.slane %v6488_v59, %v11828_v52  ;;  %7373 = vbcast.lane.b32.xlu1 %v14413_v39, 376  ;;  %v7040_v24 = vrot.slane %v6497_v27, %v11789_v31 }
 0x89b   :  { %v7027_v0 = vsel %vm1111_vm14, %v7026_v7, %v7022_v18 }
 0x89c   :  { %v7268_v3 = vsel %vm16252_vm15, %v7027_v0, %v14431_v8  ;;  %v6494_v11 = vpop.permute.xlu1 %6493  ;;  %v6503_v63 = vpop.permute.xlu0 %6502  ;;  %vm16253_vm15 = vcmask 1045509  }
 0x89d   :  { %v7035_v29 = vrot.slane %v6494_v11, %v11786_v30  ;;  %v7050_v54 = vrot.slane %v6503_v63, %v11795_v34 }
 0x89f   :  { %v7036_v45 = vsel %vm1013_vm0, %v7035_v29, %v7031_v16 }
 0x8a0   :  { %v6500_v21 = vpop.permute.xlu1 %6499  ;;  %v7041_v5 = vsel %vm1020_vm1, %v7040_v24, %v7036_v45  ;;  %v6509_v53 = vpop.permute.xlu0 %6508 }
 0x8a1   :  { %v7045_v39 = vrot.slane %v6500_v21, %v11792_v32  ;;  %v7060_v42 = vrot.slane %v6509_v53, %v11801_v36 }
 0x8a3   :  { %v7046_v8 = vsel %vm1027_vm2, %v7045_v39, %v7041_v5 }
 0x8a4   :  { %v6506_v9 = vpop.permute.xlu1 %6505  ;;  %v7051_v33 = vsel %vm1034_vm3, %v7050_v54, %v7046_v8  ;;  %v6515_v60 = vpop.permute.xlu0 %6514 }
 0x8a5   :  { %v7055_v12 = vrot.slane %v6506_v9, %v11798_v35  ;;  %v7070_v1 = vrot.slane %v6515_v60, %v11807_v38 }
 0x8a7   :  { %v7056_v57 = vsel %vm1041_vm4, %v7055_v12, %v7051_v33 }
 0x8a8   :  { %v6512_v28 = vpop.permute.xlu1 %6511  ;;  %v7061_v40 = vsel %vm1048_vm5, %v7060_v42, %v7056_v57  ;;  %v6521_v25 = vpop.permute.xlu0 %6520 }
 0x8a9   :  { %v7065_v58 = vrot.slane %v6512_v28, %v11804_v37  ;;  %v7080_v56 = vrot.slane %v6521_v25, %v11813_v47 }
 0x8ab   :  { %v7066_v44 = vsel %vm1055_vm6, %v7065_v58, %v7061_v40 }
 0x8ac   :  { %v6518_v23 = vpop.permute.xlu1 %6517  ;;  %v7071_v2 = vsel %vm1062_vm7, %v7070_v1, %v7066_v44  ;;  %v6527_v41 = vpop.permute.xlu0 %6526 }
 0x8ad   :  { %v7075_v26 = vrot.slane %v6518_v23, %v11810_v46  ;;  %v7090_v27 = vrot.slane %v6527_v41, %v11819_v49 }
 0x8af   :  { %v7076_v10 = vsel %vm1069_vm8, %v7075_v26, %v7071_v2 }
 0x8b0   :  { %v6524_v62 = vpop.permute.xlu1 %6523  ;;  %v7081_v15 = vsel %vm1076_vm9, %v7080_v56, %v7076_v10  ;;  %v6533_v59 = vpop.permute.xlu0 %6532 }
 0x8b1   :  { %v7085_v18 = vrot.slane %v6524_v62, %v11816_v48  ;;  %v7100_v29 = vrot.slane %v6533_v59, %v11825_v51 }
 0x8b3   :  { %v7086_v7 = vsel %vm16248_vm10, %v7085_v18, %v7081_v15 }
 0x8b4   :  { %v6530_v0 = vpop.permute.xlu1 %6529  ;;  %v7091_v11 = vsel %vm1090_vm11, %v7090_v27, %v7086_v7  ;;  %v6539_v63 = vpop.permute.xlu0 %6538 }
 0x8b5   :  { %v7095_v16 = vrot.slane %v6530_v0, %v11822_v50  ;;  %v7110_v33 = vrot.slane %v6539_v63, %v11783_v22 }
 0x8b7   :  { %v7096_v24 = vsel %vm1097_vm12, %v7095_v16, %v7091_v11 }
 0x8b8   :  { %v6536_v45 = vpop.permute.xlu1 %6535  ;;  %v7101_v21 = vsel %vm1104_vm13, %v7100_v29, %v7096_v24  ;;  %v6545_v5 = vpop.permute.xlu0 %6544 }
 0x8b9   :  { %v7105_v53 = vrot.slane %v6536_v45, %v11828_v52  ;;  %v7119_v12 = vrot.slane %v6545_v5, %v11789_v31 }
 0x8bb   :  { %v7106_v39 = vsel %vm1111_vm14, %v7105_v53, %v7101_v21 }
 0x8bc   :  { %v7269_v54 = vsel %vm16253_vm15, %v7106_v39, %v7268_v3  ;;  %v6542_v8 = vpop.permute.xlu1 %6541  ;;  %v6551_v9 = vpop.permute.xlu0 %6550  ;;  %vm16254_vm15 = vcmask 1046534  }
 0x8bd   :  { %v7114_v60 = vrot.slane %v6542_v8, %v11786_v30  ;;  %v7129_v58 = vrot.slane %v6551_v9, %v11795_v34 }
 0x8bf   :  { %v7115_v42 = vsel %vm1013_vm0, %v7114_v60, %v7110_v33 }
 0x8c0   :  { %v6548_v57 = vpop.permute.xlu1 %6547  ;;  %v7120_v28 = vsel %vm1020_vm1, %v7119_v12, %v7115_v42  ;;  %v6557_v40 = vpop.permute.xlu0 %6556 }
 0x8c1   :  { %v7124_v25 = vrot.slane %v6548_v57, %v11792_v32  ;;  %v7139_v41 = vrot.slane %v6557_v40, %v11801_v36 }
 0x8c3   :  { %v7125_v3 = vsel %vm1027_vm2, %v7124_v25, %v7120_v28 }
 0x8c4   :  { %v6554_v1 = vpop.permute.xlu1 %6553  ;;  %v7130_v44 = vsel %vm1034_vm3, %v7129_v58, %v7125_v3  ;;  %v6563_v23 = vpop.permute.xlu0 %6562 }
 0x8c5   :  { %v7134_v2 = vrot.slane %v6554_v1, %v11798_v35  ;;  %v7149_v59 = vrot.slane %v6563_v23, %v11807_v38 }
 0x8c7   :  { %v7135_v26 = vsel %vm1041_vm4, %v7134_v2, %v7130_v44 }
 0x8c8   :  { %v6560_v56 = vpop.permute.xlu1 %6559  ;;  %v7140_v10 = vsel %vm1048_vm5, %v7139_v41, %v7135_v26  ;;  %v6569_v62 = vpop.permute.xlu0 %6568 }
 0x8c9   :  { %v7144_v15 = vrot.slane %v6560_v56, %v11804_v37  ;;  %v7159_v63 = vrot.slane %v6569_v62, %v11813_v47 }
 0x8cb   :  { %v7145_v18 = vsel %vm1055_vm6, %v7144_v15, %v7140_v10 }
 0x8cc   :  { %v6566_v27 = vpop.permute.xlu1 %6565  ;;  %v7150_v7 = vsel %vm1062_vm7, %v7149_v59, %v7145_v18  ;;  %v6575_v0 = vpop.permute.xlu0 %6574 }
 0x8cd   :  { %v7154_v11 = vrot.slane %v6566_v27, %v11810_v46  ;;  %v7169_v5 = vrot.slane %v6575_v0, %v11819_v49 }
 0x8cf   :  { %v7155_v16 = vsel %vm1069_vm8, %v7154_v11, %v7150_v7 }
 0x8d0   :  { %v6572_v29 = vpop.permute.xlu1 %6571  ;;  %v7160_v24 = vsel %vm1076_vm9, %v7159_v63, %v7155_v16  ;;  %v6581_v45 = vpop.permute.xlu0 %6580 }
 0x8d1   :  { %v7164_v21 = vrot.slane %v6572_v29, %v11816_v48  ;;  %v7179_v60 = vrot.slane %v6581_v45, %v11825_v51 }
 0x8d3   :  { %v7165_v53 = vsel %vm16248_vm10, %v7164_v21, %v7160_v24 }
 0x8d4   :  { %v6578_v39 = vpop.permute.xlu1 %6577  ;;  %v7170_v8 = vsel %vm1090_vm11, %v7169_v5, %v7165_v53  ;;  %v6587_v9 = vpop.permute.xlu0 %6586 }
 0x8d5   :  { %v7174_v33 = vrot.slane %v6578_v39, %v11822_v50  ;;  %v7189_v44 = vrot.slane %v6587_v9, %v11783_v22 }
 0x8d7   :  { %v7175_v12 = vsel %vm1097_vm12, %v7174_v33, %v7170_v8  ;;  %v14564_v33 = vsub.s32 5, %v11780_v20 }
 0x8d8   :  { %v6584_v42 = vpop.permute.xlu1 %6583  ;;  %v7180_v57 = vsel %vm1104_vm13, %v7179_v60, %v7175_v12  ;;  %v6593_v28 = vpop.permute.xlu0 %6592 }
 0x8d9   :  { %v7184_v40 = vrot.slane %v6584_v42, %v11828_v52  ;;  %v7198_v2 = vrot.slane %v6593_v28, %v11789_v31 }
 0x8db   :  { %v7185_v25 = vsel %vm1111_vm14, %v7184_v40, %v7180_v57 }
 0x8dc   :  { %v7270_v58 = vsel %vm16254_vm15, %v7185_v25, %v7269_v54  ;;  %v6590_v3 = vpop.permute.xlu1 %6589  ;;  %v6599_v1 = vpop.permute.xlu0 %6598  ;;  %v7278_v25 = vrot.slane %v11873_v43, %v14564_v33  ;;  %vm16255_vm15 = vcmask 1047559  }
 0x8dd   :  { %v7193_v23 = vrot.slane %v6590_v3, %v11786_v30  ;;  %v7208_v15 = vrot.slane %v6599_v1, %v11795_v34 }
 0x8df   :  { %v7194_v41 = vsel %vm1013_vm0, %v7193_v23, %v7189_v44 }
 0x8e0   :  { %v6596_v26 = vpop.permute.xlu1 %6595  ;;  %v7199_v56 = vsel %vm1020_vm1, %v7198_v2, %v7194_v41  ;;  %v6605_v10 = vpop.permute.xlu0 %6604 }
 0x8e1   :  { %v7203_v62 = vrot.slane %v6596_v26, %v11792_v32  ;;  %v7218_v0 = vrot.slane %v6605_v10, %v11801_v36 }
 0x8e3   :  { %v7204_v54 = vsel %vm1027_vm2, %v7203_v62, %v7199_v56 }
 0x8e4   :  { %v6602_v59 = vpop.permute.xlu1 %6601  ;;  %v7209_v18 = vsel %vm1034_vm3, %v7208_v15, %v7204_v54  ;;  %v6611_v27 = vpop.permute.xlu0 %6610 }
 0x8e5   :  { %v7213_v7 = vrot.slane %v6602_v59, %v11798_v35  ;;  %v7228_v45 = vrot.slane %v6611_v27, %v11807_v38 }
 0x8e7   :  { %v7214_v11 = vsel %vm1041_vm4, %v7213_v7, %v7209_v18 }
 0x8e8   :  { %v6608_v63 = vpop.permute.xlu1 %6607  ;;  %v7219_v16 = vsel %vm1048_vm5, %v7218_v0, %v7214_v11  ;;  %v6617_v29 = vpop.permute.xlu0 %6616 }
 0x8e9   :  { %v7223_v24 = vrot.slane %v6608_v63, %v11804_v37  ;;  %v7238_v9 = vrot.slane %v6617_v29, %v11813_v47 }
 0x8eb   :  { %v7224_v21 = vsel %vm1055_vm6, %v7223_v24, %v7219_v16 }
 0x8ec   :  { %v6614_v5 = vpop.permute.xlu1 %6613  ;;  %v7229_v53 = vsel %vm1062_vm7, %v7228_v45, %v7224_v21  ;;  %v6623_v39 = vpop.permute.xlu0 %6622 }
 0x8ed   :  { %v7233_v8 = vrot.slane %v6614_v5, %v11810_v46  ;;  %v7248_v40 = vrot.slane %v6623_v39, %v11819_v49 }
 0x8ef   :  { %v7234_v60 = vsel %vm1069_vm8, %v7233_v8, %v7229_v53 }
 0x8f0   :  { %v6620_v12 = vpop.permute.xlu1 %6619  ;;  %v7239_v42 = vsel %vm1076_vm9, %v7238_v9, %v7234_v60  ;;  %v6629_v57 = vpop.permute.xlu0 %6628 }
 0x8f1   :  { %v7243_v28 = vrot.slane %v6620_v12, %v11816_v48  ;;  %v7258_v26 = vrot.slane %v6629_v57, %v11825_v51 }
 0x8f3   :  { %v7244_v3 = vsel %vm16248_vm10, %v7243_v28, %v7239_v42 }
 0x8f4   :  { %v6626_v1 = vpop.permute.xlu1 %6625  ;;  %v7249_v44 = vsel %vm1090_vm11, %v7248_v40, %v7244_v3  ;;  %v14574_v23 = vpop.permute.xlu0 %7313 }
 0x8f5   :  { %v7253_v2 = vrot.slane %v6626_v1, %v11822_v50  ;;  %v7391_v41 = vmul.f32 %v14574_v23, %v7278_v25 }
 0x8f7   :  { %v7254_v56 = vsel %vm1097_vm12, %v7253_v2, %v7249_v44  ;;  %7648 = vperm.xlu0 %11524, %v7391_v41   ;;  %v7282_v2 = vrot.slane %v11899_v6, %v14564_v33 }
 0x8f8   :  { %v6632_v10 = vpop.permute.xlu1 %6631  ;;  %v7259_v62 = vsel %vm1104_vm13, %v7258_v26, %v7254_v56  ;;  %v14581_v15 = vpop.permute.xlu0 %7321 }
 0x8f9   :  { %v7263_v54 = vrot.slane %v6632_v10, %v11828_v52  ;;  %v7393_v59 = vmul.f32 %v14581_v15, %v7278_v25  ;;  %v7407_v56 = vmul.f32 %v14574_v23, %v7282_v2 }
 0x8fb   :  { %v7264_v18 = vsel %vm1111_vm14, %v7263_v54, %v7259_v62  ;;  %7654 = vperm.xlu0 %11524, %v7393_v59   ;;  %v7409_v54 = vmul.f32 %v14581_v15, %v7282_v2 }
 0x8fc   :  { %v7271_v27 = vsel %vm16255_vm15, %v7264_v18, %v7270_v58  ;;  %v14587_v7 = vpop.permute.xlu1 %7317  ;;  %v14589_v0 = vpop.permute.xlu0 %7329  ;;  %vm16256_vm15 = vmmov %vm16248_vm10 }
 0x8fd   :  { %v14592_v11 = vadd.f32 %v7271_v27, %v14053_v13  ;;  %v7392_v63 = vmul.f32 %v14587_v7, %v7278_v25  ;;  %v7395_v16 = vmul.f32 %v14589_v0, %v7278_v25  ;;  %v7408_v59 = vmul.f32 %v14587_v7, %v7282_v2 }
 0x8fe   :  { %v7411_v18 = vmul.f32 %v14589_v0, %v7282_v2 }
 0x8ff   :  { %7651 = vperm.xlu1 %11523, %v7392_v63   ;;  %7660 = vperm.xlu0 %11524, %v7395_v16  }
 0x900   :  { %v14596_v29 = vpop.permute.xlu1 %7325  ;;  %v14598_v24 = vpop.permute.xlu0 %7337 }
 0x901   :  { %v7394_v45 = vmul.f32 %v14596_v29, %v7278_v25  ;;  %v7397_v58 = vmul.f32 %v14598_v24, %v7278_v25  ;;  %v7410_v27 = vmul.f32 %v14596_v29, %v7282_v2  ;;  %v7413_v63 = vmul.f32 %v14598_v24, %v7282_v2 }
 0x903   :  { %7657 = vperm.xlu1 %11523, %v7394_v45   ;;  %7666 = vperm.xlu0 %11524, %v7397_v58  }
 0x904   :  { %v14602_v21 = vpop.permute.xlu1 %7333  ;;  %v14604_v13 = vpop.permute.xlu0 %7345 }
 0x905   :  { %v7396_v5 = vmul.f32 %v14602_v21, %v7278_v25  ;;  %v7399_v53 = vmul.f32 %v14604_v13, %v7278_v25  ;;  %v7412_v16 = vmul.f32 %v14602_v21, %v7282_v2 }
 0x907   :  { %7663 = vperm.xlu1 %11523, %v7396_v5   ;;  %7672 = vperm.xlu0 %11524, %v7399_v53  }
 0x908   :  { %v14608_v39 = vpop.permute.xlu1 %7341  ;;  %v14610_v8 = vpop.permute.xlu0 %7353 }
 0x909   :  { %v7398_v9 = vmul.f32 %v14608_v39, %v7278_v25  ;;  %v7401_v60 = vmul.f32 %v14610_v8, %v7278_v25  ;;  %v7414_v45 = vmul.f32 %v14608_v39, %v7282_v2  ;;  %v7417_v58 = vmul.f32 %v14610_v8, %v7282_v2 }
 0x90b   :  { %7669 = vperm.xlu1 %11523, %v7398_v9   ;;  %7678 = vperm.xlu0 %11524, %v7401_v60  }
 0x90c   :  { %v14614_v12 = vpop.permute.xlu1 %7349  ;;  %v14616_v42 = vpop.permute.xlu0 %7361 }
 0x90d   :  { %v7400_v57 = vmul.f32 %v14614_v12, %v7278_v25  ;;  %v7403_v28 = vmul.f32 %v14616_v42, %v7278_v25  ;;  %v7416_v5 = vmul.f32 %v14614_v12, %v7282_v2  ;;  %v7419_v53 = vmul.f32 %v14616_v42, %v7282_v2 }
 0x90f   :  { %7675 = vperm.xlu1 %11523, %v7400_v57   ;;  %7684 = vperm.xlu0 %11524, %v7403_v28   ;;  %v7286_v57 = vrot.slane %v11919_v55, %v14564_v33 }
 0x910   :  { %v14620_v40 = vpop.permute.xlu1 %7357  ;;  %v14622_v3 = vpop.permute.xlu0 %7369 }
 0x911   :  { %v7402_v1 = vmul.f32 %v14620_v40, %v7278_v25  ;;  %v7405_v44 = vmul.f32 %v14622_v3, %v7278_v25  ;;  %v7418_v9 = vmul.f32 %v14620_v40, %v7282_v2  ;;  %v7421_v60 = vmul.f32 %v14622_v3, %v7282_v2 }
 0x913   :  { %7681 = vperm.xlu1 %11523, %v7402_v1   ;;  %7690 = vperm.xlu0 %11524, %v7405_v44   ;;  %v7423_v1 = vmul.f32 %v14574_v23, %v7286_v57 }
 0x914   :  { %v14628_v41 = vpop.permute.xlu1 %7365 }
 0x915   :  { %v7404_v26 = vmul.f32 %v14628_v41, %v7278_v25  ;;  %v7420_v28 = vmul.f32 %v14628_v41, %v7282_v2 }
 0x917   :  { %7687 = vperm.xlu1 %11523, %v7404_v26   ;;  %7696 = vperm.xlu0 %11524, %v7407_v56   ;;  %v7425_v26 = vmul.f32 %v14581_v15, %v7286_v57  ;;  %v7424_v56 = vmul.f32 %v14587_v7, %v7286_v57 }
 0x918   :  { %v14632_v10 = vpop.permute.xlu1 %7373 }
 0x919   :  { %v7406_v62 = vmul.f32 %v14632_v10, %v7278_v25  ;;  %v7415_v25 = vmul.f32 %v14604_v13, %v7282_v2  ;;  %v7422_v44 = vmul.f32 %v14632_v10, %v7282_v2  ;;  %v7431_v2 = vmul.f32 %v14604_v13, %v7286_v57 }
 0x91b   :  { %7693 = vperm.xlu1 %11523, %v7406_v62   ;;  %7702 = vperm.xlu0 %11524, %v7409_v54   ;;  %v7427_v62 = vmul.f32 %v14589_v0, %v7286_v57  ;;  %v7426_v54 = vmul.f32 %v14596_v29, %v7286_v57 }
 0x91f   :  { %7699 = vperm.xlu1 %11523, %v7408_v59   ;;  %7708 = vperm.xlu0 %11524, %v7411_v18   ;;  %v7429_v59 = vmul.f32 %v14598_v24, %v7286_v57  ;;  %v7428_v18 = vmul.f32 %v14602_v21, %v7286_v57 }
 0x923   :  { %7705 = vperm.xlu1 %11523, %v7410_v27   ;;  %7714 = vperm.xlu0 %11524, %v7413_v63   ;;  %v7430_v27 = vmul.f32 %v14608_v39, %v7286_v57  ;;  %v7433_v63 = vmul.f32 %v14610_v8, %v7286_v57 }
 0x927   :  { %7711 = vperm.xlu1 %11523, %v7412_v16   ;;  %7720 = vperm.xlu0 %11524, %v7415_v25   ;;  %v7432_v16 = vmul.f32 %v14614_v12, %v7286_v57  ;;  %v7435_v25 = vmul.f32 %v14616_v42, %v7286_v57 }
 0x92b   :  { %7717 = vperm.xlu1 %11523, %v7414_v45   ;;  %7726 = vperm.xlu0 %11524, %v7417_v58   ;;  %v7434_v45 = vmul.f32 %v14620_v40, %v7286_v57  ;;  %v7437_v58 = vmul.f32 %v14622_v3, %v7286_v57 }
 0x92f   :  { %7723 = vperm.xlu1 %11523, %v7416_v5   ;;  %7732 = vperm.xlu0 %11524, %v7419_v53   ;;  %v7290_v5 = vrot.slane %v11955_v61, %v14564_v33  ;;  %v7436_v53 = vmul.f32 %v14628_v41, %v7286_v57 }
 0x933   :  { %7729 = vperm.xlu1 %11523, %v7418_v9   ;;  %7738 = vperm.xlu0 %11524, %v7421_v60   ;;  %v7439_v9 = vmul.f32 %v14574_v23, %v7290_v5  ;;  %v7438_v60 = vmul.f32 %v14632_v10, %v7286_v57  ;;  %v7447_v57 = vmul.f32 %v14604_v13, %v7290_v5 }
 0x937   :  { %7735 = vperm.xlu1 %11523, %v7420_v28   ;;  %7744 = vperm.xlu0 %11524, %v7423_v1   ;;  %v7441_v28 = vmul.f32 %v14581_v15, %v7290_v5  ;;  %v7440_v1 = vmul.f32 %v14587_v7, %v7290_v5 }
 0x93b   :  { %7741 = vperm.xlu1 %11523, %v7422_v44   ;;  %7750 = vperm.xlu0 %11524, %v7425_v26   ;;  %v7443_v44 = vmul.f32 %v14589_v0, %v7290_v5  ;;  %v7442_v26 = vmul.f32 %v14596_v29, %v7290_v5 }
 0x93f   :  { %7747 = vperm.xlu1 %11523, %v7424_v56   ;;  %7756 = vperm.xlu0 %11524, %v7427_v62   ;;  %v7445_v56 = vmul.f32 %v14598_v24, %v7290_v5  ;;  %v7444_v62 = vmul.f32 %v14602_v21, %v7290_v5 }
 0x943   :  { %7753 = vperm.xlu1 %11523, %v7426_v54   ;;  %7762 = vperm.xlu0 %11524, %v7429_v59   ;;  %v7446_v54 = vmul.f32 %v14608_v39, %v7290_v5  ;;  %v7449_v59 = vmul.f32 %v14610_v8, %v7290_v5 }
 0x947   :  { %7759 = vperm.xlu1 %11523, %v7428_v18   ;;  %7768 = vperm.xlu0 %11524, %v7431_v2   ;;  %v7448_v18 = vmul.f32 %v14614_v12, %v7290_v5  ;;  %v7451_v2 = vmul.f32 %v14616_v42, %v7290_v5 }
 0x94b   :  { %7765 = vperm.xlu1 %11523, %v7430_v27   ;;  %7774 = vperm.xlu0 %11524, %v7433_v63   ;;  %v7450_v27 = vmul.f32 %v14620_v40, %v7290_v5  ;;  %v7453_v63 = vmul.f32 %v14622_v3, %v7290_v5 }
 0x94f   :  { %7771 = vperm.xlu1 %11523, %v7432_v16   ;;  %7780 = vperm.xlu0 %11524, %v7435_v25   ;;  %v14686_v16 = vrot.slane %v11939_v19, %v14564_v33  ;;  %v7452_v25 = vmul.f32 %v14628_v41, %v7290_v5 }
 0x953   :  { %7777 = vperm.xlu1 %11523, %v7434_v45   ;;  %7786 = vperm.xlu0 %11524, %v7437_v58   ;;  %v7455_v45 = vmul.f32 %v14574_v23, %v14686_v16 }
 0x957   :  { %7783 = vperm.xlu1 %11523, %v7436_v53   ;;  %7792 = vperm.xlu0 %11524, %v7439_v9   ;;  %v7454_v53 = vmul.f32 %v14632_v10, %v7290_v5  ;;  %v7457_v9 = vmul.f32 %v14581_v15, %v14686_v16 }
 0x95b   :  { %7789 = vperm.xlu1 %11523, %v7438_v60   ;;  %7798 = vperm.xlu0 %11524, %v7441_v28   ;;  %v7456_v28 = vmul.f32 %v14587_v7, %v14686_v16 }
 0x95f   :  { %7795 = vperm.xlu1 %11523, %v7440_v1   ;;  %7804 = vperm.xlu0 %11524, %v7443_v44   ;;  %v7459_v1 = vmul.f32 %v14589_v0, %v14686_v16 }
 0x963   :  { %7801 = vperm.xlu1 %11523, %v7442_v26   ;;  %7810 = vperm.xlu0 %11524, %v7445_v56  }
 0x967   :  { %7807 = vperm.xlu1 %11523, %v7444_v62   ;;  %7816 = vperm.xlu0 %11524, %v7447_v57  }
 0x96b   :  { %7813 = vperm.xlu1 %11523, %v7446_v54   ;;  %7822 = vperm.xlu0 %11524, %v7449_v59   ;;  %v7458_v54 = vmul.f32 %v14596_v29, %v14686_v16  ;;  %v7461_v59 = vmul.f32 %v14598_v24, %v14686_v16 }
 0x96f   :  { %7819 = vperm.xlu1 %11523, %v7448_v18   ;;  %7828 = vperm.xlu0 %11524, %v7451_v2  }
 0x973   :  { %7825 = vperm.xlu1 %11523, %v7450_v27   ;;  %7834 = vperm.xlu0 %11524, %v7453_v63  }
 0x976   :  { %v7649_v58 = vpop.permute.xlu0 %7648 }
 0x977   :  { %7831 = vperm.xlu1 %11523, %v7452_v25   ;;  %7840 = vperm.xlu0 %11524, %v7455_v45   ;;  %v8034_v56 = vrot.slane %v7649_v58, %v11783_v22  ;;  %v7460_v58 = vmul.f32 %v14602_v21, %v14686_v16 }
 0x97a   :  { %v7655_v60 = vpop.permute.xlu0 %7654 }
 0x97b   :  { %7837 = vperm.xlu1 %11523, %v7454_v53   ;;  %7846 = vperm.xlu0 %11524, %v7457_v9   ;;  %v8043_v5 = vrot.slane %v7655_v60, %v11789_v31  ;;  %v7463_v53 = vmul.f32 %v14604_v13, %v14686_v16 }
 0x97e   :  { %v7652_v44 = vpop.permute.xlu1 %7651  ;;  %v7661_v26 = vpop.permute.xlu0 %7660 }
 0x97f   :  { %v8038_v62 = vrot.slane %v7652_v44, %v11786_v30  ;;  %7843 = vperm.xlu1 %11523, %v7456_v28   ;;  %7852 = vperm.xlu0 %11524, %v7459_v1   ;;  %v8053_v25 = vrot.slane %v7661_v26, %v11795_v34 }
 0x981   :  { %v8039_v57 = vsel %vm1013_vm0, %v8038_v62, %v8034_v56  ;;  %v7462_v56 = vmul.f32 %v14608_v39, %v14686_v16  ;;  %v7465_v62 = vmul.f32 %v14610_v8, %v14686_v16 }
 0x982   :  { %v7658_v18 = vpop.permute.xlu1 %7657  ;;  %v8044_v2 = vsel %vm1020_vm1, %v8043_v5, %v8039_v57  ;;  %v7667_v27 = vpop.permute.xlu0 %7666 }
 0x983   :  { %v8048_v63 = vrot.slane %v7658_v18, %v11792_v32  ;;  %7849 = vperm.xlu1 %11523, %v7458_v54   ;;  %7858 = vperm.xlu0 %11524, %v7461_v59   ;;  %v8063_v44 = vrot.slane %v7667_v27, %v11801_v36  ;;  %v7464_v27 = vmul.f32 %v14614_v12, %v14686_v16 }
 0x985   :  { %v8049_v45 = vsel %vm1027_vm2, %v8048_v63, %v8044_v2  ;;  %v7467_v63 = vmul.f32 %v14616_v42, %v14686_v16 }
 0x986   :  { %v7664_v9 = vpop.permute.xlu1 %7663  ;;  %v8054_v60 = vsel %vm1034_vm3, %v8053_v25, %v8049_v45  ;;  %v7673_v28 = vpop.permute.xlu0 %7672 }
 0x987   :  { %v8058_v1 = vrot.slane %v7664_v9, %v11798_v35  ;;  %7855 = vperm.xlu1 %11523, %v7460_v58   ;;  %7864 = vperm.xlu0 %11524, %v7463_v53   ;;  %v8073_v18 = vrot.slane %v7673_v28, %v11807_v38  ;;  %v7466_v28 = vmul.f32 %v14620_v40, %v14686_v16 }
 0x989   :  { %v8059_v26 = vsel %vm1041_vm4, %v8058_v1, %v8054_v60  ;;  %v7469_v1 = vmul.f32 %v14622_v3, %v14686_v16 }
 0x98a   :  { %v7670_v5 = vpop.permute.xlu1 %7669  ;;  %v8064_v57 = vsel %vm1048_vm5, %v8063_v44, %v8059_v26  ;;  %v7679_v54 = vpop.permute.xlu0 %7678 }
 0x98b   :  { %v8068_v59 = vrot.slane %v7670_v5, %v11804_v37  ;;  %7861 = vperm.xlu1 %11523, %v7462_v56   ;;  %7870 = vperm.xlu0 %11524, %v7465_v62   ;;  %v8083_v9 = vrot.slane %v7679_v54, %v11813_v47  ;;  %v14741_v62 = vrot.slane %v11961_v4, %v14564_v33 }
 0x98d   :  { %v8069_v2 = vsel %vm1055_vm6, %v8068_v59, %v8064_v57  ;;  %v7468_v59 = vmul.f32 %v14628_v41, %v14686_v16 }
 0x98e   :  { %v7676_v25 = vpop.permute.xlu1 %7675  ;;  %v8074_v45 = vsel %vm1062_vm7, %v8073_v18, %v8069_v2  ;;  %v7685_v58 = vpop.permute.xlu0 %7684  ;;  %v7471_v18 = vmul.f32 %v14574_v23, %v14741_v62 }
 0x98f   :  { %v8078_v53 = vrot.slane %v7676_v25, %v11810_v46  ;;  %7867 = vperm.xlu1 %11523, %v7464_v27   ;;  %7876 = vperm.xlu0 %11524, %v7467_v63   ;;  %v8093_v57 = vrot.slane %v7685_v58, %v11819_v49 }
 0x991   :  { %v8079_v60 = vsel %vm1069_vm8, %v8078_v53, %v8074_v45  ;;  %v7470_v53 = vmul.f32 %v14632_v10, %v14686_v16  ;;  %v7475_v16 = vmul.f32 %v14589_v0, %v14741_v62 }
 0x992   :  { %v7682_v44 = vpop.permute.xlu1 %7681  ;;  %v8084_v26 = vsel %vm1076_vm9, %v8083_v9, %v8079_v60  ;;  %v7691_v56 = vpop.permute.xlu0 %7690  ;;  %v7473_v9 = vmul.f32 %v14581_v15, %v14741_v62 }
 0x993   :  { %v8088_v5 = vrot.slane %v7682_v44, %v11816_v48  ;;  %7873 = vperm.xlu1 %11523, %v7466_v28   ;;  %7882 = vperm.xlu0 %11524, %v7469_v1   ;;  %v8103_v45 = vrot.slane %v7691_v56, %v11825_v51  ;;  %v7472_v56 = vmul.f32 %v14587_v7, %v14741_v62 }
 0x995   :  { %v8089_v54 = vsel %vm16248_vm10, %v8088_v5, %v8084_v26  ;;  %vm16257_vm10 = vcmask 1041409  }
 0x996   :  { %v7688_v2 = vpop.permute.xlu1 %7687  ;;  %v8094_v27 = vsel %vm1090_vm11, %v8093_v57, %v8089_v54  ;;  %v7697_v63 = vpop.permute.xlu0 %7696 }
 0x997   :  { %v8098_v25 = vrot.slane %v7688_v2, %v11822_v50  ;;  %7879 = vperm.xlu1 %11523, %v7468_v59   ;;  %7888 = vperm.xlu0 %11524, %v7471_v18   ;;  %v8113_v54 = vrot.slane %v7697_v63, %v11783_v22 }
 0x999   :  { %v8099_v58 = vsel %vm1097_vm12, %v8098_v25, %v8094_v27  ;;  %v7474_v27 = vmul.f32 %v14596_v29, %v14741_v62  ;;  %v7477_v25 = vmul.f32 %v14598_v24, %v14741_v62 }
 0x99a   :  { %v7694_v60 = vpop.permute.xlu1 %7693  ;;  %v8104_v28 = vsel %vm1104_vm13, %v8103_v45, %v8099_v58  ;;  %v7703_v1 = vpop.permute.xlu0 %7702 }
 0x99b   :  { %v8108_v44 = vrot.slane %v7694_v60, %v11828_v52  ;;  %7885 = vperm.xlu1 %11523, %v7470_v53   ;;  %7894 = vperm.xlu0 %11524, %v7473_v9   ;;  %v8122_v18 = vrot.slane %v7703_v1, %v11789_v31  ;;  %v7479_v1 = vmul.f32 %v14604_v13, %v14741_v62 }
 0x99d   :  { %v14761_v26 = vsel %vm1111_vm14, %v8108_v44, %v8104_v28  ;;  %v7476_v28 = vmul.f32 %v14602_v21, %v14741_v62 }
 0x99e   :  { %v7700_v5 = vpop.permute.xlu1 %7699  ;;  %v7709_v57 = vpop.permute.xlu0 %7708 }
 0x99f   :  { %v8117_v59 = vrot.slane %v7700_v5, %v11786_v30  ;;  %7891 = vperm.xlu1 %11523, %v7472_v56   ;;  %7900 = vperm.xlu0 %11524, %v7475_v16   ;;  %v8132_v9 = vrot.slane %v7709_v57, %v11795_v34 }
 0x9a1   :  { %v8118_v2 = vsel %vm1013_vm0, %v8117_v59, %v8113_v54  ;;  %v7478_v59 = vmul.f32 %v14608_v39, %v14741_v62 }
 0x9a2   :  { %v7706_v45 = vpop.permute.xlu1 %7705  ;;  %v8123_v58 = vsel %vm1020_vm1, %v8122_v18, %v8118_v2  ;;  %v7715_v53 = vpop.permute.xlu0 %7714  ;;  %v7481_v18 = vmul.f32 %v14610_v8, %v14741_v62 }
 0x9a3   :  { %v8127_v63 = vrot.slane %v7706_v45, %v11792_v32  ;;  %7897 = vperm.xlu1 %11523, %v7474_v27   ;;  %7906 = vperm.xlu0 %11524, %v7477_v25   ;;  %v8142_v54 = vrot.slane %v7715_v53, %v11801_v36 }
 0x9a5   :  { %v8128_v60 = vsel %vm1027_vm2, %v8127_v63, %v8123_v58  ;;  %v7480_v63 = vmul.f32 %v14614_v12, %v14741_v62 }
 0x9a6   :  { %v7712_v44 = vpop.permute.xlu1 %7711  ;;  %v8133_v56 = vsel %vm1034_vm3, %v8132_v9, %v8128_v60  ;;  %v7721_v16 = vpop.permute.xlu0 %7720  ;;  %v7483_v9 = vmul.f32 %v14616_v42, %v14741_v62 }
 0x9a7   :  { %v8137_v5 = vrot.slane %v7712_v44, %v11798_v35  ;;  %7903 = vperm.xlu1 %11523, %v7476_v28   ;;  %7912 = vperm.xlu0 %11524, %v7479_v1   ;;  %v8152_v58 = vrot.slane %v7721_v16, %v11807_v38 }
 0x9a9   :  { %v8138_v57 = vsel %vm1041_vm4, %v8137_v5, %v8133_v56  ;;  %v7482_v5 = vmul.f32 %v14620_v40, %v14741_v62 }
 0x9aa   :  { %v7718_v2 = vpop.permute.xlu1 %7717  ;;  %v8143_v27 = vsel %vm1048_vm5, %v8142_v54, %v8138_v57  ;;  %v7727_v25 = vpop.permute.xlu0 %7726  ;;  %v7485_v54 = vmul.f32 %v14622_v3, %v14741_v62 }
 0x9ab   :  { %v8147_v45 = vrot.slane %v7718_v2, %v11804_v37  ;;  %7909 = vperm.xlu1 %11523, %v7478_v59   ;;  %7918 = vperm.xlu0 %11524, %v7481_v18   ;;  %v8162_v56 = vrot.slane %v7727_v25, %v11813_v47  ;;  %v14810_v2 = vrot.slane %v11969_v14, %v14564_v33 }
 0x9ad   :  { %v8148_v53 = vsel %vm1055_vm6, %v8147_v45, %v8143_v27 }
 0x9ae   :  { %v7724_v60 = vpop.permute.xlu1 %7723  ;;  %v8153_v28 = vsel %vm1062_vm7, %v8152_v58, %v8148_v53  ;;  %v7733_v1 = vpop.permute.xlu0 %7732  ;;  %v7484_v58 = vmul.f32 %v14628_v41, %v14741_v62  ;;  %v7487_v53 = vmul.f32 %v14574_v23, %v14810_v2 }
 0x9af   :  { %v8157_v44 = vrot.slane %v7724_v60, %v11810_v46  ;;  %7915 = vperm.xlu1 %11523, %v7480_v63   ;;  %7924 = vperm.xlu0 %11524, %v7483_v9   ;;  %v8172_v25 = vrot.slane %v7733_v1, %v11819_v49 }
 0x9b1   :  { %v8158_v16 = vsel %vm1069_vm8, %v8157_v44, %v8153_v28 }
 0x9b2   :  { %v7730_v57 = vpop.permute.xlu1 %7729  ;;  %v8163_v59 = vsel %vm1076_vm9, %v8162_v56, %v8158_v16  ;;  %v7739_v18 = vpop.permute.xlu0 %7738  ;;  %v7486_v56 = vmul.f32 %v14632_v10, %v14741_v62  ;;  %v7489_v16 = vmul.f32 %v14581_v15, %v14810_v2 }
 0x9b3   :  { %v8167_v27 = vrot.slane %v7730_v57, %v11816_v48  ;;  %7921 = vperm.xlu1 %11523, %v7482_v5   ;;  %7930 = vperm.xlu0 %11524, %v7485_v54   ;;  %v8182_v44 = vrot.slane %v7739_v18, %v11825_v51  ;;  %v7488_v18 = vmul.f32 %v14587_v7, %v14810_v2 }
 0x9b5   :  { %v8168_v45 = vsel %vm16256_vm15, %v8167_v27, %v8163_v59 }
 0x9b6   :  { %v7736_v63 = vpop.permute.xlu1 %7735  ;;  %v8173_v9 = vsel %vm1090_vm11, %v8172_v25, %v8168_v45  ;;  %v7745_v60 = vpop.permute.xlu0 %7744  ;;  %v7491_v25 = vmul.f32 %v14589_v0, %v14810_v2 }
 0x9b7   :  { %v8177_v28 = vrot.slane %v7736_v63, %v11822_v50  ;;  %7927 = vperm.xlu1 %11523, %v7484_v58   ;;  %7936 = vperm.xlu0 %11524, %v7487_v53   ;;  %v8192_v53 = vrot.slane %v7745_v60, %v11783_v22 }
 0x9b9   :  { %v8178_v1 = vsel %vm1097_vm12, %v8177_v28, %v8173_v9 }
 0x9ba   :  { %v7742_v5 = vpop.permute.xlu1 %7741  ;;  %v8183_v54 = vsel %vm1104_vm13, %v8182_v44, %v8178_v1  ;;  %v7751_v57 = vpop.permute.xlu0 %7750  ;;  %v7490_v44 = vmul.f32 %v14596_v29, %v14810_v2  ;;  %v7493_v1 = vmul.f32 %v14598_v24, %v14810_v2 }
 0x9bb   :  { %v8187_v59 = vrot.slane %v7742_v5, %v11828_v52  ;;  %7933 = vperm.xlu1 %11523, %v7486_v56   ;;  %7942 = vperm.xlu0 %11524, %v7489_v16   ;;  %v8201_v9 = vrot.slane %v7751_v57, %v11789_v31  ;;  %v7492_v57 = vmul.f32 %v14602_v21, %v14810_v2 }
 0x9bd   :  { %v8188_v27 = vsel %vm1111_vm14, %v8187_v59, %v8183_v54  ;;  %v7495_v59 = vmul.f32 %v14604_v13, %v14810_v2 }
 0x9be   :  { %v14836_v62 = vsel %vm16257_vm10, %v8188_v27, %v14761_v26  ;;  %v7748_v45 = vpop.permute.xlu1 %7747  ;;  %v7757_v58 = vpop.permute.xlu0 %7756  ;;  %vm16258_vm10 = vcmask 1042434  }
 0x9bf   :  { %v8196_v63 = vrot.slane %v7748_v45, %v11786_v30  ;;  %7939 = vperm.xlu1 %11523, %v7488_v18   ;;  %7948 = vperm.xlu0 %11524, %v7491_v25   ;;  %v8211_v5 = vrot.slane %v7757_v58, %v11795_v34 }
 0x9c1   :  { %v8197_v28 = vsel %vm1013_vm0, %v8196_v63, %v8192_v53  ;;  %v7494_v63 = vmul.f32 %v14608_v39, %v14810_v2 }
 0x9c2   :  { %v7754_v26 = vpop.permute.xlu1 %7753  ;;  %v8202_v56 = vsel %vm1020_vm1, %v8201_v9, %v8197_v28  ;;  %v7763_v16 = vpop.permute.xlu0 %7762  ;;  %v7497_v9 = vmul.f32 %v14610_v8, %v14810_v2 }
 0x9c3   :  { %v8206_v60 = vrot.slane %v7754_v26, %v11792_v32  ;;  %7945 = vperm.xlu1 %11523, %v7490_v44   ;;  %7954 = vperm.xlu0 %11524, %v7493_v1   ;;  %v8221_v53 = vrot.slane %v7763_v16, %v11801_v36 }
 0x9c5   :  { %v8207_v54 = vsel %vm1027_vm2, %v8206_v60, %v8202_v56  ;;  %v7496_v60 = vmul.f32 %v14614_v12, %v14810_v2 }
 0x9c6   :  { %v7760_v27 = vpop.permute.xlu1 %7759  ;;  %v8212_v18 = vsel %vm1034_vm3, %v8211_v5, %v8207_v54  ;;  %v7769_v25 = vpop.permute.xlu0 %7768  ;;  %v7499_v5 = vmul.f32 %v14616_v42, %v14810_v2 }
 0x9c7   :  { %v8216_v45 = vrot.slane %v7760_v27, %v11798_v35  ;;  %7951 = vperm.xlu1 %11523, %v7492_v57   ;;  %7960 = vperm.xlu0 %11524, %v7495_v59   ;;  %v8231_v56 = vrot.slane %v7769_v25, %v11807_v38 }
 0x9c9   :  { %v8217_v58 = vsel %vm1041_vm4, %v8216_v45, %v8212_v18  ;;  %v7498_v45 = vmul.f32 %v14620_v40, %v14810_v2 }
 0x9ca   :  { %v7766_v28 = vpop.permute.xlu1 %7765  ;;  %v8222_v44 = vsel %vm1048_vm5, %v8221_v53, %v8217_v58  ;;  %v7775_v1 = vpop.permute.xlu0 %7774  ;;  %v7501_v53 = vmul.f32 %v14622_v3, %v14810_v2 }
 0x9cb   :  { %v8226_v26 = vrot.slane %v7766_v28, %v11804_v37  ;;  %7957 = vperm.xlu1 %11523, %v7494_v63   ;;  %7966 = vperm.xlu0 %11524, %v7497_v9   ;;  %v8241_v18 = vrot.slane %v7775_v1, %v11813_v47  ;;  %v14881_v28 = vrot.slane %v11971_v17, %v14564_v33 }
 0x9cd   :  { %v8227_v16 = vsel %vm1055_vm6, %v8226_v26, %v8222_v44 }
 0x9ce   :  { %v7772_v54 = vpop.permute.xlu1 %7771  ;;  %v8232_v57 = vsel %vm1062_vm7, %v8231_v56, %v8227_v16  ;;  %v7781_v59 = vpop.permute.xlu0 %7780  ;;  %v7500_v56 = vmul.f32 %v14628_v41, %v14810_v2  ;;  %v7503_v16 = vmul.f32 %v14574_v23, %v14881_v28 }
 0x9cf   :  { %v8236_v27 = vrot.slane %v7772_v54, %v11810_v46  ;;  %7963 = vperm.xlu1 %11523, %v7496_v60   ;;  %7972 = vperm.xlu0 %11524, %v7499_v5   ;;  %v8251_v1 = vrot.slane %v7781_v59, %v11819_v49 }
 0x9d1   :  { %v8237_v25 = vsel %vm1069_vm8, %v8236_v27, %v8232_v57  ;;  %v7502_v27 = vmul.f32 %v14632_v10, %v14810_v2 }
 0x9d2   :  { %v7778_v58 = vpop.permute.xlu1 %7777  ;;  %v8242_v63 = vsel %vm1076_vm9, %v8241_v18, %v8237_v25  ;;  %v7787_v9 = vpop.permute.xlu0 %7786  ;;  %v7505_v18 = vmul.f32 %v14581_v15, %v14881_v28 }
 0x9d3   :  { %v8246_v44 = vrot.slane %v7778_v58, %v11816_v48  ;;  %7969 = vperm.xlu1 %11523, %v7498_v45   ;;  %7978 = vperm.xlu0 %11524, %v7501_v53   ;;  %v8261_v57 = vrot.slane %v7787_v9, %v11825_v51  ;;  %v7507_v9 = vmul.f32 %v14589_v0, %v14881_v28 }
 0x9d4   :  { %v7509_v0 = vmul.f32 %v14598_v24, %v14881_v28 }
 0x9d5   :  { %v8247_v26 = vsel %vm16256_vm15, %v8246_v44, %v8242_v63  ;;  %v7504_v63 = vmul.f32 %v14587_v7, %v14881_v28  ;;  %v7506_v7 = vmul.f32 %v14596_v29, %v14881_v28  ;;  %v7511_v29 = vmul.f32 %v14604_v13, %v14881_v28 }
 0x9d6   :  { %v7784_v60 = vpop.permute.xlu1 %7783  ;;  %v8252_v5 = vsel %vm1090_vm11, %v8251_v1, %v8247_v26  ;;  %v7793_v54 = vpop.permute.xlu0 %7792 }
 0x9d7   :  { %v8256_v33 = vrot.slane %v7784_v60, %v11822_v50  ;;  %7975 = vperm.xlu1 %11523, %v7500_v56   ;;  %7984 = vperm.xlu0 %11524, %v7503_v16   ;;  %v8271_v1 = vrot.slane %v7793_v54, %v11783_v22 }
 0x9d9   :  { %v8257_v59 = vsel %vm1097_vm12, %v8256_v33, %v8252_v5 }
 0x9da   :  { %v7790_v25 = vpop.permute.xlu1 %7789  ;;  %v8262_v23 = vsel %vm1104_vm13, %v8261_v57, %v8257_v59  ;;  %v7799_v45 = vpop.permute.xlu0 %7798  ;;  %v7508_v59 = vmul.f32 %v14602_v21, %v14881_v28  ;;  %v7513_v21 = vmul.f32 %v14610_v8, %v14881_v28 }
 0x9db   :  { %v8266_v53 = vrot.slane %v7790_v25, %v11828_v52  ;;  %7981 = vperm.xlu1 %11523, %v7502_v27   ;;  %7990 = vperm.xlu0 %11524, %v7505_v18   ;;  %v8280_v56 = vrot.slane %v7799_v45, %v11789_v31 }
 0x9dd   :  { %v8267_v58 = vsel %vm1111_vm14, %v8266_v53, %v8262_v23  ;;  %v7510_v53 = vmul.f32 %v14608_v39, %v14881_v28  ;;  %v7515_v39 = vmul.f32 %v14616_v42, %v14881_v28 }
 0x9de   :  { %v14907_v2 = vsel %vm16258_vm10, %v8267_v58, %v14836_v62  ;;  %v7796_v15 = vpop.permute.xlu1 %7795  ;;  %v7805_v44 = vpop.permute.xlu0 %7804  ;;  %vm16259_vm10 = vcmask 1043459  }
 0x9df   :  { %v8275_v26 = vrot.slane %v7796_v15, %v11786_v30  ;;  %7987 = vperm.xlu1 %11523, %v7504_v63   ;;  %7996 = vperm.xlu0 %11524, %v7507_v9   ;;  %v8290_v33 = vrot.slane %v7805_v44, %v11795_v34 }
 0x9e1   :  { %v8276_v16 = vsel %vm1013_vm0, %v8275_v26, %v8271_v1  ;;  %v7512_v1 = vmul.f32 %v14614_v12, %v14881_v28  ;;  %v7517_v12 = vmul.f32 %v14622_v3, %v14881_v28 }
 0x9e2   :  { %v7802_v62 = vpop.permute.xlu1 %7801  ;;  %v8281_v60 = vsel %vm1020_vm1, %v8280_v56, %v8276_v16  ;;  %v7811_v5 = vpop.permute.xlu0 %7810 }
 0x9e3   :  { %v8285_v54 = vrot.slane %v7802_v62, %v11792_v32  ;;  %7993 = vperm.xlu1 %11523, %v7506_v7   ;;  %8002 = vperm.xlu0 %11524, %v7509_v0   ;;  %v8300_v23 = vrot.slane %v7811_v5, %v11801_v36  ;;  %v7514_v62 = vmul.f32 %v14620_v40, %v14881_v28 }
 0x9e4   :  { %v7516_v40 = vmul.f32 %v14628_v41, %v14881_v28 }
 0x9e5   :  { %v8286_v57 = vsel %vm1027_vm2, %v8285_v54, %v8281_v60 }
 0x9e6   :  { %v7808_v27 = vpop.permute.xlu1 %7807  ;;  %v8291_v24 = vsel %vm1034_vm3, %v8290_v33, %v8286_v57  ;;  %v7817_v18 = vpop.permute.xlu0 %7816  ;;  %v14952_v57 = vld [vmem:[#allocation7 + $0x6] ss:$0 sm:$0xff] }
 0x9e7   :  { %v8295_v25 = vrot.slane %v7808_v27, %v11798_v35  ;;  %7999 = vperm.xlu1 %11523, %v7508_v59   ;;  %8008 = vperm.xlu0 %11524, %v7511_v29   ;;  %v8310_v15 = vrot.slane %v7817_v18, %v11807_v38 }
 0x9e9   :  { %v8296_v45 = vsel %vm1041_vm4, %v8295_v25, %v8291_v24 }
 0x9ea   :  { %v7814_v58 = vpop.permute.xlu1 %7813  ;;  %v8301_v13 = vsel %vm1048_vm5, %v8300_v23, %v8296_v45  ;;  %v7823_v63 = vpop.permute.xlu0 %7822  ;;  %v7518_v23 = vmul.f32 %v14632_v10, %v14881_v28 }
 0x9eb   :  { %v8305_v9 = vrot.slane %v7814_v58, %v11804_v37  ;;  %8005 = vperm.xlu1 %11523, %v7510_v53   ;;  %8014 = vperm.xlu0 %11524, %v7513_v21   ;;  %v8320_v7 = vrot.slane %v7823_v63, %v11813_v47 }
 0x9ed   :  { %v8306_v44 = vsel %vm1055_vm6, %v8305_v9, %v8301_v13 }
 0x9ee   :  { %v7820_v26 = vpop.permute.xlu1 %7819  ;;  %v8311_v8 = vsel %vm1062_vm7, %v8310_v15, %v8306_v44  ;;  %v7829_v56 = vpop.permute.xlu0 %7828 }
 0x9ef   :  { %v8315_v16 = vrot.slane %v7820_v26, %v11810_v46  ;;  %8011 = vperm.xlu1 %11523, %v7512_v1   ;;  %8020 = vperm.xlu0 %11524, %v7515_v39   ;;  %v8330_v33 = vrot.slane %v7829_v56, %v11819_v49 }
 0x9f1   :  { %v8316_v0 = vsel %vm1069_vm8, %v8315_v16, %v8311_v8 }
 0x9f2   :  { %v7826_v60 = vpop.permute.xlu1 %7825  ;;  %v8321_v42 = vsel %vm1076_vm9, %v8320_v7, %v8316_v0  ;;  %v7835_v5 = vpop.permute.xlu0 %7834 }
 0x9f3   :  { %v8325_v54 = vrot.slane %v7826_v60, %v11816_v48  ;;  %8017 = vperm.xlu1 %11523, %v7514_v62   ;;  %8026 = vperm.xlu0 %11524, %v7517_v12   ;;  %v8340_v18 = vrot.slane %v7835_v5, %v11825_v51 }
 0x9f5   :  { %v8326_v59 = vsel %vm16256_vm15, %v8325_v54, %v8321_v42 }
 0x9f6   :  { %v7832_v29 = vpop.permute.xlu1 %7831  ;;  %v8331_v3 = vsel %vm1090_vm11, %v8330_v33, %v8326_v59  ;;  %v7841_v27 = vpop.permute.xlu0 %7840 }
 0x9f7   :  { %v8335_v24 = vrot.slane %v7832_v29, %v11822_v50  ;;  %8023 = vperm.xlu1 %11523, %v7516_v40   ;;  %8711 = vbcast.lane.b32.xlu0 %v14952_v57, 256  ;;  %v8350_v15 = vrot.slane %v7841_v27, %v11783_v22 }
 0x9f9   :  { %v8336_v25 = vsel %vm1097_vm12, %v8335_v24, %v8331_v3 }
 0x9fa   :  { %v7838_v45 = vpop.permute.xlu1 %7837  ;;  %v8341_v53 = vsel %vm1104_vm13, %v8340_v18, %v8336_v25  ;;  %v7847_v41 = vpop.permute.xlu0 %7846 }
 0x9fb   :  { %v8345_v21 = vrot.slane %v7838_v45, %v11828_v52  ;;  %8029 = vperm.xlu1 %11523, %v7518_v23   ;;  %8719 = vbcast.lane.b32.xlu0 %v14952_v57, 272  ;;  %v8359_v28 = vrot.slane %v7847_v41, %v11789_v31 }
 0x9fd   :  { %v8346_v58 = vsel %vm1111_vm14, %v8345_v21, %v8341_v53 }
 0x9fe   :  { %v14970_v13 = vsel %vm16259_vm10, %v8346_v58, %v14907_v2  ;;  %v7844_v63 = vpop.permute.xlu1 %7843  ;;  %v7853_v9 = vpop.permute.xlu0 %7852  ;;  %vm16260_vm10 = vcmask 1044484  }
 0x9ff   :  { %v8354_v10 = vrot.slane %v7844_v63, %v11786_v30  ;;  %8715 = vbcast.lane.b32.xlu1 %v14952_v57, 264  ;;  %8727 = vbcast.lane.b32.xlu0 %v14952_v57, 288  ;;  %v8369_v8 = vrot.slane %v7853_v9, %v11795_v34 }
 0xa01   :  { %v8355_v44 = vsel %vm1013_vm0, %v8354_v10, %v8350_v15 }
 0xa02   :  { %v7850_v1 = vpop.permute.xlu1 %7849  ;;  %v8360_v39 = vsel %vm1020_vm1, %v8359_v28, %v8355_v44  ;;  %v7859_v26 = vpop.permute.xlu0 %7858 }
 0xa03   :  { %v8364_v2 = vrot.slane %v7850_v1, %v11792_v32  ;;  %8723 = vbcast.lane.b32.xlu1 %v14952_v57, 280  ;;  %8735 = vbcast.lane.b32.xlu0 %v14952_v57, 304  ;;  %v8379_v12 = vrot.slane %v7859_v26, %v11801_v36 }
 0xa05   :  { %v8365_v56 = vsel %vm1027_vm2, %v8364_v2, %v8360_v39 }
 0xa06   :  { %v7856_v16 = vpop.permute.xlu1 %7855  ;;  %v8370_v7 = vsel %vm1034_vm3, %v8369_v8, %v8365_v56  ;;  %v7865_v0 = vpop.permute.xlu0 %7864 }
 0xa07   :  { %v8374_v62 = vrot.slane %v7856_v16, %v11798_v35  ;;  %8731 = vbcast.lane.b32.xlu1 %v14952_v57, 296  ;;  %8743 = vbcast.lane.b32.xlu0 %v14952_v57, 320  ;;  %v8389_v59 = vrot.slane %v7865_v0, %v11807_v38 }
 0xa09   :  { %v8375_v60 = vsel %vm1041_vm4, %v8374_v62, %v8370_v7 }
 0xa0a   :  { %v7862_v42 = vpop.permute.xlu1 %7861  ;;  %v8380_v5 = vsel %vm1048_vm5, %v8379_v12, %v8375_v60  ;;  %v7871_v54 = vpop.permute.xlu0 %7870 }
 0xa0b   :  { %v8384_v33 = vrot.slane %v7862_v42, %v11804_v37  ;;  %8739 = vbcast.lane.b32.xlu1 %v14952_v57, 312  ;;  %8751 = vbcast.lane.b32.xlu0 %v14952_v57, 336  ;;  %v8399_v18 = vrot.slane %v7871_v54, %v11813_v47 }
 0xa0d   :  { %v8385_v40 = vsel %vm1055_vm6, %v8384_v33, %v8380_v5 }
 0xa0e   :  { %v7868_v29 = vpop.permute.xlu1 %7867  ;;  %v8390_v3 = vsel %vm1062_vm7, %v8389_v59, %v8385_v40  ;;  %v7877_v27 = vpop.permute.xlu0 %7876 }
 0xa0f   :  { %v8394_v24 = vrot.slane %v7868_v29, %v11810_v46  ;;  %8747 = vbcast.lane.b32.xlu1 %v14952_v57, 328  ;;  %8759 = vbcast.lane.b32.xlu0 %v14952_v57, 352  ;;  %v8409_v21 = vrot.slane %v7877_v27, %v11819_v49 }
 0xa11   :  { %v8395_v25 = vsel %vm1069_vm8, %v8394_v24, %v8390_v3 }
 0xa12   :  { %v7874_v23 = vpop.permute.xlu1 %7873  ;;  %v8400_v45 = vsel %vm1076_vm9, %v8399_v18, %v8395_v25  ;;  %v7883_v53 = vpop.permute.xlu0 %7882 }
 0xa13   :  { %v8404_v41 = vrot.slane %v7874_v23, %v11816_v48  ;;  %8755 = vbcast.lane.b32.xlu1 %v14952_v57, 344  ;;  %8767 = vbcast.lane.b32.xlu0 %v14952_v57, 368  ;;  %v8419_v28 = vrot.slane %v7883_v53, %v11825_v51 }
 0xa15   :  { %v8405_v58 = vsel %vm16256_vm15, %v8404_v41, %v8400_v45 }
 0xa16   :  { %v7880_v63 = vpop.permute.xlu1 %7879  ;;  %v8410_v9 = vsel %vm1090_vm11, %v8409_v21, %v8405_v58  ;;  %v7889_v15 = vpop.permute.xlu0 %7888 }
 0xa17   :  { %v8414_v10 = vrot.slane %v7880_v63, %v11822_v50  ;;  %8763 = vbcast.lane.b32.xlu1 %v14952_v57, 360  ;;  %v8429_v0 = vrot.slane %v7889_v15, %v11783_v22 }
 0xa19   :  { %v8415_v44 = vsel %vm1097_vm12, %v8414_v10, %v8410_v9 }
 0xa1a   :  { %v7886_v1 = vpop.permute.xlu1 %7885  ;;  %v8420_v39 = vsel %vm1104_vm13, %v8419_v28, %v8415_v44  ;;  %v7895_v26 = vpop.permute.xlu0 %7894 }
 0xa1b   :  { %v8424_v2 = vrot.slane %v7886_v1, %v11828_v52  ;;  %8771 = vbcast.lane.b32.xlu1 %v14952_v57, 376  ;;  %v8438_v12 = vrot.slane %v7895_v26, %v11789_v31 }
 0xa1d   :  { %v8425_v8 = vsel %vm1111_vm14, %v8424_v2, %v8420_v39 }
 0xa1e   :  { %v8666_v56 = vsel %vm16260_vm10, %v8425_v8, %v14970_v13  ;;  %v7892_v16 = vpop.permute.xlu1 %7891  ;;  %v7901_v7 = vpop.permute.xlu0 %7900  ;;  %vm16261_vm10 = vcmask 1045509  }
 0xa1f   :  { %v8433_v62 = vrot.slane %v7892_v16, %v11786_v30  ;;  %v8448_v33 = vrot.slane %v7901_v7, %v11795_v34 }
 0xa21   :  { %v8434_v60 = vsel %vm1013_vm0, %v8433_v62, %v8429_v0 }
 0xa22   :  { %v7898_v42 = vpop.permute.xlu1 %7897  ;;  %v8439_v5 = vsel %vm1020_vm1, %v8438_v12, %v8434_v60  ;;  %v7907_v54 = vpop.permute.xlu0 %7906 }
 0xa23   :  { %v8443_v57 = vrot.slane %v7898_v42, %v11792_v32  ;;  %v8458_v27 = vrot.slane %v7907_v54, %v11801_v36 }
 0xa25   :  { %v8444_v13 = vsel %vm1027_vm2, %v8443_v57, %v8439_v5 }
 0xa26   :  { %v7904_v59 = vpop.permute.xlu1 %7903  ;;  %v8449_v40 = vsel %vm1034_vm3, %v8448_v33, %v8444_v13  ;;  %v7913_v29 = vpop.permute.xlu0 %7912 }
 0xa27   :  { %v8453_v3 = vrot.slane %v7904_v59, %v11798_v35  ;;  %v8468_v53 = vrot.slane %v7913_v29, %v11807_v38 }
 0xa29   :  { %v8454_v24 = vsel %vm1041_vm4, %v8453_v3, %v8449_v40 }
 0xa2a   :  { %v7910_v18 = vpop.permute.xlu1 %7909  ;;  %v8459_v25 = vsel %vm1048_vm5, %v8458_v27, %v8454_v24  ;;  %v7919_v23 = vpop.permute.xlu0 %7918 }
 0xa2b   :  { %v8463_v45 = vrot.slane %v7910_v18, %v11804_v37  ;;  %v8478_v15 = vrot.slane %v7919_v23, %v11813_v47 }
 0xa2d   :  { %v8464_v41 = vsel %vm1055_vm6, %v8463_v45, %v8459_v25 }
 0xa2e   :  { %v7916_v21 = vpop.permute.xlu1 %7915  ;;  %v8469_v58 = vsel %vm1062_vm7, %v8468_v53, %v8464_v41  ;;  %v7925_v63 = vpop.permute.xlu0 %7924 }
 0xa2f   :  { %v8473_v9 = vrot.slane %v7916_v21, %v11810_v46  ;;  %v8488_v26 = vrot.slane %v7925_v63, %v11819_v49 }
 0xa31   :  { %v8474_v10 = vsel %vm1069_vm8, %v8473_v9, %v8469_v58 }
 0xa32   :  { %v7922_v28 = vpop.permute.xlu1 %7921  ;;  %v8479_v44 = vsel %vm1076_vm9, %v8478_v15, %v8474_v10  ;;  %v7931_v1 = vpop.permute.xlu0 %7930 }
 0xa33   :  { %v8483_v39 = vrot.slane %v7922_v28, %v11816_v48  ;;  %v8498_v62 = vrot.slane %v7931_v1, %v11825_v51 }
 0xa35   :  { %v8484_v2 = vsel %vm16256_vm15, %v8483_v39, %v8479_v44 }
 0xa36   :  { %v7928_v8 = vpop.permute.xlu1 %7927  ;;  %v8489_v16 = vsel %vm1090_vm11, %v8488_v26, %v8484_v2  ;;  %v7937_v7 = vpop.permute.xlu0 %7936 }
 0xa37   :  { %v8493_v0 = vrot.slane %v7928_v8, %v11822_v50  ;;  %v8508_v40 = vrot.slane %v7937_v7, %v11783_v22 }
 0xa39   :  { %v8494_v12 = vsel %vm1097_vm12, %v8493_v0, %v8489_v16 }
 0xa3a   :  { %v7934_v60 = vpop.permute.xlu1 %7933  ;;  %v8499_v42 = vsel %vm1104_vm13, %v8498_v62, %v8494_v12  ;;  %v7943_v5 = vpop.permute.xlu0 %7942 }
 0xa3b   :  { %v8503_v54 = vrot.slane %v7934_v60, %v11828_v52  ;;  %v8517_v3 = vrot.slane %v7943_v5, %v11789_v31 }
 0xa3d   :  { %v8504_v57 = vsel %vm1111_vm14, %v8503_v54, %v8499_v42 }
 0xa3e   :  { %v8667_v33 = vsel %vm16261_vm10, %v8504_v57, %v8666_v56  ;;  %v7940_v13 = vpop.permute.xlu1 %7939  ;;  %v7949_v59 = vpop.permute.xlu0 %7948  ;;  %vm16262_vm10 = vcmask 1046534  }
 0xa3f   :  { %v8512_v29 = vrot.slane %v7940_v13, %v11786_v30  ;;  %v8527_v45 = vrot.slane %v7949_v59, %v11795_v34 }
 0xa41   :  { %v8513_v27 = vsel %vm1013_vm0, %v8512_v29, %v8508_v40 }
 0xa42   :  { %v7946_v24 = vpop.permute.xlu1 %7945  ;;  %v8518_v18 = vsel %vm1020_vm1, %v8517_v3, %v8513_v27  ;;  %v7955_v25 = vpop.permute.xlu0 %7954 }
 0xa43   :  { %v8522_v23 = vrot.slane %v7946_v24, %v11792_v32  ;;  %v8537_v63 = vrot.slane %v7955_v25, %v11801_v36 }
 0xa45   :  { %v8523_v56 = vsel %vm1027_vm2, %v8522_v23, %v8518_v18 }
 0xa46   :  { %v7952_v53 = vpop.permute.xlu1 %7951  ;;  %v8528_v41 = vsel %vm1034_vm3, %v8527_v45, %v8523_v56  ;;  %v7961_v21 = vpop.permute.xlu0 %7960 }
 0xa47   :  { %v8532_v58 = vrot.slane %v7952_v53, %v11798_v35  ;;  %v8547_v1 = vrot.slane %v7961_v21, %v11807_v38 }
 0xa49   :  { %v8533_v9 = vsel %vm1041_vm4, %v8532_v58, %v8528_v41 }
 0xa4a   :  { %v7958_v15 = vpop.permute.xlu1 %7957  ;;  %v8538_v10 = vsel %vm1048_vm5, %v8537_v63, %v8533_v9  ;;  %v7967_v28 = vpop.permute.xlu0 %7966 }
 0xa4b   :  { %v8542_v44 = vrot.slane %v7958_v15, %v11804_v37  ;;  %v8557_v7 = vrot.slane %v7967_v28, %v11813_v47 }
 0xa4d   :  { %v8543_v39 = vsel %vm1055_vm6, %v8542_v44, %v8538_v10 }
 0xa4e   :  { %v7964_v26 = vpop.permute.xlu1 %7963  ;;  %v8548_v2 = vsel %vm1062_vm7, %v8547_v1, %v8543_v39  ;;  %v7973_v8 = vpop.permute.xlu0 %7972 }
 0xa4f   :  { %v8552_v16 = vrot.slane %v7964_v26, %v11810_v46  ;;  %v8567_v5 = vrot.slane %v7973_v8, %v11819_v49 }
 0xa51   :  { %v8553_v0 = vsel %vm1069_vm8, %v8552_v16, %v8548_v2 }
 0xa52   :  { %v7970_v62 = vpop.permute.xlu1 %7969  ;;  %v8558_v12 = vsel %vm1076_vm9, %v8557_v7, %v8553_v0  ;;  %v7979_v60 = vpop.permute.xlu0 %7978 }
 0xa53   :  { %v8562_v42 = vrot.slane %v7970_v62, %v11816_v48  ;;  %v8577_v29 = vrot.slane %v7979_v60, %v11825_v51 }
 0xa55   :  { %v8563_v54 = vsel %vm16256_vm15, %v8562_v42, %v8558_v12 }
 0xa56   :  { %v7976_v57 = vpop.permute.xlu1 %7975  ;;  %v8568_v13 = vsel %vm1090_vm11, %v8567_v5, %v8563_v54  ;;  %v7985_v59 = vpop.permute.xlu0 %7984 }
 0xa57   :  { %v8572_v40 = vrot.slane %v7976_v57, %v11822_v50  ;;  %v8587_v41 = vrot.slane %v7985_v59, %v11783_v22 }
 0xa59   :  { %v8573_v3 = vsel %vm1097_vm12, %v8572_v40, %v8568_v13  ;;  %v15103_v40 = vsub.s32 6, %v11780_v20 }
 0xa5a   :  { %v7982_v27 = vpop.permute.xlu1 %7981  ;;  %v8578_v24 = vsel %vm1104_vm13, %v8577_v29, %v8573_v3  ;;  %v7991_v18 = vpop.permute.xlu0 %7990 }
 0xa5b   :  { %v8582_v25 = vrot.slane %v7982_v27, %v11828_v52  ;;  %v8596_v58 = vrot.slane %v7991_v18, %v11789_v31 }
 0xa5d   :  { %v8583_v23 = vsel %vm1111_vm14, %v8582_v25, %v8578_v24 }
 0xa5e   :  { %v8668_v45 = vsel %vm16262_vm10, %v8583_v23, %v8667_v33  ;;  %v7988_v56 = vpop.permute.xlu1 %7987  ;;  %v7997_v53 = vpop.permute.xlu0 %7996  ;;  %v8676_v23 = vrot.slane %v11873_v43, %v15103_v40  ;;  %vm16263_vm10 = vcmask 1047559  }
 0xa5f   :  { %v8591_v21 = vrot.slane %v7988_v56, %v11786_v30  ;;  %v8606_v44 = vrot.slane %v7997_v53, %v11795_v34 }
 0xa61   :  { %v8592_v63 = vsel %vm1013_vm0, %v8591_v21, %v8587_v41 }
 0xa62   :  { %v7994_v9 = vpop.permute.xlu1 %7993  ;;  %v8597_v15 = vsel %vm1020_vm1, %v8596_v58, %v8592_v63  ;;  %v8003_v10 = vpop.permute.xlu0 %8002 }
 0xa63   :  { %v8601_v28 = vrot.slane %v7994_v9, %v11792_v32  ;;  %v8616_v8 = vrot.slane %v8003_v10, %v11801_v36 }
 0xa65   :  { %v8602_v33 = vsel %vm1027_vm2, %v8601_v28, %v8597_v15 }
 0xa66   :  { %v8000_v1 = vpop.permute.xlu1 %7999  ;;  %v8607_v39 = vsel %vm1034_vm3, %v8606_v44, %v8602_v33  ;;  %v8009_v26 = vpop.permute.xlu0 %8008 }
 0xa67   :  { %v8611_v2 = vrot.slane %v8000_v1, %v11798_v35  ;;  %v8626_v60 = vrot.slane %v8009_v26, %v11807_v38 }
 0xa69   :  { %v8612_v16 = vsel %vm1041_vm4, %v8611_v2, %v8607_v39 }
 0xa6a   :  { %v8006_v7 = vpop.permute.xlu1 %8005  ;;  %v8617_v0 = vsel %vm1048_vm5, %v8616_v8, %v8612_v16  ;;  %v8015_v62 = vpop.permute.xlu0 %8014 }
 0xa6b   :  { %v8621_v12 = vrot.slane %v8006_v7, %v11804_v37  ;;  %v8636_v59 = vrot.slane %v8015_v62, %v11813_v47 }
 0xa6d   :  { %v8622_v42 = vsel %vm1055_vm6, %v8621_v12, %v8617_v0 }
 0xa6e   :  { %v8012_v5 = vpop.permute.xlu1 %8011  ;;  %v8627_v54 = vsel %vm1062_vm7, %v8626_v60, %v8622_v42  ;;  %v8021_v57 = vpop.permute.xlu0 %8020 }
 0xa6f   :  { %v8631_v13 = vrot.slane %v8012_v5, %v11810_v46  ;;  %v8646_v25 = vrot.slane %v8021_v57, %v11819_v49 }
 0xa71   :  { %v8632_v29 = vsel %vm1069_vm8, %v8631_v13, %v8627_v54 }
 0xa72   :  { %v8018_v3 = vpop.permute.xlu1 %8017  ;;  %v8637_v27 = vsel %vm1076_vm9, %v8636_v59, %v8632_v29  ;;  %v8027_v24 = vpop.permute.xlu0 %8026 }
 0xa73   :  { %v8641_v18 = vrot.slane %v8018_v3, %v11816_v48  ;;  %v8656_v9 = vrot.slane %v8027_v24, %v11825_v51 }
 0xa75   :  { %v8642_v56 = vsel %vm16256_vm15, %v8641_v18, %v8637_v27 }
 0xa76   :  { %v8024_v53 = vpop.permute.xlu1 %8023  ;;  %v8647_v41 = vsel %vm1090_vm11, %v8646_v25, %v8642_v56  ;;  %v15113_v21 = vpop.permute.xlu0 %8711 }
 0xa77   :  { %v8651_v58 = vrot.slane %v8024_v53, %v11822_v50  ;;  %v8789_v63 = vmul.f32 %v15113_v21, %v8676_v23 }
 0xa79   :  { %v8652_v15 = vsel %vm1097_vm12, %v8651_v58, %v8647_v41  ;;  %9046 = vperm.xlu0 %11524, %v8789_v63   ;;  %v8680_v58 = vrot.slane %v11899_v6, %v15103_v40 }
 0xa7a   :  { %v8030_v10 = vpop.permute.xlu1 %8029  ;;  %v8657_v28 = vsel %vm1104_vm13, %v8656_v9, %v8652_v15  ;;  %v15120_v44 = vpop.permute.xlu0 %8719 }
 0xa7b   :  { %v8661_v33 = vrot.slane %v8030_v10, %v11828_v52  ;;  %v8791_v1 = vmul.f32 %v15120_v44, %v8676_v23  ;;  %v8805_v15 = vmul.f32 %v15113_v21, %v8680_v58 }
 0xa7d   :  { %v8662_v39 = vsel %vm1111_vm14, %v8661_v33, %v8657_v28  ;;  %9052 = vperm.xlu0 %11524, %v8791_v1   ;;  %v8807_v33 = vmul.f32 %v15120_v44, %v8680_v58 }
 0xa7e   :  { %v8669_v26 = vsel %vm16263_vm10, %v8662_v39, %v8668_v45  ;;  %v15126_v2 = vpop.permute.xlu1 %8715  ;;  %v15128_v8 = vpop.permute.xlu0 %8727  ;;  %vm16264_vm10 = vmmov %vm16256_vm15 }
 0xa7f   :  { %v15131_v16 = vadd.f32 %v8669_v26, %v14592_v11  ;;  %v8790_v7 = vmul.f32 %v15126_v2, %v8676_v23  ;;  %v8793_v0 = vmul.f32 %v15128_v8, %v8676_v23  ;;  %v8806_v1 = vmul.f32 %v15126_v2, %v8680_v58 }
 0xa80   :  { %v8809_v39 = vmul.f32 %v15128_v8, %v8680_v58 }
 0xa81   :  { %9049 = vperm.xlu1 %11523, %v8790_v7   ;;  %9058 = vperm.xlu0 %11524, %v8793_v0  }
 0xa82   :  { %v15135_v62 = vpop.permute.xlu1 %8723  ;;  %v15137_v12 = vpop.permute.xlu0 %8735 }
 0xa83   :  { %v8792_v60 = vmul.f32 %v15135_v62, %v8676_v23  ;;  %v8795_v45 = vmul.f32 %v15137_v12, %v8676_v23  ;;  %v8808_v26 = vmul.f32 %v15135_v62, %v8680_v58  ;;  %v8811_v7 = vmul.f32 %v15137_v12, %v8680_v58 }
 0xa85   :  { %9055 = vperm.xlu1 %11523, %v8792_v60   ;;  %9064 = vperm.xlu0 %11524, %v8795_v45  }
 0xa86   :  { %v15141_v42 = vpop.permute.xlu1 %8731  ;;  %v15143_v11 = vpop.permute.xlu0 %8743 }
 0xa87   :  { %v8794_v5 = vmul.f32 %v15141_v42, %v8676_v23  ;;  %v8797_v54 = vmul.f32 %v15143_v11, %v8676_v23  ;;  %v8810_v0 = vmul.f32 %v15141_v42, %v8680_v58 }
 0xa89   :  { %9061 = vperm.xlu1 %11523, %v8794_v5   ;;  %9070 = vperm.xlu0 %11524, %v8797_v54  }
 0xa8a   :  { %v15147_v57 = vpop.permute.xlu1 %8739  ;;  %v15149_v13 = vpop.permute.xlu0 %8751 }
 0xa8b   :  { %v8796_v59 = vmul.f32 %v15147_v57, %v8676_v23  ;;  %v8799_v29 = vmul.f32 %v15149_v13, %v8676_v23  ;;  %v8812_v60 = vmul.f32 %v15147_v57, %v8680_v58  ;;  %v8815_v45 = vmul.f32 %v15149_v13, %v8680_v58 }
 0xa8d   :  { %9067 = vperm.xlu1 %11523, %v8796_v59   ;;  %9076 = vperm.xlu0 %11524, %v8799_v29  }
 0xa8e   :  { %v15153_v3 = vpop.permute.xlu1 %8747  ;;  %v15155_v27 = vpop.permute.xlu0 %8759 }
 0xa8f   :  { %v8798_v24 = vmul.f32 %v15153_v3, %v8676_v23  ;;  %v8801_v18 = vmul.f32 %v15155_v27, %v8676_v23  ;;  %v8814_v5 = vmul.f32 %v15153_v3, %v8680_v58  ;;  %v8817_v54 = vmul.f32 %v15155_v27, %v8680_v58 }
 0xa91   :  { %9073 = vperm.xlu1 %11523, %v8798_v24   ;;  %9082 = vperm.xlu0 %11524, %v8801_v18   ;;  %v8684_v24 = vrot.slane %v11919_v55, %v15103_v40 }
 0xa92   :  { %v15159_v25 = vpop.permute.xlu1 %8755  ;;  %v15161_v56 = vpop.permute.xlu0 %8767 }
 0xa93   :  { %v8800_v53 = vmul.f32 %v15159_v25, %v8676_v23  ;;  %v8803_v41 = vmul.f32 %v15161_v56, %v8676_v23  ;;  %v8816_v59 = vmul.f32 %v15159_v25, %v8680_v58  ;;  %v8819_v29 = vmul.f32 %v15161_v56, %v8680_v58 }
 0xa95   :  { %9079 = vperm.xlu1 %11523, %v8800_v53   ;;  %9088 = vperm.xlu0 %11524, %v8803_v41   ;;  %v8821_v53 = vmul.f32 %v15113_v21, %v8684_v24 }
 0xa96   :  { %v15167_v63 = vpop.permute.xlu1 %8763 }
 0xa97   :  { %v8802_v9 = vmul.f32 %v15167_v63, %v8676_v23  ;;  %v8818_v18 = vmul.f32 %v15167_v63, %v8680_v58 }
 0xa99   :  { %9085 = vperm.xlu1 %11523, %v8802_v9   ;;  %9094 = vperm.xlu0 %11524, %v8805_v15   ;;  %v8823_v9 = vmul.f32 %v15120_v44, %v8684_v24  ;;  %v8822_v15 = vmul.f32 %v15126_v2, %v8684_v24 }
 0xa9a   :  { %v15171_v10 = vpop.permute.xlu1 %8771 }
 0xa9b   :  { %v8804_v28 = vmul.f32 %v15171_v10, %v8676_v23  ;;  %v8813_v23 = vmul.f32 %v15143_v11, %v8680_v58  ;;  %v8820_v41 = vmul.f32 %v15171_v10, %v8680_v58  ;;  %v8829_v58 = vmul.f32 %v15143_v11, %v8684_v24 }
 0xa9d   :  { %9091 = vperm.xlu1 %11523, %v8804_v28   ;;  %9100 = vperm.xlu0 %11524, %v8807_v33   ;;  %v8825_v28 = vmul.f32 %v15128_v8, %v8684_v24  ;;  %v8824_v33 = vmul.f32 %v15135_v62, %v8684_v24 }
 0xaa1   :  { %9097 = vperm.xlu1 %11523, %v8806_v1   ;;  %9106 = vperm.xlu0 %11524, %v8809_v39   ;;  %v8827_v1 = vmul.f32 %v15137_v12, %v8684_v24  ;;  %v8826_v39 = vmul.f32 %v15141_v42, %v8684_v24 }
 0xaa5   :  { %9103 = vperm.xlu1 %11523, %v8808_v26   ;;  %9112 = vperm.xlu0 %11524, %v8811_v7   ;;  %v8828_v26 = vmul.f32 %v15147_v57, %v8684_v24  ;;  %v8831_v7 = vmul.f32 %v15149_v13, %v8684_v24 }
 0xaa9   :  { %9109 = vperm.xlu1 %11523, %v8810_v0   ;;  %9118 = vperm.xlu0 %11524, %v8813_v23   ;;  %v8830_v0 = vmul.f32 %v15153_v3, %v8684_v24  ;;  %v8833_v23 = vmul.f32 %v15155_v27, %v8684_v24 }
 0xaad   :  { %9115 = vperm.xlu1 %11523, %v8812_v60   ;;  %9124 = vperm.xlu0 %11524, %v8815_v45   ;;  %v8832_v60 = vmul.f32 %v15159_v25, %v8684_v24  ;;  %v8835_v45 = vmul.f32 %v15161_v56, %v8684_v24 }
 0xab1   :  { %9121 = vperm.xlu1 %11523, %v8814_v5   ;;  %9130 = vperm.xlu0 %11524, %v8817_v54   ;;  %v8688_v5 = vrot.slane %v11955_v61, %v15103_v40  ;;  %v8834_v54 = vmul.f32 %v15167_v63, %v8684_v24 }
 0xab5   :  { %9127 = vperm.xlu1 %11523, %v8816_v59   ;;  %9136 = vperm.xlu0 %11524, %v8819_v29   ;;  %v8837_v59 = vmul.f32 %v15113_v21, %v8688_v5  ;;  %v8836_v29 = vmul.f32 %v15171_v10, %v8684_v24  ;;  %v8845_v24 = vmul.f32 %v15143_v11, %v8688_v5 }
 0xab9   :  { %9133 = vperm.xlu1 %11523, %v8818_v18   ;;  %9142 = vperm.xlu0 %11524, %v8821_v53   ;;  %v8839_v18 = vmul.f32 %v15120_v44, %v8688_v5  ;;  %v8838_v53 = vmul.f32 %v15126_v2, %v8688_v5 }
 0xabd   :  { %9139 = vperm.xlu1 %11523, %v8820_v41   ;;  %9148 = vperm.xlu0 %11524, %v8823_v9   ;;  %v8841_v41 = vmul.f32 %v15128_v8, %v8688_v5  ;;  %v8840_v9 = vmul.f32 %v15135_v62, %v8688_v5 }
 0xac1   :  { %9145 = vperm.xlu1 %11523, %v8822_v15   ;;  %9154 = vperm.xlu0 %11524, %v8825_v28   ;;  %v8843_v15 = vmul.f32 %v15137_v12, %v8688_v5  ;;  %v8842_v28 = vmul.f32 %v15141_v42, %v8688_v5 }
 0xac5   :  { %9151 = vperm.xlu1 %11523, %v8824_v33   ;;  %9160 = vperm.xlu0 %11524, %v8827_v1   ;;  %v8844_v33 = vmul.f32 %v15147_v57, %v8688_v5  ;;  %v8847_v1 = vmul.f32 %v15149_v13, %v8688_v5 }
 0xac9   :  { %9157 = vperm.xlu1 %11523, %v8826_v39   ;;  %9166 = vperm.xlu0 %11524, %v8829_v58   ;;  %v8846_v39 = vmul.f32 %v15153_v3, %v8688_v5  ;;  %v8849_v58 = vmul.f32 %v15155_v27, %v8688_v5 }
 0xacd   :  { %9163 = vperm.xlu1 %11523, %v8828_v26   ;;  %9172 = vperm.xlu0 %11524, %v8831_v7   ;;  %v8848_v26 = vmul.f32 %v15159_v25, %v8688_v5  ;;  %v8851_v7 = vmul.f32 %v15161_v56, %v8688_v5 }
 0xad1   :  { %9169 = vperm.xlu1 %11523, %v8830_v0   ;;  %9178 = vperm.xlu0 %11524, %v8833_v23   ;;  %v15225_v0 = vrot.slane %v11939_v19, %v15103_v40  ;;  %v8850_v23 = vmul.f32 %v15167_v63, %v8688_v5 }
 0xad5   :  { %9175 = vperm.xlu1 %11523, %v8832_v60   ;;  %9184 = vperm.xlu0 %11524, %v8835_v45   ;;  %v8853_v60 = vmul.f32 %v15113_v21, %v15225_v0 }
 0xad9   :  { %9181 = vperm.xlu1 %11523, %v8834_v54   ;;  %9190 = vperm.xlu0 %11524, %v8837_v59   ;;  %v8852_v54 = vmul.f32 %v15171_v10, %v8688_v5  ;;  %v8855_v59 = vmul.f32 %v15120_v44, %v15225_v0 }
 0xadd   :  { %9187 = vperm.xlu1 %11523, %v8836_v29   ;;  %9196 = vperm.xlu0 %11524, %v8839_v18   ;;  %v8854_v18 = vmul.f32 %v15126_v2, %v15225_v0 }
 0xae1   :  { %9193 = vperm.xlu1 %11523, %v8838_v53   ;;  %9202 = vperm.xlu0 %11524, %v8841_v41   ;;  %v8857_v53 = vmul.f32 %v15128_v8, %v15225_v0 }
 0xae5   :  { %9199 = vperm.xlu1 %11523, %v8840_v9   ;;  %9208 = vperm.xlu0 %11524, %v8843_v15  }
 0xae9   :  { %9205 = vperm.xlu1 %11523, %v8842_v28   ;;  %9214 = vperm.xlu0 %11524, %v8845_v24  }
 0xaed   :  { %9211 = vperm.xlu1 %11523, %v8844_v33   ;;  %9220 = vperm.xlu0 %11524, %v8847_v1   ;;  %v8856_v33 = vmul.f32 %v15135_v62, %v15225_v0  ;;  %v8859_v1 = vmul.f32 %v15137_v12, %v15225_v0 }
 0xaf1   :  { %9217 = vperm.xlu1 %11523, %v8846_v39   ;;  %9226 = vperm.xlu0 %11524, %v8849_v58  }
 0xaf5   :  { %9223 = vperm.xlu1 %11523, %v8848_v26   ;;  %9232 = vperm.xlu0 %11524, %v8851_v7  }
 0xaf8   :  { %v9047_v45 = vpop.permute.xlu0 %9046 }
 0xaf9   :  { %9229 = vperm.xlu1 %11523, %v8850_v23   ;;  %9238 = vperm.xlu0 %11524, %v8853_v60   ;;  %v9432_v15 = vrot.slane %v9047_v45, %v11783_v22  ;;  %v8858_v45 = vmul.f32 %v15141_v42, %v15225_v0 }
 0xafc   :  { %v9053_v29 = vpop.permute.xlu0 %9052 }
 0xafd   :  { %9235 = vperm.xlu1 %11523, %v8852_v54   ;;  %9244 = vperm.xlu0 %11524, %v8855_v59   ;;  %v9441_v5 = vrot.slane %v9053_v29, %v11789_v31  ;;  %v8861_v54 = vmul.f32 %v15143_v11, %v15225_v0 }
 0xb00   :  { %v9050_v41 = vpop.permute.xlu1 %9049  ;;  %v9059_v9 = vpop.permute.xlu0 %9058 }
 0xb01   :  { %v9436_v28 = vrot.slane %v9050_v41, %v11786_v30  ;;  %9241 = vperm.xlu1 %11523, %v8854_v18   ;;  %9250 = vperm.xlu0 %11524, %v8857_v53   ;;  %v9451_v23 = vrot.slane %v9059_v9, %v11795_v34 }
 0xb03   :  { %v9437_v24 = vsel %vm1013_vm0, %v9436_v28, %v9432_v15  ;;  %v8860_v15 = vmul.f32 %v15147_v57, %v15225_v0  ;;  %v8863_v28 = vmul.f32 %v15149_v13, %v15225_v0 }
 0xb04   :  { %v9056_v39 = vpop.permute.xlu1 %9055  ;;  %v9442_v58 = vsel %vm1020_vm1, %v9441_v5, %v9437_v24  ;;  %v9065_v26 = vpop.permute.xlu0 %9064 }
 0xb05   :  { %v9446_v7 = vrot.slane %v9056_v39, %v11792_v32  ;;  %9247 = vperm.xlu1 %11523, %v8856_v33   ;;  %9256 = vperm.xlu0 %11524, %v8859_v1   ;;  %v9461_v41 = vrot.slane %v9065_v26, %v11801_v36  ;;  %v8862_v26 = vmul.f32 %v15153_v3, %v15225_v0 }
 0xb07   :  { %v9447_v60 = vsel %vm1027_vm2, %v9446_v7, %v9442_v58  ;;  %v8865_v7 = vmul.f32 %v15155_v27, %v15225_v0 }
 0xb08   :  { %v9062_v59 = vpop.permute.xlu1 %9061  ;;  %v9452_v29 = vsel %vm1034_vm3, %v9451_v23, %v9447_v60  ;;  %v9071_v18 = vpop.permute.xlu0 %9070 }
 0xb09   :  { %v9456_v53 = vrot.slane %v9062_v59, %v11798_v35  ;;  %9253 = vperm.xlu1 %11523, %v8858_v45   ;;  %9262 = vperm.xlu0 %11524, %v8861_v54   ;;  %v9471_v39 = vrot.slane %v9071_v18, %v11807_v38  ;;  %v8864_v18 = vmul.f32 %v15159_v25, %v15225_v0 }
 0xb0b   :  { %v9457_v9 = vsel %vm1041_vm4, %v9456_v53, %v9452_v29  ;;  %v8867_v53 = vmul.f32 %v15161_v56, %v15225_v0 }
 0xb0c   :  { %v9068_v5 = vpop.permute.xlu1 %9067  ;;  %v9462_v24 = vsel %vm1048_vm5, %v9461_v41, %v9457_v9  ;;  %v9077_v33 = vpop.permute.xlu0 %9076 }
 0xb0d   :  { %v9466_v1 = vrot.slane %v9068_v5, %v11804_v37  ;;  %9259 = vperm.xlu1 %11523, %v8860_v15   ;;  %9268 = vperm.xlu0 %11524, %v8863_v28   ;;  %v9481_v59 = vrot.slane %v9077_v33, %v11813_v47  ;;  %v15280_v28 = vrot.slane %v11961_v4, %v15103_v40 }
 0xb0f   :  { %v9467_v58 = vsel %vm1055_vm6, %v9466_v1, %v9462_v24  ;;  %v8866_v1 = vmul.f32 %v15167_v63, %v15225_v0 }
 0xb10   :  { %v9074_v23 = vpop.permute.xlu1 %9073  ;;  %v9472_v60 = vsel %vm1062_vm7, %v9471_v39, %v9467_v58  ;;  %v9083_v45 = vpop.permute.xlu0 %9082  ;;  %v8869_v39 = vmul.f32 %v15113_v21, %v15280_v28 }
 0xb11   :  { %v9476_v54 = vrot.slane %v9074_v23, %v11810_v46  ;;  %9265 = vperm.xlu1 %11523, %v8862_v26   ;;  %9274 = vperm.xlu0 %11524, %v8865_v7   ;;  %v9491_v24 = vrot.slane %v9083_v45, %v11819_v49 }
 0xb13   :  { %v9477_v29 = vsel %vm1069_vm8, %v9476_v54, %v9472_v60  ;;  %v8868_v54 = vmul.f32 %v15171_v10, %v15225_v0  ;;  %v8873_v0 = vmul.f32 %v15128_v8, %v15280_v28 }
 0xb14   :  { %v9080_v41 = vpop.permute.xlu1 %9079  ;;  %v9482_v9 = vsel %vm1076_vm9, %v9481_v59, %v9477_v29  ;;  %v9089_v15 = vpop.permute.xlu0 %9088  ;;  %v8871_v59 = vmul.f32 %v15120_v44, %v15280_v28 }
 0xb15   :  { %v9486_v5 = vrot.slane %v9080_v41, %v11816_v48  ;;  %9271 = vperm.xlu1 %11523, %v8864_v18   ;;  %9280 = vperm.xlu0 %11524, %v8867_v53   ;;  %v9501_v60 = vrot.slane %v9089_v15, %v11825_v51  ;;  %v8870_v15 = vmul.f32 %v15126_v2, %v15280_v28 }
 0xb17   :  { %v9487_v33 = vsel %vm16256_vm15, %v9486_v5, %v9482_v9  ;;  %vm16265_vm15 = vcmask 1041409  }
 0xb18   :  { %v9086_v58 = vpop.permute.xlu1 %9085  ;;  %v9492_v26 = vsel %vm1090_vm11, %v9491_v24, %v9487_v33  ;;  %v9095_v7 = vpop.permute.xlu0 %9094 }
 0xb19   :  { %v9496_v23 = vrot.slane %v9086_v58, %v11822_v50  ;;  %9277 = vperm.xlu1 %11523, %v8866_v1   ;;  %9286 = vperm.xlu0 %11524, %v8869_v39   ;;  %v9511_v33 = vrot.slane %v9095_v7, %v11783_v22 }
 0xb1b   :  { %v9497_v45 = vsel %vm1097_vm12, %v9496_v23, %v9492_v26  ;;  %v8872_v26 = vmul.f32 %v15135_v62, %v15280_v28  ;;  %v8875_v23 = vmul.f32 %v15137_v12, %v15280_v28 }
 0xb1c   :  { %v9092_v29 = vpop.permute.xlu1 %9091  ;;  %v9502_v18 = vsel %vm1104_vm13, %v9501_v60, %v9497_v45  ;;  %v9101_v53 = vpop.permute.xlu0 %9100 }
 0xb1d   :  { %v9506_v41 = vrot.slane %v9092_v29, %v11828_v52  ;;  %9283 = vperm.xlu1 %11523, %v8868_v54   ;;  %9292 = vperm.xlu0 %11524, %v8871_v59   ;;  %v9520_v39 = vrot.slane %v9101_v53, %v11789_v31  ;;  %v8877_v53 = vmul.f32 %v15143_v11, %v15280_v28 }
 0xb1f   :  { %v15300_v9 = vsel %vm1111_vm14, %v9506_v41, %v9502_v18  ;;  %v8874_v18 = vmul.f32 %v15141_v42, %v15280_v28 }
 0xb20   :  { %v9098_v5 = vpop.permute.xlu1 %9097  ;;  %v9107_v24 = vpop.permute.xlu0 %9106 }
 0xb21   :  { %v9515_v1 = vrot.slane %v9098_v5, %v11786_v30  ;;  %9289 = vperm.xlu1 %11523, %v8870_v15   ;;  %9298 = vperm.xlu0 %11524, %v8873_v0   ;;  %v9530_v59 = vrot.slane %v9107_v24, %v11795_v34 }
 0xb23   :  { %v9516_v58 = vsel %vm1013_vm0, %v9515_v1, %v9511_v33  ;;  %v8876_v1 = vmul.f32 %v15147_v57, %v15280_v28 }
 0xb24   :  { %v9104_v60 = vpop.permute.xlu1 %9103  ;;  %v9521_v45 = vsel %vm1020_vm1, %v9520_v39, %v9516_v58  ;;  %v9113_v54 = vpop.permute.xlu0 %9112  ;;  %v8879_v39 = vmul.f32 %v15149_v13, %v15280_v28 }
 0xb25   :  { %v9525_v7 = vrot.slane %v9104_v60, %v11792_v32  ;;  %9295 = vperm.xlu1 %11523, %v8872_v26   ;;  %9304 = vperm.xlu0 %11524, %v8875_v23   ;;  %v9540_v33 = vrot.slane %v9113_v54, %v11801_v36 }
 0xb27   :  { %v9526_v29 = vsel %vm1027_vm2, %v9525_v7, %v9521_v45  ;;  %v8878_v7 = vmul.f32 %v15153_v3, %v15280_v28 }
 0xb28   :  { %v9110_v41 = vpop.permute.xlu1 %9109  ;;  %v9531_v15 = vsel %vm1034_vm3, %v9530_v59, %v9526_v29  ;;  %v9119_v0 = vpop.permute.xlu0 %9118  ;;  %v8881_v59 = vmul.f32 %v15155_v27, %v15280_v28 }
 0xb29   :  { %v9535_v5 = vrot.slane %v9110_v41, %v11798_v35  ;;  %9301 = vperm.xlu1 %11523, %v8874_v18   ;;  %9310 = vperm.xlu0 %11524, %v8877_v53   ;;  %v9550_v45 = vrot.slane %v9119_v0, %v11807_v38 }
 0xb2b   :  { %v9536_v24 = vsel %vm1041_vm4, %v9535_v5, %v9531_v15  ;;  %v8880_v5 = vmul.f32 %v15159_v25, %v15280_v28 }
 0xb2c   :  { %v9116_v58 = vpop.permute.xlu1 %9115  ;;  %v9541_v26 = vsel %vm1048_vm5, %v9540_v33, %v9536_v24  ;;  %v9125_v23 = vpop.permute.xlu0 %9124  ;;  %v8883_v33 = vmul.f32 %v15161_v56, %v15280_v28 }
 0xb2d   :  { %v9545_v60 = vrot.slane %v9116_v58, %v11804_v37  ;;  %9307 = vperm.xlu1 %11523, %v8876_v1   ;;  %9316 = vperm.xlu0 %11524, %v8879_v39   ;;  %v9560_v15 = vrot.slane %v9125_v23, %v11813_v47  ;;  %v15349_v58 = vrot.slane %v11969_v14, %v15103_v40 }
 0xb2f   :  { %v9546_v54 = vsel %vm1055_vm6, %v9545_v60, %v9541_v26 }
 0xb30   :  { %v9122_v29 = vpop.permute.xlu1 %9121  ;;  %v9551_v18 = vsel %vm1062_vm7, %v9550_v45, %v9546_v54  ;;  %v9131_v53 = vpop.permute.xlu0 %9130  ;;  %v8882_v45 = vmul.f32 %v15167_v63, %v15280_v28  ;;  %v8885_v54 = vmul.f32 %v15113_v21, %v15349_v58 }
 0xb31   :  { %v9555_v41 = vrot.slane %v9122_v29, %v11810_v46  ;;  %9313 = vperm.xlu1 %11523, %v8878_v7   ;;  %9322 = vperm.xlu0 %11524, %v8881_v59   ;;  %v9570_v23 = vrot.slane %v9131_v53, %v11819_v49 }
 0xb33   :  { %v9556_v0 = vsel %vm1069_vm8, %v9555_v41, %v9551_v18 }
 0xb34   :  { %v9128_v24 = vpop.permute.xlu1 %9127  ;;  %v9561_v1 = vsel %vm1076_vm9, %v9560_v15, %v9556_v0  ;;  %v9137_v39 = vpop.permute.xlu0 %9136  ;;  %v8884_v15 = vmul.f32 %v15171_v10, %v15280_v28  ;;  %v8887_v0 = vmul.f32 %v15120_v44, %v15349_v58 }
 0xb35   :  { %v9565_v26 = vrot.slane %v9128_v24, %v11816_v48  ;;  %9319 = vperm.xlu1 %11523, %v8880_v5   ;;  %9328 = vperm.xlu0 %11524, %v8883_v33   ;;  %v9580_v41 = vrot.slane %v9137_v39, %v11825_v51  ;;  %v8886_v39 = vmul.f32 %v15126_v2, %v15349_v58 }
 0xb37   :  { %v9566_v60 = vsel %vm16264_vm10, %v9565_v26, %v9561_v1 }
 0xb38   :  { %v9134_v7 = vpop.permute.xlu1 %9133  ;;  %v9571_v59 = vsel %vm1090_vm11, %v9570_v23, %v9566_v60  ;;  %v9143_v29 = vpop.permute.xlu0 %9142  ;;  %v8889_v23 = vmul.f32 %v15128_v8, %v15349_v58 }
 0xb39   :  { %v9575_v18 = vrot.slane %v9134_v7, %v11822_v50  ;;  %9325 = vperm.xlu1 %11523, %v8882_v45   ;;  %9334 = vperm.xlu0 %11524, %v8885_v54   ;;  %v9590_v54 = vrot.slane %v9143_v29, %v11783_v22 }
 0xb3b   :  { %v9576_v53 = vsel %vm1097_vm12, %v9575_v18, %v9571_v59 }
 0xb3c   :  { %v9140_v5 = vpop.permute.xlu1 %9139  ;;  %v9581_v33 = vsel %vm1104_vm13, %v9580_v41, %v9576_v53  ;;  %v9149_v24 = vpop.permute.xlu0 %9148  ;;  %v8888_v41 = vmul.f32 %v15135_v62, %v15349_v58  ;;  %v8891_v53 = vmul.f32 %v15137_v12, %v15349_v58 }
 0xb3d   :  { %v9585_v1 = vrot.slane %v9140_v5, %v11828_v52  ;;  %9331 = vperm.xlu1 %11523, %v8884_v15   ;;  %9340 = vperm.xlu0 %11524, %v8887_v0   ;;  %v9599_v59 = vrot.slane %v9149_v24, %v11789_v31  ;;  %v8890_v24 = vmul.f32 %v15141_v42, %v15349_v58 }
 0xb3f   :  { %v9586_v26 = vsel %vm1111_vm14, %v9585_v1, %v9581_v33  ;;  %v8893_v1 = vmul.f32 %v15143_v11, %v15349_v58 }
 0xb40   :  { %v15375_v28 = vsel %vm16265_vm15, %v9586_v26, %v15300_v9  ;;  %v9146_v60 = vpop.permute.xlu1 %9145  ;;  %v9155_v45 = vpop.permute.xlu0 %9154  ;;  %vm16266_vm15 = vcmask 1042434  }
 0xb41   :  { %v9594_v7 = vrot.slane %v9146_v60, %v11786_v30  ;;  %9337 = vperm.xlu1 %11523, %v8886_v39   ;;  %9346 = vperm.xlu0 %11524, %v8889_v23   ;;  %v9609_v5 = vrot.slane %v9155_v45, %v11795_v34 }
 0xb43   :  { %v9595_v18 = vsel %vm1013_vm0, %v9594_v7, %v9590_v54  ;;  %v8892_v7 = vmul.f32 %v15147_v57, %v15349_v58 }
 0xb44   :  { %v9152_v9 = vpop.permute.xlu1 %9151  ;;  %v9600_v15 = vsel %vm1020_vm1, %v9599_v59, %v9595_v18  ;;  %v9161_v0 = vpop.permute.xlu0 %9160  ;;  %v8895_v59 = vmul.f32 %v15149_v13, %v15349_v58 }
 0xb45   :  { %v9604_v29 = vrot.slane %v9152_v9, %v11792_v32  ;;  %9343 = vperm.xlu1 %11523, %v8888_v41   ;;  %9352 = vperm.xlu0 %11524, %v8891_v53   ;;  %v9619_v54 = vrot.slane %v9161_v0, %v11801_v36 }
 0xb47   :  { %v9605_v33 = vsel %vm1027_vm2, %v9604_v29, %v9600_v15  ;;  %v8894_v29 = vmul.f32 %v15153_v3, %v15349_v58 }
 0xb48   :  { %v9158_v26 = vpop.permute.xlu1 %9157  ;;  %v9610_v39 = vsel %vm1034_vm3, %v9609_v5, %v9605_v33  ;;  %v9167_v23 = vpop.permute.xlu0 %9166  ;;  %v8897_v5 = vmul.f32 %v15155_v27, %v15349_v58 }
 0xb49   :  { %v9614_v60 = vrot.slane %v9158_v26, %v11798_v35  ;;  %9349 = vperm.xlu1 %11523, %v8890_v24   ;;  %9358 = vperm.xlu0 %11524, %v8893_v1   ;;  %v9629_v15 = vrot.slane %v9167_v23, %v11807_v38 }
 0xb4b   :  { %v9615_v45 = vsel %vm1041_vm4, %v9614_v60, %v9610_v39  ;;  %v8896_v60 = vmul.f32 %v15159_v25, %v15349_v58 }
 0xb4c   :  { %v9164_v18 = vpop.permute.xlu1 %9163  ;;  %v9620_v41 = vsel %vm1048_vm5, %v9619_v54, %v9615_v45  ;;  %v9173_v53 = vpop.permute.xlu0 %9172  ;;  %v8899_v54 = vmul.f32 %v15161_v56, %v15349_v58 }
 0xb4d   :  { %v9624_v9 = vrot.slane %v9164_v18, %v11804_v37  ;;  %9355 = vperm.xlu1 %11523, %v8892_v7   ;;  %9364 = vperm.xlu0 %11524, %v8895_v59   ;;  %v9639_v39 = vrot.slane %v9173_v53, %v11813_v47  ;;  %v15420_v18 = vrot.slane %v11971_v17, %v15103_v40 }
 0xb4f   :  { %v9625_v0 = vsel %vm1055_vm6, %v9624_v9, %v9620_v41 }
 0xb50   :  { %v9170_v33 = vpop.permute.xlu1 %9169  ;;  %v9630_v24 = vsel %vm1062_vm7, %v9629_v15, %v9625_v0  ;;  %v9179_v1 = vpop.permute.xlu0 %9178  ;;  %v8898_v15 = vmul.f32 %v15167_v63, %v15349_v58  ;;  %v8901_v0 = vmul.f32 %v15113_v21, %v15420_v18 }
 0xb51   :  { %v9634_v26 = vrot.slane %v9170_v33, %v11810_v46  ;;  %9361 = vperm.xlu1 %11523, %v8894_v29   ;;  %9370 = vperm.xlu0 %11524, %v8897_v5   ;;  %v9649_v53 = vrot.slane %v9179_v1, %v11819_v49 }
 0xb53   :  { %v9635_v23 = vsel %vm1069_vm8, %v9634_v26, %v9630_v24  ;;  %v8900_v26 = vmul.f32 %v15171_v10, %v15349_v58 }
 0xb54   :  { %v9176_v45 = vpop.permute.xlu1 %9175  ;;  %v9640_v7 = vsel %vm1076_vm9, %v9639_v39, %v9635_v23  ;;  %v9185_v59 = vpop.permute.xlu0 %9184  ;;  %v8903_v39 = vmul.f32 %v15120_v44, %v15420_v18 }
 0xb55   :  { %v9644_v41 = vrot.slane %v9176_v45, %v11816_v48  ;;  %9367 = vperm.xlu1 %11523, %v8896_v60   ;;  %9376 = vperm.xlu0 %11524, %v8899_v54   ;;  %v9659_v24 = vrot.slane %v9185_v59, %v11825_v51  ;;  %v8905_v59 = vmul.f32 %v15128_v8, %v15420_v18 }
 0xb56   :  { %v8907_v8 = vmul.f32 %v15137_v12, %v15420_v18 }
 0xb57   :  { %v9645_v9 = vsel %vm16264_vm10, %v9644_v41, %v9640_v7  ;;  %v8902_v7 = vmul.f32 %v15126_v2, %v15420_v18  ;;  %v8904_v2 = vmul.f32 %v15135_v62, %v15420_v18  ;;  %v8909_v62 = vmul.f32 %v15143_v11, %v15420_v18 }
 0xb58   :  { %v9182_v29 = vpop.permute.xlu1 %9181  ;;  %v9650_v5 = vsel %vm1090_vm11, %v9649_v53, %v9645_v9  ;;  %v9191_v33 = vpop.permute.xlu0 %9190 }
 0xb59   :  { %v9654_v40 = vrot.slane %v9182_v29, %v11822_v50  ;;  %9373 = vperm.xlu1 %11523, %v8898_v15   ;;  %9382 = vperm.xlu0 %11524, %v8901_v0   ;;  %v9669_v53 = vrot.slane %v9191_v33, %v11783_v22 }
 0xb5b   :  { %v9655_v1 = vsel %vm1097_vm12, %v9654_v40, %v9650_v5 }
 0xb5c   :  { %v9188_v23 = vpop.permute.xlu1 %9187  ;;  %v9660_v21 = vsel %vm1104_vm13, %v9659_v24, %v9655_v1  ;;  %v9197_v60 = vpop.permute.xlu0 %9196  ;;  %v8906_v1 = vmul.f32 %v15141_v42, %v15420_v18  ;;  %v8911_v42 = vmul.f32 %v15149_v13, %v15420_v18 }
 0xb5d   :  { %v9664_v54 = vrot.slane %v9188_v23, %v11828_v52  ;;  %9379 = vperm.xlu1 %11523, %v8900_v26   ;;  %9388 = vperm.xlu0 %11524, %v8903_v39   ;;  %v9678_v15 = vrot.slane %v9197_v60, %v11789_v31 }
 0xb5f   :  { %v9665_v45 = vsel %vm1111_vm14, %v9664_v54, %v9660_v21  ;;  %v8908_v54 = vmul.f32 %v15147_v57, %v15420_v18  ;;  %v8913_v57 = vmul.f32 %v15155_v27, %v15420_v18 }
 0xb60   :  { %v15446_v58 = vsel %vm16266_vm15, %v9665_v45, %v15375_v28  ;;  %v9194_v44 = vpop.permute.xlu1 %9193  ;;  %v9203_v41 = vpop.permute.xlu0 %9202  ;;  %vm16267_vm15 = vcmask 1043459  }
 0xb61   :  { %v9673_v9 = vrot.slane %v9194_v44, %v11786_v30  ;;  %9385 = vperm.xlu1 %11523, %v8902_v7   ;;  %9394 = vperm.xlu0 %11524, %v8905_v59   ;;  %v9688_v40 = vrot.slane %v9203_v41, %v11795_v34 }
 0xb63   :  { %v9674_v0 = vsel %vm1013_vm0, %v9673_v9, %v9669_v53  ;;  %v8910_v53 = vmul.f32 %v15153_v3, %v15420_v18  ;;  %v8915_v3 = vmul.f32 %v15161_v56, %v15420_v18 }
 0xb64   :  { %v9200_v28 = vpop.permute.xlu1 %9199  ;;  %v9679_v29 = vsel %vm1020_vm1, %v9678_v15, %v9674_v0  ;;  %v9209_v5 = vpop.permute.xlu0 %9208 }
 0xb65   :  { %v9683_v33 = vrot.slane %v9200_v28, %v11792_v32  ;;  %9391 = vperm.xlu1 %11523, %v8904_v2   ;;  %9400 = vperm.xlu0 %11524, %v8907_v8   ;;  %v9698_v21 = vrot.slane %v9209_v5, %v11801_v36  ;;  %v8912_v28 = vmul.f32 %v15159_v25, %v15420_v18 }
 0xb66   :  { %v8914_v25 = vmul.f32 %v15167_v63, %v15420_v18 }
 0xb67   :  { %v9684_v24 = vsel %vm1027_vm2, %v9683_v33, %v9679_v29 }
 0xb68   :  { %v9206_v26 = vpop.permute.xlu1 %9205  ;;  %v9689_v12 = vsel %vm1034_vm3, %v9688_v40, %v9684_v24  ;;  %v9215_v39 = vpop.permute.xlu0 %9214  ;;  %v15491_v24 = vld [vmem:[#allocation7 + $0x7] ss:$0 sm:$0xff] }
 0xb69   :  { %v9693_v23 = vrot.slane %v9206_v26, %v11798_v35  ;;  %9397 = vperm.xlu1 %11523, %v8906_v1   ;;  %9406 = vperm.xlu0 %11524, %v8909_v62   ;;  %v9708_v44 = vrot.slane %v9215_v39, %v11807_v38 }
 0xb6b   :  { %v9694_v60 = vsel %vm1041_vm4, %v9693_v23, %v9689_v12 }
 0xb6c   :  { %v9212_v45 = vpop.permute.xlu1 %9211  ;;  %v9699_v11 = vsel %vm1048_vm5, %v9698_v21, %v9694_v60  ;;  %v9221_v7 = vpop.permute.xlu0 %9220  ;;  %v8916_v21 = vmul.f32 %v15171_v10, %v15420_v18 }
 0xb6d   :  { %v9703_v59 = vrot.slane %v9212_v45, %v11804_v37  ;;  %9403 = vperm.xlu1 %11523, %v8908_v54   ;;  %9412 = vperm.xlu0 %11524, %v8911_v42   ;;  %v9718_v2 = vrot.slane %v9221_v7, %v11813_v47 }
 0xb6f   :  { %v9704_v41 = vsel %vm1055_vm6, %v9703_v59, %v9699_v11 }
 0xb70   :  { %v9218_v9 = vpop.permute.xlu1 %9217  ;;  %v9709_v13 = vsel %vm1062_vm7, %v9708_v44, %v9704_v41  ;;  %v9227_v15 = vpop.permute.xlu0 %9226 }
 0xb71   :  { %v9713_v0 = vrot.slane %v9218_v9, %v11810_v46  ;;  %9409 = vperm.xlu1 %11523, %v8910_v53   ;;  %9418 = vperm.xlu0 %11524, %v8913_v57   ;;  %v9728_v40 = vrot.slane %v9227_v15, %v11819_v49 }
 0xb73   :  { %v9714_v8 = vsel %vm1069_vm8, %v9713_v0, %v9709_v13 }
 0xb74   :  { %v9224_v29 = vpop.permute.xlu1 %9223  ;;  %v9719_v27 = vsel %vm1076_vm9, %v9718_v2, %v9714_v8  ;;  %v9233_v5 = vpop.permute.xlu0 %9232 }
 0xb75   :  { %v9723_v33 = vrot.slane %v9224_v29, %v11816_v48  ;;  %9415 = vperm.xlu1 %11523, %v8912_v28   ;;  %9424 = vperm.xlu0 %11524, %v8915_v3   ;;  %v9738_v39 = vrot.slane %v9233_v5, %v11825_v51 }
 0xb77   :  { %v9724_v1 = vsel %vm16264_vm10, %v9723_v33, %v9719_v27 }
 0xb78   :  { %v9230_v62 = vpop.permute.xlu1 %9229  ;;  %v9729_v56 = vsel %vm1090_vm11, %v9728_v40, %v9724_v1  ;;  %v9239_v26 = vpop.permute.xlu0 %9238 }
 0xb79   :  { %v9733_v12 = vrot.slane %v9230_v62, %v11822_v50  ;;  %9421 = vperm.xlu1 %11523, %v8914_v25   ;;  %10109 = vbcast.lane.b32.xlu0 %v15491_v24, 256  ;;  %v9748_v44 = vrot.slane %v9239_v26, %v11783_v22 }
 0xb7b   :  { %v9734_v23 = vsel %vm1097_vm12, %v9733_v12, %v9729_v56 }
 0xb7c   :  { %v9236_v60 = vpop.permute.xlu1 %9235  ;;  %v9739_v54 = vsel %vm1104_vm13, %v9738_v39, %v9734_v23  ;;  %v9245_v63 = vpop.permute.xlu0 %9244 }
 0xb7d   :  { %v9743_v42 = vrot.slane %v9236_v60, %v11828_v52  ;;  %9427 = vperm.xlu1 %11523, %v8916_v21   ;;  %10117 = vbcast.lane.b32.xlu0 %v15491_v24, 272  ;;  %v9757_v18 = vrot.slane %v9245_v63, %v11789_v31 }
 0xb7f   :  { %v9744_v45 = vsel %vm1111_vm14, %v9743_v42, %v9739_v54 }
 0xb80   :  { %v15509_v11 = vsel %vm16267_vm15, %v9744_v45, %v15446_v58  ;;  %v9242_v7 = vpop.permute.xlu1 %9241  ;;  %v9251_v59 = vpop.permute.xlu0 %9250  ;;  %vm16268_vm15 = vcmask 1044484  }
 0xb81   :  { %v9752_v10 = vrot.slane %v9242_v7, %v11786_v30  ;;  %10113 = vbcast.lane.b32.xlu1 %v15491_v24, 264  ;;  %10125 = vbcast.lane.b32.xlu0 %v15491_v24, 288  ;;  %v9767_v13 = vrot.slane %v9251_v59, %v11795_v34 }
 0xb83   :  { %v9753_v41 = vsel %vm1013_vm0, %v9752_v10, %v9748_v44 }
 0xb84   :  { %v9248_v53 = vpop.permute.xlu1 %9247  ;;  %v9758_v57 = vsel %vm1020_vm1, %v9757_v18, %v9753_v41  ;;  %v9257_v9 = vpop.permute.xlu0 %9256 }
 0xb85   :  { %v9762_v58 = vrot.slane %v9248_v53, %v11792_v32  ;;  %10121 = vbcast.lane.b32.xlu1 %v15491_v24, 280  ;;  %10133 = vbcast.lane.b32.xlu0 %v15491_v24, 304  ;;  %v9777_v3 = vrot.slane %v9257_v9, %v11801_v36 }
 0xb87   :  { %v9763_v15 = vsel %vm1027_vm2, %v9762_v58, %v9758_v57 }
 0xb88   :  { %v9254_v0 = vpop.permute.xlu1 %9253  ;;  %v9768_v2 = vsel %vm1034_vm3, %v9767_v13, %v9763_v15  ;;  %v9263_v8 = vpop.permute.xlu0 %9262 }
 0xb89   :  { %v9772_v28 = vrot.slane %v9254_v0, %v11798_v35  ;;  %10129 = vbcast.lane.b32.xlu1 %v15491_v24, 296  ;;  %10141 = vbcast.lane.b32.xlu0 %v15491_v24, 320  ;;  %v9787_v1 = vrot.slane %v9263_v8, %v11807_v38 }
 0xb8b   :  { %v9773_v29 = vsel %vm1041_vm4, %v9772_v28, %v9768_v2 }
 0xb8c   :  { %v9260_v27 = vpop.permute.xlu1 %9259  ;;  %v9778_v5 = vsel %vm1048_vm5, %v9777_v3, %v9773_v29  ;;  %v9269_v33 = vpop.permute.xlu0 %9268 }
 0xb8d   :  { %v9782_v40 = vrot.slane %v9260_v27, %v11804_v37  ;;  %10137 = vbcast.lane.b32.xlu1 %v15491_v24, 312  ;;  %10149 = vbcast.lane.b32.xlu0 %v15491_v24, 336  ;;  %v9797_v39 = vrot.slane %v9269_v33, %v11813_v47 }
 0xb8f   :  { %v9783_v25 = vsel %vm1055_vm6, %v9782_v40, %v9778_v5 }
 0xb90   :  { %v9266_v62 = vpop.permute.xlu1 %9265  ;;  %v9788_v56 = vsel %vm1062_vm7, %v9787_v1, %v9783_v25  ;;  %v9275_v26 = vpop.permute.xlu0 %9274 }
 0xb91   :  { %v9792_v12 = vrot.slane %v9266_v62, %v11810_v46  ;;  %10145 = vbcast.lane.b32.xlu1 %v15491_v24, 328  ;;  %10157 = vbcast.lane.b32.xlu0 %v15491_v24, 352  ;;  %v9807_v42 = vrot.slane %v9275_v26, %v11819_v49 }
 0xb93   :  { %v9793_v23 = vsel %vm1069_vm8, %v9792_v12, %v9788_v56 }
 0xb94   :  { %v9272_v21 = vpop.permute.xlu1 %9271  ;;  %v9798_v60 = vsel %vm1076_vm9, %v9797_v39, %v9793_v23  ;;  %v9281_v54 = vpop.permute.xlu0 %9280 }
 0xb95   :  { %v9802_v63 = vrot.slane %v9272_v21, %v11816_v48  ;;  %10153 = vbcast.lane.b32.xlu1 %v15491_v24, 344  ;;  %10165 = vbcast.lane.b32.xlu0 %v15491_v24, 368  ;;  %v9817_v18 = vrot.slane %v9281_v54, %v11825_v51 }
 0xb97   :  { %v9803_v45 = vsel %vm16264_vm10, %v9802_v63, %v9798_v60 }
 0xb98   :  { %v9278_v7 = vpop.permute.xlu1 %9277  ;;  %v9808_v59 = vsel %vm1090_vm11, %v9807_v42, %v9803_v45  ;;  %v9287_v44 = vpop.permute.xlu0 %9286 }
 0xb99   :  { %v9812_v10 = vrot.slane %v9278_v7, %v11822_v50  ;;  %10161 = vbcast.lane.b32.xlu1 %v15491_v24, 360  ;;  %v9827_v8 = vrot.slane %v9287_v44, %v11783_v22 }
 0xb9b   :  { %v9813_v41 = vsel %vm1097_vm12, %v9812_v10, %v9808_v59 }
 0xb9c   :  { %v9284_v53 = vpop.permute.xlu1 %9283  ;;  %v9818_v57 = vsel %vm1104_vm13, %v9817_v18, %v9813_v41  ;;  %v9293_v9 = vpop.permute.xlu0 %9292 }
 0xb9d   :  { %v9822_v58 = vrot.slane %v9284_v53, %v11828_v52  ;;  %10169 = vbcast.lane.b32.xlu1 %v15491_v24, 376  ;;  %v9836_v3 = vrot.slane %v9293_v9, %v11789_v31 }
 0xb9f   :  { %v9823_v13 = vsel %vm1111_vm14, %v9822_v58, %v9818_v57 }
 0xba0   :  { %v10064_v15 = vsel %vm16268_vm15, %v9823_v13, %v15509_v11  ;;  %v9290_v0 = vpop.permute.xlu1 %9289  ;;  %v9299_v2 = vpop.permute.xlu0 %9298  ;;  %vm16269_vm15 = vcmask 1045509  }
 0xba1   :  { %v9831_v28 = vrot.slane %v9290_v0, %v11786_v30  ;;  %v9846_v40 = vrot.slane %v9299_v2, %v11795_v34 }
 0xba3   :  { %v9832_v29 = vsel %vm1013_vm0, %v9831_v28, %v9827_v8 }
 0xba4   :  { %v9296_v27 = vpop.permute.xlu1 %9295  ;;  %v9837_v5 = vsel %vm1020_vm1, %v9836_v3, %v9832_v29  ;;  %v9305_v33 = vpop.permute.xlu0 %9304 }
 0xba5   :  { %v9841_v24 = vrot.slane %v9296_v27, %v11792_v32  ;;  %v9856_v26 = vrot.slane %v9305_v33, %v11801_v36 }
 0xba7   :  { %v9842_v11 = vsel %vm1027_vm2, %v9841_v24, %v9837_v5 }
 0xba8   :  { %v9302_v1 = vpop.permute.xlu1 %9301  ;;  %v9847_v25 = vsel %vm1034_vm3, %v9846_v40, %v9842_v11  ;;  %v9311_v62 = vpop.permute.xlu0 %9310 }
 0xba9   :  { %v9851_v56 = vrot.slane %v9302_v1, %v11798_v35  ;;  %v9866_v54 = vrot.slane %v9311_v62, %v11807_v38 }
 0xbab   :  { %v9852_v12 = vsel %vm1041_vm4, %v9851_v56, %v9847_v25 }
 0xbac   :  { %v9308_v39 = vpop.permute.xlu1 %9307  ;;  %v9857_v23 = vsel %vm1048_vm5, %v9856_v26, %v9852_v12  ;;  %v9317_v21 = vpop.permute.xlu0 %9316 }
 0xbad   :  { %v9861_v60 = vrot.slane %v9308_v39, %v11804_v37  ;;  %v9876_v44 = vrot.slane %v9317_v21, %v11813_v47 }
 0xbaf   :  { %v9862_v63 = vsel %vm1055_vm6, %v9861_v60, %v9857_v23 }
 0xbb0   :  { %v9314_v42 = vpop.permute.xlu1 %9313  ;;  %v9867_v45 = vsel %vm1062_vm7, %v9866_v54, %v9862_v63  ;;  %v9323_v7 = vpop.permute.xlu0 %9322 }
 0xbb1   :  { %v9871_v59 = vrot.slane %v9314_v42, %v11810_v46  ;;  %v9886_v9 = vrot.slane %v9323_v7, %v11819_v49 }
 0xbb3   :  { %v9872_v10 = vsel %vm1069_vm8, %v9871_v59, %v9867_v45 }
 0xbb4   :  { %v9320_v18 = vpop.permute.xlu1 %9319  ;;  %v9877_v41 = vsel %vm1076_vm9, %v9876_v44, %v9872_v10  ;;  %v9329_v53 = vpop.permute.xlu0 %9328 }
 0xbb5   :  { %v9881_v57 = vrot.slane %v9320_v18, %v11816_v48  ;;  %v9896_v28 = vrot.slane %v9329_v53, %v11825_v51 }
 0xbb7   :  { %v9882_v58 = vsel %vm16264_vm10, %v9881_v57, %v9877_v41 }
 0xbb8   :  { %v9326_v13 = vpop.permute.xlu1 %9325  ;;  %v9887_v0 = vsel %vm1090_vm11, %v9886_v9, %v9882_v58  ;;  %v9335_v2 = vpop.permute.xlu0 %9334 }
 0xbb9   :  { %v9891_v8 = vrot.slane %v9326_v13, %v11822_v50  ;;  %v9906_v25 = vrot.slane %v9335_v2, %v11783_v22 }
 0xbbb   :  { %v9892_v3 = vsel %vm1097_vm12, %v9891_v8, %v9887_v0 }
 0xbbc   :  { %v9332_v29 = vpop.permute.xlu1 %9331  ;;  %v9897_v27 = vsel %vm1104_vm13, %v9896_v28, %v9892_v3  ;;  %v9341_v5 = vpop.permute.xlu0 %9340 }
 0xbbd   :  { %v9901_v33 = vrot.slane %v9332_v29, %v11828_v52  ;;  %v9915_v56 = vrot.slane %v9341_v5, %v11789_v31 }
 0xbbf   :  { %v9902_v24 = vsel %vm1111_vm14, %v9901_v33, %v9897_v27 }
 0xbc0   :  { %v10065_v40 = vsel %vm16269_vm15, %v9902_v24, %v10064_v15  ;;  %v9338_v11 = vpop.permute.xlu1 %9337  ;;  %v9347_v1 = vpop.permute.xlu0 %9346  ;;  %vm16270_vm15 = vcmask 1046534  }
 0xbc1   :  { %v9910_v62 = vrot.slane %v9338_v11, %v11786_v30  ;;  %v9925_v60 = vrot.slane %v9347_v1, %v11795_v34 }
 0xbc3   :  { %v9911_v26 = vsel %vm1013_vm0, %v9910_v62, %v9906_v25 }
 0xbc4   :  { %v9344_v12 = vpop.permute.xlu1 %9343  ;;  %v9916_v39 = vsel %vm1020_vm1, %v9915_v56, %v9911_v26  ;;  %v9353_v23 = vpop.permute.xlu0 %9352 }
 0xbc5   :  { %v9920_v21 = vrot.slane %v9344_v12, %v11792_v32  ;;  %v9935_v7 = vrot.slane %v9353_v23, %v11801_v36 }
 0xbc7   :  { %v9921_v15 = vsel %vm1027_vm2, %v9920_v21, %v9916_v39 }
 0xbc8   :  { %v9350_v54 = vpop.permute.xlu1 %9349  ;;  %v9926_v63 = vsel %vm1034_vm3, %v9925_v60, %v9921_v15  ;;  %v9359_v42 = vpop.permute.xlu0 %9358 }
 0xbc9   :  { %v9930_v45 = vrot.slane %v9350_v54, %v11798_v35  ;;  %v9945_v53 = vrot.slane %v9359_v42, %v11807_v38 }
 0xbcb   :  { %v9931_v59 = vsel %vm1041_vm4, %v9930_v45, %v9926_v63 }
 0xbcc   :  { %v9356_v44 = vpop.permute.xlu1 %9355  ;;  %v9936_v10 = vsel %vm1048_vm5, %v9935_v7, %v9931_v59  ;;  %v9365_v18 = vpop.permute.xlu0 %9364 }
 0xbcd   :  { %v9940_v41 = vrot.slane %v9356_v44, %v11804_v37  ;;  %v9955_v2 = vrot.slane %v9365_v18, %v11813_v47 }
 0xbcf   :  { %v9941_v57 = vsel %vm1055_vm6, %v9940_v41, %v9936_v10 }
 0xbd0   :  { %v9362_v9 = vpop.permute.xlu1 %9361  ;;  %v9946_v58 = vsel %vm1062_vm7, %v9945_v53, %v9941_v57  ;;  %v9371_v13 = vpop.permute.xlu0 %9370 }
 0xbd1   :  { %v9950_v0 = vrot.slane %v9362_v9, %v11810_v46  ;;  %v9965_v5 = vrot.slane %v9371_v13, %v11819_v49 }
 0xbd3   :  { %v9951_v8 = vsel %vm1069_vm8, %v9950_v0, %v9946_v58 }
 0xbd4   :  { %v9368_v28 = vpop.permute.xlu1 %9367  ;;  %v9956_v3 = vsel %vm1076_vm9, %v9955_v2, %v9951_v8  ;;  %v9377_v29 = vpop.permute.xlu0 %9376 }
 0xbd5   :  { %v9960_v27 = vrot.slane %v9368_v28, %v11816_v48  ;;  %v9975_v62 = vrot.slane %v9377_v29, %v11825_v51 }
 0xbd7   :  { %v9961_v33 = vsel %vm16264_vm10, %v9960_v27, %v9956_v3 }
 0xbd8   :  { %v9374_v24 = vpop.permute.xlu1 %9373  ;;  %v9966_v11 = vsel %vm1090_vm11, %v9965_v5, %v9961_v33  ;;  %v9383_v1 = vpop.permute.xlu0 %9382 }
 0xbd9   :  { %v9970_v25 = vrot.slane %v9374_v24, %v11822_v50  ;;  %v9985_v63 = vrot.slane %v9383_v1, %v11783_v22 }
 0xbdb   :  { %v9971_v56 = vsel %vm1097_vm12, %v9970_v25, %v9966_v11  ;;  %v15642_v25 = vsub.s32 7, %v11780_v20 }
 0xbdc   :  { %v9380_v26 = vpop.permute.xlu1 %9379  ;;  %v9976_v12 = vsel %vm1104_vm13, %v9975_v62, %v9971_v56  ;;  %v9389_v39 = vpop.permute.xlu0 %9388 }
 0xbdd   :  { %v9980_v23 = vrot.slane %v9380_v26, %v11828_v52  ;;  %v9994_v45 = vrot.slane %v9389_v39, %v11789_v31 }
 0xbdf   :  { %v9981_v21 = vsel %vm1111_vm14, %v9980_v23, %v9976_v12 }
 0xbe0   :  { %v10066_v60 = vsel %vm16270_vm15, %v9981_v21, %v10065_v40  ;;  %v9386_v15 = vpop.permute.xlu1 %9385  ;;  %v9395_v54 = vpop.permute.xlu0 %9394  ;;  %v10074_v21 = vrot.slane %v11873_v43, %v15642_v25  ;;  %vm16271_vm15 = vcmask 1047559  }
 0xbe1   :  { %v9989_v42 = vrot.slane %v9386_v15, %v11786_v30  ;;  %v10004_v41 = vrot.slane %v9395_v54, %v11795_v34 }
 0xbe3   :  { %v9990_v7 = vsel %vm1013_vm0, %v9989_v42, %v9985_v63 }
 0xbe4   :  { %v9392_v59 = vpop.permute.xlu1 %9391  ;;  %v9995_v44 = vsel %vm1020_vm1, %v9994_v45, %v9990_v7  ;;  %v9401_v10 = vpop.permute.xlu0 %9400 }
 0xbe5   :  { %v9999_v18 = vrot.slane %v9392_v59, %v11792_v32  ;;  %v10014_v13 = vrot.slane %v9401_v10, %v11801_v36 }
 0xbe7   :  { %v10000_v40 = vsel %vm1027_vm2, %v9999_v18, %v9995_v44 }
 0xbe8   :  { %v9398_v53 = vpop.permute.xlu1 %9397  ;;  %v10005_v57 = vsel %vm1034_vm3, %v10004_v41, %v10000_v40  ;;  %v9407_v9 = vpop.permute.xlu0 %9406 }
 0xbe9   :  { %v10009_v58 = vrot.slane %v9398_v53, %v11798_v35  ;;  %v10024_v29 = vrot.slane %v9407_v9, %v11807_v38 }
 0xbeb   :  { %v10010_v0 = vsel %vm1041_vm4, %v10009_v58, %v10005_v57 }
 0xbec   :  { %v9404_v2 = vpop.permute.xlu1 %9403  ;;  %v10015_v8 = vsel %vm1048_vm5, %v10014_v13, %v10010_v0  ;;  %v9413_v28 = vpop.permute.xlu0 %9412 }
 0xbed   :  { %v10019_v3 = vrot.slane %v9404_v2, %v11804_v37  ;;  %v10034_v1 = vrot.slane %v9413_v28, %v11813_v47 }
 0xbef   :  { %v10020_v27 = vsel %vm1055_vm6, %v10019_v3, %v10015_v8 }
 0xbf0   :  { %v9410_v5 = vpop.permute.xlu1 %9409  ;;  %v10025_v33 = vsel %vm1062_vm7, %v10024_v29, %v10020_v27  ;;  %v9419_v24 = vpop.permute.xlu0 %9418 }
 0xbf1   :  { %v10029_v11 = vrot.slane %v9410_v5, %v11810_v46  ;;  %v10044_v23 = vrot.slane %v9419_v24, %v11819_v49 }
 0xbf3   :  { %v10030_v62 = vsel %vm1069_vm8, %v10029_v11, %v10025_v33 }
 0xbf4   :  { %v9416_v56 = vpop.permute.xlu1 %9415  ;;  %v10035_v26 = vsel %vm1076_vm9, %v10034_v1, %v10030_v62  ;;  %v9425_v12 = vpop.permute.xlu0 %9424 }
 0xbf5   :  { %v10039_v39 = vrot.slane %v9416_v56, %v11816_v48  ;;  %v10054_v7 = vrot.slane %v9425_v12, %v11825_v51 }
 0xbf7   :  { %v10040_v15 = vsel %vm16264_vm10, %v10039_v39, %v10035_v26 }
 0xbf8   :  { %v9422_v54 = vpop.permute.xlu1 %9421  ;;  %v10045_v63 = vsel %vm1090_vm11, %v10044_v23, %v10040_v15  ;;  %v15652_v20 = vpop.permute.xlu0 %10109 }
 0xbf9   :  { %v10049_v42 = vrot.slane %v9422_v54, %v11822_v50  ;;  %v10187_v45 = vmul.f32 %v15652_v20, %v10074_v21  ;;  %v10078_v54 = vrot.slane %v11899_v6, %v15642_v25 }
 0xbfb   :  { %v10050_v59 = vsel %vm1097_vm12, %v10049_v42, %v10045_v63  ;;  %10444 = vperm.xlu0 %11524, %v10187_v45   ;;  %v10203_v45 = vmul.f32 %v15652_v20, %v10078_v54 }
 0xbfc   :  { %v9428_v44 = vpop.permute.xlu1 %9427  ;;  %v10055_v10 = vsel %vm1104_vm13, %v10054_v7, %v10050_v59  ;;  %v15659_v43 = vpop.permute.xlu0 %10117 }
 0xbfd   :  { %v10059_v18 = vrot.slane %v9428_v44, %v11828_v52  ;;  %v10189_v41 = vmul.f32 %v15659_v43, %v10074_v21  ;;  %v10205_v44 = vmul.f32 %v15659_v43, %v10078_v54 }
 0xbff   :  { %v10060_v40 = vsel %vm1111_vm14, %v10059_v18, %v10055_v10  ;;  %10450 = vperm.xlu0 %11524, %v10189_v41  }
 0xc00   :  { %v10067_v53 = vsel %vm16271_vm15, %v10060_v40, %v10066_v60  ;;  %v15665_v57 = vpop.permute.xlu1 %10113  ;;  %v15667_v9 = vpop.permute.xlu0 %10125  ;;  %vm16272_vm15 = vmmov %vm16264_vm10 }
 0xc01   :  { %v15670_v58 = vadd.f32 %v10067_v53, %v15131_v16  ;;  %v10188_v13 = vmul.f32 %v15665_v57, %v10074_v21  ;;  %v10191_v0 = vmul.f32 %v15667_v9, %v10074_v21  ;;  %v10204_v6 = vmul.f32 %v15665_v57, %v10078_v54 }
 0xc02   :  { %v10207_v10 = vmul.f32 %v15667_v9, %v10078_v54 }
 0xc03   :  { %10447 = vperm.xlu1 %11523, %v10188_v13   ;;  %10456 = vperm.xlu0 %11524, %v10191_v0  }
 0xc04   :  { %v15674_v2 = vpop.permute.xlu1 %10121  ;;  %v15676_v8 = vpop.permute.xlu0 %10133 }
 0xc05   :  { %v10190_v28 = vmul.f32 %v15674_v2, %v10074_v21  ;;  %v10193_v60 = vmul.f32 %v15676_v8, %v10074_v21  ;;  %v10206_v18 = vmul.f32 %v15674_v2, %v10078_v54  ;;  %v10209_v41 = vmul.f32 %v15676_v8, %v10078_v54 }
 0xc07   :  { %10453 = vperm.xlu1 %11523, %v10190_v28   ;;  %10462 = vperm.xlu0 %11524, %v10193_v60  }
 0xc08   :  { %v15680_v3 = vpop.permute.xlu1 %10129  ;;  %v15682_v16 = vpop.permute.xlu0 %10141 }
 0xc09   :  { %v10192_v29 = vmul.f32 %v15680_v3, %v10074_v21  ;;  %v10195_v27 = vmul.f32 %v15682_v16, %v10074_v21  ;;  %v10208_v40 = vmul.f32 %v15680_v3, %v10078_v54 }
 0xc0b   :  { %10459 = vperm.xlu1 %11523, %v10192_v29   ;;  %10468 = vperm.xlu0 %11524, %v10195_v27   ;;  %v10082_v27 = vrot.slane %v11919_v55, %v15642_v25 }
 0xc0c   :  { %v15686_v5 = vpop.permute.xlu1 %10137  ;;  %v15688_v33 = vpop.permute.xlu0 %10149 }
 0xc0d   :  { %v10194_v24 = vmul.f32 %v15686_v5, %v10074_v21  ;;  %v10197_v11 = vmul.f32 %v15688_v33, %v10074_v21  ;;  %v10210_v53 = vmul.f32 %v15686_v5, %v10078_v54  ;;  %v10213_v13 = vmul.f32 %v15688_v33, %v10078_v54 }
 0xc0e   :  { %v10222_v55 = vmul.f32 %v15674_v2, %v10082_v27 }
 0xc0f   :  { %10465 = vperm.xlu1 %11523, %v10194_v24   ;;  %10474 = vperm.xlu0 %11524, %v10197_v11   ;;  %v10219_v11 = vmul.f32 %v15652_v20, %v10082_v27 }
 0xc10   :  { %v15692_v1 = vpop.permute.xlu1 %10145  ;;  %v15694_v62 = vpop.permute.xlu0 %10157 }
 0xc11   :  { %v10196_v56 = vmul.f32 %v15692_v1, %v10074_v21  ;;  %v10199_v26 = vmul.f32 %v15694_v62, %v10074_v21  ;;  %v10212_v0 = vmul.f32 %v15692_v1, %v10078_v54  ;;  %v10215_v28 = vmul.f32 %v15694_v62, %v10078_v54 }
 0xc13   :  { %10471 = vperm.xlu1 %11523, %v10196_v56   ;;  %10480 = vperm.xlu0 %11524, %v10199_v26   ;;  %v10221_v26 = vmul.f32 %v15659_v43, %v10082_v27 }
 0xc14   :  { %v15698_v12 = vpop.permute.xlu1 %10153  ;;  %v15700_v39 = vpop.permute.xlu0 %10165 }
 0xc15   :  { %v10198_v23 = vmul.f32 %v15698_v12, %v10074_v21  ;;  %v10201_v15 = vmul.f32 %v15700_v39, %v10074_v21  ;;  %v10214_v60 = vmul.f32 %v15698_v12, %v10078_v54  ;;  %v10217_v29 = vmul.f32 %v15700_v39, %v10078_v54 }
 0xc17   :  { %10477 = vperm.xlu1 %11523, %v10198_v23   ;;  %10486 = vperm.xlu0 %11524, %v10201_v15   ;;  %v10220_v23 = vmul.f32 %v15665_v57, %v10082_v27  ;;  %v10223_v15 = vmul.f32 %v15667_v9, %v10082_v27 }
 0xc18   :  { %v15706_v63 = vpop.permute.xlu1 %10161 }
 0xc19   :  { %v10200_v42 = vmul.f32 %v15706_v63, %v10074_v21  ;;  %v10216_v24 = vmul.f32 %v15706_v63, %v10078_v54 }
 0xc1b   :  { %10483 = vperm.xlu1 %11523, %v10200_v42   ;;  %10492 = vperm.xlu0 %11524, %v10203_v45   ;;  %v10225_v42 = vmul.f32 %v15676_v8, %v10082_v27  ;;  %v10224_v45 = vmul.f32 %v15680_v3, %v10082_v27 }
 0xc1c   :  { %v15710_v7 = vpop.permute.xlu1 %10169 }
 0xc1d   :  { %v10202_v59 = vmul.f32 %v15710_v7, %v10074_v21  ;;  %v10211_v21 = vmul.f32 %v15682_v16, %v10078_v54  ;;  %v10218_v56 = vmul.f32 %v15710_v7, %v10078_v54  ;;  %v10227_v54 = vmul.f32 %v15682_v16, %v10082_v27 }
 0xc1f   :  { %10489 = vperm.xlu1 %11523, %v10202_v59   ;;  %10498 = vperm.xlu0 %11524, %v10205_v44   ;;  %v10226_v59 = vmul.f32 %v15686_v5, %v10082_v27  ;;  %v10229_v44 = vmul.f32 %v15688_v33, %v10082_v27 }
 0xc23   :  { %10495 = vperm.xlu1 %11523, %v10204_v6   ;;  %10504 = vperm.xlu0 %11524, %v10207_v10   ;;  %v10228_v6 = vmul.f32 %v15692_v1, %v10082_v27  ;;  %v10231_v10 = vmul.f32 %v15694_v62, %v10082_v27 }
 0xc27   :  { %10501 = vperm.xlu1 %11523, %v10206_v18   ;;  %10510 = vperm.xlu0 %11524, %v10209_v41   ;;  %v10230_v18 = vmul.f32 %v15698_v12, %v10082_v27  ;;  %v10233_v41 = vmul.f32 %v15700_v39, %v10082_v27 }
 0xc2b   :  { %10507 = vperm.xlu1 %11523, %v10208_v40   ;;  %10516 = vperm.xlu0 %11524, %v10211_v21   ;;  %v10086_v40 = vrot.slane %v11955_v61, %v15642_v25  ;;  %v10232_v21 = vmul.f32 %v15706_v63, %v10082_v27 }
 0xc2d   :  { %v10238_v61 = vmul.f32 %v15674_v2, %v10086_v40 }
 0xc2f   :  { %10513 = vperm.xlu1 %11523, %v10210_v53   ;;  %10522 = vperm.xlu0 %11524, %v10213_v13   ;;  %v10235_v53 = vmul.f32 %v15652_v20, %v10086_v40  ;;  %v10234_v13 = vmul.f32 %v15710_v7, %v10082_v27  ;;  %v10243_v27 = vmul.f32 %v15682_v16, %v10086_v40 }
 0xc33   :  { %10519 = vperm.xlu1 %11523, %v10212_v0   ;;  %10528 = vperm.xlu0 %11524, %v10215_v28   ;;  %v10237_v0 = vmul.f32 %v15659_v43, %v10086_v40  ;;  %v10236_v28 = vmul.f32 %v15665_v57, %v10086_v40 }
 0xc37   :  { %10525 = vperm.xlu1 %11523, %v10214_v60   ;;  %10534 = vperm.xlu0 %11524, %v10217_v29   ;;  %v10239_v60 = vmul.f32 %v15667_v9, %v10086_v40  ;;  %v10241_v29 = vmul.f32 %v15676_v8, %v10086_v40 }
 0xc3b   :  { %10531 = vperm.xlu1 %11523, %v10216_v24   ;;  %10540 = vperm.xlu0 %11524, %v10219_v11   ;;  %v10240_v24 = vmul.f32 %v15680_v3, %v10086_v40  ;;  %v10242_v11 = vmul.f32 %v15686_v5, %v10086_v40 }
 0xc3f   :  { %10537 = vperm.xlu1 %11523, %v10218_v56   ;;  %10546 = vperm.xlu0 %11524, %v10221_v26   ;;  %v10245_v56 = vmul.f32 %v15688_v33, %v10086_v40  ;;  %v10244_v26 = vmul.f32 %v15692_v1, %v10086_v40 }
 0xc43   :  { %10543 = vperm.xlu1 %11523, %v10220_v23   ;;  %10552 = vperm.xlu0 %11524, %v10223_v15   ;;  %v10247_v23 = vmul.f32 %v15694_v62, %v10086_v40  ;;  %v10246_v15 = vmul.f32 %v15698_v12, %v10086_v40 }
 0xc47   :  { %10549 = vperm.xlu1 %11523, %v10222_v55   ;;  %10558 = vperm.xlu0 %11524, %v10225_v42   ;;  %v10249_v55 = vmul.f32 %v15700_v39, %v10086_v40  ;;  %v15764_v42 = vrot.slane %v11939_v19, %v15642_v25 }
 0xc49   :  { %v10252_v19 = vmul.f32 %v15665_v57, %v15764_v42 }
 0xc4b   :  { %10555 = vperm.xlu1 %11523, %v10224_v45   ;;  %10564 = vperm.xlu0 %11524, %v10227_v54   ;;  %v10248_v45 = vmul.f32 %v15706_v63, %v10086_v40  ;;  %v10251_v54 = vmul.f32 %v15652_v20, %v15764_v42 }
 0xc4f   :  { %10561 = vperm.xlu1 %11523, %v10226_v59   ;;  %10570 = vperm.xlu0 %11524, %v10229_v44   ;;  %v10250_v44 = vmul.f32 %v15710_v7, %v10086_v40 }
 0xc53   :  { %10567 = vperm.xlu1 %11523, %v10228_v6   ;;  %10576 = vperm.xlu0 %11524, %v10231_v10   ;;  %v10253_v6 = vmul.f32 %v15659_v43, %v15764_v42 }
 0xc57   :  { %10573 = vperm.xlu1 %11523, %v10230_v18   ;;  %10582 = vperm.xlu0 %11524, %v10233_v41   ;;  %v10255_v18 = vmul.f32 %v15667_v9, %v15764_v42 }
 0xc5b   :  { %10579 = vperm.xlu1 %11523, %v10232_v21   ;;  %10588 = vperm.xlu0 %11524, %v10235_v53  }
 0xc5f   :  { %10585 = vperm.xlu1 %11523, %v10234_v13   ;;  %10594 = vperm.xlu0 %11524, %v10237_v0  }
 0xc63   :  { %10591 = vperm.xlu1 %11523, %v10236_v28   ;;  %10600 = vperm.xlu0 %11524, %v10239_v60   ;;  %v10254_v28 = vmul.f32 %v15674_v2, %v15764_v42  ;;  %v10257_v60 = vmul.f32 %v15676_v8, %v15764_v42 }
 0xc67   :  { %10597 = vperm.xlu1 %11523, %v10238_v61   ;;  %10606 = vperm.xlu0 %11524, %v10241_v29  }
 0xc6b   :  { %10603 = vperm.xlu1 %11523, %v10240_v24   ;;  %10612 = vperm.xlu0 %11524, %v10243_v27  }
 0xc6f   :  { %10609 = vperm.xlu1 %11523, %v10242_v11   ;;  %10618 = vperm.xlu0 %11524, %v10245_v56  }
 0xc73   :  { %10615 = vperm.xlu1 %11523, %v10244_v26   ;;  %10624 = vperm.xlu0 %11524, %v10247_v23   ;;  %v10256_v26 = vmul.f32 %v15680_v3, %v15764_v42  ;;  %v10259_v23 = vmul.f32 %v15682_v16, %v15764_v42 }
 0xc77   :  { %10621 = vperm.xlu1 %11523, %v10246_v15   ;;  %10630 = vperm.xlu0 %11524, %v10249_v55  }
 0xc7a   :  { %v10445_v59 = vpop.permute.xlu0 %10444 }
 0xc7b   :  { %10627 = vperm.xlu1 %11523, %v10248_v45   ;;  %10636 = vperm.xlu0 %11524, %v10251_v54   ;;  %v10830_v53 = vrot.slane %v10445_v59, %v11783_v22 }
 0xc7e   :  { %v10451_v10 = vpop.permute.xlu0 %10450 }
 0xc7f   :  { %10633 = vperm.xlu1 %11523, %v10250_v44   ;;  %10642 = vperm.xlu0 %11524, %v10253_v6   ;;  %v10839_v40 = vrot.slane %v10451_v10, %v11789_v31  ;;  %v10258_v6 = vmul.f32 %v15686_v5, %v15764_v42  ;;  %v10261_v10 = vmul.f32 %v15688_v33, %v15764_v42 }
 0xc82   :  { %v10448_v41 = vpop.permute.xlu1 %10447  ;;  %v10457_v21 = vpop.permute.xlu0 %10456 }
 0xc83   :  { %v10834_v13 = vrot.slane %v10448_v41, %v11786_v30  ;;  %10639 = vperm.xlu1 %11523, %v10252_v19   ;;  %10648 = vperm.xlu0 %11524, %v10255_v18   ;;  %v10849_v11 = vrot.slane %v10457_v21, %v11795_v34 }
 0xc85   :  { %v10835_v0 = vsel %vm1013_vm0, %v10834_v13, %v10830_v53 }
 0xc86   :  { %v10454_v61 = vpop.permute.xlu1 %10453  ;;  %v10840_v29 = vsel %vm1020_vm1, %v10839_v40, %v10835_v0  ;;  %v10463_v24 = vpop.permute.xlu0 %10462  ;;  %v10260_v40 = vmul.f32 %v15692_v1, %v15764_v42  ;;  %v10263_v0 = vmul.f32 %v15694_v62, %v15764_v42 }
 0xc87   :  { %v10844_v27 = vrot.slane %v10454_v61, %v11792_v32  ;;  %10645 = vperm.xlu1 %11523, %v10254_v28   ;;  %10654 = vperm.xlu0 %11524, %v10257_v60   ;;  %v10859_v59 = vrot.slane %v10463_v24, %v11801_v36 }
 0xc89   :  { %v10845_v56 = vsel %vm1027_vm2, %v10844_v27, %v10840_v29 }
 0xc8a   :  { %v10460_v15 = vpop.permute.xlu1 %10459  ;;  %v10850_v55 = vsel %vm1034_vm3, %v10849_v11, %v10845_v56  ;;  %v10469_v45 = vpop.permute.xlu0 %10468  ;;  %v10262_v11 = vmul.f32 %v15698_v12, %v15764_v42  ;;  %v10265_v56 = vmul.f32 %v15700_v39, %v15764_v42 }
 0xc8b   :  { %v10854_v54 = vrot.slane %v10460_v15, %v11798_v35  ;;  %10651 = vperm.xlu1 %11523, %v10256_v26   ;;  %10660 = vperm.xlu0 %11524, %v10259_v23   ;;  %v10869_v53 = vrot.slane %v10469_v45, %v11807_v38 }
 0xc8d   :  { %v10855_v44 = vsel %vm1041_vm4, %v10854_v54, %v10850_v55  ;;  %v15819_v55 = vrot.slane %v11961_v4, %v15642_v25 }
 0xc8e   :  { %v10466_v19 = vpop.permute.xlu1 %10465  ;;  %v10860_v18 = vsel %vm1048_vm5, %v10859_v59, %v10855_v44  ;;  %v10475_v41 = vpop.permute.xlu0 %10474  ;;  %v10264_v44 = vmul.f32 %v15706_v63, %v15764_v42 }
 0xc8f   :  { %v10864_v21 = vrot.slane %v10466_v19, %v11804_v37  ;;  %10657 = vperm.xlu1 %11523, %v10258_v6   ;;  %10666 = vperm.xlu0 %11524, %v10261_v10   ;;  %v10879_v24 = vrot.slane %v10475_v41, %v11813_v47  ;;  %v10267_v6 = vmul.f32 %v15652_v20, %v15819_v55 }
 0xc91   :  { %v10865_v13 = vsel %vm1055_vm6, %v10864_v21, %v10860_v18 }
 0xc92   :  { %v10472_v28 = vpop.permute.xlu1 %10471  ;;  %v10870_v60 = vsel %vm1062_vm7, %v10869_v53, %v10865_v13  ;;  %v10481_v61 = vpop.permute.xlu0 %10480  ;;  %v10266_v53 = vmul.f32 %v15710_v7, %v15764_v42  ;;  %v10269_v13 = vmul.f32 %v15659_v43, %v15819_v55  ;;  %v10271_v42 = vmul.f32 %v15667_v9, %v15819_v55 }
 0xc93   :  { %v10874_v29 = vrot.slane %v10472_v28, %v11810_v46  ;;  %10663 = vperm.xlu1 %11523, %v10260_v40   ;;  %10672 = vperm.xlu0 %11524, %v10263_v0   ;;  %v10889_v54 = vrot.slane %v10481_v61, %v11819_v49 }
 0xc95   :  { %v10875_v27 = vsel %vm1069_vm8, %v10874_v29, %v10870_v60  ;;  %v10268_v29 = vmul.f32 %v15665_v57, %v15819_v55 }
 0xc96   :  { %v10478_v26 = vpop.permute.xlu1 %10477  ;;  %v10880_v23 = vsel %vm1076_vm9, %v10879_v24, %v10875_v27  ;;  %v10487_v15 = vpop.permute.xlu0 %10486 }
 0xc97   :  { %v10884_v45 = vrot.slane %v10478_v26, %v11816_v48  ;;  %10669 = vperm.xlu1 %11523, %v10262_v11   ;;  %10678 = vperm.xlu0 %11524, %v10265_v56   ;;  %v10899_v41 = vrot.slane %v10487_v15, %v11825_v51  ;;  %v10270_v15 = vmul.f32 %v15674_v2, %v15819_v55 }
 0xc99   :  { %v10885_v59 = vsel %vm16264_vm10, %v10884_v45, %v10880_v23  ;;  %v10273_v45 = vmul.f32 %v15676_v8, %v15819_v55  ;;  %vm16273_vm10 = vcmask 1041409  }
 0xc9a   :  { %v10484_v10 = vpop.permute.xlu1 %10483  ;;  %v10890_v19 = vsel %vm1090_vm11, %v10889_v54, %v10885_v59  ;;  %v10493_v18 = vpop.permute.xlu0 %10492 }
 0xc9b   :  { %v10894_v4 = vrot.slane %v10484_v10, %v11822_v50  ;;  %10675 = vperm.xlu1 %11523, %v10264_v44   ;;  %10684 = vperm.xlu0 %11524, %v10267_v6   ;;  %v10909_v11 = vrot.slane %v10493_v18, %v11783_v22  ;;  %v10272_v18 = vmul.f32 %v15680_v3, %v15819_v55 }
 0xc9d   :  { %v10895_v21 = vsel %vm1097_vm12, %v10894_v4, %v10890_v19  ;;  %v10275_v4 = vmul.f32 %v15682_v16, %v15819_v55 }
 0xc9e   :  { %v10490_v40 = vpop.permute.xlu1 %10489  ;;  %v10900_v0 = vsel %vm1104_vm13, %v10899_v41, %v10895_v21  ;;  %v10499_v28 = vpop.permute.xlu0 %10498 }
 0xc9f   :  { %v10904_v60 = vrot.slane %v10490_v40, %v11828_v52  ;;  %10681 = vperm.xlu1 %11523, %v10266_v53   ;;  %10690 = vperm.xlu0 %11524, %v10269_v13   ;;  %v10918_v26 = vrot.slane %v10499_v28, %v11789_v31  ;;  %v10274_v28 = vmul.f32 %v15686_v5, %v15819_v55 }
 0xca1   :  { %v15839_v61 = vsel %vm1111_vm14, %v10904_v60, %v10900_v0  ;;  %v10277_v60 = vmul.f32 %v15688_v33, %v15819_v55 }
 0xca2   :  { %v10496_v24 = vpop.permute.xlu1 %10495  ;;  %v10505_v27 = vpop.permute.xlu0 %10504 }
 0xca3   :  { %v10913_v56 = vrot.slane %v10496_v24, %v11786_v30  ;;  %10687 = vperm.xlu1 %11523, %v10268_v29   ;;  %10696 = vperm.xlu0 %11524, %v10271_v42   ;;  %v10928_v10 = vrot.slane %v10505_v27, %v11795_v34 }
 0xca5   :  { %v10914_v23 = vsel %vm1013_vm0, %v10913_v56, %v10909_v11 }
 0xca6   :  { %v10502_v54 = vpop.permute.xlu1 %10501  ;;  %v10919_v59 = vsel %vm1020_vm1, %v10918_v26, %v10914_v23  ;;  %v10511_v44 = vpop.permute.xlu0 %10510  ;;  %v10276_v26 = vmul.f32 %v15692_v1, %v15819_v55  ;;  %v10279_v23 = vmul.f32 %v15694_v62, %v15819_v55 }
 0xca7   :  { %v10923_v6 = vrot.slane %v10502_v54, %v11792_v32  ;;  %10693 = vperm.xlu1 %11523, %v10270_v15   ;;  %10702 = vperm.xlu0 %11524, %v10273_v45   ;;  %v10938_v40 = vrot.slane %v10511_v44, %v11801_v36 }
 0xca9   :  { %v10924_v19 = vsel %vm1027_vm2, %v10923_v6, %v10919_v59 }
 0xcaa   :  { %v10508_v41 = vpop.permute.xlu1 %10507  ;;  %v10929_v21 = vsel %vm1034_vm3, %v10928_v10, %v10924_v19  ;;  %v10517_v53 = vpop.permute.xlu0 %10516  ;;  %v10278_v10 = vmul.f32 %v15698_v12, %v15819_v55  ;;  %v10281_v19 = vmul.f32 %v15700_v39, %v15819_v55 }
 0xcab   :  { %v10933_v13 = vrot.slane %v10508_v41, %v11798_v35  ;;  %10699 = vperm.xlu1 %11523, %v10272_v18   ;;  %10708 = vperm.xlu0 %11524, %v10275_v4   ;;  %v10948_v11 = vrot.slane %v10517_v53, %v11807_v38 }
 0xcad   :  { %v10934_v0 = vsel %vm1041_vm4, %v10933_v13, %v10929_v21  ;;  %v15888_v21 = vrot.slane %v11969_v14, %v15642_v25 }
 0xcae   :  { %v10514_v29 = vpop.permute.xlu1 %10513  ;;  %v10939_v42 = vsel %vm1048_vm5, %v10938_v40, %v10934_v0  ;;  %v10523_v24 = vpop.permute.xlu0 %10522 }
 0xcaf   :  { %v10943_v27 = vrot.slane %v10514_v29, %v11804_v37  ;;  %10705 = vperm.xlu1 %11523, %v10274_v28   ;;  %10714 = vperm.xlu0 %11524, %v10277_v60   ;;  %v10958_v44 = vrot.slane %v10523_v24, %v11813_v47  ;;  %v10280_v28 = vmul.f32 %v15706_v63, %v15819_v55 }
 0xcb0   :  { %v10283_v60 = vmul.f32 %v15652_v20, %v15888_v21 }
 0xcb1   :  { %v10944_v56 = vsel %vm1055_vm6, %v10943_v27, %v10939_v42 }
 0xcb2   :  { %v10520_v15 = vpop.permute.xlu1 %10519  ;;  %v10949_v45 = vsel %vm1062_vm7, %v10948_v11, %v10944_v56  ;;  %v10529_v54 = vpop.permute.xlu0 %10528  ;;  %v10282_v56 = vmul.f32 %v15710_v7, %v15819_v55  ;;  %v10287_v55 = vmul.f32 %v15667_v9, %v15888_v21 }
 0xcb3   :  { %v10953_v59 = vrot.slane %v10520_v15, %v11810_v46  ;;  %10711 = vperm.xlu1 %11523, %v10276_v26   ;;  %10720 = vperm.xlu0 %11524, %v10279_v23   ;;  %v10968_v40 = vrot.slane %v10529_v54, %v11819_v49  ;;  %v10285_v26 = vmul.f32 %v15659_v43, %v15888_v21 }
 0xcb5   :  { %v10954_v6 = vsel %vm1069_vm8, %v10953_v59, %v10949_v45 }
 0xcb6   :  { %v10526_v18 = vpop.permute.xlu1 %10525  ;;  %v10959_v4 = vsel %vm1076_vm9, %v10958_v44, %v10954_v6  ;;  %v10535_v41 = vpop.permute.xlu0 %10534  ;;  %v10284_v6 = vmul.f32 %v15665_v57, %v15888_v21 }
 0xcb7   :  { %v10963_v53 = vrot.slane %v10526_v18, %v11816_v48  ;;  %v10978_v13 = vrot.slane %v10535_v41, %v11825_v51  ;;  %10717 = vperm.xlu1 %11523, %v10278_v10   ;;  %10726 = vperm.xlu0 %11524, %v10281_v19  }
 0xcb9   :  { %v10964_v0 = vsel %vm16272_vm15, %v10963_v53, %v10959_v4 }
 0xcba   :  { %v10532_v29 = vpop.permute.xlu1 %10531  ;;  %v10969_v14 = vsel %vm1090_vm11, %v10968_v40, %v10964_v0  ;;  %v10541_v42 = vpop.permute.xlu0 %10540  ;;  %v10289_v40 = vmul.f32 %v15676_v8, %v15888_v21 }
 0xcbb   :  { %v10973_v24 = vrot.slane %v10532_v29, %v11822_v50  ;;  %v10988_v27 = vrot.slane %v10541_v42, %v11783_v22  ;;  %10723 = vperm.xlu1 %11523, %v10280_v28   ;;  %10732 = vperm.xlu0 %11524, %v10283_v60   ;;  %v15928_v60 = vrot.slane %v11971_v17, %v15642_v25 }
 0xcbd   :  { %v10974_v11 = vsel %vm1097_vm12, %v10973_v24, %v10969_v14  ;;  %v10288_v24 = vmul.f32 %v15680_v3, %v15888_v21 }
 0xcbe   :  { %v10538_v23 = vpop.permute.xlu1 %10537  ;;  %v10979_v15 = vsel %vm1104_vm13, %v10978_v13, %v10974_v11  ;;  %v10547_v45 = vpop.permute.xlu0 %10546  ;;  %v10286_v13 = vmul.f32 %v15674_v2, %v15888_v21 }
 0xcbf   :  { %v10983_v54 = vrot.slane %v10538_v23, %v11828_v52  ;;  %v10997_v59 = vrot.slane %v10547_v45, %v11789_v31  ;;  %10729 = vperm.xlu1 %11523, %v10282_v56   ;;  %10738 = vperm.xlu0 %11524, %v10285_v26   ;;  %v10302_v45 = vmul.f32 %v15674_v2, %v15928_v60 }
 0xcc1   :  { %v10984_v44 = vsel %vm1111_vm14, %v10983_v54, %v10979_v15  ;;  %v10299_v15 = vmul.f32 %v15652_v20, %v15928_v60  ;;  %v10304_v20 = vmul.f32 %v15680_v3, %v15928_v60 }
 0xcc2   :  { %v15916_v10 = vsel %vm16273_vm10, %v10984_v44, %v15839_v61  ;;  %v10544_v19 = vpop.permute.xlu1 %10543  ;;  %v10553_v18 = vpop.permute.xlu0 %10552  ;;  %vm16274_vm10 = vcmask 1042434  }
 0xcc3   :  { %v10992_v4 = vrot.slane %v10544_v19, %v11786_v30  ;;  %v11007_v41 = vrot.slane %v10553_v18, %v11795_v34  ;;  %10735 = vperm.xlu1 %11523, %v10284_v6   ;;  %10744 = vperm.xlu0 %11524, %v10287_v55   ;;  %v10301_v19 = vmul.f32 %v15659_v43, %v15928_v60 }
 0xcc4   :  { %v10305_v43 = vmul.f32 %v15676_v8, %v15928_v60 }
 0xcc5   :  { %v10993_v53 = vsel %vm1013_vm0, %v10992_v4, %v10988_v27  ;;  %v10300_v27 = vmul.f32 %v15665_v57, %v15928_v60 }
 0xcc6   :  { %v10550_v0 = vpop.permute.xlu1 %10549  ;;  %v10998_v61 = vsel %vm1020_vm1, %v10997_v59, %v10993_v53  ;;  %v10559_v28 = vpop.permute.xlu0 %10558 }
 0xcc7   :  { %v11002_v29 = vrot.slane %v10550_v0, %v11792_v32  ;;  %v11017_v14 = vrot.slane %v10559_v28, %v11801_v36  ;;  %10741 = vperm.xlu1 %11523, %v10286_v13   ;;  %10750 = vperm.xlu0 %11524, %v10289_v40   ;;  %v10303_v40 = vmul.f32 %v15667_v9, %v15928_v60 }
 0xcc8   :  { %v10306_v9 = vmul.f32 %v15686_v5, %v15928_v60 }
 0xcc9   :  { %v11003_v42 = vsel %vm1027_vm2, %v11002_v29, %v10998_v61 }
 0xcca   :  { %v10556_v11 = vpop.permute.xlu1 %10555  ;;  %v11008_v56 = vsel %vm1034_vm3, %v11007_v41, %v11003_v42  ;;  %v10565_v26 = vpop.permute.xlu0 %10564  ;;  %v10290_v42 = vmul.f32 %v15686_v5, %v15888_v21 }
 0xccb   :  { %v11012_v17 = vrot.slane %v10556_v11, %v11798_v35  ;;  %v11027_v25 = vrot.slane %v10565_v26, %v11807_v38  ;;  %10747 = vperm.xlu1 %11523, %v10288_v24   ;;  %10783 = vperm.xlu0 %11524, %v10300_v27  }
 0xccd   :  { %v11013_v23 = vsel %vm1041_vm4, %v11012_v17, %v11008_v56  ;;  %v10291_v17 = vmul.f32 %v15682_v16, %v15888_v21 }
 0xcce   :  { %v10562_v54 = vpop.permute.xlu1 %10561  ;;  %v11018_v57 = vsel %vm1048_vm5, %v11017_v14, %v11013_v23  ;;  %v10571_v59 = vpop.permute.xlu0 %10570 }
 0xccf   :  { %v11022_v44 = vrot.slane %v10562_v54, %v11804_v37  ;;  %v11037_v6 = vrot.slane %v10571_v59, %v11813_v47  ;;  %10780 = vperm.xlu1 %11523, %v10299_v15   ;;  %10789 = vperm.xlu0 %11524, %v10302_v45   ;;  %v10292_v59 = vmul.f32 %v15692_v1, %v15888_v21 }
 0xcd1   :  { %v11023_v55 = vsel %vm1055_vm6, %v11022_v44, %v11018_v57  ;;  %v10308_v44 = vmul.f32 %v15692_v1, %v15928_v60  ;;  %v10309_v1 = vmul.f32 %v15688_v33, %v15928_v60 }
 0xcd2   :  { %v10568_v18 = vpop.permute.xlu1 %10567  ;;  %v11028_v2 = vsel %vm1062_vm7, %v11027_v25, %v11023_v55  ;;  %v10577_v4 = vpop.permute.xlu0 %10576  ;;  %v10307_v25 = vmul.f32 %v15682_v16, %v15928_v60 }
 0xcd3   :  { %v11032_v41 = vrot.slane %v10568_v18, %v11810_v46  ;;  %v11047_v53 = vrot.slane %v10577_v4, %v11819_v49  ;;  %10786 = vperm.xlu1 %11523, %v10301_v19   ;;  %10795 = vperm.xlu0 %11524, %v10304_v20  }
 0xcd5   :  { %v11033_v13 = vsel %vm1069_vm8, %v11032_v41, %v11028_v2  ;;  %v10293_v2 = vmul.f32 %v15688_v33, %v15888_v21 }
 0xcd6   :  { %v10574_v0 = vpop.permute.xlu1 %10573  ;;  %v11038_v3 = vsel %vm1076_vm9, %v11037_v6, %v11033_v13  ;;  %v10583_v61 = vpop.permute.xlu0 %10582 }
 0xcd7   :  { %v11042_v28 = vrot.slane %v10574_v0, %v11816_v48  ;;  %v11057_v29 = vrot.slane %v10583_v61, %v11825_v51  ;;  %10792 = vperm.xlu1 %11523, %v10303_v40   ;;  %10798 = vperm.xlu0 %11524, %v10305_v43   ;;  %v10294_v43 = vmul.f32 %v15698_v12, %v15888_v21 }
 0xcd8   :  { %v10310_v0 = vmul.f32 %v15698_v12, %v15928_v60 }
 0xcd9   :  { %v11043_v14 = vsel %vm16272_vm15, %v11042_v28, %v11038_v3 }
 0xcda   :  { %v10580_v24 = vpop.permute.xlu1 %10579  ;;  %v11048_v8 = vsel %vm1090_vm11, %v11047_v53, %v11043_v14  ;;  %v10589_v27 = vpop.permute.xlu0 %10588 }
 0xcdb   :  { %v11052_v11 = vrot.slane %v10580_v24, %v11822_v50  ;;  %v11067_v56 = vrot.slane %v10589_v27, %v11783_v22  ;;  %10753 = vperm.xlu1 %11523, %v10290_v42   ;;  %10801 = vperm.xlu0 %11524, %v10306_v9   ;;  %v10295_v42 = vmul.f32 %v15694_v62, %v15888_v21 }
 0xcdc   :  { %v10311_v9 = vmul.f32 %v15694_v62, %v15928_v60 }
 0xcdd   :  { %v11053_v26 = vsel %vm1097_vm12, %v11052_v11, %v11048_v8 }
 0xcde   :  { %v10586_v23 = vpop.permute.xlu1 %10585  ;;  %v11058_v5 = vsel %vm1104_vm13, %v11057_v29, %v11053_v26  ;;  %v10595_v15 = vpop.permute.xlu0 %10594  ;;  %v10296_v26 = vmul.f32 %v15706_v63, %v15888_v21 }
 0xcdf   :  { %v11062_v45 = vrot.slane %v10586_v23, %v11828_v52  ;;  %v11076_v54 = vrot.slane %v10595_v15, %v11789_v31  ;;  %10756 = vperm.xlu1 %11523, %v10291_v17   ;;  %10804 = vperm.xlu0 %11524, %v10307_v25   ;;  %v10312_v17 = vmul.f32 %v15706_v63, %v15928_v60 }
 0xce1   :  { %v11063_v57 = vsel %vm1111_vm14, %v11062_v45, %v11058_v5 }
 0xce2   :  { %v15987_v16 = vsel %vm16274_vm10, %v11063_v57, %v15916_v10  ;;  %v10592_v6 = vpop.permute.xlu1 %10591  ;;  %v10601_v55 = vpop.permute.xlu0 %10600  ;;  %v10313_v57 = vmul.f32 %v15700_v39, %v15928_v60  ;;  %vm16275_vm10 = vcmask 1043459  }
 0xce3   :  { %v11071_v19 = vrot.slane %v10592_v6, %v11786_v30  ;;  %v11086_v20 = vrot.slane %v10601_v55, %v11795_v34  ;;  %10759 = vperm.xlu1 %11523, %v10292_v59   ;;  %10807 = vperm.xlu0 %11524, %v10308_v44  }
 0xce5   :  { %v11072_v18 = vsel %vm1013_vm0, %v11071_v19, %v11067_v56 }
 0xce6   :  { %v10598_v4 = vpop.permute.xlu1 %10597  ;;  %v11077_v10 = vsel %vm1020_vm1, %v11076_v54, %v11072_v18  ;;  %v10607_v41 = vpop.permute.xlu0 %10606  ;;  %v10297_v54 = vmul.f32 %v15700_v39, %v15888_v21 }
 0xce7   :  { %v11081_v53 = vrot.slane %v10598_v4, %v11792_v32  ;;  %v11096_v13 = vrot.slane %v10607_v41, %v11801_v36  ;;  %10762 = vperm.xlu1 %11523, %v10293_v2   ;;  %10810 = vperm.xlu0 %11524, %v10309_v1   ;;  %v10314_v41 = vmul.f32 %v15710_v7, %v15928_v60 }
 0xce9   :  { %v11082_v40 = vsel %vm1027_vm2, %v11081_v53, %v11077_v10 }
 0xcea   :  { %v10604_v3 = vpop.permute.xlu1 %10603  ;;  %v11087_v33 = vsel %vm1034_vm3, %v11086_v20, %v11082_v40  ;;  %v10613_v61 = vpop.permute.xlu0 %10612  ;;  %v10298_v20 = vmul.f32 %v15710_v7, %v15888_v21 }
 0xceb   :  { %v11091_v28 = vrot.slane %v10604_v3, %v11798_v35  ;;  %v11106_v29 = vrot.slane %v10613_v61, %v11807_v38  ;;  %10765 = vperm.xlu1 %11523, %v10294_v43   ;;  %10813 = vperm.xlu0 %11524, %v10310_v0  }
 0xced   :  { %v11092_v14 = vsel %vm1041_vm4, %v11091_v28, %v11087_v33 }
 0xcee   :  { %v10610_v24 = vpop.permute.xlu1 %10609  ;;  %v11097_v12 = vsel %vm1048_vm5, %v11096_v13, %v11092_v14  ;;  %v10619_v8 = vpop.permute.xlu0 %10618 }
 0xcef   :  { %v11101_v27 = vrot.slane %v10610_v24, %v11804_v37  ;;  %v11116_v11 = vrot.slane %v10619_v8, %v11813_v47  ;;  %10768 = vperm.xlu1 %11523, %v10295_v42   ;;  %10816 = vperm.xlu0 %11524, %v10311_v9  }
 0xcf1   :  { %v11102_v56 = vsel %vm1055_vm6, %v11101_v27, %v11097_v12 }
 0xcf2   :  { %v10616_v25 = vpop.permute.xlu1 %10615  ;;  %v11107_v62 = vsel %vm1062_vm7, %v11106_v29, %v11102_v56  ;;  %v10625_v23 = vpop.permute.xlu0 %10624 }
 0xcf3   :  { %v11111_v5 = vrot.slane %v10616_v25, %v11810_v46  ;;  %v11126_v15 = vrot.slane %v10625_v23, %v11819_v49  ;;  %10771 = vperm.xlu1 %11523, %v10296_v26   ;;  %10819 = vperm.xlu0 %11524, %v10312_v17  }
 0xcf5   :  { %v11112_v45 = vsel %vm1069_vm8, %v11111_v5, %v11107_v62 }
 0xcf6   :  { %v10622_v59 = vpop.permute.xlu1 %10621  ;;  %v11117_v63 = vsel %vm1076_vm9, %v11116_v11, %v11112_v45  ;;  %v10631_v44 = vpop.permute.xlu0 %10630 }
 0xcf7   :  { %v11121_v6 = vrot.slane %v10622_v59, %v11816_v48  ;;  %v11136_v55 = vrot.slane %v10631_v44, %v11825_v51  ;;  %10774 = vperm.xlu1 %11523, %v10297_v54   ;;  %10822 = vperm.xlu0 %11524, %v10313_v57  }
 0xcf9   :  { %v11122_v19 = vsel %vm16272_vm15, %v11121_v6, %v11117_v63 }
 0xcfa   :  { %v10628_v18 = vpop.permute.xlu1 %10627  ;;  %v11127_v2 = vsel %vm1090_vm11, %v11126_v15, %v11122_v19  ;;  %v10637_v1 = vpop.permute.xlu0 %10636 }
 0xcfb   :  { %v11131_v39 = vrot.slane %v10628_v18, %v11822_v50  ;;  %v11146_v4 = vrot.slane %v10637_v1, %v11783_v22  ;;  %10777 = vperm.xlu1 %11523, %v10298_v20  }
 0xcfd   :  { %v11132_v10 = vsel %vm1097_vm12, %v11131_v39, %v11127_v2 }
 0xcfe   :  { %v10634_v53 = vpop.permute.xlu1 %10633  ;;  %v11137_v13 = vsel %vm1104_vm13, %v11136_v55, %v11132_v10  ;;  %v10643_v40 = vpop.permute.xlu0 %10642 }
 0xcff   :  { %v11141_v21 = vrot.slane %v10634_v53, %v11828_v52  ;;  %v11155_v43 = vrot.slane %v10643_v40, %v11789_v31  ;;  %10825 = vperm.xlu1 %11523, %v10314_v41  }
 0xd01   :  { %v11142_v0 = vsel %vm1111_vm14, %v11141_v21, %v11137_v13 }
 0xd02   :  { %v11461_v3 = vsel %vm16275_vm10, %v11142_v0, %v15987_v16  ;;  %v10640_v33 = vpop.permute.xlu1 %10639  ;;  %v10649_v61 = vpop.permute.xlu0 %10648  ;;  %vm16276_vm10 = vcmask 1044484  }
 0xd03   :  { %v11150_v28 = vrot.slane %v10640_v33, %v11786_v30  ;;  %v11165_v7 = vrot.slane %v10649_v61, %v11795_v34 }
 0xd05   :  { %v11151_v60 = vsel %vm1013_vm0, %v11150_v28, %v11146_v4 }
 0xd06   :  { %v10646_v29 = vpop.permute.xlu1 %10645  ;;  %v11156_v14 = vsel %vm1020_vm1, %v11155_v43, %v11151_v60  ;;  %v10655_v42 = vpop.permute.xlu0 %10654 }
 0xd07   :  { %v11160_v9 = vrot.slane %v10646_v29, %v11792_v32  ;;  %v11175_v24 = vrot.slane %v10655_v42, %v11801_v36 }
 0xd09   :  { %v11161_v12 = vsel %vm1027_vm2, %v11160_v9, %v11156_v14 }
 0xd0a   :  { %v10652_v8 = vpop.permute.xlu1 %10651  ;;  %v11166_v16 = vsel %vm1034_vm3, %v11165_v7, %v11161_v12  ;;  %v10661_v27 = vpop.permute.xlu0 %10660 }
 0xd0b   :  { %v11170_v11 = vrot.slane %v10652_v8, %v11798_v35  ;;  %v11185_v56 = vrot.slane %v10661_v27, %v11807_v38 }
 0xd0d   :  { %v11171_v26 = vsel %vm1041_vm4, %v11170_v11, %v11166_v16 }
 0xd0e   :  { %v10658_v17 = vpop.permute.xlu1 %10657  ;;  %v11176_v25 = vsel %vm1048_vm5, %v11175_v24, %v11171_v26  ;;  %v10667_v62 = vpop.permute.xlu0 %10666 }
 0xd0f   :  { %v11180_v23 = vrot.slane %v10658_v17, %v11804_v37  ;;  %v11195_v5 = vrot.slane %v10667_v62, %v11813_v47 }
 0xd11   :  { %v11181_v15 = vsel %vm1055_vm6, %v11180_v23, %v11176_v25 }
 0xd12   :  { %v10664_v45 = vpop.permute.xlu1 %10663  ;;  %v11186_v54 = vsel %vm1062_vm7, %v11185_v56, %v11181_v15  ;;  %v10673_v57 = vpop.permute.xlu0 %10672 }
 0xd13   :  { %v11190_v59 = vrot.slane %v10664_v45, %v11810_v46  ;;  %v11205_v63 = vrot.slane %v10673_v57, %v11819_v49 }
 0xd15   :  { %v11191_v44 = vsel %vm1069_vm8, %v11190_v59, %v11186_v54 }
 0xd16   :  { %v10670_v6 = vpop.permute.xlu1 %10669  ;;  %v11196_v55 = vsel %vm1076_vm9, %v11195_v5, %v11191_v44  ;;  %v10679_v19 = vpop.permute.xlu0 %10678 }
 0xd17   :  { %v11200_v20 = vrot.slane %v10670_v6, %v11816_v48  ;;  %v11215_v18 = vrot.slane %v10679_v19, %v11825_v51 }
 0xd19   :  { %v11201_v2 = vsel %vm16272_vm15, %v11200_v20, %v11196_v55 }
 0xd1a   :  { %v10676_v1 = vpop.permute.xlu1 %10675  ;;  %v11206_v39 = vsel %vm1090_vm11, %v11205_v63, %v11201_v2  ;;  %v10685_v4 = vpop.permute.xlu0 %10684 }
 0xd1b   :  { %v11210_v10 = vrot.slane %v10676_v1, %v11822_v50  ;;  %v11225_v41 = vrot.slane %v10685_v4, %v11783_v22 }
 0xd1d   :  { %v11211_v53 = vsel %vm1097_vm12, %v11210_v10, %v11206_v39 }
 0xd1e   :  { %v10682_v13 = vpop.permute.xlu1 %10681  ;;  %v11216_v40 = vsel %vm1104_vm13, %v11215_v18, %v11211_v53  ;;  %v10691_v21 = vpop.permute.xlu0 %10690 }
 0xd1f   :  { %v11220_v43 = vrot.slane %v10682_v13, %v11828_v52  ;;  %v11234_v0 = vrot.slane %v10691_v21, %v11789_v31 }
 0xd21   :  { %v11221_v33 = vsel %vm1111_vm14, %v11220_v43, %v11216_v40 }
 0xd22   :  { %v11462_v61 = vsel %vm16276_vm10, %v11221_v33, %v11461_v3  ;;  %v10688_v28 = vpop.permute.xlu1 %10687  ;;  %v10697_v7 = vpop.permute.xlu0 %10696  ;;  %vm16277_vm10 = vcmask 1045509  }
 0xd23   :  { %v11229_v60 = vrot.slane %v10688_v28, %v11786_v30  ;;  %v11244_v29 = vrot.slane %v10697_v7, %v11795_v34 }
 0xd25   :  { %v11230_v14 = vsel %vm1013_vm0, %v11229_v60, %v11225_v41 }
 0xd26   :  { %v10694_v42 = vpop.permute.xlu1 %10693  ;;  %v11235_v9 = vsel %vm1020_vm1, %v11234_v0, %v11230_v14  ;;  %v10703_v24 = vpop.permute.xlu0 %10702 }
 0xd27   :  { %v11239_v12 = vrot.slane %v10694_v42, %v11792_v32  ;;  %v11254_v8 = vrot.slane %v10703_v24, %v11801_v36 }
 0xd29   :  { %v11240_v16 = vsel %vm1027_vm2, %v11239_v12, %v11235_v9 }
 0xd2a   :  { %v10700_v27 = vpop.permute.xlu1 %10699  ;;  %v11245_v3 = vsel %vm1034_vm3, %v11244_v29, %v11240_v16  ;;  %v10709_v11 = vpop.permute.xlu0 %10708 }
 0xd2b   :  { %v11249_v56 = vrot.slane %v10700_v27, %v11798_v35  ;;  %v11264_v26 = vrot.slane %v10709_v11, %v11807_v38 }
 0xd2d   :  { %v11250_v17 = vsel %vm1041_vm4, %v11249_v56, %v11245_v3 }
 0xd2e   :  { %v10706_v25 = vpop.permute.xlu1 %10705  ;;  %v11255_v62 = vsel %vm1048_vm5, %v11254_v8, %v11250_v17  ;;  %v10715_v23 = vpop.permute.xlu0 %10714 }
 0xd2f   :  { %v11259_v5 = vrot.slane %v10706_v25, %v11804_v37  ;;  %v11274_v15 = vrot.slane %v10715_v23, %v11813_v47 }
 0xd31   :  { %v11260_v45 = vsel %vm1055_vm6, %v11259_v5, %v11255_v62 }
 0xd32   :  { %v10712_v54 = vpop.permute.xlu1 %10711  ;;  %v11265_v57 = vsel %vm1062_vm7, %v11264_v26, %v11260_v45  ;;  %v10721_v59 = vpop.permute.xlu0 %10720 }
 0xd33   :  { %v11269_v63 = vrot.slane %v10712_v54, %v11810_v46  ;;  %v11284_v44 = vrot.slane %v10721_v59, %v11819_v49 }
 0xd35   :  { %v11270_v6 = vsel %vm1069_vm8, %v11269_v63, %v11265_v57 }
 0xd36   :  { %v10718_v55 = vpop.permute.xlu1 %10717  ;;  %v11275_v19 = vsel %vm1076_vm9, %v11274_v15, %v11270_v6  ;;  %v10727_v20 = vpop.permute.xlu0 %10726 }
 0xd37   :  { %v11279_v18 = vrot.slane %v10718_v55, %v11816_v48  ;;  %v11294_v41 = vrot.slane %v10727_v20, %v11825_v51 }
 0xd39   :  { %v11280_v2 = vsel %vm16272_vm15, %v11279_v18, %v11275_v19 }
 0xd3a   :  { %v10724_v1 = vpop.permute.xlu1 %10723  ;;  %v11285_v39 = vsel %vm1090_vm11, %v11284_v44, %v11280_v2  ;;  %v10733_v4 = vpop.permute.xlu0 %10732 }
 0xd3b   :  { %v11289_v10 = vrot.slane %v10724_v1, %v11822_v50  ;;  %v11304_v60 = vrot.slane %v10733_v4, %v11783_v22 }
 0xd3d   :  { %v11290_v53 = vsel %vm1097_vm12, %v11289_v10, %v11285_v39 }
 0xd3e   :  { %v10730_v13 = vpop.permute.xlu1 %10729  ;;  %v11295_v40 = vsel %vm1104_vm13, %v11294_v41, %v11290_v53  ;;  %v10739_v21 = vpop.permute.xlu0 %10738 }
 0xd3f   :  { %v11299_v43 = vrot.slane %v10730_v13, %v11828_v52  ;;  %v11313_v14 = vrot.slane %v10739_v21, %v11789_v31 }
 0xd41   :  { %v11300_v0 = vsel %vm1111_vm14, %v11299_v43, %v11295_v40 }
 0xd42   :  { %v16108_v33 = vsel %vm16277_vm10, %v11300_v0, %v11462_v61  ;;  %v10736_v28 = vpop.permute.xlu1 %10735  ;;  %v10745_v7 = vpop.permute.xlu0 %10744 }
 0xd43   :  { %v11308_v29 = vrot.slane %v10736_v28, %v11786_v30  ;;  %v11323_v16 = vrot.slane %v10745_v7, %v11795_v34 }
 0xd45   :  { %v11309_v42 = vsel %vm1013_vm0, %v11308_v29, %v11304_v60 }
 0xd46   :  { %v10742_v9 = vpop.permute.xlu1 %10741  ;;  %v11314_v24 = vsel %vm1020_vm1, %v11313_v14, %v11309_v42  ;;  %v10751_v12 = vpop.permute.xlu0 %10750 }
 0xd47   :  { %v11318_v8 = vrot.slane %v10742_v9, %v11792_v32  ;;  %v11333_v26 = vrot.slane %v10751_v12, %v11801_v36 }
 0xd49   :  { %v11319_v61 = vsel %vm1027_vm2, %v11318_v8, %v11314_v24 }
 0xd4a   :  { %v10748_v27 = vpop.permute.xlu1 %10747  ;;  %v11324_v3 = vsel %vm1034_vm3, %v11323_v16, %v11319_v61  ;;  %v10784_v11 = vpop.permute.xlu0 %10783 }
 0xd4b   :  { %v11328_v56 = vrot.slane %v10748_v27, %v11798_v35  ;;  %v11387_v5 = vrot.slane %v10784_v11, %v11786_v30 }
 0xd4d   :  { %v11329_v17 = vsel %vm1041_vm4, %v11328_v56, %v11324_v3 }
 0xd4e   :  { %v10781_v25 = vpop.permute.xlu1 %10780  ;;  %v10790_v62 = vpop.permute.xlu0 %10789  ;;  %v11334_v23 = vsel %vm1048_vm5, %v11333_v26, %v11329_v17 }
 0xd4f   :  { %v11383_v15 = vrot.slane %v10781_v25, %v11783_v22  ;;  %v11397_v63 = vrot.slane %v10790_v62, %v11792_v32 }
 0xd51   :  { %v11388_v45 = vsel %vm1013_vm0, %v11387_v5, %v11383_v15  ;;  %vm16278_vm0 = vmmov %vm16272_vm15 }
 0xd52   :  { %v10787_v54 = vpop.permute.xlu1 %10786  ;;  %v10796_v57 = vpop.permute.xlu0 %10795 }
 0xd53   :  { %v11392_v59 = vrot.slane %v10787_v54, %v11789_v31  ;;  %v11407_v30 = vrot.slane %v10796_v57, %v11798_v35 }
 0xd55   :  { %v11393_v44 = vsel %vm1020_vm1, %v11392_v59, %v11388_v45  ;;  %vm16279_vm1 = vmmov %vm16278_vm0 }
 0xd56   :  { %v10793_v6 = vpop.permute.xlu1 %10792  ;;  %v11398_v55 = vsel %vm1027_vm2, %v11397_v63, %v11393_v44  ;;  %v10799_v19 = vpop.permute.xlu0 %10798  ;;  %vm16280_vm2 = vcmask 1046534  }
 0xd57   :  { %v11402_v20 = vrot.slane %v10793_v6, %v11795_v34  ;;  %v11412_v18 = vrot.slane %v10799_v19, %v11801_v36 }
 0xd59   :  { %v11403_v22 = vsel %vm1034_vm3, %v11402_v20, %v11398_v55  ;;  %vm16281_vm3 = vcmask 1047559  }
 0xd5a   :  { %v11408_v2 = vsel %vm1041_vm4, %v11407_v30, %v11403_v22  ;;  %v10754_v1 = vpop.permute.xlu1 %10753  ;;  %v10802_v31 = vpop.permute.xlu0 %10801 }
 0xd5b   :  { %v11413_v32 = vsel %vm1048_vm5, %v11412_v18, %v11408_v2  ;;  %v11338_v39 = vrot.slane %v10754_v1, %v11804_v37  ;;  %v11417_v4 = vrot.slane %v10802_v31, %v11804_v37 }
 0xd5d   :  { %v11339_v10 = vsel %vm1055_vm6, %v11338_v39, %v11334_v23  ;;  %v11418_v34 = vsel %vm1055_vm6, %v11417_v4, %v11413_v32 }
 0xd5e   :  { %v10757_v41 = vpop.permute.xlu1 %10756  ;;  %v10805_v35 = vpop.permute.xlu0 %10804 }
 0xd5f   :  { %v11343_v53 = vrot.slane %v10757_v41, %v11807_v38  ;;  %v11422_v36 = vrot.slane %v10805_v35, %v11807_v38 }
 0xd61   :  { %v11344_v13 = vsel %vm1062_vm7, %v11343_v53, %v11339_v10  ;;  %v11423_v40 = vsel %vm1062_vm7, %v11422_v36, %v11418_v34 }
 0xd62   :  { %v10760_v21 = vpop.permute.xlu1 %10759  ;;  %v10808_v43 = vpop.permute.xlu0 %10807 }
 0xd63   :  { %v11348_v0 = vrot.slane %v10760_v21, %v11810_v46  ;;  %v11427_v37 = vrot.slane %v10808_v43, %v11810_v46 }
 0xd65   :  { %v11349_v28 = vsel %vm1069_vm8, %v11348_v0, %v11344_v13  ;;  %v11428_v7 = vsel %vm1069_vm8, %v11427_v37, %v11423_v40 }
 0xd66   :  { %v10763_v60 = vpop.permute.xlu1 %10762  ;;  %v10811_v29 = vpop.permute.xlu0 %10810 }
 0xd67   :  { %v11353_v14 = vrot.slane %v10763_v60, %v11813_v47  ;;  %v11432_v38 = vrot.slane %v10811_v29, %v11813_v47 }
 0xd69   :  { %v11354_v42 = vsel %vm1076_vm9, %v11353_v14, %v11349_v28  ;;  %v11433_v9 = vsel %vm1076_vm9, %v11432_v38, %v11428_v7 }
 0xd6a   :  { %v10766_v24 = vpop.permute.xlu1 %10765  ;;  %v10814_v12 = vpop.permute.xlu0 %10813 }
 0xd6b   :  { %v11358_v8 = vrot.slane %v10766_v24, %v11816_v48  ;;  %v11437_v46 = vrot.slane %v10814_v12, %v11816_v48 }
 0xd6d   :  { %v11359_v16 = vsel %vm16278_vm0, %v11358_v8, %v11354_v42  ;;  %v11438_v61 = vsel %vm16279_vm1, %v11437_v46, %v11433_v9 }
 0xd6e   :  { %v10769_v27 = vpop.permute.xlu1 %10768  ;;  %v10817_v3 = vpop.permute.xlu0 %10816 }
 0xd6f   :  { %v11363_v11 = vrot.slane %v10769_v27, %v11819_v49  ;;  %v11442_v47 = vrot.slane %v10817_v3, %v11819_v49 }
 0xd71   :  { %v11364_v56 = vsel %vm1090_vm11, %v11363_v11, %v11359_v16  ;;  %v11443_v26 = vsel %vm1090_vm11, %v11442_v47, %v11438_v61 }
 0xd72   :  { %v10772_v17 = vpop.permute.xlu1 %10771  ;;  %v10820_v25 = vpop.permute.xlu0 %10819 }
 0xd73   :  { %v11368_v62 = vrot.slane %v10772_v17, %v11822_v50  ;;  %v11447_v48 = vrot.slane %v10820_v25, %v11822_v50 }
 0xd75   :  { %v11369_v23 = vsel %vm1097_vm12, %v11368_v62, %v11364_v56  ;;  %v11448_v5 = vsel %vm1097_vm12, %v11447_v48, %v11443_v26 }
 0xd76   :  { %v10775_v15 = vpop.permute.xlu1 %10774  ;;  %v10823_v45 = vpop.permute.xlu0 %10822 }
 0xd77   :  { %v11373_v54 = vrot.slane %v10775_v15, %v11825_v51  ;;  %v11452_v49 = vrot.slane %v10823_v45, %v11825_v51 }
 0xd79   :  { %v11374_v57 = vsel %vm1104_vm13, %v11373_v54, %v11369_v23  ;;  %v11453_v59 = vsel %vm1104_vm13, %v11452_v49, %v11448_v5 }
 0xd7a   :  { %v10778_v63 = vpop.permute.xlu1 %10777 }
 0xd7b   :  { %v11378_v44 = vrot.slane %v10778_v63, %v11828_v52 }
 0xd7d   :  { %v11379_v6 = vsel %vm1111_vm14, %v11378_v44, %v11374_v57 }
 0xd7e   :  { %v11464_v50 = vsel %vm16280_vm2, %v11379_v6, %v16108_v33  ;;  %v10826_v55 = vpop.permute.xlu1 %10825 }
 0xd7f   :  { %v11457_v19 = vrot.slane %v10826_v55, %v11828_v52 }
 0xd81   :  { %v11458_v20 = vsel %vm1111_vm14, %v11457_v19, %v11453_v59 }
 0xd82   :  { %v11465_v51 = vsel %vm16281_vm3, %v11458_v20, %v11464_v50 }
 0xd83   :  { %v11467_v30 = vadd.f32 %v11465_v51, %v15670_v58 }
 0xd85   :  { %v11468_v22 = vmul.f32 1.442695, %v11467_v30  ;;  %11474 = vst [vmem:[#allocation9] sm:$0xff] %v11467_v30 }
 0xd86   :  { %11623 = shalt.err (!%p11620_p0)
}
 0xd87   :  { %s11624_s14 = scalar_lea.hbm %s16209_s6, 128 }
 0xd88   :  { %p11625_p1 = scmp.ne.s32.totalorder %s16209_s6, %s11624_s14  ;;  %p11628_p2 = scmp.lt.u32.totalorder %s11624_s14, %s16209_s6 }
 0xd8a   :  { %p11630_p3 = pnand %p11628_p2, %p11625_p1 }
 0xd8c   :  { %11633 = shalt.err (!%p11630_p3)
}
 0xd8d   :  { %11494 = dma.vmem_to_hbm [thread:$0]  %s11492_s10, 128, %s16209_s6, [#allocation10]   ;;  %11543 = vpow2.f32 %v11468_v22  ;;  %v11470_v52 = vld [vmem:[%s16207_s4] sm:$0xff] }
 0xd8e   :  { %s11672_s22 = smov [#allocation8]   ;;  %v11545_v18 = vld [vmem:[#allocation2] sm:$0xff] }
 0xd8f   :  { %s11481_s23 = sshll.u32 %s11672_s22, 4  ;;  %s11482_s23 = int_to_ptr.vmem [resolvable:$true] %s11481_s23 }
 0xd90   :  { %s11634_s24 = scalar_lea.vmem %s11482_s23, 128  ;;  %p11639_p5 = scmp.lt.s32.totalorder %s11482_s23, %s11482_s23 }
 0xd91   :  { %p11635_p4 = scmp.ne.s32.totalorder %s11482_s23, %s11634_s24  ;;  %p11640_p6 = scmp.lt.s32.totalorder %s11634_s24, %s11634_s24 }
 0xd93   :  { %p11641_p7 = por %p11640_p6, %p11639_p5 }
 0xd95   :  { %p11642_p8 = pnand %p11641_p7, %p11635_p4 }
 0xd97   :  { %v11544_v58 = vpop.eup %11543 }
 0xd98   :  { %v11471_v33 = vmul.f32 %v11544_v58, %v11470_v52 }
 0xd9a   :  { %v11472_v2 = vadd.f32 %v11545_v18, %v11471_v33 }
 0xd9c   :  { %11473 = vst [vmem:[#allocation8] sm:$0xff] %v11472_v2 }
 0xd9d   :  { %11645 = shalt.err (!%p11642_p8)
}
 0xd9e   :  { %s11646_s26 = scalar_lea.hbm %s16208_s5, 128 }
 0xd9f   :  { %p11647_p9 = scmp.ne.s32.totalorder %s16208_s5, %s11646_s26  ;;  %p11650_p10 = scmp.lt.u32.totalorder %s11646_s26, %s16208_s5 }
 0xda1   :  { %p11652_p11 = pnand %p11650_p10, %p11647_p9 }
 0xda3   :  { %11655 = shalt.err (!%p11652_p11)
}
 0xda4   :  { %11484 = dma.vmem_to_hbm [thread:$0]  %s11482_s23, 128, %s16208_s5, [#allocation4]  }
 0xda5   :  { %11660 = dma.done.wait [#allocation4], 128  }
 0xda6   :  { %11661 = vsyncadd [#allocation4], 4294967168 }
 0xda7   :  { %11662 = dma.done.wait [#allocation10], 128  }
 0xda8   :  { %11663 = vsyncadd [#allocation10], 4294967168 }
 0xda9   :  { %11501 = vsyncpa [#allocation3], 1 }
 0xdaa   :  { %11502 = vsyncpa [#allocation6], 1 }
 0xdab   :  { %11503 = vsyncpa [#allocation4], 1 }
 0xdac   :  { %11504 = vsyncpa [#allocation10], 1 }

</bundles_post_ra>
